<compile_context>
chip_gen: v7x
topology: tpu7x:2x2x1
jax: 0.10.0
libtpu: 0.0.40
codegen_flags: <defaults>
</compile_context>

<pallas_src>
import numpy as np
import jax
import jax.numpy as jnp
from jax.experimental import pallas as pl
from jax.experimental.pallas import tpu as pltpu

# Hyperparameters mirroring JMMD_01.py globals
CNN_INPUT_SIZE = 22      # cnn_input_size == input_size
LSTM_INPUT_SIZE = 22     # lstm_input_size == input_size
LSTM_HIDDEN = 128        # lstm_hidden_size
LSTM_LAYERS = 2          # lstm_num_layers (two explicit layers below)
NUM_CLASSES = 10         # num_classes
SEQ_LEN = 8              # x2 sequence length (x2.dim()==3 path of LSTMBranch.forward)

C1, C2 = 16, 32                         # conv channel counts
L1_OUT = CNN_INPUT_SIZE // 2            # 11 (after pool1)
L2_OUT = CNN_INPUT_SIZE // 2 // 2       # 5  (after pool2)
CNN_FLAT = C2 * L2_OUT                  # 160
HEAD_PAD = 128                          # lane-dense logits width (sliced to 10 outside)


def _sigmoid1(x):
    # One EUP push (tanh) per sigmoid instead of a possible exp+divide lowering.
    return 0.5 * jnp.tanh(0.5 * x) + 0.5


def _dual_branch_kernel(
    x1_ref, gx0_ref,
    m1a_ref, m1b_ref, cb1_ref,
    m2a_ref, m2b_ref, cb2_ref,
    cnn_fc_w_ref, cnn_fc_b_ref,
    whh0_ref, w1s_ref, lb1_ref,
    lstm_fc_w_ref, lstm_fc_b_ref,
    head_w_ref, head_b_ref,
    logits_ref, feat_ref,
):
    f32 = jnp.float32
    bf16 = jnp.bfloat16
    H = LSTM_HIDDEN
    T = gx0_ref.shape[0]
    bt = x1_ref.shape[0]

    # ---------------- CNN branch ----------------
    # conv+relu+pool pairs folded into banded matmuls built in glue:
    #   p1[:, j*16+c] = max(relu(conv1(x)[c, 2j]), relu(conv1(x)[c, 2j+1]))
    # 5 MXU matmuls + a few lane-dense elementwise ops; the LLO scheduler hides this
    # (~20 MFLOP) under the LSTM recurrence since it lives in the same basic block.
    xp = x1_ref[...].astype(f32)                                          # (bt, 24)
    p1 = jnp.maximum(
        jnp.maximum(jnp.dot(xp, m1a_ref[...], preferred_element_type=f32),
                    jnp.dot(xp, m1b_ref[...], preferred_element_type=f32))
        + cb1_ref[...], 0.0)                                              # (bt, 176)
    p2 = jnp.maximum(
        jnp.maximum(jnp.dot(p1, m2a_ref[...], preferred_element_type=f32),
                    jnp.dot(p1, m2b_ref[...], preferred_element_type=f32))
        + cb2_ref[...], 0.0)                                              # (bt, 160)
    cnn_out = jnp.maximum(
        jnp.dot(p2, cnn_fc_w_ref[...], preferred_element_type=f32) + cnn_fc_b_ref[...],
        0.0)                                                              # (bt, 64)

    # ---------------- LSTM branch (2 layers, interleaved per time step) ----------------
    # gx0_ref holds the hoisted layer-0 input projection x2@wih0 + (bih0+bhh0): (T, bt, 4H).
    whh0 = whh0_ref[...]                                                  # (H, 4H) bf16
    w1s = w1s_ref[...]                                                    # (2H, 4H) bf16 (wih1;whh1 stacked)
    lb1 = lb1_ref[...]                                                    # (1, 4H) f32

    def gates(g):
        i = _sigmoid1(g[:, 0 * H:1 * H])
        f = _sigmoid1(g[:, 1 * H:2 * H])
        gg = jnp.tanh(g[:, 2 * H:3 * H])
        o = _sigmoid1(g[:, 3 * H:4 * H])
        return i, f, gg, o

    h0 = jnp.zeros((bt, H), f32)
    c0 = jnp.zeros((bt, H), f32)
    h1 = jnp.zeros((bt, H), f32)
    c1 = jnp.zeros((bt, H), f32)
    for t in range(T):  # static unroll (T=8): one basic block, layer-0/layer-1 chains overlap
        # layer 0, step t  (K=128 recurrent matmul, bf16 single-pass, f32 accumulate)
        g0 = gx0_ref[t] + jnp.dot(h0.astype(bf16), whh0, preferred_element_type=f32)
        i0, f0, gg0, o0 = gates(g0)
        c0 = f0 * c0 + i0 * gg0
        h0 = o0 * jnp.tanh(c0)
        # layer 1, step t: fused input+recurrent projection, K=256 fills the MXU
        xh = jnp.concatenate([h0.astype(bf16), h1.astype(bf16)], axis=1)  # (bt, 2H)
        g1 = jnp.dot(xh, w1s, preferred_element_type=f32) + lb1
        i1, f1, gg1, o1 = gates(g1)
        c1 = f1 * c1 + i1 * gg1
        h1 = o1 * jnp.tanh(c1)

    # out[:, -1, :] == h1 after the last step
    lstm_out = jnp.maximum(
        jnp.dot(h1, lstm_fc_w_ref[...], preferred_element_type=f32) + lstm_fc_b_ref[...],
        0.0)                                                              # (bt, 64)

    # ---------------- Head: concat + Linear(128 -> num_classes, padded to 128 lanes) ----------------
    feat = jnp.concatenate([cnn_out, lstm_out], axis=1)                   # (bt, 128)
    feat_ref[...] = feat.astype(feat_ref.dtype)
    logits_ref[...] = (jnp.dot(feat, head_w_ref[...], preferred_element_type=f32)
                       + head_b_ref[...]).astype(logits_ref.dtype)        # (bt, 128) padded
    # TODO(synk): jmmd_loss() is a training-time auxiliary method, not part of forward();
    # it is intentionally not fused into this kernel.


def _num_batch_tiles(B):
    """One batch tile per TensorCore: 2 on v7x (2 TC/chip), otherwise 1."""
    try:
        kind = jax.devices()[0].device_kind.lower()
    except Exception:
        kind = ""
    n = 2 if "v7" in kind else 1
    if n > 1 and (B % n != 0 or (B // n) % 8 != 0):
        n = 1
    return n


def dual_branch_forward(x1, x2, params, *, batch_tile=None):
    """x1: (B, 1, L) like PyTorch Conv1d NCL input; x2: (B, T, F) batch_first."""
    B = x1.shape[0]
    L = x1.shape[-1]
    T = x2.shape[1]
    if batch_tile is None:
        bt = B // _num_batch_tiles(B)
    else:
        bt = min(batch_tile, B)
    assert B % bt == 0, "batch must be divisible by batch_tile"
    assert bt == B or bt % 8 == 0, "batch tile must be sublane-aligned"

    x1p = jnp.pad(x1[:, 0, :], ((0, 0), (1, 1)))        # (B, L+2): conv1 padding=1 in glue
    # Hoisted layer-0 input projection over all T steps, time-major and lane-dense (4H=512):
    # removes the F=22 (lane-padded 22->128) block and the 3D einsum from the kernel.
    gx0 = (jnp.einsum('btf,fg->tbg', x2.astype(jnp.float32), params['wih0'])
           + params['b0']).astype(jnp.float32)          # (T, B, 4H)

    weight_names = ('m1a', 'm1b', 'cb1', 'm2a', 'm2b', 'cb2',
                    'cnn_fc_w', 'cnn_fc_b',
                    'whh0', 'w1s', 'lb1',
                    'lstm_fc_w', 'lstm_fc_b', 'head_w', 'head_b')
    weight_args = tuple(params[k] for k in weight_names)

    def full_spec(a):
        nd = a.ndim
        return pl.BlockSpec(a.shape, lambda i, _nd=nd: (0,) * _nd)

    in_specs = [
        pl.BlockSpec((bt, L + 2), lambda i: (i, 0)),
        pl.BlockSpec((T, bt, 4 * LSTM_HIDDEN), lambda i: (0, i, 0)),
    ] + [full_spec(a) for a in weight_args]

    out_specs = (
        pl.BlockSpec((bt, HEAD_PAD), lambda i: (i, 0)),
        pl.BlockSpec((bt, 128), lambda i: (i, 0)),
    )
    out_shape = (
        jax.ShapeDtypeStruct((B, HEAD_PAD), jnp.float32),
        jax.ShapeDtypeStruct((B, 128), jnp.float32),
    )
    logits_pad, feat = pl.pallas_call(
        _dual_branch_kernel,
        grid=(B // bt,),
        in_specs=in_specs,
        out_specs=out_specs,
        out_shape=out_shape,
        compiler_params=pltpu.CompilerParams(dimension_semantics=("parallel",)),
    )(x1p, gx0, *weight_args)
    return logits_pad[:, :NUM_CLASSES], feat


def init_params(key):
    """Synthetic params generated in PyTorch layouts, then re-laid-out for the kernel."""
    def nrm(k, shape, scale=0.25):
        return scale * jax.random.normal(k, shape, dtype=jnp.float32)

    keys = jax.random.split(key, 18)
    L, H, F = CNN_INPUT_SIZE, LSTM_HIDDEN, LSTM_INPUT_SIZE

    conv1_w = np.asarray(nrm(keys[0], (C1, 1, 3)))       # (out, in, k)
    conv1_b = np.asarray(nrm(keys[1], (C1,)))
    conv2_w = np.asarray(nrm(keys[2], (C2, C1, 3)))
    conv2_b = np.asarray(nrm(keys[3], (C2,)))
    cnn_fc_w_t = np.asarray(nrm(keys[4], (64, CNN_FLAT)))  # (out, in), in indexed c*5+m
    cnn_fc_b = np.asarray(nrm(keys[5], (64,)))
    wih0_t = np.asarray(nrm(keys[6], (4 * H, F)))
    whh0_t = np.asarray(nrm(keys[7], (4 * H, H)))
    bih0 = np.asarray(nrm(keys[8], (4 * H,)))
    bhh0 = np.asarray(nrm(keys[9], (4 * H,)))
    wih1_t = np.asarray(nrm(keys[10], (4 * H, H)))
    whh1_t = np.asarray(nrm(keys[11], (4 * H, H)))
    bih1 = np.asarray(nrm(keys[12], (4 * H,)))
    bhh1 = np.asarray(nrm(keys[13], (4 * H,)))
    lstm_fc_w_t = np.asarray(nrm(keys[14], (64, H)))
    lstm_fc_b = np.asarray(nrm(keys[15], (64,)))
    head_w_t = np.asarray(nrm(keys[16], (NUM_CLASSES, 128)))
    head_b_t = np.asarray(nrm(keys[17], (NUM_CLASSES,)))

    # conv1+relu+pool1 as two banded matmuls over the padded input xp (len 24).
    # m1a column j*C1+o = conv1 output at position 2j, m1b at position 2j+1.
    w1 = conv1_w[:, 0, :]                                # (C1, 3)
    m1a = np.zeros((L + 2, L1_OUT * C1), np.float32)
    m1b = np.zeros((L + 2, L1_OUT * C1), np.float32)
    for j in range(L1_OUT):
        for k in range(3):
            m1a[2 * j + k, j * C1:(j + 1) * C1] = w1[:, k]
            m1b[2 * j + 1 + k, j * C1:(j + 1) * C1] = w1[:, k]
    cb1 = np.tile(conv1_b, L1_OUT)[None, :]              # (1, 176)

    # conv2+relu+pool2, consuming pool1 lanes ordered (position j', channel c).
    m2a = np.zeros((L1_OUT * C1, L2_OUT * C2), np.float32)
    m2b = np.zeros((L1_OUT * C1, L2_OUT * C2), np.float32)
    for m in range(L2_OUT):
        for k in range(3):
            ja = 2 * m + k - 1              # conv2 padding=1 (out of range -> stays 0)
            jb = 2 * m + 1 + k - 1
            if 0 <= ja < L1_OUT:
                m2a[ja * C1:(ja + 1) * C1, m * C2:(m + 1) * C2] = conv2_w[:, :, k].T
            if 0 <= jb < L1_OUT:
                m2b[jb * C1:(jb + 1) * C1, m * C2:(m + 1) * C2] = conv2_w[:, :, k].T
    cb2 = np.tile(conv2_b, L2_OUT)[None, :]              # (1, 160)

    # cnn fc: PyTorch flatten is channel-major (c*5+m); kernel lanes are (m*32+c).
    cnn_fc_w = (cnn_fc_w_t.reshape(64, C2, L2_OUT)
                .transpose(2, 1, 0).reshape(L2_OUT * C2, 64)).astype(np.float32)

    # layer-1 input + recurrent weights stacked: concat([h0_t, h1_{t-1}]) @ w1s
    w1s = np.vstack([wih1_t.T, whh1_t.T]).astype(np.float32)   # (2H, 4H)

    # head padded to 128 output lanes for lane-dense stores.
    head_w = np.zeros((128, HEAD_PAD), np.float32)
    head_w[:, :NUM_CLASSES] = head_w_t.T
    head_b = np.zeros((1, HEAD_PAD), np.float32)
    head_b[0, :NUM_CLASSES] = head_b_t

    params = dict(
        m1a=jnp.asarray(m1a), m1b=jnp.asarray(m1b), cb1=jnp.asarray(cb1),
        m2a=jnp.asarray(m2a), m2b=jnp.asarray(m2b), cb2=jnp.asarray(cb2),
        cnn_fc_w=jnp.asarray(cnn_fc_w), cnn_fc_b=jnp.asarray(cnn_fc_b[None, :]),
        # wrapper-only (hoisted layer-0 input projection):
        wih0=jnp.asarray(wih0_t.T), b0=jnp.asarray((bih0 + bhh0)[None, :]),
        # recurrent weights bf16 (MXU single-pass, half the VMEM/vreg load traffic):
        whh0=jnp.asarray(whh0_t.T, dtype=jnp.bfloat16),
        w1s=jnp.asarray(w1s, dtype=jnp.bfloat16),
        lb1=jnp.asarray((bih1 + bhh1)[None, :]),
        lstm_fc_w=jnp.asarray(lstm_fc_w_t.T), lstm_fc_b=jnp.asarray(lstm_fc_b[None, :]),
        head_w=jnp.asarray(head_w), head_b=jnp.asarray(head_b),
    )
    raw = dict(conv1_w=conv1_w, conv1_b=conv1_b, conv2_w=conv2_w, conv2_b=conv2_b,
               cnn_fc_w=cnn_fc_w_t, cnn_fc_b=cnn_fc_b,
               wih0=wih0_t, whh0=whh0_t, bih0=bih0, bhh0=bhh0,
               wih1=wih1_t, whh1=whh1_t, bih1=bih1, bhh1=bhh1,
               lstm_fc_w=lstm_fc_w_t, lstm_fc_b=lstm_fc_b,
               head_w=head_w_t, head_b=head_b_t)
    return params, raw


def _sigmoid(x):
    return 1.0 / (1.0 + np.exp(-x))


def _reference_forward(x1, x2, raw):
    """Plain numpy (float64) reference of the PyTorch module forward."""
    x1 = np.asarray(x1, np.float64)
    x2 = np.asarray(x2, np.float64)
    B = x1.shape[0]
    L = CNN_INPUT_SIZE
    # CNN branch
    w1 = raw['conv1_w'][:, 0, :]
    xp = np.pad(x1[:, 0, :], ((0, 0), (1, 1)))
    h = np.zeros((B, C1, L))
    for k in range(3):
        h += xp[:, None, k:k + L] * w1[None, :, k:k + 1]
    h = np.maximum(h + raw['conv1_b'][None, :, None], 0.0)
    p1 = h.reshape(B, C1, L // 2, 2).max(-1)
    p1p = np.pad(p1, ((0, 0), (0, 0), (1, 1)))
    c2 = np.zeros((B, C2, L1_OUT))
    for k in range(3):
        c2 += np.einsum('bcl,oc->bol', p1p[:, :, k:k + L1_OUT], raw['conv2_w'][:, :, k])
    c2 = np.maximum(c2 + raw['conv2_b'][None, :, None], 0.0)
    p2 = c2[:, :, :2 * L2_OUT].reshape(B, C2, L2_OUT, 2).max(-1)
    flat = p2.reshape(B, CNN_FLAT)
    cnn_out = np.maximum(flat @ raw['cnn_fc_w'].T + raw['cnn_fc_b'], 0.0)

    # LSTM branch
    def lstm_layer(seq, w_ih, w_hh, b_ih, b_hh):
        Bq, T, _ = seq.shape
        H = w_hh.shape[1]
        hh = np.zeros((Bq, H))
        cc = np.zeros((Bq, H))
        outs = []
        for t in range(T):
            g = seq[:, t] @ w_ih.T + hh @ w_hh.T + b_ih + b_hh
            i = _sigmoid(g[:, :H]); f = _sigmoid(g[:, H:2 * H])
            gg = np.tanh(g[:, 2 * H:3 * H]); o = _sigmoid(g[:, 3 * H:])
            cc = f * cc + i * gg
            hh = o * np.tanh(cc)
            outs.append(hh)
        return np.stack(outs, axis=1)

    out0 = lstm_layer(x2, raw['wih0'], raw['whh0'], raw['bih0'], raw['bhh0'])
    out1 = lstm_layer(out0, raw['wih1'], raw['whh1'], raw['bih1'], raw['bhh1'])
    lstm_out = np.maximum(out1[:, -1] @ raw['lstm_fc_w'].T + raw['lstm_fc_b'], 0.0)

    feat = np.concatenate([cnn_out, lstm_out], axis=1)
    logits = feat @ raw['head_w'].T + raw['head_b']
    return logits, feat


if __name__ == "__main__":
    key = jax.random.PRNGKey(0)
    kx1, kx2, kp = jax.random.split(key, 3)
    B = 32
    x1 = jax.random.normal(kx1, (B, 1, CNN_INPUT_SIZE), dtype=jnp.float32)         # NCL
    x2 = jax.random.normal(kx2, (B, SEQ_LEN, LSTM_INPUT_SIZE), dtype=jnp.float32)  # batch_first
    params, raw = init_params(kp)

    logits, feats = dual_branch_forward(x1, x2, params)
    jax.block_until_ready((logits, feats))
    assert logits.shape == (B, NUM_CLASSES)
    assert feats.shape == (B, 128)

    ref_logits, ref_feat = _reference_forward(x1, x2, raw)
    np.testing.assert_allclose(np.asarray(logits), ref_logits, rtol=0.1, atol=0.03)
    np.testing.assert_allclose(np.asarray(feats), ref_feat, rtol=0.1, atol=0.03)
    print("KERNEL_OK")
</pallas_src>

<mosaic_0001>
module attributes {stable_mosaic.version = 11 : i64} {
  func.func @_dual_branch_kernel(%arg0: i32, %arg1: memref<32x24xf32, #tpu.memory_space<vmem>>, %arg2: memref<8x32x512xf32, #tpu.memory_space<vmem>>, %arg3: memref<24x176xf32, #tpu.memory_space<vmem>>, %arg4: memref<24x176xf32, #tpu.memory_space<vmem>>, %arg5: memref<1x176xf32, #tpu.memory_space<vmem>>, %arg6: memref<176x160xf32, #tpu.memory_space<vmem>>, %arg7: memref<176x160xf32, #tpu.memory_space<vmem>>, %arg8: memref<1x160xf32, #tpu.memory_space<vmem>>, %arg9: memref<160x64xf32, #tpu.memory_space<vmem>>, %arg10: memref<1x64xf32, #tpu.memory_space<vmem>>, %arg11: memref<128x512xbf16, #tpu.memory_space<vmem>>, %arg12: memref<256x512xbf16, #tpu.memory_space<vmem>>, %arg13: memref<1x512xf32, #tpu.memory_space<vmem>>, %arg14: memref<128x64xf32, #tpu.memory_space<vmem>>, %arg15: memref<1x64xf32, #tpu.memory_space<vmem>>, %arg16: memref<128x128xf32, #tpu.memory_space<vmem>>, %arg17: memref<1x128xf32, #tpu.memory_space<vmem>>, %arg18: memref<32x128xf32, #tpu.memory_space<vmem>>, %arg19: memref<32x128xf32, #tpu.memory_space<vmem>>) attributes {dimension_semantics = [#tpu.dimension_semantics<parallel>], iteration_bounds = array<i64: 1>, scalar_prefetch = 0 : i64, scratch_operands = 0 : i64, tpu.core_type = #tpu.core_type<tc>, window_params = [{transform_indices = @transform_0, window_bounds = array<i64: 32, 24>}, {transform_indices = @transform_1, window_bounds = array<i64: 8, 32, 512>}, {pipeline_mode = #tpu.pipeline_mode<synchronous>, transform_indices = @transform_2, window_bounds = array<i64: 24, 176>}, {pipeline_mode = #tpu.pipeline_mode<synchronous>, transform_indices = @transform_3, window_bounds = array<i64: 24, 176>}, {pipeline_mode = #tpu.pipeline_mode<synchronous>, transform_indices = @transform_4, window_bounds = array<i64: 1, 176>}, {pipeline_mode = #tpu.pipeline_mode<synchronous>, transform_indices = @transform_5, window_bounds = array<i64: 176, 160>}, {pipeline_mode = #tpu.pipeline_mode<synchronous>, transform_indices = @transform_6, window_bounds = array<i64: 176, 160>}, {pipeline_mode = #tpu.pipeline_mode<synchronous>, transform_indices = @transform_7, window_bounds = array<i64: 1, 160>}, {pipeline_mode = #tpu.pipeline_mode<synchronous>, transform_indices = @transform_8, window_bounds = array<i64: 160, 64>}, {pipeline_mode = #tpu.pipeline_mode<synchronous>, transform_indices = @transform_9, window_bounds = array<i64: 1, 64>}, {pipeline_mode = #tpu.pipeline_mode<synchronous>, transform_indices = @transform_10, window_bounds = array<i64: 128, 512>}, {pipeline_mode = #tpu.pipeline_mode<synchronous>, transform_indices = @transform_11, window_bounds = array<i64: 256, 512>}, {pipeline_mode = #tpu.pipeline_mode<synchronous>, transform_indices = @transform_12, window_bounds = array<i64: 1, 512>}, {pipeline_mode = #tpu.pipeline_mode<synchronous>, transform_indices = @transform_13, window_bounds = array<i64: 128, 64>}, {pipeline_mode = #tpu.pipeline_mode<synchronous>, transform_indices = @transform_14, window_bounds = array<i64: 1, 64>}, {pipeline_mode = #tpu.pipeline_mode<synchronous>, transform_indices = @transform_15, window_bounds = array<i64: 128, 128>}, {pipeline_mode = #tpu.pipeline_mode<synchronous>, transform_indices = @transform_16, window_bounds = array<i64: 1, 128>}, {transform_indices = @transform_17, window_bounds = array<i64: 32, 128>}, {transform_indices = @transform_18, window_bounds = array<i64: 32, 128>}]} {
    %c0 = arith.constant 0 : index
    %c0_0 = arith.constant 0 : index
    %0 = vector.load %arg1[%c0, %c0_0] : memref<32x24xf32, #tpu.memory_space<vmem>>, vector<32x24xf32>
    %c0_1 = arith.constant 0 : index
    %c0_2 = arith.constant 0 : index
    %1 = vector.load %arg3[%c0_1, %c0_2] : memref<24x176xf32, #tpu.memory_space<vmem>>, vector<24x176xf32>
    %cst = arith.constant dense<0.000000e+00> : vector<32x176xf32>
    %2 = tpu.matmul %0, %1, %cst {dimension_numbers = #tpu.dot_dimension_numbers<[1], [0], [0], [1], [0, 0, 1, 1], [], []>} : vector<32x24xf32>, vector<24x176xf32>, vector<32x176xf32> -> vector<32x176xf32>
    %c0_3 = arith.constant 0 : index
    %c0_4 = arith.constant 0 : index
    %3 = vector.load %arg4[%c0_3, %c0_4] : memref<24x176xf32, #tpu.memory_space<vmem>>, vector<24x176xf32>
    %cst_5 = arith.constant dense<0.000000e+00> : vector<32x176xf32>
    %4 = tpu.matmul %0, %3, %cst_5 {dimension_numbers = #tpu.dot_dimension_numbers<[1], [0], [0], [1], [0, 0, 1, 1], [], []>} : vector<32x24xf32>, vector<24x176xf32>, vector<32x176xf32> -> vector<32x176xf32>
    %5 = arith.maximumf %2, %4 : vector<32x176xf32>
    %c0_6 = arith.constant 0 : index
    %c0_7 = arith.constant 0 : index
    %6 = vector.load %arg5[%c0_6, %c0_7] : memref<1x176xf32, #tpu.memory_space<vmem>>, vector<1x176xf32>
    %7 = vector.broadcast %6 : vector<1x176xf32> to vector<32x176xf32>
    %8 = arith.addf %5, %7 : vector<32x176xf32>
    %cst_8 = arith.constant 0.000000e+00 : f32
    %9 = vector.broadcast %cst_8 : f32 to vector<32x176xf32>
    %10 = arith.maximumf %8, %9 : vector<32x176xf32>
    %c0_9 = arith.constant 0 : index
    %c0_10 = arith.constant 0 : index
    %11 = vector.load %arg6[%c0_9, %c0_10] : memref<176x160xf32, #tpu.memory_space<vmem>>, vector<176x160xf32>
    %cst_11 = arith.constant dense<0.000000e+00> : vector<32x160xf32>
    %12 = tpu.matmul %10, %11, %cst_11 {dimension_numbers = #tpu.dot_dimension_numbers<[1], [0], [0], [1], [0, 0, 1, 1], [], []>} : vector<32x176xf32>, vector<176x160xf32>, vector<32x160xf32> -> vector<32x160xf32>
    %c0_12 = arith.constant 0 : index
    %c0_13 = arith.constant 0 : index
    %13 = vector.load %arg7[%c0_12, %c0_13] : memref<176x160xf32, #tpu.memory_space<vmem>>, vector<176x160xf32>
    %cst_14 = arith.constant dense<0.000000e+00> : vector<32x160xf32>
    %14 = tpu.matmul %10, %13, %cst_14 {dimension_numbers = #tpu.dot_dimension_numbers<[1], [0], [0], [1], [0, 0, 1, 1], [], []>} : vector<32x176xf32>, vector<176x160xf32>, vector<32x160xf32> -> vector<32x160xf32>
    %15 = arith.maximumf %12, %14 : vector<32x160xf32>
    %c0_15 = arith.constant 0 : index
    %c0_16 = arith.constant 0 : index
    %16 = vector.load %arg8[%c0_15, %c0_16] : memref<1x160xf32, #tpu.memory_space<vmem>>, vector<1x160xf32>
    %17 = vector.broadcast %16 : vector<1x160xf32> to vector<32x160xf32>
    %18 = arith.addf %15, %17 : vector<32x160xf32>
    %cst_17 = arith.constant 0.000000e+00 : f32
    %19 = vector.broadcast %cst_17 : f32 to vector<32x160xf32>
    %20 = arith.maximumf %18, %19 : vector<32x160xf32>
    %c0_18 = arith.constant 0 : index
    %c0_19 = arith.constant 0 : index
    %21 = vector.load %arg9[%c0_18, %c0_19] : memref<160x64xf32, #tpu.memory_space<vmem>>, vector<160x64xf32>
    %cst_20 = arith.constant dense<0.000000e+00> : vector<32x64xf32>
    %22 = tpu.matmul %20, %21, %cst_20 {dimension_numbers = #tpu.dot_dimension_numbers<[1], [0], [0], [1], [0, 0, 1, 1], [], []>} : vector<32x160xf32>, vector<160x64xf32>, vector<32x64xf32> -> vector<32x64xf32>
    %c0_21 = arith.constant 0 : index
    %c0_22 = arith.constant 0 : index
    %23 = vector.load %arg10[%c0_21, %c0_22] : memref<1x64xf32, #tpu.memory_space<vmem>>, vector<1x64xf32>
    %24 = vector.broadcast %23 : vector<1x64xf32> to vector<32x64xf32>
    %25 = arith.addf %22, %24 : vector<32x64xf32>
    %cst_23 = arith.constant 0.000000e+00 : f32
    %26 = vector.broadcast %cst_23 : f32 to vector<32x64xf32>
    %27 = arith.maximumf %25, %26 : vector<32x64xf32>
    %c0_24 = arith.constant 0 : index
    %c0_25 = arith.constant 0 : index
    %28 = vector.load %arg11[%c0_24, %c0_25] : memref<128x512xbf16, #tpu.memory_space<vmem>>, vector<128x512xbf16>
    %c0_26 = arith.constant 0 : index
    %c0_27 = arith.constant 0 : index
    %29 = vector.load %arg12[%c0_26, %c0_27] : memref<256x512xbf16, #tpu.memory_space<vmem>>, vector<256x512xbf16>
    %c0_28 = arith.constant 0 : index
    %c0_29 = arith.constant 0 : index
    %30 = vector.load %arg13[%c0_28, %c0_29] : memref<1x512xf32, #tpu.memory_space<vmem>>, vector<1x512xf32>
    %cst_30 = arith.constant 0.000000e+00 : f32
    %31 = vector.broadcast %cst_30 : f32 to vector<32x128xf32>
    %cst_31 = arith.constant 0.000000e+00 : f32
    %32 = vector.broadcast %cst_31 : f32 to vector<32x128xf32>
    %cst_32 = arith.constant 0.000000e+00 : f32
    %33 = vector.broadcast %cst_32 : f32 to vector<32x128xf32>
    %cst_33 = arith.constant 0.000000e+00 : f32
    %34 = vector.broadcast %cst_33 : f32 to vector<32x128xf32>
    %c0_34 = arith.constant 0 : index
    %c0_35 = arith.constant 0 : index
    %c0_36 = arith.constant 0 : index
    %35 = vector.load %arg2[%c0_34, %c0_35, %c0_36] : memref<8x32x512xf32, #tpu.memory_space<vmem>>, vector<1x32x512xf32>
    %36 = vector.shape_cast %35 : vector<1x32x512xf32> to vector<32x512xf32>
    %37 = arith.truncf %31 : vector<32x128xf32> to vector<32x128xbf16>
    %cst_37 = arith.constant dense<0.000000e+00> : vector<32x512xf32>
    %38 = tpu.matmul %37, %28, %cst_37 {dimension_numbers = #tpu.dot_dimension_numbers<[1], [0], [0], [1], [0, 0, 1, 1], [], []>} : vector<32x128xbf16>, vector<128x512xbf16>, vector<32x512xf32> -> vector<32x512xf32>
    %39 = arith.addf %36, %38 : vector<32x512xf32>
    %40 = vector.extract_strided_slice %39 {offsets = [0, 0], sizes = [32, 128], strides = [1, 1]} : vector<32x512xf32> to vector<32x128xf32>
    %cst_38 = arith.constant 5.000000e-01 : f32
    %41 = vector.broadcast %cst_38 : f32 to vector<32x128xf32>
    %42 = arith.mulf %41, %40 : vector<32x128xf32>
    %43 = math.tanh %42 : vector<32x128xf32>
    %cst_39 = arith.constant 5.000000e-01 : f32
    %44 = vector.broadcast %cst_39 : f32 to vector<32x128xf32>
    %45 = arith.mulf %44, %43 : vector<32x128xf32>
    %cst_40 = arith.constant 5.000000e-01 : f32
    %46 = vector.broadcast %cst_40 : f32 to vector<32x128xf32>
    %47 = arith.addf %45, %46 : vector<32x128xf32>
    %48 = vector.extract_strided_slice %39 {offsets = [0, 128], sizes = [32, 128], strides = [1, 1]} : vector<32x512xf32> to vector<32x128xf32>
    %cst_41 = arith.constant 5.000000e-01 : f32
    %49 = vector.broadcast %cst_41 : f32 to vector<32x128xf32>
    %50 = arith.mulf %49, %48 : vector<32x128xf32>
    %51 = math.tanh %50 : vector<32x128xf32>
    %cst_42 = arith.constant 5.000000e-01 : f32
    %52 = vector.broadcast %cst_42 : f32 to vector<32x128xf32>
    %53 = arith.mulf %52, %51 : vector<32x128xf32>
    %cst_43 = arith.constant 5.000000e-01 : f32
    %54 = vector.broadcast %cst_43 : f32 to vector<32x128xf32>
    %55 = arith.addf %53, %54 : vector<32x128xf32>
    %56 = vector.extract_strided_slice %39 {offsets = [0, 256], sizes = [32, 128], strides = [1, 1]} : vector<32x512xf32> to vector<32x128xf32>
    %57 = math.tanh %56 : vector<32x128xf32>
    %58 = vector.extract_strided_slice %39 {offsets = [0, 384], sizes = [32, 128], strides = [1, 1]} : vector<32x512xf32> to vector<32x128xf32>
    %cst_44 = arith.constant 5.000000e-01 : f32
    %59 = vector.broadcast %cst_44 : f32 to vector<32x128xf32>
    %60 = arith.mulf %59, %58 : vector<32x128xf32>
    %61 = math.tanh %60 : vector<32x128xf32>
    %cst_45 = arith.constant 5.000000e-01 : f32
    %62 = vector.broadcast %cst_45 : f32 to vector<32x128xf32>
    %63 = arith.mulf %62, %61 : vector<32x128xf32>
    %cst_46 = arith.constant 5.000000e-01 : f32
    %64 = vector.broadcast %cst_46 : f32 to vector<32x128xf32>
    %65 = arith.addf %63, %64 : vector<32x128xf32>
    %66 = arith.mulf %55, %32 : vector<32x128xf32>
    %67 = arith.mulf %47, %57 : vector<32x128xf32>
    %68 = arith.addf %66, %67 : vector<32x128xf32>
    %69 = math.tanh %68 : vector<32x128xf32>
    %70 = arith.mulf %65, %69 : vector<32x128xf32>
    %71 = arith.truncf %70 : vector<32x128xf32> to vector<32x128xbf16>
    %72 = arith.truncf %33 : vector<32x128xf32> to vector<32x128xbf16>
    %73 = tpu.concatenate %71, %72 in 1 : vector<32x128xbf16>, vector<32x128xbf16> -> vector<32x256xbf16>
    %cst_47 = arith.constant dense<0.000000e+00> : vector<32x512xf32>
    %74 = tpu.matmul %73, %29, %cst_47 {dimension_numbers = #tpu.dot_dimension_numbers<[1], [0], [0], [1], [0, 0, 1, 1], [], []>} : vector<32x256xbf16>, vector<256x512xbf16>, vector<32x512xf32> -> vector<32x512xf32>
    %75 = vector.broadcast %30 : vector<1x512xf32> to vector<32x512xf32>
    %76 = arith.addf %74, %75 : vector<32x512xf32>
    %77 = vector.extract_strided_slice %76 {offsets = [0, 0], sizes = [32, 128], strides = [1, 1]} : vector<32x512xf32> to vector<32x128xf32>
    %cst_48 = arith.constant 5.000000e-01 : f32
    %78 = vector.broadcast %cst_48 : f32 to vector<32x128xf32>
    %79 = arith.mulf %78, %77 : vector<32x128xf32>
    %80 = math.tanh %79 : vector<32x128xf32>
    %cst_49 = arith.constant 5.000000e-01 : f32
    %81 = vector.broadcast %cst_49 : f32 to vector<32x128xf32>
    %82 = arith.mulf %81, %80 : vector<32x128xf32>
    %cst_50 = arith.constant 5.000000e-01 : f32
    %83 = vector.broadcast %cst_50 : f32 to vector<32x128xf32>
    %84 = arith.addf %82, %83 : vector<32x128xf32>
    %85 = vector.extract_strided_slice %76 {offsets = [0, 128], sizes = [32, 128], strides = [1, 1]} : vector<32x512xf32> to vector<32x128xf32>
    %cst_51 = arith.constant 5.000000e-01 : f32
    %86 = vector.broadcast %cst_51 : f32 to vector<32x128xf32>
    %87 = arith.mulf %86, %85 : vector<32x128xf32>
    %88 = math.tanh %87 : vector<32x128xf32>
    %cst_52 = arith.constant 5.000000e-01 : f32
    %89 = vector.broadcast %cst_52 : f32 to vector<32x128xf32>
    %90 = arith.mulf %89, %88 : vector<32x128xf32>
    %cst_53 = arith.constant 5.000000e-01 : f32
    %91 = vector.broadcast %cst_53 : f32 to vector<32x128xf32>
    %92 = arith.addf %90, %91 : vector<32x128xf32>
    %93 = vector.extract_strided_slice %76 {offsets = [0, 256], sizes = [32, 128], strides = [1, 1]} : vector<32x512xf32> to vector<32x128xf32>
    %94 = math.tanh %93 : vector<32x128xf32>
    %95 = vector.extract_strided_slice %76 {offsets = [0, 384], sizes = [32, 128], strides = [1, 1]} : vector<32x512xf32> to vector<32x128xf32>
    %cst_54 = arith.constant 5.000000e-01 : f32
    %96 = vector.broadcast %cst_54 : f32 to vector<32x128xf32>
    %97 = arith.mulf %96, %95 : vector<32x128xf32>
    %98 = math.tanh %97 : vector<32x128xf32>
    %cst_55 = arith.constant 5.000000e-01 : f32
    %99 = vector.broadcast %cst_55 : f32 to vector<32x128xf32>
    %100 = arith.mulf %99, %98 : vector<32x128xf32>
    %cst_56 = arith.constant 5.000000e-01 : f32
    %101 = vector.broadcast %cst_56 : f32 to vector<32x128xf32>
    %102 = arith.addf %100, %101 : vector<32x128xf32>
    %103 = arith.mulf %92, %34 : vector<32x128xf32>
    %104 = arith.mulf %84, %94 : vector<32x128xf32>
    %105 = arith.addf %103, %104 : vector<32x128xf32>
    %106 = math.tanh %105 : vector<32x128xf32>
    %107 = arith.mulf %102, %106 : vector<32x128xf32>
    %c1 = arith.constant 1 : index
    %c0_57 = arith.constant 0 : index
    %c0_58 = arith.constant 0 : index
    %108 = vector.load %arg2[%c1, %c0_57, %c0_58] : memref<8x32x512xf32, #tpu.memory_space<vmem>>, vector<1x32x512xf32>
    %109 = vector.shape_cast %108 : vector<1x32x512xf32> to vector<32x512xf32>
    %110 = arith.truncf %70 : vector<32x128xf32> to vector<32x128xbf16>
    %cst_59 = arith.constant dense<0.000000e+00> : vector<32x512xf32>
    %111 = tpu.matmul %110, %28, %cst_59 {dimension_numbers = #tpu.dot_dimension_numbers<[1], [0], [0], [1], [0, 0, 1, 1], [], []>} : vector<32x128xbf16>, vector<128x512xbf16>, vector<32x512xf32> -> vector<32x512xf32>
    %112 = arith.addf %109, %111 : vector<32x512xf32>
    %113 = vector.extract_strided_slice %112 {offsets = [0, 0], sizes = [32, 128], strides = [1, 1]} : vector<32x512xf32> to vector<32x128xf32>
    %cst_60 = arith.constant 5.000000e-01 : f32
    %114 = vector.broadcast %cst_60 : f32 to vector<32x128xf32>
    %115 = arith.mulf %114, %113 : vector<32x128xf32>
    %116 = math.tanh %115 : vector<32x128xf32>
    %cst_61 = arith.constant 5.000000e-01 : f32
    %117 = vector.broadcast %cst_61 : f32 to vector<32x128xf32>
    %118 = arith.mulf %117, %116 : vector<32x128xf32>
    %cst_62 = arith.constant 5.000000e-01 : f32
    %119 = vector.broadcast %cst_62 : f32 to vector<32x128xf32>
    %120 = arith.addf %118, %119 : vector<32x128xf32>
    %121 = vector.extract_strided_slice %112 {offsets = [0, 128], sizes = [32, 128], strides = [1, 1]} : vector<32x512xf32> to vector<32x128xf32>
    %cst_63 = arith.constant 5.000000e-01 : f32
    %122 = vector.broadcast %cst_63 : f32 to vector<32x128xf32>
    %123 = arith.mulf %122, %121 : vector<32x128xf32>
    %124 = math.tanh %123 : vector<32x128xf32>
    %cst_64 = arith.constant 5.000000e-01 : f32
    %125 = vector.broadcast %cst_64 : f32 to vector<32x128xf32>
    %126 = arith.mulf %125, %124 : vector<32x128xf32>
    %cst_65 = arith.constant 5.000000e-01 : f32
    %127 = vector.broadcast %cst_65 : f32 to vector<32x128xf32>
    %128 = arith.addf %126, %127 : vector<32x128xf32>
    %129 = vector.extract_strided_slice %112 {offsets = [0, 256], sizes = [32, 128], strides = [1, 1]} : vector<32x512xf32> to vector<32x128xf32>
    %130 = math.tanh %129 : vector<32x128xf32>
    %131 = vector.extract_strided_slice %112 {offsets = [0, 384], sizes = [32, 128], strides = [1, 1]} : vector<32x512xf32> to vector<32x128xf32>
    %cst_66 = arith.constant 5.000000e-01 : f32
    %132 = vector.broadcast %cst_66 : f32 to vector<32x128xf32>
    %133 = arith.mulf %132, %131 : vector<32x128xf32>
    %134 = math.tanh %133 : vector<32x128xf32>
    %cst_67 = arith.constant 5.000000e-01 : f32
    %135 = vector.broadcast %cst_67 : f32 to vector<32x128xf32>
    %136 = arith.mulf %135, %134 : vector<32x128xf32>
    %cst_68 = arith.constant 5.000000e-01 : f32
    %137 = vector.broadcast %cst_68 : f32 to vector<32x128xf32>
    %138 = arith.addf %136, %137 : vector<32x128xf32>
    %139 = arith.mulf %128, %68 : vector<32x128xf32>
    %140 = arith.mulf %120, %130 : vector<32x128xf32>
    %141 = arith.addf %139, %140 : vector<32x128xf32>
    %142 = math.tanh %141 : vector<32x128xf32>
    %143 = arith.mulf %138, %142 : vector<32x128xf32>
    %144 = arith.truncf %143 : vector<32x128xf32> to vector<32x128xbf16>
    %145 = arith.truncf %107 : vector<32x128xf32> to vector<32x128xbf16>
    %146 = tpu.concatenate %144, %145 in 1 : vector<32x128xbf16>, vector<32x128xbf16> -> vector<32x256xbf16>
    %cst_69 = arith.constant dense<0.000000e+00> : vector<32x512xf32>
    %147 = tpu.matmul %146, %29, %cst_69 {dimension_numbers = #tpu.dot_dimension_numbers<[1], [0], [0], [1], [0, 0, 1, 1], [], []>} : vector<32x256xbf16>, vector<256x512xbf16>, vector<32x512xf32> -> vector<32x512xf32>
    %148 = vector.broadcast %30 : vector<1x512xf32> to vector<32x512xf32>
    %149 = arith.addf %147, %148 : vector<32x512xf32>
    %150 = vector.extract_strided_slice %149 {offsets = [0, 0], sizes = [32, 128], strides = [1, 1]} : vector<32x512xf32> to vector<32x128xf32>
    %cst_70 = arith.constant 5.000000e-01 : f32
    %151 = vector.broadcast %cst_70 : f32 to vector<32x128xf32>
    %152 = arith.mulf %151, %150 : vector<32x128xf32>
    %153 = math.tanh %152 : vector<32x128xf32>
    %cst_71 = arith.constant 5.000000e-01 : f32
    %154 = vector.broadcast %cst_71 : f32 to vector<32x128xf32>
    %155 = arith.mulf %154, %153 : vector<32x128xf32>
    %cst_72 = arith.constant 5.000000e-01 : f32
    %156 = vector.broadcast %cst_72 : f32 to vector<32x128xf32>
    %157 = arith.addf %155, %156 : vector<32x128xf32>
    %158 = vector.extract_strided_slice %149 {offsets = [0, 128], sizes = [32, 128], strides = [1, 1]} : vector<32x512xf32> to vector<32x128xf32>
    %cst_73 = arith.constant 5.000000e-01 : f32
    %159 = vector.broadcast %cst_73 : f32 to vector<32x128xf32>
    %160 = arith.mulf %159, %158 : vector<32x128xf32>
    %161 = math.tanh %160 : vector<32x128xf32>
    %cst_74 = arith.constant 5.000000e-01 : f32
    %162 = vector.broadcast %cst_74 : f32 to vector<32x128xf32>
    %163 = arith.mulf %162, %161 : vector<32x128xf32>
    %cst_75 = arith.constant 5.000000e-01 : f32
    %164 = vector.broadcast %cst_75 : f32 to vector<32x128xf32>
    %165 = arith.addf %163, %164 : vector<32x128xf32>
    %166 = vector.extract_strided_slice %149 {offsets = [0, 256], sizes = [32, 128], strides = [1, 1]} : vector<32x512xf32> to vector<32x128xf32>
    %167 = math.tanh %166 : vector<32x128xf32>
    %168 = vector.extract_strided_slice %149 {offsets = [0, 384], sizes = [32, 128], strides = [1, 1]} : vector<32x512xf32> to vector<32x128xf32>
    %cst_76 = arith.constant 5.000000e-01 : f32
    %169 = vector.broadcast %cst_76 : f32 to vector<32x128xf32>
    %170 = arith.mulf %169, %168 : vector<32x128xf32>
    %171 = math.tanh %170 : vector<32x128xf32>
    %cst_77 = arith.constant 5.000000e-01 : f32
    %172 = vector.broadcast %cst_77 : f32 to vector<32x128xf32>
    %173 = arith.mulf %172, %171 : vector<32x128xf32>
    %cst_78 = arith.constant 5.000000e-01 : f32
    %174 = vector.broadcast %cst_78 : f32 to vector<32x128xf32>
    %175 = arith.addf %173, %174 : vector<32x128xf32>
    %176 = arith.mulf %165, %105 : vector<32x128xf32>
    %177 = arith.mulf %157, %167 : vector<32x128xf32>
    %178 = arith.addf %176, %177 : vector<32x128xf32>
    %179 = math.tanh %178 : vector<32x128xf32>
    %180 = arith.mulf %175, %179 : vector<32x128xf32>
    %c2 = arith.constant 2 : index
    %c0_79 = arith.constant 0 : index
    %c0_80 = arith.constant 0 : index
    %181 = vector.load %arg2[%c2, %c0_79, %c0_80] : memref<8x32x512xf32, #tpu.memory_space<vmem>>, vector<1x32x512xf32>
    %182 = vector.shape_cast %181 : vector<1x32x512xf32> to vector<32x512xf32>
    %183 = arith.truncf %143 : vector<32x128xf32> to vector<32x128xbf16>
    %cst_81 = arith.constant dense<0.000000e+00> : vector<32x512xf32>
    %184 = tpu.matmul %183, %28, %cst_81 {dimension_numbers = #tpu.dot_dimension_numbers<[1], [0], [0], [1], [0, 0, 1, 1], [], []>} : vector<32x128xbf16>, vector<128x512xbf16>, vector<32x512xf32> -> vector<32x512xf32>
    %185 = arith.addf %182, %184 : vector<32x512xf32>
    %186 = vector.extract_strided_slice %185 {offsets = [0, 0], sizes = [32, 128], strides = [1, 1]} : vector<32x512xf32> to vector<32x128xf32>
    %cst_82 = arith.constant 5.000000e-01 : f32
    %187 = vector.broadcast %cst_82 : f32 to vector<32x128xf32>
    %188 = arith.mulf %187, %186 : vector<32x128xf32>
    %189 = math.tanh %188 : vector<32x128xf32>
    %cst_83 = arith.constant 5.000000e-01 : f32
    %190 = vector.broadcast %cst_83 : f32 to vector<32x128xf32>
    %191 = arith.mulf %190, %189 : vector<32x128xf32>
    %cst_84 = arith.constant 5.000000e-01 : f32
    %192 = vector.broadcast %cst_84 : f32 to vector<32x128xf32>
    %193 = arith.addf %191, %192 : vector<32x128xf32>
    %194 = vector.extract_strided_slice %185 {offsets = [0, 128], sizes = [32, 128], strides = [1, 1]} : vector<32x512xf32> to vector<32x128xf32>
    %cst_85 = arith.constant 5.000000e-01 : f32
    %195 = vector.broadcast %cst_85 : f32 to vector<32x128xf32>
    %196 = arith.mulf %195, %194 : vector<32x128xf32>
    %197 = math.tanh %196 : vector<32x128xf32>
    %cst_86 = arith.constant 5.000000e-01 : f32
    %198 = vector.broadcast %cst_86 : f32 to vector<32x128xf32>
    %199 = arith.mulf %198, %197 : vector<32x128xf32>
    %cst_87 = arith.constant 5.000000e-01 : f32
    %200 = vector.broadcast %cst_87 : f32 to vector<32x128xf32>
    %201 = arith.addf %199, %200 : vector<32x128xf32>
    %202 = vector.extract_strided_slice %185 {offsets = [0, 256], sizes = [32, 128], strides = [1, 1]} : vector<32x512xf32> to vector<32x128xf32>
    %203 = math.tanh %202 : vector<32x128xf32>
    %204 = vector.extract_strided_slice %185 {offsets = [0, 384], sizes = [32, 128], strides = [1, 1]} : vector<32x512xf32> to vector<32x128xf32>
    %cst_88 = arith.constant 5.000000e-01 : f32
    %205 = vector.broadcast %cst_88 : f32 to vector<32x128xf32>
    %206 = arith.mulf %205, %204 : vector<32x128xf32>
    %207 = math.tanh %206 : vector<32x128xf32>
    %cst_89 = arith.constant 5.000000e-01 : f32
    %208 = vector.broadcast %cst_89 : f32 to vector<32x128xf32>
    %209 = arith.mulf %208, %207 : vector<32x128xf32>
    %cst_90 = arith.constant 5.000000e-01 : f32
    %210 = vector.broadcast %cst_90 : f32 to vector<32x128xf32>
    %211 = arith.addf %209, %210 : vector<32x128xf32>
    %212 = arith.mulf %201, %141 : vector<32x128xf32>
    %213 = arith.mulf %193, %203 : vector<32x128xf32>
    %214 = arith.addf %212, %213 : vector<32x128xf32>
    %215 = math.tanh %214 : vector<32x128xf32>
    %216 = arith.mulf %211, %215 : vector<32x128xf32>
    %217 = arith.truncf %216 : vector<32x128xf32> to vector<32x128xbf16>
    %218 = arith.truncf %180 : vector<32x128xf32> to vector<32x128xbf16>
    %219 = tpu.concatenate %217, %218 in 1 : vector<32x128xbf16>, vector<32x128xbf16> -> vector<32x256xbf16>
    %cst_91 = arith.constant dense<0.000000e+00> : vector<32x512xf32>
    %220 = tpu.matmul %219, %29, %cst_91 {dimension_numbers = #tpu.dot_dimension_numbers<[1], [0], [0], [1], [0, 0, 1, 1], [], []>} : vector<32x256xbf16>, vector<256x512xbf16>, vector<32x512xf32> -> vector<32x512xf32>
    %221 = vector.broadcast %30 : vector<1x512xf32> to vector<32x512xf32>
    %222 = arith.addf %220, %221 : vector<32x512xf32>
    %223 = vector.extract_strided_slice %222 {offsets = [0, 0], sizes = [32, 128], strides = [1, 1]} : vector<32x512xf32> to vector<32x128xf32>
    %cst_92 = arith.constant 5.000000e-01 : f32
    %224 = vector.broadcast %cst_92 : f32 to vector<32x128xf32>
    %225 = arith.mulf %224, %223 : vector<32x128xf32>
    %226 = math.tanh %225 : vector<32x128xf32>
    %cst_93 = arith.constant 5.000000e-01 : f32
    %227 = vector.broadcast %cst_93 : f32 to vector<32x128xf32>
    %228 = arith.mulf %227, %226 : vector<32x128xf32>
    %cst_94 = arith.constant 5.000000e-01 : f32
    %229 = vector.broadcast %cst_94 : f32 to vector<32x128xf32>
    %230 = arith.addf %228, %229 : vector<32x128xf32>
    %231 = vector.extract_strided_slice %222 {offsets = [0, 128], sizes = [32, 128], strides = [1, 1]} : vector<32x512xf32> to vector<32x128xf32>
    %cst_95 = arith.constant 5.000000e-01 : f32
    %232 = vector.broadcast %cst_95 : f32 to vector<32x128xf32>
    %233 = arith.mulf %232, %231 : vector<32x128xf32>
    %234 = math.tanh %233 : vector<32x128xf32>
    %cst_96 = arith.constant 5.000000e-01 : f32
    %235 = vector.broadcast %cst_96 : f32 to vector<32x128xf32>
    %236 = arith.mulf %235, %234 : vector<32x128xf32>
    %cst_97 = arith.constant 5.000000e-01 : f32
    %237 = vector.broadcast %cst_97 : f32 to vector<32x128xf32>
    %238 = arith.addf %236, %237 : vector<32x128xf32>
    %239 = vector.extract_strided_slice %222 {offsets = [0, 256], sizes = [32, 128], strides = [1, 1]} : vector<32x512xf32> to vector<32x128xf32>
    %240 = math.tanh %239 : vector<32x128xf32>
    %241 = vector.extract_strided_slice %222 {offsets = [0, 384], sizes = [32, 128], strides = [1, 1]} : vector<32x512xf32> to vector<32x128xf32>
    %cst_98 = arith.constant 5.000000e-01 : f32
    %242 = vector.broadcast %cst_98 : f32 to vector<32x128xf32>
    %243 = arith.mulf %242, %241 : vector<32x128xf32>
    %244 = math.tanh %243 : vector<32x128xf32>
    %cst_99 = arith.constant 5.000000e-01 : f32
    %245 = vector.broadcast %cst_99 : f32 to vector<32x128xf32>
    %246 = arith.mulf %245, %244 : vector<32x128xf32>
    %cst_100 = arith.constant 5.000000e-01 : f32
    %247 = vector.broadcast %cst_100 : f32 to vector<32x128xf32>
    %248 = arith.addf %246, %247 : vector<32x128xf32>
    %249 = arith.mulf %238, %178 : vector<32x128xf32>
    %250 = arith.mulf %230, %240 : vector<32x128xf32>
    %251 = arith.addf %249, %250 : vector<32x128xf32>
    %252 = math.tanh %251 : vector<32x128xf32>
    %253 = arith.mulf %248, %252 : vector<32x128xf32>
    %c3 = arith.constant 3 : index
    %c0_101 = arith.constant 0 : index
    %c0_102 = arith.constant 0 : index
    %254 = vector.load %arg2[%c3, %c0_101, %c0_102] : memref<8x32x512xf32, #tpu.memory_space<vmem>>, vector<1x32x512xf32>
    %255 = vector.shape_cast %254 : vector<1x32x512xf32> to vector<32x512xf32>
    %256 = arith.truncf %216 : vector<32x128xf32> to vector<32x128xbf16>
    %cst_103 = arith.constant dense<0.000000e+00> : vector<32x512xf32>
    %257 = tpu.matmul %256, %28, %cst_103 {dimension_numbers = #tpu.dot_dimension_numbers<[1], [0], [0], [1], [0, 0, 1, 1], [], []>} : vector<32x128xbf16>, vector<128x512xbf16>, vector<32x512xf32> -> vector<32x512xf32>
    %258 = arith.addf %255, %257 : vector<32x512xf32>
    %259 = vector.extract_strided_slice %258 {offsets = [0, 0], sizes = [32, 128], strides = [1, 1]} : vector<32x512xf32> to vector<32x128xf32>
    %cst_104 = arith.constant 5.000000e-01 : f32
    %260 = vector.broadcast %cst_104 : f32 to vector<32x128xf32>
    %261 = arith.mulf %260, %259 : vector<32x128xf32>
    %262 = math.tanh %261 : vector<32x128xf32>
    %cst_105 = arith.constant 5.000000e-01 : f32
    %263 = vector.broadcast %cst_105 : f32 to vector<32x128xf32>
    %264 = arith.mulf %263, %262 : vector<32x128xf32>
    %cst_106 = arith.constant 5.000000e-01 : f32
    %265 = vector.broadcast %cst_106 : f32 to vector<32x128xf32>
    %266 = arith.addf %264, %265 : vector<32x128xf32>
    %267 = vector.extract_strided_slice %258 {offsets = [0, 128], sizes = [32, 128], strides = [1, 1]} : vector<32x512xf32> to vector<32x128xf32>
    %cst_107 = arith.constant 5.000000e-01 : f32
    %268 = vector.broadcast %cst_107 : f32 to vector<32x128xf32>
    %269 = arith.mulf %268, %267 : vector<32x128xf32>
    %270 = math.tanh %269 : vector<32x128xf32>
    %cst_108 = arith.constant 5.000000e-01 : f32
    %271 = vector.broadcast %cst_108 : f32 to vector<32x128xf32>
    %272 = arith.mulf %271, %270 : vector<32x128xf32>
    %cst_109 = arith.constant 5.000000e-01 : f32
    %273 = vector.broadcast %cst_109 : f32 to vector<32x128xf32>
    %274 = arith.addf %272, %273 : vector<32x128xf32>
    %275 = vector.extract_strided_slice %258 {offsets = [0, 256], sizes = [32, 128], strides = [1, 1]} : vector<32x512xf32> to vector<32x128xf32>
    %276 = math.tanh %275 : vector<32x128xf32>
    %277 = vector.extract_strided_slice %258 {offsets = [0, 384], sizes = [32, 128], strides = [1, 1]} : vector<32x512xf32> to vector<32x128xf32>
    %cst_110 = arith.constant 5.000000e-01 : f32
    %278 = vector.broadcast %cst_110 : f32 to vector<32x128xf32>
    %279 = arith.mulf %278, %277 : vector<32x128xf32>
    %280 = math.tanh %279 : vector<32x128xf32>
    %cst_111 = arith.constant 5.000000e-01 : f32
    %281 = vector.broadcast %cst_111 : f32 to vector<32x128xf32>
    %282 = arith.mulf %281, %280 : vector<32x128xf32>
    %cst_112 = arith.constant 5.000000e-01 : f32
    %283 = vector.broadcast %cst_112 : f32 to vector<32x128xf32>
    %284 = arith.addf %282, %283 : vector<32x128xf32>
    %285 = arith.mulf %274, %214 : vector<32x128xf32>
    %286 = arith.mulf %266, %276 : vector<32x128xf32>
    %287 = arith.addf %285, %286 : vector<32x128xf32>
    %288 = math.tanh %287 : vector<32x128xf32>
    %289 = arith.mulf %284, %288 : vector<32x128xf32>
    %290 = arith.truncf %289 : vector<32x128xf32> to vector<32x128xbf16>
    %291 = arith.truncf %253 : vector<32x128xf32> to vector<32x128xbf16>
    %292 = tpu.concatenate %290, %291 in 1 : vector<32x128xbf16>, vector<32x128xbf16> -> vector<32x256xbf16>
    %cst_113 = arith.constant dense<0.000000e+00> : vector<32x512xf32>
    %293 = tpu.matmul %292, %29, %cst_113 {dimension_numbers = #tpu.dot_dimension_numbers<[1], [0], [0], [1], [0, 0, 1, 1], [], []>} : vector<32x256xbf16>, vector<256x512xbf16>, vector<32x512xf32> -> vector<32x512xf32>
    %294 = vector.broadcast %30 : vector<1x512xf32> to vector<32x512xf32>
    %295 = arith.addf %293, %294 : vector<32x512xf32>
    %296 = vector.extract_strided_slice %295 {offsets = [0, 0], sizes = [32, 128], strides = [1, 1]} : vector<32x512xf32> to vector<32x128xf32>
    %cst_114 = arith.constant 5.000000e-01 : f32
    %297 = vector.broadcast %cst_114 : f32 to vector<32x128xf32>
    %298 = arith.mulf %297, %296 : vector<32x128xf32>
    %299 = math.tanh %298 : vector<32x128xf32>
    %cst_115 = arith.constant 5.000000e-01 : f32
    %300 = vector.broadcast %cst_115 : f32 to vector<32x128xf32>
    %301 = arith.mulf %300, %299 : vector<32x128xf32>
    %cst_116 = arith.constant 5.000000e-01 : f32
    %302 = vector.broadcast %cst_116 : f32 to vector<32x128xf32>
    %303 = arith.addf %301, %302 : vector<32x128xf32>
    %304 = vector.extract_strided_slice %295 {offsets = [0, 128], sizes = [32, 128], strides = [1, 1]} : vector<32x512xf32> to vector<32x128xf32>
    %cst_117 = arith.constant 5.000000e-01 : f32
    %305 = vector.broadcast %cst_117 : f32 to vector<32x128xf32>
    %306 = arith.mulf %305, %304 : vector<32x128xf32>
    %307 = math.tanh %306 : vector<32x128xf32>
    %cst_118 = arith.constant 5.000000e-01 : f32
    %308 = vector.broadcast %cst_118 : f32 to vector<32x128xf32>
    %309 = arith.mulf %308, %307 : vector<32x128xf32>
    %cst_119 = arith.constant 5.000000e-01 : f32
    %310 = vector.broadcast %cst_119 : f32 to vector<32x128xf32>
    %311 = arith.addf %309, %310 : vector<32x128xf32>
    %312 = vector.extract_strided_slice %295 {offsets = [0, 256], sizes = [32, 128], strides = [1, 1]} : vector<32x512xf32> to vector<32x128xf32>
    %313 = math.tanh %312 : vector<32x128xf32>
    %314 = vector.extract_strided_slice %295 {offsets = [0, 384], sizes = [32, 128], strides = [1, 1]} : vector<32x512xf32> to vector<32x128xf32>
    %cst_120 = arith.constant 5.000000e-01 : f32
    %315 = vector.broadcast %cst_120 : f32 to vector<32x128xf32>
    %316 = arith.mulf %315, %314 : vector<32x128xf32>
    %317 = math.tanh %316 : vector<32x128xf32>
    %cst_121 = arith.constant 5.000000e-01 : f32
    %318 = vector.broadcast %cst_121 : f32 to vector<32x128xf32>
    %319 = arith.mulf %318, %317 : vector<32x128xf32>
    %cst_122 = arith.constant 5.000000e-01 : f32
    %320 = vector.broadcast %cst_122 : f32 to vector<32x128xf32>
    %321 = arith.addf %319, %320 : vector<32x128xf32>
    %322 = arith.mulf %311, %251 : vector<32x128xf32>
    %323 = arith.mulf %303, %313 : vector<32x128xf32>
    %324 = arith.addf %322, %323 : vector<32x128xf32>
    %325 = math.tanh %324 : vector<32x128xf32>
    %326 = arith.mulf %321, %325 : vector<32x128xf32>
    %c4 = arith.constant 4 : index
    %c0_123 = arith.constant 0 : index
    %c0_124 = arith.constant 0 : index
    %327 = vector.load %arg2[%c4, %c0_123, %c0_124] : memref<8x32x512xf32, #tpu.memory_space<vmem>>, vector<1x32x512xf32>
    %328 = vector.shape_cast %327 : vector<1x32x512xf32> to vector<32x512xf32>
    %329 = arith.truncf %289 : vector<32x128xf32> to vector<32x128xbf16>
    %cst_125 = arith.constant dense<0.000000e+00> : vector<32x512xf32>
    %330 = tpu.matmul %329, %28, %cst_125 {dimension_numbers = #tpu.dot_dimension_numbers<[1], [0], [0], [1], [0, 0, 1, 1], [], []>} : vector<32x128xbf16>, vector<128x512xbf16>, vector<32x512xf32> -> vector<32x512xf32>
    %331 = arith.addf %328, %330 : vector<32x512xf32>
    %332 = vector.extract_strided_slice %331 {offsets = [0, 0], sizes = [32, 128], strides = [1, 1]} : vector<32x512xf32> to vector<32x128xf32>
    %cst_126 = arith.constant 5.000000e-01 : f32
    %333 = vector.broadcast %cst_126 : f32 to vector<32x128xf32>
    %334 = arith.mulf %333, %332 : vector<32x128xf32>
    %335 = math.tanh %334 : vector<32x128xf32>
    %cst_127 = arith.constant 5.000000e-01 : f32
    %336 = vector.broadcast %cst_127 : f32 to vector<32x128xf32>
    %337 = arith.mulf %336, %335 : vector<32x128xf32>
    %cst_128 = arith.constant 5.000000e-01 : f32
    %338 = vector.broadcast %cst_128 : f32 to vector<32x128xf32>
    %339 = arith.addf %337, %338 : vector<32x128xf32>
    %340 = vector.extract_strided_slice %331 {offsets = [0, 128], sizes = [32, 128], strides = [1, 1]} : vector<32x512xf32> to vector<32x128xf32>
    %cst_129 = arith.constant 5.000000e-01 : f32
    %341 = vector.broadcast %cst_129 : f32 to vector<32x128xf32>
    %342 = arith.mulf %341, %340 : vector<32x128xf32>
    %343 = math.tanh %342 : vector<32x128xf32>
    %cst_130 = arith.constant 5.000000e-01 : f32
    %344 = vector.broadcast %cst_130 : f32 to vector<32x128xf32>
    %345 = arith.mulf %344, %343 : vector<32x128xf32>
    %cst_131 = arith.constant 5.000000e-01 : f32
    %346 = vector.broadcast %cst_131 : f32 to vector<32x128xf32>
    %347 = arith.addf %345, %346 : vector<32x128xf32>
    %348 = vector.extract_strided_slice %331 {offsets = [0, 256], sizes = [32, 128], strides = [1, 1]} : vector<32x512xf32> to vector<32x128xf32>
    %349 = math.tanh %348 : vector<32x128xf32>
    %350 = vector.extract_strided_slice %331 {offsets = [0, 384], sizes = [32, 128], strides = [1, 1]} : vector<32x512xf32> to vector<32x128xf32>
    %cst_132 = arith.constant 5.000000e-01 : f32
    %351 = vector.broadcast %cst_132 : f32 to vector<32x128xf32>
    %352 = arith.mulf %351, %350 : vector<32x128xf32>
    %353 = math.tanh %352 : vector<32x128xf32>
    %cst_133 = arith.constant 5.000000e-01 : f32
    %354 = vector.broadcast %cst_133 : f32 to vector<32x128xf32>
    %355 = arith.mulf %354, %353 : vector<32x128xf32>
    %cst_134 = arith.constant 5.000000e-01 : f32
    %356 = vector.broadcast %cst_134 : f32 to vector<32x128xf32>
    %357 = arith.addf %355, %356 : vector<32x128xf32>
    %358 = arith.mulf %347, %287 : vector<32x128xf32>
    %359 = arith.mulf %339, %349 : vector<32x128xf32>
    %360 = arith.addf %358, %359 : vector<32x128xf32>
    %361 = math.tanh %360 : vector<32x128xf32>
    %362 = arith.mulf %357, %361 : vector<32x128xf32>
    %363 = arith.truncf %362 : vector<32x128xf32> to vector<32x128xbf16>
    %364 = arith.truncf %326 : vector<32x128xf32> to vector<32x128xbf16>
    %365 = tpu.concatenate %363, %364 in 1 : vector<32x128xbf16>, vector<32x128xbf16> -> vector<32x256xbf16>
    %cst_135 = arith.constant dense<0.000000e+00> : vector<32x512xf32>
    %366 = tpu.matmul %365, %29, %cst_135 {dimension_numbers = #tpu.dot_dimension_numbers<[1], [0], [0], [1], [0, 0, 1, 1], [], []>} : vector<32x256xbf16>, vector<256x512xbf16>, vector<32x512xf32> -> vector<32x512xf32>
    %367 = vector.broadcast %30 : vector<1x512xf32> to vector<32x512xf32>
    %368 = arith.addf %366, %367 : vector<32x512xf32>
    %369 = vector.extract_strided_slice %368 {offsets = [0, 0], sizes = [32, 128], strides = [1, 1]} : vector<32x512xf32> to vector<32x128xf32>
    %cst_136 = arith.constant 5.000000e-01 : f32
    %370 = vector.broadcast %cst_136 : f32 to vector<32x128xf32>
    %371 = arith.mulf %370, %369 : vector<32x128xf32>
    %372 = math.tanh %371 : vector<32x128xf32>
    %cst_137 = arith.constant 5.000000e-01 : f32
    %373 = vector.broadcast %cst_137 : f32 to vector<32x128xf32>
    %374 = arith.mulf %373, %372 : vector<32x128xf32>
    %cst_138 = arith.constant 5.000000e-01 : f32
    %375 = vector.broadcast %cst_138 : f32 to vector<32x128xf32>
    %376 = arith.addf %374, %375 : vector<32x128xf32>
    %377 = vector.extract_strided_slice %368 {offsets = [0, 128], sizes = [32, 128], strides = [1, 1]} : vector<32x512xf32> to vector<32x128xf32>
    %cst_139 = arith.constant 5.000000e-01 : f32
    %378 = vector.broadcast %cst_139 : f32 to vector<32x128xf32>
    %379 = arith.mulf %378, %377 : vector<32x128xf32>
    %380 = math.tanh %379 : vector<32x128xf32>
    %cst_140 = arith.constant 5.000000e-01 : f32
    %381 = vector.broadcast %cst_140 : f32 to vector<32x128xf32>
    %382 = arith.mulf %381, %380 : vector<32x128xf32>
    %cst_141 = arith.constant 5.000000e-01 : f32
    %383 = vector.broadcast %cst_141 : f32 to vector<32x128xf32>
    %384 = arith.addf %382, %383 : vector<32x128xf32>
    %385 = vector.extract_strided_slice %368 {offsets = [0, 256], sizes = [32, 128], strides = [1, 1]} : vector<32x512xf32> to vector<32x128xf32>
    %386 = math.tanh %385 : vector<32x128xf32>
    %387 = vector.extract_strided_slice %368 {offsets = [0, 384], sizes = [32, 128], strides = [1, 1]} : vector<32x512xf32> to vector<32x128xf32>
    %cst_142 = arith.constant 5.000000e-01 : f32
    %388 = vector.broadcast %cst_142 : f32 to vector<32x128xf32>
    %389 = arith.mulf %388, %387 : vector<32x128xf32>
    %390 = math.tanh %389 : vector<32x128xf32>
    %cst_143 = arith.constant 5.000000e-01 : f32
    %391 = vector.broadcast %cst_143 : f32 to vector<32x128xf32>
    %392 = arith.mulf %391, %390 : vector<32x128xf32>
    %cst_144 = arith.constant 5.000000e-01 : f32
    %393 = vector.broadcast %cst_144 : f32 to vector<32x128xf32>
    %394 = arith.addf %392, %393 : vector<32x128xf32>
    %395 = arith.mulf %384, %324 : vector<32x128xf32>
    %396 = arith.mulf %376, %386 : vector<32x128xf32>
    %397 = arith.addf %395, %396 : vector<32x128xf32>
    %398 = math.tanh %397 : vector<32x128xf32>
    %399 = arith.mulf %394, %398 : vector<32x128xf32>
    %c5 = arith.constant 5 : index
    %c0_145 = arith.constant 0 : index
    %c0_146 = arith.constant 0 : index
    %400 = vector.load %arg2[%c5, %c0_145, %c0_146] : memref<8x32x512xf32, #tpu.memory_space<vmem>>, vector<1x32x512xf32>
    %401 = vector.shape_cast %400 : vector<1x32x512xf32> to vector<32x512xf32>
    %402 = arith.truncf %362 : vector<32x128xf32> to vector<32x128xbf16>
    %cst_147 = arith.constant dense<0.000000e+00> : vector<32x512xf32>
    %403 = tpu.matmul %402, %28, %cst_147 {dimension_numbers = #tpu.dot_dimension_numbers<[1], [0], [0], [1], [0, 0, 1, 1], [], []>} : vector<32x128xbf16>, vector<128x512xbf16>, vector<32x512xf32> -> vector<32x512xf32>
    %404 = arith.addf %401, %403 : vector<32x512xf32>
    %405 = vector.extract_strided_slice %404 {offsets = [0, 0], sizes = [32, 128], strides = [1, 1]} : vector<32x512xf32> to vector<32x128xf32>
    %cst_148 = arith.constant 5.000000e-01 : f32
    %406 = vector.broadcast %cst_148 : f32 to vector<32x128xf32>
    %407 = arith.mulf %406, %405 : vector<32x128xf32>
    %408 = math.tanh %407 : vector<32x128xf32>
    %cst_149 = arith.constant 5.000000e-01 : f32
    %409 = vector.broadcast %cst_149 : f32 to vector<32x128xf32>
    %410 = arith.mulf %409, %408 : vector<32x128xf32>
    %cst_150 = arith.constant 5.000000e-01 : f32
    %411 = vector.broadcast %cst_150 : f32 to vector<32x128xf32>
    %412 = arith.addf %410, %411 : vector<32x128xf32>
    %413 = vector.extract_strided_slice %404 {offsets = [0, 128], sizes = [32, 128], strides = [1, 1]} : vector<32x512xf32> to vector<32x128xf32>
    %cst_151 = arith.constant 5.000000e-01 : f32
    %414 = vector.broadcast %cst_151 : f32 to vector<32x128xf32>
    %415 = arith.mulf %414, %413 : vector<32x128xf32>
    %416 = math.tanh %415 : vector<32x128xf32>
    %cst_152 = arith.constant 5.000000e-01 : f32
    %417 = vector.broadcast %cst_152 : f32 to vector<32x128xf32>
    %418 = arith.mulf %417, %416 : vector<32x128xf32>
    %cst_153 = arith.constant 5.000000e-01 : f32
    %419 = vector.broadcast %cst_153 : f32 to vector<32x128xf32>
    %420 = arith.addf %418, %419 : vector<32x128xf32>
    %421 = vector.extract_strided_slice %404 {offsets = [0, 256], sizes = [32, 128], strides = [1, 1]} : vector<32x512xf32> to vector<32x128xf32>
    %422 = math.tanh %421 : vector<32x128xf32>
    %423 = vector.extract_strided_slice %404 {offsets = [0, 384], sizes = [32, 128], strides = [1, 1]} : vector<32x512xf32> to vector<32x128xf32>
    %cst_154 = arith.constant 5.000000e-01 : f32
    %424 = vector.broadcast %cst_154 : f32 to vector<32x128xf32>
    %425 = arith.mulf %424, %423 : vector<32x128xf32>
    %426 = math.tanh %425 : vector<32x128xf32>
    %cst_155 = arith.constant 5.000000e-01 : f32
    %427 = vector.broadcast %cst_155 : f32 to vector<32x128xf32>
    %428 = arith.mulf %427, %426 : vector<32x128xf32>
    %cst_156 = arith.constant 5.000000e-01 : f32
    %429 = vector.broadcast %cst_156 : f32 to vector<32x128xf32>
    %430 = arith.addf %428, %429 : vector<32x128xf32>
    %431 = arith.mulf %420, %360 : vector<32x128xf32>
    %432 = arith.mulf %412, %422 : vector<32x128xf32>
    %433 = arith.addf %431, %432 : vector<32x128xf32>
    %434 = math.tanh %433 : vector<32x128xf32>
    %435 = arith.mulf %430, %434 : vector<32x128xf32>
    %436 = arith.truncf %435 : vector<32x128xf32> to vector<32x128xbf16>
    %437 = arith.truncf %399 : vector<32x128xf32> to vector<32x128xbf16>
    %438 = tpu.concatenate %436, %437 in 1 : vector<32x128xbf16>, vector<32x128xbf16> -> vector<32x256xbf16>
    %cst_157 = arith.constant dense<0.000000e+00> : vector<32x512xf32>
    %439 = tpu.matmul %438, %29, %cst_157 {dimension_numbers = #tpu.dot_dimension_numbers<[1], [0], [0], [1], [0, 0, 1, 1], [], []>} : vector<32x256xbf16>, vector<256x512xbf16>, vector<32x512xf32> -> vector<32x512xf32>
    %440 = vector.broadcast %30 : vector<1x512xf32> to vector<32x512xf32>
    %441 = arith.addf %439, %440 : vector<32x512xf32>
    %442 = vector.extract_strided_slice %441 {offsets = [0, 0], sizes = [32, 128], strides = [1, 1]} : vector<32x512xf32> to vector<32x128xf32>
    %cst_158 = arith.constant 5.000000e-01 : f32
    %443 = vector.broadcast %cst_158 : f32 to vector<32x128xf32>
    %444 = arith.mulf %443, %442 : vector<32x128xf32>
    %445 = math.tanh %444 : vector<32x128xf32>
    %cst_159 = arith.constant 5.000000e-01 : f32
    %446 = vector.broadcast %cst_159 : f32 to vector<32x128xf32>
    %447 = arith.mulf %446, %445 : vector<32x128xf32>
    %cst_160 = arith.constant 5.000000e-01 : f32
    %448 = vector.broadcast %cst_160 : f32 to vector<32x128xf32>
    %449 = arith.addf %447, %448 : vector<32x128xf32>
    %450 = vector.extract_strided_slice %441 {offsets = [0, 128], sizes = [32, 128], strides = [1, 1]} : vector<32x512xf32> to vector<32x128xf32>
    %cst_161 = arith.constant 5.000000e-01 : f32
    %451 = vector.broadcast %cst_161 : f32 to vector<32x128xf32>
    %452 = arith.mulf %451, %450 : vector<32x128xf32>
    %453 = math.tanh %452 : vector<32x128xf32>
    %cst_162 = arith.constant 5.000000e-01 : f32
    %454 = vector.broadcast %cst_162 : f32 to vector<32x128xf32>
    %455 = arith.mulf %454, %453 : vector<32x128xf32>
    %cst_163 = arith.constant 5.000000e-01 : f32
    %456 = vector.broadcast %cst_163 : f32 to vector<32x128xf32>
    %457 = arith.addf %455, %456 : vector<32x128xf32>
    %458 = vector.extract_strided_slice %441 {offsets = [0, 256], sizes = [32, 128], strides = [1, 1]} : vector<32x512xf32> to vector<32x128xf32>
    %459 = math.tanh %458 : vector<32x128xf32>
    %460 = vector.extract_strided_slice %441 {offsets = [0, 384], sizes = [32, 128], strides = [1, 1]} : vector<32x512xf32> to vector<32x128xf32>
    %cst_164 = arith.constant 5.000000e-01 : f32
    %461 = vector.broadcast %cst_164 : f32 to vector<32x128xf32>
    %462 = arith.mulf %461, %460 : vector<32x128xf32>
    %463 = math.tanh %462 : vector<32x128xf32>
    %cst_165 = arith.constant 5.000000e-01 : f32
    %464 = vector.broadcast %cst_165 : f32 to vector<32x128xf32>
    %465 = arith.mulf %464, %463 : vector<32x128xf32>
    %cst_166 = arith.constant 5.000000e-01 : f32
    %466 = vector.broadcast %cst_166 : f32 to vector<32x128xf32>
    %467 = arith.addf %465, %466 : vector<32x128xf32>
    %468 = arith.mulf %457, %397 : vector<32x128xf32>
    %469 = arith.mulf %449, %459 : vector<32x128xf32>
    %470 = arith.addf %468, %469 : vector<32x128xf32>
    %471 = math.tanh %470 : vector<32x128xf32>
    %472 = arith.mulf %467, %471 : vector<32x128xf32>
    %c6 = arith.constant 6 : index
    %c0_167 = arith.constant 0 : index
    %c0_168 = arith.constant 0 : index
    %473 = vector.load %arg2[%c6, %c0_167, %c0_168] : memref<8x32x512xf32, #tpu.memory_space<vmem>>, vector<1x32x512xf32>
    %474 = vector.shape_cast %473 : vector<1x32x512xf32> to vector<32x512xf32>
    %475 = arith.truncf %435 : vector<32x128xf32> to vector<32x128xbf16>
    %cst_169 = arith.constant dense<0.000000e+00> : vector<32x512xf32>
    %476 = tpu.matmul %475, %28, %cst_169 {dimension_numbers = #tpu.dot_dimension_numbers<[1], [0], [0], [1], [0, 0, 1, 1], [], []>} : vector<32x128xbf16>, vector<128x512xbf16>, vector<32x512xf32> -> vector<32x512xf32>
    %477 = arith.addf %474, %476 : vector<32x512xf32>
    %478 = vector.extract_strided_slice %477 {offsets = [0, 0], sizes = [32, 128], strides = [1, 1]} : vector<32x512xf32> to vector<32x128xf32>
    %cst_170 = arith.constant 5.000000e-01 : f32
    %479 = vector.broadcast %cst_170 : f32 to vector<32x128xf32>
    %480 = arith.mulf %479, %478 : vector<32x128xf32>
    %481 = math.tanh %480 : vector<32x128xf32>
    %cst_171 = arith.constant 5.000000e-01 : f32
    %482 = vector.broadcast %cst_171 : f32 to vector<32x128xf32>
    %483 = arith.mulf %482, %481 : vector<32x128xf32>
    %cst_172 = arith.constant 5.000000e-01 : f32
    %484 = vector.broadcast %cst_172 : f32 to vector<32x128xf32>
    %485 = arith.addf %483, %484 : vector<32x128xf32>
    %486 = vector.extract_strided_slice %477 {offsets = [0, 128], sizes = [32, 128], strides = [1, 1]} : vector<32x512xf32> to vector<32x128xf32>
    %cst_173 = arith.constant 5.000000e-01 : f32
    %487 = vector.broadcast %cst_173 : f32 to vector<32x128xf32>
    %488 = arith.mulf %487, %486 : vector<32x128xf32>
    %489 = math.tanh %488 : vector<32x128xf32>
    %cst_174 = arith.constant 5.000000e-01 : f32
    %490 = vector.broadcast %cst_174 : f32 to vector<32x128xf32>
    %491 = arith.mulf %490, %489 : vector<32x128xf32>
    %cst_175 = arith.constant 5.000000e-01 : f32
    %492 = vector.broadcast %cst_175 : f32 to vector<32x128xf32>
    %493 = arith.addf %491, %492 : vector<32x128xf32>
    %494 = vector.extract_strided_slice %477 {offsets = [0, 256], sizes = [32, 128], strides = [1, 1]} : vector<32x512xf32> to vector<32x128xf32>
    %495 = math.tanh %494 : vector<32x128xf32>
    %496 = vector.extract_strided_slice %477 {offsets = [0, 384], sizes = [32, 128], strides = [1, 1]} : vector<32x512xf32> to vector<32x128xf32>
    %cst_176 = arith.constant 5.000000e-01 : f32
    %497 = vector.broadcast %cst_176 : f32 to vector<32x128xf32>
    %498 = arith.mulf %497, %496 : vector<32x128xf32>
    %499 = math.tanh %498 : vector<32x128xf32>
    %cst_177 = arith.constant 5.000000e-01 : f32
    %500 = vector.broadcast %cst_177 : f32 to vector<32x128xf32>
    %501 = arith.mulf %500, %499 : vector<32x128xf32>
    %cst_178 = arith.constant 5.000000e-01 : f32
    %502 = vector.broadcast %cst_178 : f32 to vector<32x128xf32>
    %503 = arith.addf %501, %502 : vector<32x128xf32>
    %504 = arith.mulf %493, %433 : vector<32x128xf32>
    %505 = arith.mulf %485, %495 : vector<32x128xf32>
    %506 = arith.addf %504, %505 : vector<32x128xf32>
    %507 = math.tanh %506 : vector<32x128xf32>
    %508 = arith.mulf %503, %507 : vector<32x128xf32>
    %509 = arith.truncf %508 : vector<32x128xf32> to vector<32x128xbf16>
    %510 = arith.truncf %472 : vector<32x128xf32> to vector<32x128xbf16>
    %511 = tpu.concatenate %509, %510 in 1 : vector<32x128xbf16>, vector<32x128xbf16> -> vector<32x256xbf16>
    %cst_179 = arith.constant dense<0.000000e+00> : vector<32x512xf32>
    %512 = tpu.matmul %511, %29, %cst_179 {dimension_numbers = #tpu.dot_dimension_numbers<[1], [0], [0], [1], [0, 0, 1, 1], [], []>} : vector<32x256xbf16>, vector<256x512xbf16>, vector<32x512xf32> -> vector<32x512xf32>
    %513 = vector.broadcast %30 : vector<1x512xf32> to vector<32x512xf32>
    %514 = arith.addf %512, %513 : vector<32x512xf32>
    %515 = vector.extract_strided_slice %514 {offsets = [0, 0], sizes = [32, 128], strides = [1, 1]} : vector<32x512xf32> to vector<32x128xf32>
    %cst_180 = arith.constant 5.000000e-01 : f32
    %516 = vector.broadcast %cst_180 : f32 to vector<32x128xf32>
    %517 = arith.mulf %516, %515 : vector<32x128xf32>
    %518 = math.tanh %517 : vector<32x128xf32>
    %cst_181 = arith.constant 5.000000e-01 : f32
    %519 = vector.broadcast %cst_181 : f32 to vector<32x128xf32>
    %520 = arith.mulf %519, %518 : vector<32x128xf32>
    %cst_182 = arith.constant 5.000000e-01 : f32
    %521 = vector.broadcast %cst_182 : f32 to vector<32x128xf32>
    %522 = arith.addf %520, %521 : vector<32x128xf32>
    %523 = vector.extract_strided_slice %514 {offsets = [0, 128], sizes = [32, 128], strides = [1, 1]} : vector<32x512xf32> to vector<32x128xf32>
    %cst_183 = arith.constant 5.000000e-01 : f32
    %524 = vector.broadcast %cst_183 : f32 to vector<32x128xf32>
    %525 = arith.mulf %524, %523 : vector<32x128xf32>
    %526 = math.tanh %525 : vector<32x128xf32>
    %cst_184 = arith.constant 5.000000e-01 : f32
    %527 = vector.broadcast %cst_184 : f32 to vector<32x128xf32>
    %528 = arith.mulf %527, %526 : vector<32x128xf32>
    %cst_185 = arith.constant 5.000000e-01 : f32
    %529 = vector.broadcast %cst_185 : f32 to vector<32x128xf32>
    %530 = arith.addf %528, %529 : vector<32x128xf32>
    %531 = vector.extract_strided_slice %514 {offsets = [0, 256], sizes = [32, 128], strides = [1, 1]} : vector<32x512xf32> to vector<32x128xf32>
    %532 = math.tanh %531 : vector<32x128xf32>
    %533 = vector.extract_strided_slice %514 {offsets = [0, 384], sizes = [32, 128], strides = [1, 1]} : vector<32x512xf32> to vector<32x128xf32>
    %cst_186 = arith.constant 5.000000e-01 : f32
    %534 = vector.broadcast %cst_186 : f32 to vector<32x128xf32>
    %535 = arith.mulf %534, %533 : vector<32x128xf32>
    %536 = math.tanh %535 : vector<32x128xf32>
    %cst_187 = arith.constant 5.000000e-01 : f32
    %537 = vector.broadcast %cst_187 : f32 to vector<32x128xf32>
    %538 = arith.mulf %537, %536 : vector<32x128xf32>
    %cst_188 = arith.constant 5.000000e-01 : f32
    %539 = vector.broadcast %cst_188 : f32 to vector<32x128xf32>
    %540 = arith.addf %538, %539 : vector<32x128xf32>
    %541 = arith.mulf %530, %470 : vector<32x128xf32>
    %542 = arith.mulf %522, %532 : vector<32x128xf32>
    %543 = arith.addf %541, %542 : vector<32x128xf32>
    %544 = math.tanh %543 : vector<32x128xf32>
    %545 = arith.mulf %540, %544 : vector<32x128xf32>
    %c7 = arith.constant 7 : index
    %c0_189 = arith.constant 0 : index
    %c0_190 = arith.constant 0 : index
    %546 = vector.load %arg2[%c7, %c0_189, %c0_190] : memref<8x32x512xf32, #tpu.memory_space<vmem>>, vector<1x32x512xf32>
    %547 = vector.shape_cast %546 : vector<1x32x512xf32> to vector<32x512xf32>
    %548 = arith.truncf %508 : vector<32x128xf32> to vector<32x128xbf16>
    %cst_191 = arith.constant dense<0.000000e+00> : vector<32x512xf32>
    %549 = tpu.matmul %548, %28, %cst_191 {dimension_numbers = #tpu.dot_dimension_numbers<[1], [0], [0], [1], [0, 0, 1, 1], [], []>} : vector<32x128xbf16>, vector<128x512xbf16>, vector<32x512xf32> -> vector<32x512xf32>
    %550 = arith.addf %547, %549 : vector<32x512xf32>
    %551 = vector.extract_strided_slice %550 {offsets = [0, 0], sizes = [32, 128], strides = [1, 1]} : vector<32x512xf32> to vector<32x128xf32>
    %cst_192 = arith.constant 5.000000e-01 : f32
    %552 = vector.broadcast %cst_192 : f32 to vector<32x128xf32>
    %553 = arith.mulf %552, %551 : vector<32x128xf32>
    %554 = math.tanh %553 : vector<32x128xf32>
    %cst_193 = arith.constant 5.000000e-01 : f32
    %555 = vector.broadcast %cst_193 : f32 to vector<32x128xf32>
    %556 = arith.mulf %555, %554 : vector<32x128xf32>
    %cst_194 = arith.constant 5.000000e-01 : f32
    %557 = vector.broadcast %cst_194 : f32 to vector<32x128xf32>
    %558 = arith.addf %556, %557 : vector<32x128xf32>
    %559 = vector.extract_strided_slice %550 {offsets = [0, 128], sizes = [32, 128], strides = [1, 1]} : vector<32x512xf32> to vector<32x128xf32>
    %cst_195 = arith.constant 5.000000e-01 : f32
    %560 = vector.broadcast %cst_195 : f32 to vector<32x128xf32>
    %561 = arith.mulf %560, %559 : vector<32x128xf32>
    %562 = math.tanh %561 : vector<32x128xf32>
    %cst_196 = arith.constant 5.000000e-01 : f32
    %563 = vector.broadcast %cst_196 : f32 to vector<32x128xf32>
    %564 = arith.mulf %563, %562 : vector<32x128xf32>
    %cst_197 = arith.constant 5.000000e-01 : f32
    %565 = vector.broadcast %cst_197 : f32 to vector<32x128xf32>
    %566 = arith.addf %564, %565 : vector<32x128xf32>
    %567 = vector.extract_strided_slice %550 {offsets = [0, 256], sizes = [32, 128], strides = [1, 1]} : vector<32x512xf32> to vector<32x128xf32>
    %568 = math.tanh %567 : vector<32x128xf32>
    %569 = vector.extract_strided_slice %550 {offsets = [0, 384], sizes = [32, 128], strides = [1, 1]} : vector<32x512xf32> to vector<32x128xf32>
    %cst_198 = arith.constant 5.000000e-01 : f32
    %570 = vector.broadcast %cst_198 : f32 to vector<32x128xf32>
    %571 = arith.mulf %570, %569 : vector<32x128xf32>
    %572 = math.tanh %571 : vector<32x128xf32>
    %cst_199 = arith.constant 5.000000e-01 : f32
    %573 = vector.broadcast %cst_199 : f32 to vector<32x128xf32>
    %574 = arith.mulf %573, %572 : vector<32x128xf32>
    %cst_200 = arith.constant 5.000000e-01 : f32
    %575 = vector.broadcast %cst_200 : f32 to vector<32x128xf32>
    %576 = arith.addf %574, %575 : vector<32x128xf32>
    %577 = arith.mulf %566, %506 : vector<32x128xf32>
    %578 = arith.mulf %558, %568 : vector<32x128xf32>
    %579 = arith.addf %577, %578 : vector<32x128xf32>
    %580 = math.tanh %579 : vector<32x128xf32>
    %581 = arith.mulf %576, %580 : vector<32x128xf32>
    %582 = arith.truncf %581 : vector<32x128xf32> to vector<32x128xbf16>
    %583 = arith.truncf %545 : vector<32x128xf32> to vector<32x128xbf16>
    %584 = tpu.concatenate %582, %583 in 1 : vector<32x128xbf16>, vector<32x128xbf16> -> vector<32x256xbf16>
    %cst_201 = arith.constant dense<0.000000e+00> : vector<32x512xf32>
    %585 = tpu.matmul %584, %29, %cst_201 {dimension_numbers = #tpu.dot_dimension_numbers<[1], [0], [0], [1], [0, 0, 1, 1], [], []>} : vector<32x256xbf16>, vector<256x512xbf16>, vector<32x512xf32> -> vector<32x512xf32>
    %586 = vector.broadcast %30 : vector<1x512xf32> to vector<32x512xf32>
    %587 = arith.addf %585, %586 : vector<32x512xf32>
    %588 = vector.extract_strided_slice %587 {offsets = [0, 0], sizes = [32, 128], strides = [1, 1]} : vector<32x512xf32> to vector<32x128xf32>
    %cst_202 = arith.constant 5.000000e-01 : f32
    %589 = vector.broadcast %cst_202 : f32 to vector<32x128xf32>
    %590 = arith.mulf %589, %588 : vector<32x128xf32>
    %591 = math.tanh %590 : vector<32x128xf32>
    %cst_203 = arith.constant 5.000000e-01 : f32
    %592 = vector.broadcast %cst_203 : f32 to vector<32x128xf32>
    %593 = arith.mulf %592, %591 : vector<32x128xf32>
    %cst_204 = arith.constant 5.000000e-01 : f32
    %594 = vector.broadcast %cst_204 : f32 to vector<32x128xf32>
    %595 = arith.addf %593, %594 : vector<32x128xf32>
    %596 = vector.extract_strided_slice %587 {offsets = [0, 128], sizes = [32, 128], strides = [1, 1]} : vector<32x512xf32> to vector<32x128xf32>
    %cst_205 = arith.constant 5.000000e-01 : f32
    %597 = vector.broadcast %cst_205 : f32 to vector<32x128xf32>
    %598 = arith.mulf %597, %596 : vector<32x128xf32>
    %599 = math.tanh %598 : vector<32x128xf32>
    %cst_206 = arith.constant 5.000000e-01 : f32
    %600 = vector.broadcast %cst_206 : f32 to vector<32x128xf32>
    %601 = arith.mulf %600, %599 : vector<32x128xf32>
    %cst_207 = arith.constant 5.000000e-01 : f32
    %602 = vector.broadcast %cst_207 : f32 to vector<32x128xf32>
    %603 = arith.addf %601, %602 : vector<32x128xf32>
    %604 = vector.extract_strided_slice %587 {offsets = [0, 256], sizes = [32, 128], strides = [1, 1]} : vector<32x512xf32> to vector<32x128xf32>
    %605 = math.tanh %604 : vector<32x128xf32>
    %606 = vector.extract_strided_slice %587 {offsets = [0, 384], sizes = [32, 128], strides = [1, 1]} : vector<32x512xf32> to vector<32x128xf32>
    %cst_208 = arith.constant 5.000000e-01 : f32
    %607 = vector.broadcast %cst_208 : f32 to vector<32x128xf32>
    %608 = arith.mulf %607, %606 : vector<32x128xf32>
    %609 = math.tanh %608 : vector<32x128xf32>
    %cst_209 = arith.constant 5.000000e-01 : f32
    %610 = vector.broadcast %cst_209 : f32 to vector<32x128xf32>
    %611 = arith.mulf %610, %609 : vector<32x128xf32>
    %cst_210 = arith.constant 5.000000e-01 : f32
    %612 = vector.broadcast %cst_210 : f32 to vector<32x128xf32>
    %613 = arith.addf %611, %612 : vector<32x128xf32>
    %614 = arith.mulf %603, %543 : vector<32x128xf32>
    %615 = arith.mulf %595, %605 : vector<32x128xf32>
    %616 = arith.addf %614, %615 : vector<32x128xf32>
    %617 = math.tanh %616 : vector<32x128xf32>
    %618 = arith.mulf %613, %617 : vector<32x128xf32>
    %c0_211 = arith.constant 0 : index
    %c0_212 = arith.constant 0 : index
    %619 = vector.load %arg14[%c0_211, %c0_212] : memref<128x64xf32, #tpu.memory_space<vmem>>, vector<128x64xf32>
    %cst_213 = arith.constant dense<0.000000e+00> : vector<32x64xf32>
    %620 = tpu.matmul %618, %619, %cst_213 {dimension_numbers = #tpu.dot_dimension_numbers<[1], [0], [0], [1], [0, 0, 1, 1], [], []>} : vector<32x128xf32>, vector<128x64xf32>, vector<32x64xf32> -> vector<32x64xf32>
    %c0_214 = arith.constant 0 : index
    %c0_215 = arith.constant 0 : index
    %621 = vector.load %arg15[%c0_214, %c0_215] : memref<1x64xf32, #tpu.memory_space<vmem>>, vector<1x64xf32>
    %622 = vector.broadcast %621 : vector<1x64xf32> to vector<32x64xf32>
    %623 = arith.addf %620, %622 : vector<32x64xf32>
    %cst_216 = arith.constant 0.000000e+00 : f32
    %624 = vector.broadcast %cst_216 : f32 to vector<32x64xf32>
    %625 = arith.maximumf %623, %624 : vector<32x64xf32>
    %626 = tpu.concatenate %27, %625 in 1 : vector<32x64xf32>, vector<32x64xf32> -> vector<32x128xf32>
    %c0_217 = arith.constant 0 : index
    %c0_218 = arith.constant 0 : index
    %627 = vector.load %arg19[%c0_217, %c0_218] : memref<32x128xf32, #tpu.memory_space<vmem>>, vector<32x128xf32>
    tpu.vector_store %arg19[%c0_217, %c0_218], %626 {strides = array<i32>} : memref<32x128xf32, #tpu.memory_space<vmem>>, vector<32x128xf32>,
    %c0_219 = arith.constant 0 : index
    %c0_220 = arith.constant 0 : index
    %628 = vector.load %arg16[%c0_219, %c0_220] : memref<128x128xf32, #tpu.memory_space<vmem>>, vector<128x128xf32>
    %cst_221 = arith.constant dense<0.000000e+00> : vector<32x128xf32>
    %629 = tpu.matmul %626, %628, %cst_221 {dimension_numbers = #tpu.dot_dimension_numbers<[1], [0], [0], [1], [0, 0, 1, 1], [], []>} : vector<32x128xf32>, vector<128x128xf32>, vector<32x128xf32> -> vector<32x128xf32>
    %c0_222 = arith.constant 0 : index
    %c0_223 = arith.constant 0 : index
    %630 = vector.load %arg17[%c0_222, %c0_223] : memref<1x128xf32, #tpu.memory_space<vmem>>, vector<1x128xf32>
    %631 = vector.broadcast %630 : vector<1x128xf32> to vector<32x128xf32>
    %632 = arith.addf %629, %631 : vector<32x128xf32>
    %c0_224 = arith.constant 0 : index
    %c0_225 = arith.constant 0 : index
    %633 = vector.load %arg18[%c0_224, %c0_225] : memref<32x128xf32, #tpu.memory_space<vmem>>, vector<32x128xf32>
    tpu.vector_store %arg18[%c0_224, %c0_225], %632 {strides = array<i32>} : memref<32x128xf32, #tpu.memory_space<vmem>>, vector<32x128xf32>,
    return
  }
  func.func @transform_0(%arg0: i32) -> (i32, i32) {
    %c0_i32 = arith.constant 0 : i32
    %c0_i32_0 = arith.constant 0 : i32
    return %arg0, %c0_i32 : i32, i32
  }
  func.func @transform_1(%arg0: i32) -> (i32, i32, i32) {
    %c0_i32 = arith.constant 0 : i32
    %c0_i32_0 = arith.constant 0 : i32
    %c0_i32_1 = arith.constant 0 : i32
    return %c0_i32, %arg0, %c0_i32_0 : i32, i32, i32
  }
  func.func @transform_2(%arg0: i32) -> (i32, i32) {
    %c0_i32 = arith.constant 0 : i32
    %c0_i32_0 = arith.constant 0 : i32
    %c0_i32_1 = arith.constant 0 : i32
    return %c0_i32, %c0_i32_0 : i32, i32
  }
  func.func @transform_3(%arg0: i32) -> (i32, i32) {
    %c0_i32 = arith.constant 0 : i32
    %c0_i32_0 = arith.constant 0 : i32
    %c0_i32_1 = arith.constant 0 : i32
    return %c0_i32, %c0_i32_0 : i32, i32
  }
  func.func @transform_4(%arg0: i32) -> (i32, i32) {
    %c0_i32 = arith.constant 0 : i32
    %c0_i32_0 = arith.constant 0 : i32
    %c0_i32_1 = arith.constant 0 : i32
    return %c0_i32, %c0_i32_0 : i32, i32
  }
  func.func @transform_5(%arg0: i32) -> (i32, i32) {
    %c0_i32 = arith.constant 0 : i32
    %c0_i32_0 = arith.constant 0 : i32
    %c0_i32_1 = arith.constant 0 : i32
    return %c0_i32, %c0_i32_0 : i32, i32
  }
  func.func @transform_6(%arg0: i32) -> (i32, i32) {
    %c0_i32 = arith.constant 0 : i32
    %c0_i32_0 = arith.constant 0 : i32
    %c0_i32_1 = arith.constant 0 : i32
    return %c0_i32, %c0_i32_0 : i32, i32
  }
  func.func @transform_7(%arg0: i32) -> (i32, i32) {
    %c0_i32 = arith.constant 0 : i32
    %c0_i32_0 = arith.constant 0 : i32
    %c0_i32_1 = arith.constant 0 : i32
    return %c0_i32, %c0_i32_0 : i32, i32
  }
  func.func @transform_8(%arg0: i32) -> (i32, i32) {
    %c0_i32 = arith.constant 0 : i32
    %c0_i32_0 = arith.constant 0 : i32
    %c0_i32_1 = arith.constant 0 : i32
    return %c0_i32, %c0_i32_0 : i32, i32
  }
  func.func @transform_9(%arg0: i32) -> (i32, i32) {
    %c0_i32 = arith.constant 0 : i32
    %c0_i32_0 = arith.constant 0 : i32
    %c0_i32_1 = arith.constant 0 : i32
    return %c0_i32, %c0_i32_0 : i32, i32
  }
  func.func @transform_10(%arg0: i32) -> (i32, i32) {
    %c0_i32 = arith.constant 0 : i32
    %c0_i32_0 = arith.constant 0 : i32
    %c0_i32_1 = arith.constant 0 : i32
    return %c0_i32, %c0_i32_0 : i32, i32
  }
  func.func @transform_11(%arg0: i32) -> (i32, i32) {
    %c0_i32 = arith.constant 0 : i32
    %c0_i32_0 = arith.constant 0 : i32
    %c0_i32_1 = arith.constant 0 : i32
    return %c0_i32, %c0_i32_0 : i32, i32
  }
  func.func @transform_12(%arg0: i32) -> (i32, i32) {
    %c0_i32 = arith.constant 0 : i32
    %c0_i32_0 = arith.constant 0 : i32
    %c0_i32_1 = arith.constant 0 : i32
    return %c0_i32, %c0_i32_0 : i32, i32
  }
  func.func @transform_13(%arg0: i32) -> (i32, i32) {
    %c0_i32 = arith.constant 0 : i32
    %c0_i32_0 = arith.constant 0 : i32
    %c0_i32_1 = arith.constant 0 : i32
    return %c0_i32, %c0_i32_0 : i32, i32
  }
  func.func @transform_14(%arg0: i32) -> (i32, i32) {
    %c0_i32 = arith.constant 0 : i32
    %c0_i32_0 = arith.constant 0 : i32
    %c0_i32_1 = arith.constant 0 : i32
    return %c0_i32, %c0_i32_0 : i32, i32
  }
  func.func @transform_15(%arg0: i32) -> (i32, i32) {
    %c0_i32 = arith.constant 0 : i32
    %c0_i32_0 = arith.constant 0 : i32
    %c0_i32_1 = arith.constant 0 : i32
    return %c0_i32, %c0_i32_0 : i32, i32
  }
  func.func @transform_16(%arg0: i32) -> (i32, i32) {
    %c0_i32 = arith.constant 0 : i32
    %c0_i32_0 = arith.constant 0 : i32
    %c0_i32_1 = arith.constant 0 : i32
    return %c0_i32, %c0_i32_0 : i32, i32
  }
  func.func @transform_17(%arg0: i32) -> (i32, i32) {
    %c0_i32 = arith.constant 0 : i32
    %c0_i32_0 = arith.constant 0 : i32
    return %arg0, %c0_i32 : i32, i32
  }
  func.func @transform_18(%arg0: i32) -> (i32, i32) {
    %c0_i32 = arith.constant 0 : i32
    %c0_i32_0 = arith.constant 0 : i32
    return %arg0, %c0_i32 : i32, i32
  }
}

</mosaic_0001>

<bundles_post_ra>
// kernel: tpu_custom_call.1
= control target key start
LH: loop header
LB: loop body
LE: loop exit
PB: predicated region body
PF: predicated region fallthrough
CT: control target
= control target key end

     0   :  { %s10528_s0 = inlined_call_operand.vmem [shape: f32[32,24], index: 0, kind: input, shape index: {}]   ;;  %s10529_s1 = inlined_call_operand.vmem [shape: f32[8,32,512], index: 1, kind: input, shape index: {}]   ;;  %s10530_s2 = inlined_call_operand.hbm [shape: f32[24,176], index: 2, kind: input, shape index: {}]   ;;  %s10531_s3 = inlined_call_operand.hbm [shape: f32[24,176], index: 3, kind: input, shape index: {}]   ;;  %s10532_s4 = inlined_call_operand.vmem [shape: f32[1,176], index: 4, kind: input, shape index: {}]   ;;  %s10533_s5 = inlined_call_operand.vmem [shape: f32[176,160], index: 5, kind: input, shape index: {}]   ;;  %s10534_s6 = inlined_call_operand.vmem [shape: f32[176,160], index: 6, kind: input, shape index: {}]   ;;  %s10535_s7 = inlined_call_operand.vmem [shape: f32[1,160], index: 7, kind: input, shape index: {}]   ;;  %s10536_s8 = inlined_call_operand.vmem [shape: f32[160,64], index: 8, kind: input, shape index: {}]   ;;  %s10537_s9 = inlined_call_operand.vmem [shape: f32[1,64], index: 9, kind: input, shape index: {}]   ;;  %s10538_s10 = inlined_call_operand.hbm [shape: bf16[128,512], index: 10, kind: input, shape index: {}]   ;;  %s10539_s11 = inlined_call_operand.vmem [shape: bf16[256,512], index: 11, kind: input, shape index: {}]   ;;  %s10540_s12 = inlined_call_operand.vmem [shape: f32[1,512], index: 12, kind: input, shape index: {}]   ;;  %s10541_s13 = inlined_call_operand.vmem [shape: f32[128,64], index: 13, kind: input, shape index: {}]   ;;  %s10542_s14 = inlined_call_operand.hbm [shape: f32[1,64], index: 14, kind: input, shape index: {}]   ;;  %s10543_s15 = inlined_call_operand.hbm [shape: f32[128,128], index: 15, kind: input, shape index: {}]   ;;  %s10544_s16 = inlined_call_operand.hbm [shape: f32[1,128], index: 16, kind: input, shape index: {}]   ;;  %s10545_s17 = inlined_call_operand.hbm [shape: f32[32,128], index: 17, kind: output, shape index: {0}]   ;;  %s10546_s18 = inlined_call_operand.hbm [shape: f32[32,128], index: 18, kind: output, shape index: {1}]  }
   0x1   :  { %10853 = sst [smem:[#allocation103_spill]] %s10528_s0 }
   0x2   :  { %10854 = sst [smem:[#allocation104_spill]] %s10529_s1 }
   0x3   :  { %10855 = sst [smem:[#allocation105_spill]] %s10530_s2 }
   0x4   :  { %24 = vsyncpa [#allocation3], 0 }
   0x5   :  { %25 = vsyncpa [#allocation6], 0 }
   0x6   :  { %26 = vsyncpa [#allocation9], 0 }
   0x7   :  { %27 = vsyncpa [#allocation12], 0 }
   0x8   :  { %28 = vsyncpa [#allocation4], 0 }
   0x9   :  { %29 = vsyncpa [#allocation15], 0  ;;  %s6663_s27 = smov [#allocation5]   ;;  %s6664_s29 = smov [#allocation8]  }
   0xa   :  { %s51_s28 = sshll.u32 %s6663_s27, 4  ;;  %s94_s30 = sshll.u32 %s6664_s29, 4  ;;  %s52_s28 = int_to_ptr.vmem [resolvable:$true] %s51_s28  ;;  %s6774_s30 = int_to_ptr.vmem [resolvable:$true] %s94_s30 }
   0xb   :  { %s6475_s1 = scalar_lea.hbm %s10531_s3, 768 }
   0xc   :  { %p6476_p0 = scmp.ne.s32.totalorder %s10531_s3, %s6475_s1  ;;  %p6479_p1 = scmp.lt.u32.totalorder %s6475_s1, %s10531_s3 }
   0xe   :  { %p6481_p2 = pnand %p6479_p1, %p6476_p0 }
  0x10   :  { %6484 = shalt.err (!%p6481_p2)
}
  0x11   :  { %s6485_s23 = scalar_lea.vmem %s52_s28, 768  ;;  %p6490_p4 = scmp.lt.s32.totalorder %s52_s28, %s52_s28 }
  0x12   :  { %p6486_p3 = scmp.ne.s32.totalorder %s52_s28, %s6485_s23  ;;  %p6491_p5 = scmp.lt.s32.totalorder %s6485_s23, %s6485_s23 }
  0x14   :  { %p6492_p6 = por %p6491_p5, %p6490_p4 }
  0x16   :  { %p6493_p7 = pnand %p6492_p6, %p6486_p3 }
  0x18   :  { %6496 = shalt.err (!%p6493_p7)
}
  0x19   :  { %s10550_s24 = smov 256   ;;  %s6666_s25 = smov 16  }
  0x1a   :  { %57 = dma.hbm_to_vmem [thread:$0]  %s10531_s3, 768, %s52_s28, [#allocation6], %s10550_s24, %s10550_s24, %s6666_s25  }
  0x1b   :  { %s6497_s19 = scalar_lea.hbm %s10542_s14, 16 }
  0x1c   :  { %p6498_p8 = scmp.ne.s32.totalorder %s10542_s14, %s6497_s19  ;;  %p6501_p9 = scmp.lt.u32.totalorder %s6497_s19, %s10542_s14 }
  0x1e   :  { %p6503_p10 = pnand %p6501_p9, %p6498_p8 }
  0x20   :  { %6506 = shalt.err (!%p6503_p10)
}
  0x21   :  { %s6507_s2 = scalar_lea.vmem %s6774_s30, 16  ;;  %s6511_s3 = scalar_lea.vmem %s6774_s30, 32 }
  0x22   :  { %p6508_p11 = scmp.ne.s32.totalorder %s6774_s30, %s6507_s2  ;;  %p6512_p12 = scmp.lt.s32.totalorder %s6774_s30, %s6774_s30 }
  0x23   :  { %p6513_p13 = scmp.lt.s32.totalorder %s6511_s3, %s6507_s2 }
  0x25   :  { %p6514_p0 = por %p6513_p13, %p6512_p12 }
  0x27   :  { %p6515_p1 = pnand %p6514_p0, %p6508_p11 }
  0x29   :  { %6518 = shalt.err (!%p6515_p1)
}
  0x2a   :  { %97 = dma.hbm_to_vmem [thread:$0]  %s10542_s14, 16, %s6774_s30, [#allocation9]  }
  0x2b   :  { %s6667_s26 = smov [#allocation2]   ;;  %s6668_s29 = smov [#allocation7]  }
  0x2c   :  { %s39_s27 = sshll.u32 %s6667_s26, 4  ;;  %s75_s0 = sshll.u32 %s6668_s29, 4  ;;  %s40_s27 = int_to_ptr.vmem [resolvable:$true] %s39_s27  ;;  %s6809_s0 = int_to_ptr.vmem [resolvable:$true] %s75_s0 }
  0x2d   :  { %s10856_s20 = sld [smem:[#allocation105_spill]] }
  0x33   :  { %s6519_s21 = scalar_lea.hbm %s10856_s20, 768 }
  0x34   :  { %p6520_p2 = scmp.ne.s32.totalorder %s10856_s20, %s6519_s21  ;;  %p6523_p3 = scmp.lt.u32.totalorder %s6519_s21, %s10856_s20 }
  0x36   :  { %p6525_p4 = pnand %p6523_p3, %p6520_p2 }
  0x38   :  { %6528 = shalt.err (!%p6525_p4)
}
  0x39   :  { %s6529_s14 = scalar_lea.vmem %s40_s27, 768  ;;  %p6534_p6 = scmp.lt.s32.totalorder %s40_s27, %s40_s27 }
  0x3a   :  { %p6530_p5 = scmp.ne.s32.totalorder %s40_s27, %s6529_s14  ;;  %p6535_p7 = scmp.lt.s32.totalorder %s6529_s14, %s6529_s14 }
  0x3c   :  { %p6536_p8 = por %p6535_p7, %p6534_p6 }
  0x3e   :  { %p6537_p9 = pnand %p6536_p8, %p6530_p5 }
  0x40   :  { %6540 = shalt.err (!%p6537_p9)
}
  0x41   :  { %s10857_s30 = smov 256   ;;  %s6541_s24 = scalar_lea.hbm %s10538_s10, 4096 }
  0x42   :  { %45 = dma.hbm_to_vmem [thread:$0]  %s10856_s20, 768, %s40_s27, [#allocation3], %s10857_s30, %s10857_s30, %s6666_s25  }
  0x43   :  { %p6542_p10 = scmp.ne.s32.totalorder %s10538_s10, %s6541_s24  ;;  %p6545_p11 = scmp.lt.u32.totalorder %s6541_s24, %s10538_s10 }
  0x45   :  { %p6547_p12 = pnand %p6545_p11, %p6542_p10 }
  0x47   :  { %6550 = shalt.err (!%p6547_p12)
}
  0x48   :  { %s6551_s2 = scalar_lea.vmem %s6809_s0, 4096  ;;  %p6556_p0 = scmp.lt.s32.totalorder %s6809_s0, %s6809_s0 }
  0x49   :  { %p6552_p13 = scmp.ne.s32.totalorder %s6809_s0, %s6551_s2  ;;  %p6557_p1 = scmp.lt.s32.totalorder %s6551_s2, %s6551_s2 }
  0x4b   :  { %p6558_p2 = por %p6557_p1, %p6556_p0 }
  0x4d   :  { %p6559_p3 = pnand %p6558_p2, %p6552_p13 }
  0x4f   :  { %6562 = shalt.err (!%p6559_p3)
}
  0x50   :  { %81 = dma.hbm_to_vmem [thread:$0]  %s10538_s10, 4096, %s6809_s0, [#allocation6], %s10857_s30, %s10857_s30, %s6666_s25  }
  0x51   :  { %s6669_s3 = smov [#allocation10]   ;;  %s6563_s26 = scalar_lea.hbm %s10543_s15, 2048 }
  0x52   :  { %s103_s14 = sshll.u32 %s6669_s3, 4  ;;  %p6564_p4 = scmp.ne.s32.totalorder %s10543_s15, %s6563_s26  ;;  %s104_s14 = int_to_ptr.vmem [resolvable:$true] %s103_s14 }
  0x53   :  { %p6567_p5 = scmp.lt.u32.totalorder %s6563_s26, %s10543_s15 }
  0x55   :  { %p6569_p6 = pnand %p6567_p5, %p6564_p4 }
  0x57   :  { %6572 = shalt.err (!%p6569_p6)
}
  0x58   :  { %s6573_s21 = scalar_lea.vmem %s104_s14, 2048  ;;  %p6578_p8 = scmp.lt.s32.totalorder %s104_s14, %s104_s14 }
  0x59   :  { %p6574_p7 = scmp.ne.s32.totalorder %s104_s14, %s6573_s21  ;;  %p6579_p9 = scmp.lt.s32.totalorder %s6573_s21, %s6573_s21 }
  0x5b   :  { %p6580_p10 = por %p6579_p9, %p6578_p8 }
  0x5d   :  { %p6581_p11 = pnand %p6580_p10, %p6574_p7 }
  0x5f   :  { %6584 = shalt.err (!%p6581_p11)
}
  0x60   :  { %s6670_s10 = smov 128   ;;  %s6671_s25 = smov 8  }
  0x61   :  { %109 = dma.hbm_to_vmem [thread:$0]  %s10543_s15, 2048, %s104_s14, [#allocation9], %s6670_s10, %s6670_s10, %s6671_s25  }
  0x62   :  { %s6672_s22 = smov [#allocation11]   ;;  %s6585_s3 = scalar_lea.hbm %s10544_s16, 16 }
  0x63   :  { %s116_s2 = sshll.u32 %s6672_s22, 4  ;;  %p6586_p12 = scmp.ne.s32.totalorder %s10544_s16, %s6585_s3  ;;  %s117_s2 = int_to_ptr.vmem [resolvable:$true] %s116_s2 }
  0x64   :  { %p6589_p13 = scmp.lt.u32.totalorder %s6585_s3, %s10544_s16 }
  0x66   :  { %p6591_p0 = pnand %p6589_p13, %p6586_p12 }
  0x68   :  { %6594 = shalt.err (!%p6591_p0)
}
  0x69   :  { %s6595_s24 = scalar_lea.vmem %s117_s2, 16  ;;  %s6599_s15 = scalar_lea.vmem %s117_s2, 32 }
  0x6a   :  { %p6596_p1 = scmp.ne.s32.totalorder %s117_s2, %s6595_s24  ;;  %p6600_p2 = scmp.lt.s32.totalorder %s117_s2, %s117_s2 }
  0x6b   :  { %p6601_p3 = scmp.lt.s32.totalorder %s6599_s15, %s6595_s24 }
  0x6d   :  { %p6602_p4 = por %p6601_p3, %p6600_p2 }
  0x6f   :  { %p6603_p5 = pnand %p6602_p4, %p6596_p1 }
  0x71   :  { %6606 = shalt.err (!%p6603_p5)
}
  0x72   :  { %119 = dma.hbm_to_vmem [thread:$0]  %s10544_s16, 16, %s117_s2, [#allocation12]  }
  0x73   :  { %6651 = dma.done.wait [#allocation3], 768  }
  0x74   :  { %6652 = vsyncadd [#allocation3], 4294966528 }
  0x75   :  { %6653 = dma.done.wait [#allocation6], 4864  }
  0x76   :  { %6654 = vsyncadd [#allocation6], 4294962432 }
  0x77   :  { %6655 = dma.done.wait [#allocation9], 2064  }
  0x78   :  { %6656 = vsyncadd [#allocation9], 4294965232 }
  0x79   :  { %6657 = dma.done.wait [#allocation12], 16  }
  0x7a   :  { %6658 = vsyncadd [#allocation12], 4294967280  ;;  %v6673_v0 = vmov 0.0   ;;  %v144_v1 = vld [vmem:[#allocation2 + $0x8] sm:$0xff]  ;;  %v146_v2 = vld [vmem:[#allocation2 + $0x18] sm:$0xff]  ;;  %s10858_s2 = sld [smem:[#allocation103_spill]] }
  0x7b   :  { %226 = vmatprep.mubr.f32.mxu0 %v6673_v0  ;;  %v143_v3 = vld [vmem:[#allocation2] sm:$0xff]  ;;  %v5197_v4 = vpack.c.bf16 %v146_v2, %v144_v1  ;;  %v145_v5 = vld [vmem:[#allocation2 + $0x10] sm:$0xff]  ;;  %v148_v7 = vld [vmem:[#allocation2 + $0x28] sm:$0xff]  ;;  %vm149_vm0 = vcmask 195584   ;;  %vm426_vm1 = vcmask 392192   ;;  %vm724_vm2 = vcmask 261120  }
  0x7c   :  { %v5199_v6 = vpack.c.bf16 %v145_v5, %v143_v3  ;;  %v252_v8 = vld [vmem:[#allocation5 + $0x8] sm:$0xff]  ;;  %v254_v9 = vld [vmem:[#allocation5 + $0x18] sm:$0xff]  ;;  %v251_v10 = vld [vmem:[#allocation5] sm:$0xff]  ;;  %s10913_s30 = sld [smem:[#allocation104_spill]]  ;;  %vm4693_vm3 = vcmask 523264  }
  0x7d   :  { %5198 = vmatprep.subr.bf16.mxu0 %v5197_v4  ;;  %v253_v11 = vld [vmem:[#allocation5 + $0x10] sm:$0xff]  ;;  %v5201_v13 = vpack.c.bf16 %v254_v9, %v252_v8  ;;  %v529_v14 = vld [vmem:[%s10534_s6 + $0x8] sm:$0xff]  ;;  %v531_v15 = vld [vmem:[%s10534_s6 + $0x18] sm:$0xff] }
  0x7e   :  { %5200 = vmatpush1.bf16.msra.mxu0 %v5199_v6  ;;  %v147_v12 = vld [vmem:[#allocation2 + $0x20] sm:$0xff]  ;;  %v5203_v17 = vpack.c.bf16 %v253_v11, %v251_v10  ;;  %v5249_v18 = vpack.c.bf16 %v531_v15, %v529_v14  ;;  %v256_v20 = vld [vmem:[#allocation5 + $0x28] sm:$0xff]  ;;  %v383_v21 = vld [vmem:[%s10533_s5 + $0x8] sm:$0xff] }
  0x7f   :  { %166 = vmatprep.subr.mxu0 %v148_v7  ;;  %v528_v19 = vld [vmem:[%s10534_s6] sm:$0xff]  ;;  %v530_v22 = vld [vmem:[%s10534_s6 + $0x10] sm:$0xff]  ;;  %v385_v23 = vld [vmem:[%s10533_s5 + $0x18] sm:$0xff] }
  0x80   :  { %v6883_v16 = vld [vmem:[%s10858_s2] sm:$0xff]  ;;  %5250 = vmatprep.subr.bf16.mxu1 %v5249_v18  ;;  %v5251_v24 = vpack.c.bf16 %v530_v22, %v528_v19  ;;  %v533_v25 = vld [vmem:[%s10534_s6 + $0x28] sm:$0xff]  ;;  %v535_v26 = vld [vmem:[%s10534_s6 + $0x38] sm:$0xff]  ;;  %v5205_v33 = vpack.c.bf16 %v385_v23, %v383_v21 }
  0x81   :  { %v5253_v27 = vpack.c.bf16 %v535_v26, %v533_v25  ;;  %v532_v28 = vld [vmem:[%s10534_s6 + $0x20] sm:$0xff]  ;;  %v534_v29 = vld [vmem:[%s10534_s6 + $0x30] sm:$0xff]  ;;  %v140_v30 = vld [vmem:[%s10858_s2 + $0x8] sm:$0xff] }
  0x82   :  { %167 = vmatpush1.msra.mxu0 %v147_v12  ;;  %v537_v31 = vld [vmem:[%s10534_s6 + $0x48] sm:$0xff]  ;;  %v255_v32 = vld [vmem:[#allocation5 + $0x20] sm:$0xff]  ;;  %5252 = vmatpush1.bf16.msra.mxu1 %v5251_v24  ;;  %v5255_v34 = vpack.c.bf16 %v534_v29, %v532_v28  ;;  %v539_v35 = vld [vmem:[%s10534_s6 + $0x58] sm:$0xff] }
  0x83   :  { %4850 = vmatmul.mubr.msk.f32.vlgmr.msra.gmra.mrb[0].mxu0 %vm149_vm0, %v6883_v16  ;;  %5202 = vmatprep.subr.bf16.mxu0 %v5201_v13  ;;  %v5257_v36 = vpack.c.bf16 %v539_v35, %v537_v31  ;;  %v536_v37 = vld [vmem:[%s10534_s6 + $0x40] sm:$0xff]  ;;  %v538_v38 = vld [vmem:[%s10534_s6 + $0x50] sm:$0xff]  ;;  %v541_v39 = vld [vmem:[%s10534_s6 + $0x68] sm:$0xff] }
  0x84   :  { %5204 = vmatpush1.bf16.msra.mxu0 %v5203_v17  ;;  %232 = vmatprep.mubr.f32.mxu0 %v6673_v0  ;;  %v543_v40 = vld [vmem:[%s10534_s6 + $0x78] sm:$0xff]  ;;  %v141_v41 = vld [vmem:[%s10858_s2 + $0x10] sm:$0xff]  ;;  %v5259_v42 = vpack.c.bf16 %v538_v38, %v536_v37  ;;  %v540_v45 = vld [vmem:[%s10534_s6 + $0x60] sm:$0xff] }
  0x85   :  { %261 = vmatprep.subr.mxu0 %v256_v20  ;;  %5254 = vmatprep.subr.bf16.mxu1 %v5253_v27  ;;  %v142_v43 = vld [vmem:[%s10858_s2 + $0x18] sm:$0xff]  ;;  %v5261_v44 = vpack.c.bf16 %v543_v40, %v541_v39  ;;  %v542_v46 = vld [vmem:[%s10534_s6 + $0x70] sm:$0xff]  ;;  %v382_v47 = vld [vmem:[%s10533_s5] sm:$0xff] }
  0x86   :  { %5256 = vmatpush1.bf16.msra.mxu1 %v5255_v34  ;;  %v384_v48 = vld [vmem:[%s10533_s5 + $0x10] sm:$0xff]  ;;  %v545_v49 = vld [vmem:[%s10534_s6 + $0x88] sm:$0xff]  ;;  %v547_v50 = vld [vmem:[%s10534_s6 + $0x98] sm:$0xff]  ;;  %v5263_v55 = vpack.c.bf16 %v542_v46, %v540_v45 }
  0x87   :  { %4851 = vmatmul.mubr.msk.f32.gmra.mrb[2].mxu0 %vm149_vm0, %v140_v30  ;;  %5258 = vmatprep.subr.bf16.mxu1 %v5257_v36  ;;  %v387_v51 = vld [vmem:[%s10533_s5 + $0x28] sm:$0xff]  ;;  %v389_v52 = vld [vmem:[%s10533_s5 + $0x38] sm:$0xff]  ;;  %v544_v53 = vld [vmem:[%s10534_s6 + $0x80] sm:$0xff]  ;;  %v5265_v56 = vpack.c.bf16 %v547_v50, %v545_v49  ;;  %v5207_v59 = vpack.c.bf16 %v384_v48, %v382_v47 }
  0x88   :  { %238 = vmatprep.mubr.f32.mxu0 %v6673_v0  ;;  %262 = vmatpush1.msra.mxu0 %v255_v32  ;;  %v546_v54 = vld [vmem:[%s10534_s6 + $0x90] sm:$0xff]  ;;  %v386_v57 = vld [vmem:[%s10533_s5 + $0x20] sm:$0xff]  ;;  %v391_v60 = vld [vmem:[%s10533_s5 + $0x48] sm:$0xff]  ;;  %v5209_v62 = vpack.c.bf16 %v389_v52, %v387_v51 }
  0x89   :  { %5206 = vmatprep.subr.bf16.mxu0 %v5205_v33  ;;  %v388_v58 = vld [vmem:[%s10533_s5 + $0x30] sm:$0xff]  ;;  %v393_v61 = vld [vmem:[%s10533_s5 + $0x58] sm:$0xff]  ;;  %v5267_v63 = vpack.c.bf16 %v546_v54, %v544_v53  ;;  %v390_v1 = vld [vmem:[%s10533_s5 + $0x40] sm:$0xff] }
  0x8a   :  { %5260 = vmatpush1.bf16.msra.mxu1 %v5259_v42  ;;  %v392_v2 = vld [vmem:[%s10533_s5 + $0x50] sm:$0xff]  ;;  %v5211_v3 = vpack.c.bf16 %v388_v58, %v386_v57  ;;  %v395_v4 = vld [vmem:[%s10533_s5 + $0x68] sm:$0xff]  ;;  %v397_v5 = vld [vmem:[%s10533_s5 + $0x78] sm:$0xff]  ;;  %v5213_v6 = vpack.c.bf16 %v393_v61, %v391_v60 }
  0x8b   :  { %4852 = vmatmul.mubr.msk.f32.gmra.mrb[4].mxu0 %vm149_vm0, %v141_v41  ;;  %5262 = vmatprep.subr.bf16.mxu1 %v5261_v44  ;;  %v394_v7 = vld [vmem:[%s10533_s5 + $0x60] sm:$0xff]  ;;  %v396_v8 = vld [vmem:[%s10533_s5 + $0x70] sm:$0xff]  ;;  %v5215_v9 = vpack.c.bf16 %v392_v2, %v390_v1  ;;  %v399_v10 = vld [vmem:[%s10533_s5 + $0x88] sm:$0xff]  ;;  %v5217_v12 = vpack.c.bf16 %v397_v5, %v395_v4 }
  0x8c   :  { %244 = vmatprep.mubr.f32.mxu0 %v6673_v0  ;;  %v401_v11 = vld [vmem:[%s10533_s5 + $0x98] sm:$0xff]  ;;  %v398_v13 = vld [vmem:[%s10533_s5 + $0x80] sm:$0xff]  ;;  %v400_v14 = vld [vmem:[%s10533_s5 + $0x90] sm:$0xff]  ;;  %v5219_v15 = vpack.c.bf16 %v396_v8, %v394_v7 }
  0x8d   :  { %v5223_v17 = vpack.c.bf16 %v400_v14, %v398_v13  ;;  %v549_v18 = vld [vmem:[%s10534_s6 + $0xa8] sm:$0xff]  ;;  %v551_v19 = vld [vmem:[%s10534_s6 + $0xb8] sm:$0xff]  ;;  %v548_v22 = vld [vmem:[%s10534_s6 + $0xa0] sm:$0xff] }
  0x8e   :  { %5264 = vmatpush1.bf16.msra.mxu1 %v5263_v55  ;;  %v5269_v20 = vpack.c.bf16 %v551_v19, %v549_v18  ;;  %v405_v21 = vld [vmem:[%s10533_s5 + $0xb8] sm:$0xff]  ;;  %v550_v24 = vld [vmem:[%s10534_s6 + $0xb0] sm:$0xff]  ;;  %v402_v25 = vld [vmem:[%s10533_s5 + $0xa0] sm:$0xff] }
  0x8f   :  { %4853 = vmatmul.mubr.msk.f32.gmra.mrb[6].mxu0 %vm149_vm0, %v142_v43  ;;  %5266 = vmatprep.subr.bf16.mxu1 %v5265_v56  ;;  %v404_v26 = vld [vmem:[%s10533_s5 + $0xb0] sm:$0xff]  ;;  %v5271_v27 = vpack.c.bf16 %v550_v24, %v548_v22  ;;  %v553_v29 = vld [vmem:[%s10534_s6 + $0xc8] sm:$0xff]  ;;  %v409_v33 = vld [vmem:[%s10533_s5 + $0xd8] sm:$0xff] }
  0x90   :  { %321 = vmatprep.mubr.f32.mxu0 %v6673_v0  ;;  %v5227_v28 = vpack.c.bf16 %v404_v26, %v402_v25  ;;  %v407_v32 = vld [vmem:[%s10533_s5 + $0xc8] sm:$0xff]  ;;  %v552_v34 = vld [vmem:[%s10534_s6 + $0xc0] sm:$0xff]  ;;  %v554_v36 = vld [vmem:[%s10534_s6 + $0xd0] sm:$0xff]  ;;  %v6674_v26 = vmov 0.0|0.0  }
  0x91   :  { %v5229_v35 = vpack.c.bf16 %v409_v33, %v407_v32  ;;  %v406_v37 = vld [vmem:[%s10533_s5 + $0xc0] sm:$0xff]  ;;  %v408_v38 = vld [vmem:[%s10533_s5 + $0xd0] sm:$0xff]  ;;  %v5275_v39 = vpack.c.bf16 %v554_v36, %v552_v34  ;;  %v559_v42 = vld [vmem:[%s10534_s6 + $0xf8] sm:$0xff] }
  0x92   :  { %5268 = vmatpush1.bf16.msra.mxu1 %v5267_v63  ;;  %v5231_v40 = vpack.c.bf16 %v408_v38, %v406_v37  ;;  %v411_v44 = vld [vmem:[%s10533_s5 + $0xe8] sm:$0xff]  ;;  %v413_v45 = vld [vmem:[%s10533_s5 + $0xf8] sm:$0xff]  ;;  %v556_v46 = vld [vmem:[%s10534_s6 + $0xe0] sm:$0xff] }
  0x93   :  { %4854 = vmatmul.mubr.msk.f32.vlgmr.msra.gmra.mrb[8].mxu0 %vm149_vm0, %v6883_v16  ;;  %v5221_v16 = vpack.c.bf16 %v401_v11, %v399_v10  ;;  %5270 = vmatprep.subr.bf16.mxu1 %v5269_v20  ;;  %v5233_v47 = vpack.c.bf16 %v413_v45, %v411_v44  ;;  %v558_v48 = vld [vmem:[%s10534_s6 + $0xf0] sm:$0xff]  ;;  %v410_v49 = vld [vmem:[%s10533_s5 + $0xe0] sm:$0xff]  ;;  %v561_v53 = vld [vmem:[%s10534_s6 + $0x108] sm:$0xff] }
  0x94   :  { %327 = vmatprep.mubr.f32.mxu0 %v6673_v0  ;;  %5208 = vmatpush1.bf16.msra.mxu0 %v5207_v59  ;;  %v412_v50 = vld [vmem:[%s10533_s5 + $0xf0] sm:$0xff]  ;;  %v5279_v51 = vpack.c.bf16 %v558_v48, %v556_v46  ;;  %v563_v54 = vld [vmem:[%s10534_s6 + $0x118] sm:$0xff]  ;;  %v415_v56 = vld [vmem:[%s10533_s5 + $0x108] sm:$0xff] }
  0x95   :  { %5210 = vmatprep.subr.bf16.mxu0 %v5209_v62  ;;  %v5235_v52 = vpack.c.bf16 %v412_v50, %v410_v49  ;;  %v5281_v55 = vpack.c.bf16 %v563_v54, %v561_v53  ;;  %v417_v57 = vld [vmem:[%s10533_s5 + $0x118] sm:$0xff]  ;;  %v560_v58 = vld [vmem:[%s10534_s6 + $0x100] sm:$0xff]  ;;  %v562_v60 = vld [vmem:[%s10534_s6 + $0x110] sm:$0xff] }
  0x96   :  { %5272 = vmatpush1.bf16.msra.mxu1 %v5271_v27  ;;  %v5237_v59 = vpack.c.bf16 %v417_v57, %v415_v56  ;;  %v414_v61 = vld [vmem:[%s10533_s5 + $0x100] sm:$0xff]  ;;  %v416_v62 = vld [vmem:[%s10533_s5 + $0x110] sm:$0xff]  ;;  %v5283_v63 = vpack.c.bf16 %v562_v60, %v560_v58  ;;  %v565_v2 = vld [vmem:[%s10534_s6 + $0x128] sm:$0xff] }
  0x97   :  { %4855 = vmatmul.mubr.msk.f32.gmra.mrb[10].mxu0 %vm149_vm0, %v140_v30  ;;  %v555_v30 = vld [vmem:[%s10534_s6 + $0xd8] sm:$0xff]  ;;  %v5239_v1 = vpack.c.bf16 %v416_v62, %v414_v61  ;;  %v419_v5 = vld [vmem:[%s10533_s5 + $0x128] sm:$0xff]  ;;  %v564_v7 = vld [vmem:[%s10534_s6 + $0x120] sm:$0xff] }
  0x98   :  { %333 = vmatprep.mubr.f32.mxu0 %v6673_v0  ;;  %5212 = vmatpush1.bf16.msra.mxu0 %v5211_v3  ;;  %v5273_v31 = vpack.c.bf16 %v555_v30, %v553_v29  ;;  %v567_v3 = vld [vmem:[%s10534_s6 + $0x138] sm:$0xff]  ;;  %v418_v10 = vld [vmem:[%s10533_s5 + $0x120] sm:$0xff]  ;;  %v420_v11 = vld [vmem:[%s10533_s5 + $0x130] sm:$0xff]  ;;  %v356_v29 = vlaneseq }
  0x99   :  { %5214 = vmatprep.subr.bf16.mxu0 %v5213_v6  ;;  %v5285_v4 = vpack.c.bf16 %v567_v3, %v565_v2  ;;  %v421_v6 = vld [vmem:[%s10533_s5 + $0x138] sm:$0xff]  ;;  %v5243_v13 = vpack.c.bf16 %v420_v11, %v418_v10  ;;  %v569_v14 = vld [vmem:[%s10534_s6 + $0x148] sm:$0xff]  ;;  %v568_v19 = vld [vmem:[%s10534_s6 + $0x140] sm:$0xff] }
  0x9a   :  { %5274 = vmatprep.subr.bf16.mxu1 %v5273_v31  ;;  %v5241_v8 = vpack.c.bf16 %v421_v6, %v419_v5  ;;  %v425_v18 = vld [vmem:[%s10533_s5 + $0x158] sm:$0xff]  ;;  %v424_v22 = vld [vmem:[%s10533_s5 + $0x150] sm:$0xff]  ;;  %v7173_v32 = vshrl.u32 %v356_v29, 7  ;;  %v354_v37 = vld [vmem:[%s10532_s4] sm:$0x3] }
  0x9b   :  { %4856 = vmatmul.mubr.msk.f32.gmra.mrb[12].mxu0 %vm149_vm0, %v141_v41  ;;  %v557_v41 = vld [vmem:[%s10534_s6 + $0xe8] sm:$0xff]  ;;  %5276 = vmatpush1.bf16.msra.mxu1 %v5275_v39  ;;  %v7169_v25 = vld [vmem:[#allocation7 + $0x4] ss:$16 sps:$4 sm:$0xff]   ;;  %v700_v61 = vld [vmem:[%s10536_s8 + $0x18] sm:$0xff] }
  0x9c   :  { %339 = vmatprep.mubr.f32.mxu0 %v6673_v0  ;;  %5216 = vmatpush1.bf16.msra.mxu0 %v5215_v9  ;;  %v403_v0 = vld [vmem:[%s10533_s5 + $0xa8] sm:$0xff]  ;;  %v566_v9 = vld [vmem:[%s10534_s6 + $0x130] sm:$0xff]  ;;  %10859 = vst [vmem:[#allocation22_spill] sm:$0xff] %v7173_v32  ;;  %v7184_v38 = vsub.s32 1, %v7173_v32  ;;  %v701_v10 = vld [vmem:[%s10536_s8 + $0x20] sm:$0xff] }
  0x9d   :  { %5218 = vmatprep.subr.bf16.mxu0 %v5217_v12  ;;  %v5225_v23 = vpack.c.bf16 %v405_v21, %v403_v0  ;;  %v5287_v12 = vpack.c.bf16 %v566_v9, %v564_v7  ;;  %v570_v0 = vld [vmem:[%s10534_s6 + $0x150] sm:$0xff]  ;;  %v422_v21 = vld [vmem:[%s10533_s5 + $0x140] sm:$0xff]  ;;  %v698_v48 = vld [vmem:[%s10536_s8 + $0x8] sm:$0xff] }
  0x9e   :  { %v5247_v24 = vpack.c.bf16 %v424_v22, %v422_v21  ;;  %10861 = vst [vmem:[#allocation24_spill] sm:$0xff] %v7184_v38  ;;  %v699_v60 = vld [vmem:[%s10536_s8 + $0x10] sm:$0xff]  ;;  %v702_v11 = vld [vmem:[%s10536_s8 + $0x28] sm:$0xff] }
  0x9f   :  { %4857 = vmatmul.mubr.msk.f32.gmra.mrb[14].mxu0 %vm149_vm0, %v142_v43  ;;  %v5277_v43 = vpack.c.bf16 %v559_v42, %v557_v41  ;;  %v363_v42 = vrot.slane %v354_v37, %v7184_v38  ;;  %v7209_v5 = vld [vmem:[#allocation7 + $0x20] ss:$16 sps:$4 sm:$0xff]   ;;  %v5297_v6 = vpack.c.bf16 %v700_v61, %v699_v60  ;;  %v7212_v9 = vld [vmem:[#allocation7 + $0x44] ss:$16 sps:$4 sm:$0xff]   ;;  %v7311_v60 = vld [vmem:[#allocation7 + $0x28] ss:$16 sps:$4 sm:$0xff]  }
  0xa0   :  { %5220 = vmatpush1.bf16.msra.mxu0 %v5219_v15  ;;  %v571_v15 = vld [vmem:[%s10534_s6 + $0x158] sm:$0xff]  ;;  %v7229_v21 = vld [vmem:[#allocation7 + $0x64] ss:$16 sps:$4 sm:$0xff]  }
  0xa1   :  { %5222 = vmatprep.subr.bf16.mxu0 %v5221_v16  ;;  %5278 = vmatprep.subr.bf16.mxu1 %v5277_v43  ;;  %v5289_v16 = vpack.c.bf16 %v571_v15, %v569_v14  ;;  %v7315_v61 = vld [vmem:[#allocation7 + $0x4c] ss:$16 sps:$4 sm:$0xff]  }
  0xa2   :  { %5280 = vmatpush1.bf16.msra.mxu1 %v5279_v51 }
  0xa3   :  { %5282 = vmatprep.subr.bf16.mxu1 %v5281_v55  ;;  %v7196_v55 = vld [vmem:[#allocation7] ss:$16 sps:$4 sm:$0xff]  }
  0xa4   :  { %5224 = vmatpush1.bf16.msra.mxu0 %v5223_v17  ;;  %v423_v17 = vld [vmem:[%s10533_s5 + $0x148] sm:$0xff] }
  0xa5   :  { %5226 = vmatprep.subr.bf16.mxu0 %v5225_v23  ;;  %v5245_v20 = vpack.c.bf16 %v425_v18, %v423_v17  ;;  %v5291_v23 = vpack.c.bf16 %v570_v0, %v568_v19  ;;  %v7226_v18 = vld [vmem:[#allocation7 + $0x40] ss:$16 sps:$4 sm:$0xff]   ;;  %v5300_v19 = vpack.c.bf16 %v702_v11, %v701_v10  ;;  %v7347_v10 = vld [vmem:[#allocation7 + $0xec] ss:$16 sps:$4 sm:$0xff]   ;;  %v7350_v11 = vld [vmem:[#allocation7 + $0xe8] ss:$16 sps:$4 sm:$0xff]  }
  0xa6   :  { %5284 = vmatpush1.bf16.msra.mxu1 %v5283_v63 }
  0xa7   :  { %5286 = vmatprep.subr.bf16.mxu1 %v5285_v4 }
  0xa8   :  { %5228 = vmatpush1.bf16.msra.mxu0 %v5227_v28 }
  0xa9   :  { %5230 = vmatprep.subr.bf16.mxu0 %v5229_v35  ;;  %v7176_v35 = vsub.s32 0, %v7173_v32  ;;  %v7548_v32 = vld [vmem:[%s10539_s11 + $0x1cc] ss:$16 sps:$4 sm:$0xff]  }
  0xaa   :  { %5288 = vmatpush1.bf16.msra.mxu1 %v5287_v12  ;;  %10889 = vst [vmem:[#allocation52_spill] sm:$0xff] %v7548_v32 }
  0xab   :  { %5290 = vmatprep.subr.bf16.mxu1 %v5289_v16  ;;  %10860 = vst [vmem:[#allocation23_spill] sm:$0xff] %v7176_v35 }
  0xac   :  { %5232 = vmatpush1.bf16.msra.mxu0 %v5231_v40  ;;  %v359_v40 = vrot.slane %v354_v37, %v7176_v35  ;;  %v10552_v37 = vmov 0  }
  0xad   :  { %5234 = vmatprep.subr.bf16.mxu0 %v5233_v47  ;;  %v697_v47 = vld [vmem:[%s10536_s8] sm:$0xff] }
  0xae   :  { %5292 = vmatpush1.bf16.msra.mxu1 %v5291_v23  ;;  %v5294_v56 = vpack.c.bf16 %v698_v48, %v697_v47  ;;  %v703_v23 = vld [vmem:[%s10536_s8 + $0x30] sm:$0xff]  ;;  %v710_v47 = vld [vmem:[%s10536_s8 + $0x68] sm:$0xff] }
  0xaf   :  { %1099 = vmatprep.subr.bf16.mxu1 %v7169_v25  ;;  %v7283_v48 = vld [vmem:[#allocation7 + $0xc0] ss:$16 sps:$4 sm:$0xff]  }
  0xb0   :  { %5236 = vmatpush1.bf16.msra.mxu0 %v5235_v52 }
  0xb1   :  { %5238 = vmatprep.subr.bf16.mxu0 %v5237_v59  ;;  %v7198_v59 = vld [vmem:[#allocation7 + $0x24] ss:$16 sps:$4 sm:$0xff]  }
  0xb4   :  { %5240 = vmatpush1.bf16.msra.mxu0 %v5239_v1 }
  0xb5   :  { %5242 = vmatprep.subr.bf16.mxu0 %v5241_v8 }
  0xb8   :  { %5244 = vmatpush1.bf16.msra.mxu0 %v5243_v13 }
  0xb9   :  { %5246 = vmatprep.subr.bf16.mxu0 %v5245_v20 }
  0xbc   :  { %5248 = vmatpush1.bf16.msra.mxu0 %v5247_v24  ;;  %v704_v24 = vld [vmem:[%s10536_s8 + $0x38] sm:$0xff] }
  0xbd   :  { %5293 = vmatprep.subr.bf16.mxu0 %v6674_v26 }
 0x156   :  { %v228_v27 = vpop.f32.mrb[0].mxu0 }
 0x157   :  { %v230_v28 = vpop.f32.mrb[1].mxu0 }
 0x15a   :  { %v234_v30 = vpop.f32.mrb[2].mxu0 }
 0x15b   :  { %v236_v31 = vpop.f32.mrb[3].mxu0 }
 0x15e   :  { %v240_v33 = vpop.f32.mrb[4].mxu0 }
 0x15f   :  { %v242_v34 = vpop.f32.mrb[5].mxu0 }
 0x162   :  { %v7178_v36 = vpop.f32.mrb[6].mxu0 }
 0x163   :  { %v7186_v39 = vpop.f32.mrb[7].mxu0 }
 0x166   :  { %v323_v41 = vpop.f32.mrb[8].mxu0 }
 0x167   :  { %v346_v43 = vmax.f32 %v228_v27, %v323_v41  ;;  %v325_v44 = vpop.f32.mrb[9].mxu0  ;;  %v707_v41 = vld [vmem:[%s10536_s8 + $0x50] sm:$0xff] }
 0x168   :  { %v347_v45 = vmax.f32 %v230_v28, %v325_v44  ;;  %v7241_v28 = vld [vmem:[#allocation7 + $0x60] ss:$16 sps:$4 sm:$0xff]   ;;  %v7273_v44 = vld [vmem:[#allocation7 + $0xc4] ss:$16 sps:$4 sm:$0xff]  }
 0x169   :  { %v366_v46 = vadd.f32 %v359_v40, %v346_v43  ;;  %v7270_v43 = vld [vmem:[#allocation7 + $0xa0] ss:$16 sps:$4 sm:$0xff]  }
 0x16a   :  { %v367_v49 = vadd.f32 %v363_v42, %v347_v45  ;;  %v329_v50 = vpop.f32.mrb[10].mxu0 }
 0x16b   :  { %v348_v51 = vmax.f32 %v234_v30, %v329_v50  ;;  %v331_v52 = vpop.f32.mrb[11].mxu0  ;;  %v374_v57 = vmax.f32 %v366_v46, 0.0  ;;  %v7244_v30 = vld [vmem:[#allocation7 + $0x84] ss:$16 sps:$4 sm:$0xff]  }
 0x16c   :  { %v375_v53 = vmax.f32 %v367_v49, 0.0  ;;  %v349_v54 = vmax.f32 %v236_v31, %v331_v52  ;;  %v5303_v31 = vpack.c.bf16 %v704_v24, %v703_v23  ;;  %v709_v46 = vld [vmem:[%s10536_s8 + $0x60] sm:$0xff]  ;;  %v712_v52 = vld [vmem:[%s10536_s8 + $0x78] sm:$0xff] }
 0x16d   :  { %v368_v58 = vadd.f32 %v359_v40, %v348_v51  ;;  %v7286_v49 = vld [vmem:[#allocation7 + $0xe4] ss:$16 sps:$4 sm:$0xff]   ;;  %v5312_v50 = vpack.c.bf16 %v710_v47, %v709_v46  ;;  %v7404_v23 = vld [vmem:[%s10539_s11 + $0x4c] ss:$16 sps:$4 sm:$0xff]   ;;  %v7409_v24 = vld [vmem:[%s10539_s11 + $0x48] ss:$16 sps:$4 sm:$0xff]  }
 0x16e   :  { %v369_v62 = vadd.f32 %v363_v42, %v349_v54  ;;  %v335_v63 = vpop.f32.mrb[12].mxu0  ;;  %4858 = vmatprep.mubr.msk.f32.mxu0 %vm426_vm1, %v375_v53  ;;  %4862 = vmatprep.mubr.msk.f32.mxu1 %vm426_vm1, %v375_v53  ;;  %v711_v51 = vld [vmem:[%s10536_s8 + $0x70] sm:$0xff]  ;;  %v7299_v54 = vld [vmem:[#allocation7 + $0xc] ss:$16 sps:$4 sm:$0xff]   ;;  %10865 = vst [vmem:[#allocation28_spill] sm:$0xff] %v7404_v23  ;;  %10866 = vst [vmem:[#allocation29_spill] sm:$0xff] %v7409_v24 }
 0x16f   :  { %v350_v1 = vmax.f32 %v240_v33, %v335_v63  ;;  %v337_v2 = vpop.f32.mrb[13].mxu0  ;;  %504 = vmatmul.mubr.f32.vlgmr.msra.gmra.mrb[16].mxu0 %v374_v57  ;;  %637 = vmatmul.mubr.f32.vlgmr.msra.gmra.mrb[0].mxu1 %v374_v57  ;;  %v376_v7 = vmax.f32 %v368_v58, 0.0  ;;  %v705_v33 = vld [vmem:[%s10536_s8 + $0x40] sm:$0xff]  ;;  %10862 = vst [vmem:[#allocation25_spill] sm:$0xff] %v7299_v54  ;;  %v7303_v57 = vld [vmem:[#allocation7 + $0x8] ss:$16 sps:$4 sm:$0xff]  }
 0x170   :  { %v377_v3 = vmax.f32 %v369_v62, 0.0  ;;  %v351_v4 = vmax.f32 %v242_v34, %v337_v2  ;;  %1100 = vmatpush1.bf16.msra.mxu1 %v7196_v55  ;;  %5295 = vmatpush1.bf16.msra.mxu0 %v5294_v56  ;;  %v706_v34 = vld [vmem:[%s10536_s8 + $0x48] sm:$0xff]  ;;  %v7296_v53 = vld [vmem:[#allocation7 + $0xe0] ss:$16 sps:$4 sm:$0xff]   ;;  %v5315_v56 = vpack.c.bf16 %v712_v52, %v711_v51 }
 0x171   :  { %v370_v8 = vadd.f32 %v359_v40, %v350_v1  ;;  %1101 = vmatprep.subr.bf16.mxu1 %v7198_v59  ;;  %5296 = vmatprep.subr.bf16.mxu0 %v6674_v26  ;;  %v7306_v58 = vld [vmem:[#allocation7 + $0x2c] ss:$16 sps:$4 sm:$0xff]   ;;  %v7318_v62 = vld [vmem:[#allocation7 + $0x48] ss:$16 sps:$4 sm:$0xff]  }
 0x172   :  { %v371_v12 = vadd.f32 %v363_v42, %v351_v4  ;;  %v341_v13 = vpop.f32.mrb[14].mxu0  ;;  %4859 = vmatprep.mubr.msk.f32.mxu0 %vm426_vm1, %v377_v3  ;;  %4863 = vmatprep.mubr.msk.f32.mxu1 %vm426_vm1, %v377_v3  ;;  %v7321_v63 = vld [vmem:[#allocation7 + $0x6c] ss:$16 sps:$4 sm:$0xff]   ;;  %v7325_v1 = vld [vmem:[#allocation7 + $0x68] ss:$16 sps:$4 sm:$0xff]  }
 0x173   :  { %v352_v14 = vmax.f32 %v7178_v36, %v341_v13  ;;  %v343_v15 = vpop.f32.mrb[15].mxu0  ;;  %510 = vmatmul.mubr.f32.gmra.mrb[18].mxu0 %v376_v7  ;;  %643 = vmatmul.mubr.f32.gmra.mrb[2].mxu1 %v376_v7  ;;  %v378_v20 = vmax.f32 %v370_v8, 0.0  ;;  %v7256_v36 = vld [vmem:[#allocation7 + $0x80] ss:$16 sps:$4 sm:$0xff]   ;;  %v7329_v2 = vld [vmem:[#allocation7 + $0x8c] ss:$16 sps:$4 sm:$0xff]  }
 0x174   :  { %v379_v16 = vmax.f32 %v371_v12, 0.0  ;;  %v353_v17 = vmax.f32 %v7186_v39, %v343_v15  ;;  %1102 = vmatpush1.bf16.msra.mxu1 %v7209_v5  ;;  %5298 = vmatpush1.bf16.msra.mxu0 %v5297_v6  ;;  %v7260_v39 = vld [vmem:[#allocation7 + $0xa4] ss:$16 sps:$4 sm:$0xff]   ;;  %v7332_v3 = vld [vmem:[#allocation7 + $0x88] ss:$16 sps:$4 sm:$0xff]  }
 0x175   :  { %v372_v0 = vadd.f32 %v359_v40, %v352_v14  ;;  %1103 = vmatprep.subr.bf16.mxu1 %v7212_v9  ;;  %5299 = vmatprep.subr.bf16.mxu0 %v6674_v26  ;;  %v5306_v40 = vpack.c.bf16 %v706_v34, %v705_v33  ;;  %v7335_v4 = vld [vmem:[#allocation7 + $0xac] ss:$16 sps:$4 sm:$0xff]   ;;  %v7338_v6 = vld [vmem:[#allocation7 + $0xa8] ss:$16 sps:$4 sm:$0xff]   ;;  %v713_v12 = vld [vmem:[%s10536_s8 + $0x80] sm:$0xff] }
 0x176   :  { %v373_v22 = vadd.f32 %v363_v42, %v353_v17  ;;  %4860 = vmatprep.mubr.msk.f32.mxu0 %vm426_vm1, %v379_v16  ;;  %4864 = vmatprep.mubr.msk.f32.mxu1 %vm426_vm1, %v379_v16  ;;  %v708_v42 = vld [vmem:[%s10536_s8 + $0x58] sm:$0xff]  ;;  %v714_v13 = vld [vmem:[%s10536_s8 + $0x88] sm:$0xff]  ;;  %v715_v15 = vld [vmem:[%s10536_s8 + $0x90] sm:$0xff] }
 0x177   :  { %516 = vmatmul.mubr.f32.gmra.mrb[20].mxu0 %v378_v20  ;;  %649 = vmatmul.mubr.f32.gmra.mrb[4].mxu1 %v378_v20  ;;  %v380_v29 = vmax.f32 %v372_v0, 0.0  ;;  %v5309_v45 = vpack.c.bf16 %v708_v42, %v707_v41  ;;  %v7341_v7 = vld [vmem:[#allocation7 + $0xcc] ss:$16 sps:$4 sm:$0xff]   ;;  %v7344_v8 = vld [vmem:[#allocation7 + $0xc8] ss:$16 sps:$4 sm:$0xff]   ;;  %v5318_v14 = vpack.c.bf16 %v714_v13, %v713_v12 }
 0x178   :  { %v381_v27 = vmax.f32 %v373_v22, 0.0  ;;  %1104 = vmatpush1.bf16.msra.mxu1 %v7226_v18  ;;  %5301 = vmatpush1.bf16.msra.mxu0 %v5300_v19  ;;  %v716_v16 = vld [vmem:[%s10536_s8 + $0x98] sm:$0xff]  ;;  %v7374_v19 = vld [vmem:[%s10539_s11 + $0x4] ss:$16 sps:$4 sm:$0xff]  }
 0x179   :  { %1105 = vmatprep.subr.bf16.mxu1 %v7229_v21  ;;  %5302 = vmatprep.subr.bf16.mxu0 %v6674_v26  ;;  %v5321_v17 = vpack.c.bf16 %v716_v16, %v715_v15  ;;  %v7379_v20 = vld [vmem:[%s10539_s11 + $0xc] ss:$16 sps:$4 sm:$0xff]   ;;  %v7397_v22 = vld [vmem:[%s10539_s11 + $0x28] ss:$16 sps:$4 sm:$0xff]  }
 0x17a   :  { %4861 = vmatprep.mubr.msk.f32.mxu0 %vm426_vm1, %v381_v27  ;;  %4865 = vmatprep.mubr.msk.f32.mxu1 %vm426_vm1, %v381_v27  ;;  %v7392_v0 = vld [vmem:[%s10539_s11 + $0x2c] ss:$16 sps:$4 sm:$0xff]   ;;  %10864 = vst [vmem:[#allocation27_spill] sm:$0xff] %v7397_v22  ;;  %v7433_v33 = vld [vmem:[%s10539_s11 + $0x88] ss:$16 sps:$4 sm:$0xff]  }
 0x17b   :  { %522 = vmatmul.mubr.f32.gmra.mrb[22].mxu0 %v380_v29  ;;  %655 = vmatmul.mubr.f32.gmra.mrb[6].mxu1 %v380_v29  ;;  %10863 = vst [vmem:[#allocation26_spill] sm:$0xff] %v7392_v0  ;;  %v7416_v27 = vld [vmem:[%s10539_s11 + $0x6c] ss:$16 sps:$4 sm:$0xff]   ;;  %v7421_v29 = vld [vmem:[%s10539_s11 + $0x68] ss:$16 sps:$4 sm:$0xff]   ;;  %10870 = vst [vmem:[#allocation33_spill] sm:$0xff] %v7433_v33 }
 0x17c   :  { %1106 = vmatpush1.bf16.msra.mxu1 %v7241_v28  ;;  %1131 = vmatprep.mubr.bf16.mxu1 %v10552_v37  ;;  %10867 = vst [vmem:[#allocation30_spill] sm:$0xff] %v7416_v27  ;;  %10868 = vst [vmem:[#allocation31_spill] sm:$0xff] %v7421_v29  ;;  %v7440_v34 = vld [vmem:[%s10539_s11 + $0xac] ss:$16 sps:$4 sm:$0xff]   ;;  %v7457_v42 = vld [vmem:[%s10539_s11 + $0xc8] ss:$16 sps:$4 sm:$0xff]  }
 0x17d   :  { %1107 = vmatprep.subr.bf16.mxu1 %v7244_v30  ;;  %5304 = vmatpush1.bf16.msra.mxu0 %v5303_v31  ;;  %v7428_v31 = vld [vmem:[%s10539_s11 + $0x8c] ss:$16 sps:$4 sm:$0xff]   ;;  %10871 = vst [vmem:[#allocation34_spill] sm:$0xff] %v7440_v34  ;;  %10874 = vst [vmem:[#allocation37_spill] sm:$0xff] %v7457_v42  ;;  %v7469_v46 = vld [vmem:[%s10539_s11 + $0xe8] ss:$16 sps:$4 sm:$0xff]  }
 0x17e   :  { %5305 = vmatprep.subr.bf16.mxu0 %v6674_v26  ;;  %10869 = vst [vmem:[#allocation32_spill] sm:$0xff] %v7428_v31  ;;  %v7452_v41 = vld [vmem:[%s10539_s11 + $0xcc] ss:$16 sps:$4 sm:$0xff]   ;;  %10876 = vst [vmem:[#allocation39_spill] sm:$0xff] %v7469_v46  ;;  %v7493_v52 = vld [vmem:[%s10539_s11 + $0x128] ss:$16 sps:$4 sm:$0xff]  }
 0x17f   :  { %10873 = vst [vmem:[#allocation36_spill] sm:$0xff] %v7452_v41  ;;  %v7476_v47 = vld [vmem:[%s10539_s11 + $0x10c] ss:$16 sps:$4 sm:$0xff]   ;;  %10880 = vst [vmem:[#allocation43_spill] sm:$0xff] %v7493_v52  ;;  %v7505_v12 = vld [vmem:[%s10539_s11 + $0x148] ss:$16 sps:$4 sm:$0xff]  }
 0x180   :  { %1108 = vmatpush1.bf16.msra.mxu1 %v7256_v36  ;;  %10877 = vst [vmem:[#allocation40_spill] sm:$0xff] %v7476_v47  ;;  %v7488_v51 = vld [vmem:[%s10539_s11 + $0x12c] ss:$16 sps:$4 sm:$0xff]   ;;  %10882 = vst [vmem:[#allocation45_spill] sm:$0xff] %v7505_v12  ;;  %v7529_v16 = vld [vmem:[%s10539_s11 + $0x188] ss:$16 sps:$4 sm:$0xff]  }
 0x181   :  { %1109 = vmatprep.subr.bf16.mxu1 %v7260_v39  ;;  %5307 = vmatpush1.bf16.msra.mxu0 %v5306_v40  ;;  %v7445_v40 = vld [vmem:[%s10539_s11 + $0xa8] ss:$16 sps:$4 sm:$0xff]   ;;  %10879 = vst [vmem:[#allocation42_spill] sm:$0xff] %v7488_v51  ;;  %v7512_v13 = vld [vmem:[%s10539_s11 + $0x16c] ss:$16 sps:$4 sm:$0xff]   ;;  %10886 = vst [vmem:[#allocation49_spill] sm:$0xff] %v7529_v16 }
 0x182   :  { %5308 = vmatprep.subr.bf16.mxu0 %v6674_v26  ;;  %10872 = vst [vmem:[#allocation35_spill] sm:$0xff] %v7445_v40  ;;  %10883 = vst [vmem:[#allocation46_spill] sm:$0xff] %v7512_v13  ;;  %v7524_v15 = vld [vmem:[%s10539_s11 + $0x18c] ss:$16 sps:$4 sm:$0xff]  }
 0x183   :  { %10885 = vst [vmem:[#allocation48_spill] sm:$0xff] %v7524_v15 }
 0x184   :  { %1110 = vmatpush1.bf16.msra.mxu1 %v7270_v43 }
 0x185   :  { %1111 = vmatprep.subr.bf16.mxu1 %v7273_v44  ;;  %5310 = vmatpush1.bf16.msra.mxu0 %v5309_v45  ;;  %v7464_v45 = vld [vmem:[%s10539_s11 + $0xec] ss:$16 sps:$4 sm:$0xff]  }
 0x186   :  { %5311 = vmatprep.subr.bf16.mxu0 %v6674_v26  ;;  %10875 = vst [vmem:[#allocation38_spill] sm:$0xff] %v7464_v45 }
 0x188   :  { %1112 = vmatpush1.bf16.msra.mxu1 %v7283_v48 }
 0x189   :  { %1113 = vmatprep.subr.bf16.mxu1 %v7286_v49  ;;  %5313 = vmatpush1.bf16.msra.mxu0 %v5312_v50  ;;  %v7481_v50 = vld [vmem:[%s10539_s11 + $0x108] ss:$16 sps:$4 sm:$0xff]  }
 0x18a   :  { %5314 = vmatprep.subr.bf16.mxu0 %v6674_v26  ;;  %10878 = vst [vmem:[#allocation41_spill] sm:$0xff] %v7481_v50 }
 0x18c   :  { %1114 = vmatpush1.bf16.msra.mxu1 %v7296_v53 }
 0x18d   :  { %1152 = vmatprep.subr.bf16.mxu1 %v7299_v54  ;;  %5316 = vmatpush1.bf16.msra.mxu0 %v5315_v56  ;;  %v7500_v56 = vld [vmem:[%s10539_s11 + $0x14c] ss:$16 sps:$4 sm:$0xff]  }
 0x18e   :  { %5317 = vmatprep.subr.bf16.mxu0 %v6674_v26  ;;  %10881 = vst [vmem:[#allocation44_spill] sm:$0xff] %v7500_v56 }
 0x18f   :  { %1132 = vmatmul.mubr.bf16.vlgmr.msra.gmra.mrb[8].mxu1 %v10552_v37 }
 0x190   :  { %1153 = vmatpush1.bf16.msra.mxu1 %v7303_v57  ;;  %1141 = vmatprep.mubr.bf16.mxu1 %v10552_v37 }
 0x191   :  { %1154 = vmatprep.subr.bf16.mxu1 %v7306_v58  ;;  %5319 = vmatpush1.bf16.msra.mxu0 %v5318_v14  ;;  %v7517_v14 = vld [vmem:[%s10539_s11 + $0x168] ss:$16 sps:$4 sm:$0xff]  }
 0x192   :  { %5320 = vmatprep.subr.bf16.mxu0 %v6674_v26  ;;  %v7384_v26 = vld [vmem:[%s10539_s11 + $0x8] ss:$16 sps:$4 sm:$0xff]   ;;  %10884 = vst [vmem:[#allocation47_spill] sm:$0xff] %v7517_v14 }
 0x194   :  { %1155 = vmatpush1.bf16.msra.mxu1 %v7311_v60 }
 0x195   :  { %1156 = vmatprep.subr.bf16.mxu1 %v7315_v61  ;;  %5322 = vmatpush1.bf16.msra.mxu0 %v5321_v17  ;;  %v7536_v17 = vld [vmem:[%s10539_s11 + $0x1ac] ss:$16 sps:$4 sm:$0xff]  }
 0x196   :  { %1636 = vmatprep.subr.bf16.mxu0 %v7374_v19  ;;  %10887 = vst [vmem:[#allocation50_spill] sm:$0xff] %v7536_v17 }
 0x197   :  { %1142 = vmatmul.mubr.bf16.gmra.mrb[12].mxu1 %v10552_v37 }
 0x198   :  { %1157 = vmatpush1.bf16.msra.mxu1 %v7318_v62  ;;  %1184 = vmatprep.mubr.bf16.mxu1 %v10552_v37 }
 0x199   :  { %1158 = vmatprep.subr.bf16.mxu1 %v7321_v63 }
 0x19c   :  { %1159 = vmatpush1.bf16.msra.mxu1 %v7325_v1 }
 0x19d   :  { %1160 = vmatprep.subr.bf16.mxu1 %v7329_v2 }
 0x1a0   :  { %1161 = vmatpush1.bf16.msra.mxu1 %v7332_v3 }
 0x1a1   :  { %1162 = vmatprep.subr.bf16.mxu1 %v7335_v4 }
 0x1a4   :  { %1163 = vmatpush1.bf16.msra.mxu1 %v7338_v6 }
 0x1a5   :  { %1164 = vmatprep.subr.bf16.mxu1 %v7341_v7 }
 0x1a8   :  { %1165 = vmatpush1.bf16.msra.mxu1 %v7344_v8 }
 0x1a9   :  { %1166 = vmatprep.subr.bf16.mxu1 %v7347_v10 }
 0x1ac   :  { %1167 = vmatpush1.bf16.msra.mxu1 %v7350_v11 }
 0x1ad   :  { %1689 = vmatprep.subr.bf16.mxu1 %v7379_v20 }
 0x1af   :  { %1185 = vmatmul.mubr.bf16.vlgmr.msra.gmra.mrb[16].mxu1 %v10552_v37 }
 0x1b0   :  { %1194 = vmatprep.mubr.bf16.mxu1 %v10552_v37  ;;  %1690 = vmatpush1.bf16.msra.mxu1 %v7384_v26 }
 0x1b1   :  { %1691 = vmatprep.subr.bf16.mxu1 %v7392_v0 }
 0x1b4   :  { %1692 = vmatpush1.bf16.msra.mxu1 %v7397_v22 }
 0x1b5   :  { %1693 = vmatprep.subr.bf16.mxu1 %v7404_v23 }
 0x1b7   :  { %1195 = vmatmul.mubr.bf16.gmra.mrb[20].mxu1 %v10552_v37 }
 0x1b8   :  { %1721 = vmatprep.mubr.bf16.mxu1 %v10552_v37  ;;  %1694 = vmatpush1.bf16.msra.mxu1 %v7409_v24  ;;  %v7541_v37 = vld [vmem:[%s10539_s11 + $0x1a8] ss:$16 sps:$4 sm:$0xff]  }
 0x1b9   :  { %1695 = vmatprep.subr.bf16.mxu1 %v7416_v27  ;;  %10888 = vst [vmem:[#allocation51_spill] sm:$0xff] %v7541_v37  ;;  %v7732_v27 = vld [vmem:[%s10539_s11 + $0x184] ss:$16 sps:$4 sm:$0xff]  }
 0x1ba   :  { %10917 = vst [vmem:[#allocation78_spill] sm:$0xff] %v7732_v27 }
 0x1bc   :  { %1696 = vmatpush1.bf16.msra.mxu1 %v7421_v29 }
 0x1bd   :  { %1697 = vmatprep.subr.bf16.mxu1 %v7428_v31 }
 0x1c0   :  { %1698 = vmatpush1.bf16.msra.mxu1 %v7433_v33  ;;  %v924_v33 = vld [vmem:[%s10913_s30 + $0x8] sm:$0xff] }
 0x1c1   :  { %1699 = vmatprep.subr.bf16.mxu1 %v7440_v34 }
 0x1c4   :  { %1700 = vmatpush1.bf16.msra.mxu1 %v7445_v40 }
 0x1c5   :  { %1701 = vmatprep.subr.bf16.mxu1 %v7452_v41 }
 0x1c8   :  { %1702 = vmatpush1.bf16.msra.mxu1 %v7457_v42 }
 0x1c9   :  { %1703 = vmatprep.subr.bf16.mxu1 %v7464_v45 }
 0x1cc   :  { %1704 = vmatpush1.bf16.msra.mxu1 %v7469_v46 }
 0x1cd   :  { %1705 = vmatprep.subr.bf16.mxu1 %v7476_v47 }
 0x1d0   :  { %1706 = vmatpush1.bf16.msra.mxu1 %v7481_v50 }
 0x1d1   :  { %1707 = vmatprep.subr.bf16.mxu1 %v7488_v51 }
 0x1d4   :  { %1708 = vmatpush1.bf16.msra.mxu1 %v7493_v52 }
 0x1d5   :  { %1709 = vmatprep.subr.bf16.mxu1 %v7500_v56 }
 0x1d8   :  { %1710 = vmatpush1.bf16.msra.mxu1 %v7505_v12 }
 0x1d9   :  { %1711 = vmatprep.subr.bf16.mxu1 %v7512_v13 }
 0x1dc   :  { %1712 = vmatpush1.bf16.msra.mxu1 %v7517_v14 }
 0x1dd   :  { %1713 = vmatprep.subr.bf16.mxu1 %v7524_v15 }
 0x1e0   :  { %1714 = vmatpush1.bf16.msra.mxu1 %v7529_v16  ;;  %v7553_v16 = vld [vmem:[%s10539_s11 + $0x1c8] ss:$16 sps:$4 sm:$0xff]  }
 0x1e1   :  { %1715 = vmatprep.subr.bf16.mxu1 %v7536_v17  ;;  %10890 = vst [vmem:[#allocation53_spill] sm:$0xff] %v7553_v16  ;;  %v7560_v17 = vld [vmem:[%s10539_s11 + $0x1ec] ss:$16 sps:$4 sm:$0xff]  }
 0x1e2   :  { %10891 = vst [vmem:[#allocation54_spill] sm:$0xff] %v7560_v17 }
 0x1e4   :  { %1716 = vmatpush1.bf16.msra.mxu1 %v7541_v37  ;;  %v7565_v37 = vld [vmem:[%s10539_s11 + $0x1e8] ss:$16 sps:$4 sm:$0xff]  }
 0x1e5   :  { %1717 = vmatprep.subr.bf16.mxu1 %v7548_v32  ;;  %10892 = vst [vmem:[#allocation55_spill] sm:$0xff] %v7565_v37 }
 0x1e8   :  { %1718 = vmatpush1.bf16.msra.mxu1 %v7553_v16  ;;  %v669_v16 = vld [vmem:[%s10535_s7] sm:$0x3] }
 0x1e9   :  { %1719 = vmatprep.subr.bf16.mxu1 %v7560_v17  ;;  %v674_v32 = vrot.slane %v669_v16, %v7176_v35  ;;  %v678_v13 = vrot.slane %v669_v16, %v7184_v38  ;;  %v7578_v35 = vld [vmem:[%s10539_s11] ss:$16 sps:$4 sm:$0xff]  }
 0x1ec   :  { %1720 = vmatpush1.bf16.msra.mxu1 %v7565_v37 }
 0x1ed   :  { %1884 = vmatprep.subr.bf16.mxu1 %v7299_v54 }
 0x242   :  { %v505_v15 = vpop.f32.mrb[16].mxu0  ;;  %v638_v14 = vpop.f32.mrb[0].mxu1 }
 0x243   :  { %v661_v12 = vmax.f32 %v505_v15, %v638_v14  ;;  %v507_v56 = vpop.f32.mrb[17].mxu0  ;;  %v640_v52 = vpop.f32.mrb[1].mxu1 }
 0x244   :  { %v662_v51 = vmax.f32 %v507_v56, %v640_v52  ;;  %v7583_v52 = vld [vmem:[%s10539_s11 + $0x24] ss:$16 sps:$4 sm:$0xff]  }
 0x245   :  { %v681_v50 = vadd.f32 %v674_v32, %v661_v12  ;;  %10893 = vst [vmem:[#allocation56_spill] sm:$0xff] %v7583_v52 }
 0x246   :  { %v682_v17 = vadd.f32 %v678_v13, %v662_v51  ;;  %v511_v47 = vpop.f32.mrb[18].mxu0  ;;  %v644_v37 = vpop.f32.mrb[2].mxu1 }
 0x247   :  { %v663_v46 = vmax.f32 %v511_v47, %v644_v37  ;;  %v513_v54 = vpop.f32.mrb[19].mxu0  ;;  %v646_v45 = vpop.f32.mrb[3].mxu1  ;;  %v689_v16 = vmax.f32 %v681_v50, 0.0 }
 0x248   :  { %v690_v42 = vmax.f32 %v682_v17, 0.0  ;;  %v664_v41 = vmax.f32 %v513_v54, %v646_v45 }
 0x249   :  { %v683_v14 = vadd.f32 %v674_v32, %v663_v46  ;;  %v7590_v46 = vld [vmem:[%s10539_s11 + $0x20] ss:$16 sps:$4 sm:$0xff]  }
 0x24a   :  { %v684_v51 = vadd.f32 %v678_v13, %v664_v41  ;;  %v517_v56 = vpop.f32.mrb[20].mxu0  ;;  %v650_v37 = vpop.f32.mrb[4].mxu1  ;;  %4867 = vmatprep.mubr.msk.f32.mxu0 %vm724_vm2, %v690_v42  ;;  %10894 = vst [vmem:[#allocation57_spill] sm:$0xff] %v7590_v46  ;;  %v7596_v41 = vld [vmem:[%s10539_s11 + $0x44] ss:$16 sps:$4 sm:$0xff]  }
 0x24b   :  { %v665_v47 = vmax.f32 %v517_v56, %v650_v37  ;;  %v519_v12 = vpop.f32.mrb[21].mxu0  ;;  %v652_v54 = vpop.f32.mrb[5].mxu1  ;;  %802 = vmatmul.mubr.f32.vlgmr.msra.gmra.mrb[24].mxu0 %v689_v16  ;;  %v691_v50 = vmax.f32 %v683_v14, 0.0  ;;  %10895 = vst [vmem:[#allocation58_spill] sm:$0xff] %v7596_v41  ;;  %v7603_v14 = vld [vmem:[%s10539_s11 + $0x40] ss:$16 sps:$4 sm:$0xff]  }
 0x24c   :  { %v692_v45 = vmax.f32 %v684_v51, 0.0  ;;  %v666_v15 = vmax.f32 %v519_v12, %v652_v54  ;;  %1637 = vmatpush1.bf16.msra.mxu0 %v7578_v35  ;;  %10896 = vst [vmem:[#allocation59_spill] sm:$0xff] %v7603_v14 }
 0x24d   :  { %v685_v17 = vadd.f32 %v674_v32, %v665_v47  ;;  %1638 = vmatprep.subr.bf16.mxu0 %v7583_v52 }
 0x24e   :  { %v686_v42 = vadd.f32 %v678_v13, %v666_v15  ;;  %v523_v16 = vpop.f32.mrb[22].mxu0  ;;  %v656_v51 = vpop.f32.mrb[6].mxu1  ;;  %4868 = vmatprep.mubr.msk.f32.mxu0 %vm724_vm2, %v692_v45  ;;  %v7609_v45 = vld [vmem:[%s10539_s11 + $0x64] ss:$16 sps:$4 sm:$0xff]  }
 0x24f   :  { %v667_v56 = vmax.f32 %v523_v16, %v656_v51  ;;  %v525_v37 = vpop.f32.mrb[23].mxu0  ;;  %v658_v12 = vpop.f32.mrb[7].mxu1  ;;  %807 = vmatmul.mubr.f32.gmra.mrb[26].mxu0 %v691_v50  ;;  %v693_v47 = vmax.f32 %v685_v17, 0.0  ;;  %10897 = vst [vmem:[#allocation60_spill] sm:$0xff] %v7609_v45  ;;  %v7622_v17 = vld [vmem:[%s10539_s11 + $0x84] ss:$16 sps:$4 sm:$0xff]  }
 0x250   :  { %v694_v54 = vmax.f32 %v686_v42, 0.0  ;;  %v668_v38 = vmax.f32 %v525_v37, %v658_v12  ;;  %1639 = vmatpush1.bf16.msra.mxu0 %v7590_v46  ;;  %v7616_v42 = vld [vmem:[%s10539_s11 + $0x60] ss:$16 sps:$4 sm:$0xff]   ;;  %10899 = vst [vmem:[#allocation62_spill] sm:$0xff] %v7622_v17  ;;  %v7648_v51 = vld [vmem:[%s10539_s11 + $0xc4] ss:$16 sps:$4 sm:$0xff]  }
 0x251   :  { %v687_v40 = vadd.f32 %v674_v32, %v667_v56  ;;  %1640 = vmatprep.subr.bf16.mxu0 %v7596_v41  ;;  %10898 = vst [vmem:[#allocation61_spill] sm:$0xff] %v7616_v42  ;;  %v7642_v16 = vld [vmem:[%s10539_s11 + $0xa0] ss:$16 sps:$4 sm:$0xff]   ;;  %10904 = vst [vmem:[#allocation66_spill] sm:$0xff] %v7648_v51  ;;  %v7660_v37 = vld [vmem:[%s10539_s11 + $0xe4] ss:$16 sps:$4 sm:$0xff]  }
 0x252   :  { %v688_v15 = vadd.f32 %v678_v13, %v668_v38  ;;  %4869 = vmatprep.mubr.msk.f32.mxu0 %vm724_vm2, %v694_v54  ;;  %v7629_v38 = vld [vmem:[%s10539_s11 + $0x80] ss:$16 sps:$4 sm:$0xff]   ;;  %v10901_v13 = vmov 0   ;;  %10903 = vst [vmem:[#allocation65_spill] sm:$0xff] %v7642_v16  ;;  %10906 = vst [vmem:[#allocation68_spill] sm:$0xff] %v7660_v37 }
 0x253   :  { %812 = vmatmul.mubr.f32.gmra.mrb[28].mxu0 %v693_v47  ;;  %v695_v32 = vmax.f32 %v687_v40, 0.0  ;;  %10900 = vst [vmem:[#allocation63_spill] sm:$0xff] %v7629_v38  ;;  %v7636_v40 = vld [vmem:[%s10539_s11 + $0xa4] ss:$16 sps:$4 sm:$0xff]   ;;  %v7654_v56 = vld [vmem:[%s10539_s11 + $0xc0] ss:$16 sps:$4 sm:$0xff]  }
 0x254   :  { %v696_v50 = vmax.f32 %v688_v15, 0.0  ;;  %1641 = vmatpush1.bf16.msra.mxu0 %v7603_v14  ;;  %10902 = vst [vmem:[#allocation64_spill] sm:$0xff] %v7636_v40  ;;  %10905 = vst [vmem:[#allocation67_spill] sm:$0xff] %v7654_v56  ;;  %v7666_v15 = vld [vmem:[%s10539_s11 + $0xe0] ss:$16 sps:$4 sm:$0xff]  }
 0x255   :  { %1642 = vmatprep.subr.bf16.mxu0 %v7609_v45  ;;  %10907 = vst [vmem:[#allocation69_spill] sm:$0xff] %v7666_v15 }
 0x256   :  { %4870 = vmatprep.mubr.msk.f32.mxu0 %vm724_vm2, %v696_v50 }
 0x257   :  { %817 = vmatmul.mubr.f32.gmra.mrb[30].mxu0 %v695_v32  ;;  %v7672_v32 = vld [vmem:[%s10539_s11 + $0x104] ss:$16 sps:$4 sm:$0xff]  }
 0x258   :  { %1643 = vmatpush1.bf16.msra.mxu0 %v7616_v42  ;;  %1668 = vmatprep.mubr.bf16.mxu0 %v10901_v13  ;;  %10908 = vst [vmem:[#allocation70_spill] sm:$0xff] %v7672_v32 }
 0x259   :  { %1644 = vmatprep.subr.bf16.mxu0 %v7622_v17  ;;  %v927_v17 = vld [vmem:[%s10913_s30 + $0x20] sm:$0xff] }
 0x25c   :  { %1645 = vmatpush1.bf16.msra.mxu0 %v7629_v38  ;;  %v7714_v38 = vld [vmem:[%s10539_s11 + $0x164] ss:$16 sps:$4 sm:$0xff]  }
 0x25d   :  { %1646 = vmatprep.subr.bf16.mxu0 %v7636_v40  ;;  %10915 = vst [vmem:[#allocation76_spill] sm:$0xff] %v7714_v38 }
 0x260   :  { %1647 = vmatpush1.bf16.msra.mxu0 %v7642_v16 }
 0x261   :  { %1648 = vmatprep.subr.bf16.mxu0 %v7648_v51  ;;  %v7678_v51 = vld [vmem:[%s10539_s11 + $0x100] ss:$16 sps:$4 sm:$0xff]  }
 0x262   :  { %v1133_v12 = vpop.f32.mrb[8].mxu1  ;;  %10909 = vst [vmem:[#allocation71_spill] sm:$0xff] %v7678_v51 }
 0x263   :  { %v1135_v54 = vpop.f32.mrb[9].mxu1 }
 0x264   :  { %v1137_v47 = vpop.f32.mrb[10].mxu1  ;;  %1649 = vmatpush1.bf16.msra.mxu0 %v7654_v56  ;;  %v7684_v56 = vld [vmem:[%s10539_s11 + $0x124] ss:$16 sps:$4 sm:$0xff]   ;;  %v1206_v31 = vadd.f32 %v1135_v54, %v924_v33 }
 0x265   :  { %v1139_v50 = vpop.f32.mrb[11].mxu1  ;;  %1650 = vmatprep.subr.bf16.mxu0 %v7660_v37  ;;  %10910 = vst [vmem:[#allocation72_spill] sm:$0xff] %v7684_v56  ;;  %v1209_v33 = vadd.f32 %v1137_v47, %v927_v17 }
 0x266   :  { %v1237_v54 = vmul.f32 0.5, %v1206_v31  ;;  %v936_v31 = vld [vmem:[%s10913_s30 + $0x68] sm:$0xff] }
 0x267   :  { %v1222_v17 = vmul.f32 0.5, %v1209_v33 }
 0x268   :  { %1651 = vmatpush1.bf16.msra.mxu0 %v7666_v15  ;;  %v7690_v15 = vld [vmem:[%s10539_s11 + $0x120] ss:$16 sps:$4 sm:$0xff]   ;;  %5547 = vtanh.f32 %v1237_v54 }
 0x269   :  { %1652 = vmatprep.subr.bf16.mxu0 %v7672_v32  ;;  %10911 = vst [vmem:[#allocation73_spill] sm:$0xff] %v7690_v15  ;;  %v7696_v32 = vld [vmem:[%s10539_s11 + $0x144] ss:$16 sps:$4 sm:$0xff]  }
 0x26a   :  { %v1143_v37 = vpop.f32.mrb[12].mxu1  ;;  %10912 = vst [vmem:[#allocation74_spill] sm:$0xff] %v7696_v32  ;;  %v925_v54 = vld [vmem:[%s10913_s30 + $0x10] sm:$0xff] }
 0x26b   :  { %v1145_v16 = vpop.f32.mrb[13].mxu1 }
 0x26c   :  { %v1147_v34 = vpop.f32.mrb[14].mxu1  ;;  %1653 = vmatpush1.bf16.msra.mxu0 %v7678_v51  ;;  %v7705_v51 = vld [vmem:[%s10539_s11 + $0x140] ss:$16 sps:$4 sm:$0xff]  }
 0x26d   :  { %v1149_v40 = vpop.f32.mrb[15].mxu1  ;;  %1654 = vmatprep.subr.bf16.mxu0 %v7684_v56  ;;  %10914 = vst [vmem:[#allocation75_spill] sm:$0xff] %v7705_v51  ;;  %v928_v56 = vld [vmem:[%s10913_s30 + $0x28] sm:$0xff] }
 0x26e   :  { %v1210_v29 = vadd.f32 %v1139_v50, %v928_v56  ;;  %v931_v56 = vld [vmem:[%s10913_s30 + $0x40] sm:$0xff] }
 0x26f   :  { %v1213_v47 = vadd.f32 %v1143_v37, %v931_v56  ;;  %v7777_v56 = vld [vmem:[%s10539_s11 + $0x1c0] ss:$16 sps:$4 sm:$0xff]  }
 0x270   :  { %1655 = vmatpush1.bf16.msra.mxu0 %v7690_v15  ;;  %v923_v15 = vld [vmem:[%s10913_s30] sm:$0xff]  ;;  %v1238_v50 = vmul.f32 0.5, %v1210_v29  ;;  %10922 = vst [vmem:[#allocation83_spill] sm:$0xff] %v7777_v56 }
 0x271   :  { %1656 = vmatprep.subr.bf16.mxu0 %v7696_v32  ;;  %v7726_v32 = vld [vmem:[%s10539_s11 + $0x160] ss:$16 sps:$4 sm:$0xff]   ;;  %v1205_v42 = vadd.f32 %v1133_v12, %v923_v15  ;;  %v7753_v29 = vld [vmem:[%s10539_s11 + $0x1a4] ss:$16 sps:$4 sm:$0xff]  }
 0x272   :  { %10916 = vst [vmem:[#allocation77_spill] sm:$0xff] %v7726_v32  ;;  %v7744_v12 = vld [vmem:[%s10539_s11 + $0x180] ss:$16 sps:$4 sm:$0xff]   ;;  %10919 = vst [vmem:[#allocation80_spill] sm:$0xff] %v7753_v29  ;;  %5549 = vtanh.f32 %v1238_v50  ;;  %v926_v50 = vld [vmem:[%s10913_s30 + $0x18] sm:$0xff] }
 0x273   :  { %10918 = vst [vmem:[#allocation79_spill] sm:$0xff] %v7744_v12  ;;  %v1221_v15 = vmul.f32 0.5, %v1205_v42  ;;  %v1218_v42 = vadd.f32 %v1149_v40, %v936_v31 }
 0x274   :  { %1657 = vmatpush1.bf16.msra.mxu0 %v7705_v51  ;;  %v932_v51 = vld [vmem:[%s10913_s30 + $0x48] sm:$0xff] }
 0x275   :  { %1658 = vmatprep.subr.bf16.mxu0 %v7714_v38  ;;  %v935_v38 = vld [vmem:[%s10913_s30 + $0x60] sm:$0xff]  ;;  %5551 = vtanh.f32 %v1221_v15  ;;  %v1240_v40 = vmul.f32 0.5, %v1218_v42  ;;  %v929_v15 = vld [vmem:[%s10913_s30 + $0x30] sm:$0xff] }
 0x276   :  { %5553 = vtanh.f32 %v1222_v17  ;;  %v1217_v37 = vadd.f32 %v1147_v34, %v935_v38  ;;  %v7786_v34 = vld [vmem:[%s10539_s11 + $0x1e4] ss:$16 sps:$4 sm:$0xff]  }
 0x277   :  { %10923 = vst [vmem:[#allocation84_spill] sm:$0xff] %v7786_v34 }
 0x278   :  { %1659 = vmatpush1.bf16.msra.mxu0 %v7726_v32  ;;  %v1214_v32 = vadd.f32 %v1145_v16, %v932_v51  ;;  %v7768_v16 = vld [vmem:[%s10539_s11 + $0x1c4] ss:$16 sps:$4 sm:$0xff]   ;;  %v1223_v51 = vmul.f32 0.5, %v1213_v47  ;;  %v1224_v38 = vmul.f32 0.5, %v1217_v37  ;;  %v930_v47 = vld [vmem:[%s10913_s30 + $0x38] sm:$0xff]  ;;  %v5548_v37 = vpop.eup %5547 }
 0x279   :  { %1660 = vmatprep.subr.bf16.mxu0 %v7732_v27  ;;  %v7762_v27 = vld [vmem:[%s10539_s11 + $0x1a0] ss:$16 sps:$4 sm:$0xff]   ;;  %10921 = vst [vmem:[#allocation82_spill] sm:$0xff] %v7768_v16 }
 0x27a   :  { %10920 = vst [vmem:[#allocation81_spill] sm:$0xff] %v7762_v27  ;;  %v1239_v33 = vmul.f32 0.5, %v1214_v32  ;;  %5555 = vtanh.f32 %v1223_v51  ;;  %v7798_v51 = vld [vmem:[%s10539_s11 + $0x1e0] ss:$16 sps:$4 sm:$0xff]  }
 0x27b   :  { %10924 = vst [vmem:[#allocation85_spill] sm:$0xff] %v7798_v51 }
 0x27c   :  { %1661 = vmatpush1.bf16.msra.mxu0 %v7744_v12  ;;  %5557 = vtanh.f32 %v1239_v33 }
 0x27d   :  { %1662 = vmatprep.subr.bf16.mxu0 %v7753_v29  ;;  %5559 = vtanh.f32 %v1240_v40 }
 0x280   :  { %1663 = vmatpush1.bf16.msra.mxu0 %v7762_v27 }
 0x281   :  { %1664 = vmatprep.subr.bf16.mxu0 %v7768_v16 }
 0x282   :  { %v1186_v32 = vpop.f32.mrb[16].mxu1 }
 0x283   :  { %v1207_v31 = vadd.f32 %v1186_v32, %v925_v54  ;;  %v1188_v17 = vpop.f32.mrb[17].mxu1  ;;  %v5550_v54 = vpop.eup %5549 }
 0x284   :  { %v1208_v42 = vadd.f32 %v1188_v17, %v926_v50  ;;  %v1190_v16 = vpop.f32.mrb[18].mxu1  ;;  %1665 = vmatpush1.bf16.msra.mxu0 %v7777_v56  ;;  %v5552_v29 = vpop.eup %5551  ;;  %v1245_v50 = vmul.f32 0.5, %v5548_v37  ;;  %v933_v56 = vld [vmem:[%s10913_s30 + $0x50] sm:$0xff]  ;;  %v1246_v12 = vmul.f32 0.5, %v5550_v54 }
 0x285   :  { %5561 = vtanh.f32 %v1207_v31  ;;  %v1211_v27 = vadd.f32 %v1190_v16, %v929_v15  ;;  %v1192_v33 = vpop.f32.mrb[19].mxu1  ;;  %1666 = vmatprep.subr.bf16.mxu0 %v7786_v34  ;;  %v5554_v40 = vpop.eup %5553  ;;  %v934_v16 = vld [vmem:[%s10913_s30 + $0x58] sm:$0xff] }
 0x286   :  { %5563 = vtanh.f32 %v1224_v38  ;;  %v1212_v32 = vadd.f32 %v1192_v33, %v930_v47  ;;  %v1257_v17 = vmul.f32 0.5, %v1208_v42  ;;  %v1229_v38 = vmul.f32 0.5, %v5552_v29  ;;  %v938_v33 = vld [vmem:[%s10913_s30 + $0x78] sm:$0xff]  ;;  %v5556_v54 = vpop.eup %5555 }
 0x287   :  { %5565 = vtanh.f32 %v1211_v27  ;;  %v937_v27 = vld [vmem:[%s10913_s30 + $0x70] sm:$0xff]  ;;  %v1230_v47 = vmul.f32 0.5, %v5554_v40  ;;  %v1250_v29 = vadd.f32 0.5, %v1246_v12  ;;  %v1231_v52 = vmul.f32 0.5, %v5556_v54 }
 0x288   :  { %1667 = vmatpush1.bf16.msra.mxu0 %v7798_v51  ;;  %v1258_v15 = vmul.f32 0.5, %v1212_v32  ;;  %v1249_v51 = vadd.f32 0.5, %v1245_v50  ;;  %5567 = vtanh.f32 %v1257_v17  ;;  %v1233_v23 = vadd.f32 0.5, %v1229_v38 }
 0x289   :  { %1831 = vmatprep.subr.bf16.mxu0 %v7169_v25  ;;  %v5558_v25 = vpop.eup %5557  ;;  %v1234_v41 = vadd.f32 0.5, %v1230_v47 }
 0x28a   :  { %v1196_v31 = vpop.f32.mrb[20].mxu1  ;;  %v5560_v14 = vpop.eup %5559  ;;  %v1273_v46 = vmul.f32 0.0, %v1249_v51  ;;  %v1247_v0 = vmul.f32 0.5, %v5558_v25  ;;  %v1235_v51 = vadd.f32 0.5, %v1231_v52 }
 0x28b   :  { %v1215_v42 = vadd.f32 %v1196_v31, %v933_v56  ;;  %v1198_v37 = vpop.f32.mrb[21].mxu1  ;;  %v1248_v12 = vmul.f32 0.5, %v5560_v14 }
 0x28c   :  { %v1216_v34 = vadd.f32 %v1198_v37, %v934_v16  ;;  %v1200_v45 = vpop.f32.mrb[22].mxu1  ;;  %v1274_v37 = vmul.f32 0.0, %v1250_v29  ;;  %v1251_v38 = vadd.f32 0.5, %v1247_v0 }
 0x28d   :  { %5569 = vtanh.f32 %v1215_v42  ;;  %v1219_v32 = vadd.f32 %v1200_v45, %v937_v27  ;;  %v1202_v24 = vpop.f32.mrb[23].mxu1  ;;  %v1252_v27 = vadd.f32 0.5, %v1248_v12 }
 0x28e   :  { %5571 = vtanh.f32 %v1258_v15  ;;  %v1259_v40 = vmul.f32 0.5, %v1216_v34  ;;  %v1220_v56 = vadd.f32 %v1202_v24, %v938_v33  ;;  %v1275_v33 = vmul.f32 0.0, %v1251_v38 }
 0x28f   :  { %v5562_v31 = vpop.eup %5561  ;;  %5573 = vtanh.f32 %v1219_v32 }
 0x290   :  { %v5564_v22 = vpop.eup %5563  ;;  %v1277_v50 = vmul.f32 %v5562_v31, %v1233_v23  ;;  %v1260_v17 = vmul.f32 0.5, %v1220_v56  ;;  %5575 = vtanh.f32 %v1259_v40 }
 0x291   :  { %v5566_v16 = vpop.eup %5565  ;;  %v1232_v34 = vmul.f32 0.5, %v5564_v22 }
 0x292   :  { %v7815_v42 = vadd.f32 %v1277_v50, %v1273_v46  ;;  %v1278_v45 = vmul.f32 %v5566_v16, %v1234_v41  ;;  %5577 = vtanh.f32 %v1260_v17  ;;  %v5568_v15 = vpop.eup %5567  ;;  %v1276_v41 = vmul.f32 0.0, %v1252_v27 }
 0x293   :  { %v1236_v14 = vadd.f32 0.5, %v1232_v34  ;;  %v1265_v22 = vmul.f32 0.5, %v5568_v15 }
 0x294   :  { %5579 = vtanh.f32 %v7815_v42  ;;  %v7818_v24 = vadd.f32 %v1278_v45, %v1274_v37 }
 0x295   :  { %v1269_v31 = vadd.f32 0.5, %v1265_v22  ;;  %v10964_v22 = vld [vmem:[#allocation45_spill] sm:$0xff] }
 0x296   :  { %5581 = vtanh.f32 %v7818_v24 }
 0x297   :  { %v5570_v23 = vpop.eup %5569 }
 0x298   :  { %v5572_v47 = vpop.eup %5571  ;;  %v1279_v46 = vmul.f32 %v5570_v23, %v1235_v51 }
 0x299   :  { %v5574_v54 = vpop.eup %5573  ;;  %v1266_v29 = vmul.f32 0.5, %v5572_v47 }
 0x29a   :  { %v7821_v25 = vadd.f32 %v1279_v46, %v1275_v33  ;;  %v1280_v0 = vmul.f32 %v5574_v54, %v1236_v14  ;;  %v5576_v32 = vpop.eup %5575  ;;  %v10958_v33 = vld [vmem:[#allocation42_spill] sm:$0xff]  ;;  %v10959_v14 = vld [vmem:[#allocation73_spill] sm:$0xff]  ;;  %v10960_v46 = vld [vmem:[#allocation43_spill] sm:$0xff] }
 0x29b   :  { %v1270_v50 = vadd.f32 0.5, %v1266_v29  ;;  %v1267_v12 = vmul.f32 0.5, %v5576_v32  ;;  %v10961_v54 = vld [vmem:[#allocation74_spill] sm:$0xff]  ;;  %v10965_v29 = vld [vmem:[#allocation76_spill] sm:$0xff] }
 0x29c   :  { %5583 = vtanh.f32 %v7821_v25  ;;  %v7824_v40 = vadd.f32 %v1280_v0, %v1276_v41  ;;  %v5578_v52 = vpop.eup %5577  ;;  %v10962_v41 = vld [vmem:[#allocation44_spill] sm:$0xff]  ;;  %v10963_v0 = vld [vmem:[#allocation75_spill] sm:$0xff]  ;;  %v10966_v32 = vld [vmem:[#allocation46_spill] sm:$0xff] }
 0x29d   :  { %v1268_v45 = vmul.f32 0.5, %v5578_v52  ;;  %v1271_v34 = vadd.f32 0.5, %v1267_v12  ;;  %v10967_v52 = vld [vmem:[#allocation77_spill] sm:$0xff]  ;;  %v10974_v12 = vld [vmem:[#allocation50_spill] sm:$0xff] }
 0x29e   :  { %v5580_v56 = vpop.eup %5579  ;;  %5585 = vtanh.f32 %v7824_v40 }
 0x29f   :  { %v1289_v16 = vmul.f32 %v5580_v56, %v1269_v31  ;;  %v1272_v15 = vadd.f32 0.5, %v1268_v45  ;;  %v10968_v56 = vld [vmem:[#allocation47_spill] sm:$0xff]  ;;  %v10969_v31 = vld [vmem:[#allocation78_spill] sm:$0xff]  ;;  %v10975_v45 = vld [vmem:[#allocation81_spill] sm:$0xff] }
 0x2a0   :  { %v5582_v17 = vpop.eup %5581 }
 0x2a1   :  { %v1290_v37 = vmul.f32 %v5582_v17, %v1270_v50  ;;  %v10970_v50 = vld [vmem:[#allocation48_spill] sm:$0xff]  ;;  %v10971_v17 = vld [vmem:[#allocation79_spill] sm:$0xff] }
 0x2a3   :  { %v1293_v38 = vpack.c.bf16 %v1290_v37, %v1289_v16  ;;  %v10972_v16 = vld [vmem:[#allocation49_spill] sm:$0xff]  ;;  %v10973_v37 = vld [vmem:[#allocation80_spill] sm:$0xff] }
 0x2a5   :  { %1669 = vmatmul.mubr.bf16.vlgmr.msra.gmra.mrb[32].mxu0 %v1293_v38  ;;  %1722 = vmatmul.mubr.bf16.vlgmr.msra.gmra.mrb[24].mxu1 %v1293_v38 }
 0x2a6   :  { %v5584_v51 = vpop.eup %5583  ;;  %1832 = vmatpush1.bf16.msra.mxu0 %v7196_v55  ;;  %1885 = vmatpush1.bf16.msra.mxu1 %v7303_v57  ;;  %v10940_v57 = vld [vmem:[#allocation33_spill] sm:$0xff] }
 0x2a7   :  { %1833 = vmatprep.subr.bf16.mxu0 %v7198_v59  ;;  %1886 = vmatprep.subr.bf16.mxu1 %v7306_v58  ;;  %v1291_v23 = vmul.f32 %v5584_v51, %v1271_v34  ;;  %v10925_v59 = vld [vmem:[#allocation56_spill] sm:$0xff]  ;;  %v10977_v34 = vld [vmem:[#allocation82_spill] sm:$0xff]  ;;  %v10979_v51 = vld [vmem:[#allocation83_spill] sm:$0xff] }
 0x2a8   :  { %v5586_v27 = vpop.eup %5585  ;;  %1678 = vmatprep.mubr.bf16.mxu0 %v10901_v13  ;;  %1731 = vmatprep.mubr.bf16.mxu1 %v10901_v13  ;;  %v10941_v58 = vld [vmem:[#allocation64_spill] sm:$0xff] }
 0x2a9   :  { %v1292_v47 = vmul.f32 %v5586_v27, %v1272_v15  ;;  %v10978_v15 = vld [vmem:[#allocation52_spill] sm:$0xff]  ;;  %v10980_v27 = vld [vmem:[#allocation53_spill] sm:$0xff] }
 0x2aa   :  { %1834 = vmatpush1.bf16.msra.mxu0 %v7209_v5  ;;  %1887 = vmatpush1.bf16.msra.mxu1 %v7311_v60  ;;  %v10926_v5 = vld [vmem:[#allocation26_spill] sm:$0xff] }
 0x2ab   :  { %1835 = vmatprep.subr.bf16.mxu0 %v7212_v9  ;;  %1888 = vmatprep.subr.bf16.mxu1 %v7315_v61  ;;  %v1294_v55 = vpack.c.bf16 %v1292_v47, %v1291_v23  ;;  %v10927_v9 = vld [vmem:[#allocation57_spill] sm:$0xff]  ;;  %v10942_v60 = vld [vmem:[#allocation34_spill] sm:$0xff]  ;;  %v10981_v23 = vld [vmem:[#allocation84_spill] sm:$0xff] }
 0x2ac   :  { %v10943_v61 = vld [vmem:[#allocation65_spill] sm:$0xff]  ;;  %v10982_v47 = vld [vmem:[#allocation54_spill] sm:$0xff] }
 0x2ad   :  { %1679 = vmatmul.mubr.bf16.gmra.mrb[36].mxu0 %v1294_v55  ;;  %1732 = vmatmul.mubr.bf16.gmra.mrb[28].mxu1 %v1294_v55 }
 0x2ae   :  { %1836 = vmatpush1.bf16.msra.mxu0 %v7226_v18  ;;  %1889 = vmatpush1.bf16.msra.mxu1 %v7318_v62  ;;  %v10928_v18 = vld [vmem:[#allocation27_spill] sm:$0xff] }
 0x2af   :  { %1837 = vmatprep.subr.bf16.mxu0 %v7229_v21  ;;  %1890 = vmatprep.subr.bf16.mxu1 %v7321_v63  ;;  %v10929_v21 = vld [vmem:[#allocation58_spill] sm:$0xff]  ;;  %v10944_v62 = vld [vmem:[#allocation35_spill] sm:$0xff] }
 0x2b0   :  { %1863 = vmatprep.mubr.bf16.mxu0 %v10901_v13  ;;  %1916 = vmatprep.mubr.bf16.mxu1 %v10901_v13  ;;  %v10945_v63 = vld [vmem:[#allocation66_spill] sm:$0xff] }
 0x2b2   :  { %1838 = vmatpush1.bf16.msra.mxu0 %v7241_v28  ;;  %1891 = vmatpush1.bf16.msra.mxu1 %v7325_v1  ;;  %v10930_v28 = vld [vmem:[#allocation28_spill] sm:$0xff] }
 0x2b3   :  { %1839 = vmatprep.subr.bf16.mxu0 %v7244_v30  ;;  %1892 = vmatprep.subr.bf16.mxu1 %v7329_v2  ;;  %v10931_v30 = vld [vmem:[#allocation59_spill] sm:$0xff]  ;;  %v10946_v1 = vld [vmem:[#allocation36_spill] sm:$0xff] }
 0x2b4   :  { %v10947_v2 = vld [vmem:[#allocation67_spill] sm:$0xff] }
 0x2b6   :  { %1840 = vmatpush1.bf16.msra.mxu0 %v7256_v36  ;;  %1893 = vmatpush1.bf16.msra.mxu1 %v7332_v3  ;;  %v10932_v36 = vld [vmem:[#allocation29_spill] sm:$0xff] }
 0x2b7   :  { %1841 = vmatprep.subr.bf16.mxu0 %v7260_v39  ;;  %1894 = vmatprep.subr.bf16.mxu1 %v7335_v4  ;;  %v10934_v39 = vld [vmem:[#allocation30_spill] sm:$0xff]  ;;  %v10948_v3 = vld [vmem:[#allocation37_spill] sm:$0xff]  ;;  %v10949_v4 = vld [vmem:[#allocation68_spill] sm:$0xff] }
 0x2ba   :  { %1842 = vmatpush1.bf16.msra.mxu0 %v7270_v43  ;;  %1895 = vmatpush1.bf16.msra.mxu1 %v7338_v6  ;;  %v10935_v43 = vld [vmem:[#allocation61_spill] sm:$0xff]  ;;  %v10950_v6 = vld [vmem:[#allocation38_spill] sm:$0xff] }
 0x2bb   :  { %1843 = vmatprep.subr.bf16.mxu0 %v7273_v44  ;;  %1896 = vmatprep.subr.bf16.mxu1 %v7341_v7  ;;  %v10936_v44 = vld [vmem:[#allocation31_spill] sm:$0xff]  ;;  %v10951_v7 = vld [vmem:[#allocation69_spill] sm:$0xff] }
 0x2be   :  { %1844 = vmatpush1.bf16.msra.mxu0 %v7283_v48  ;;  %1897 = vmatpush1.bf16.msra.mxu1 %v7344_v8  ;;  %v10937_v48 = vld [vmem:[#allocation62_spill] sm:$0xff]  ;;  %v10952_v8 = vld [vmem:[#allocation39_spill] sm:$0xff] }
 0x2bf   :  { %1845 = vmatprep.subr.bf16.mxu0 %v7286_v49  ;;  %1898 = vmatprep.subr.bf16.mxu1 %v7347_v10  ;;  %v10938_v49 = vld [vmem:[#allocation32_spill] sm:$0xff]  ;;  %v10953_v10 = vld [vmem:[#allocation70_spill] sm:$0xff] }
 0x2c2   :  { %1846 = vmatpush1.bf16.msra.mxu0 %v7296_v53  ;;  %1899 = vmatpush1.bf16.msra.mxu1 %v7350_v11  ;;  %v10939_v53 = vld [vmem:[#allocation63_spill] sm:$0xff]  ;;  %v10954_v11 = vld [vmem:[#allocation40_spill] sm:$0xff] }
 0x2c3   :  { %2029 = vmatprep.subr.bf16.mxu0 %v7374_v19  ;;  %2082 = vmatprep.subr.bf16.mxu1 %v7379_v20  ;;  %v10955_v19 = vld [vmem:[#allocation71_spill] sm:$0xff]  ;;  %v10956_v20 = vld [vmem:[#allocation41_spill] sm:$0xff] }
 0x2c5   :  { %1864 = vmatmul.mubr.bf16.vlgmr.msra.gmra.mrb[40].mxu0 %v1293_v38  ;;  %1917 = vmatmul.mubr.bf16.vlgmr.msra.gmra.mrb[32].mxu1 %v1293_v38  ;;  %v10976_v38 = vld [vmem:[#allocation51_spill] sm:$0xff] }
 0x2c6   :  { %1873 = vmatprep.mubr.bf16.mxu0 %v10901_v13  ;;  %1926 = vmatprep.mubr.bf16.mxu1 %v10901_v13 }
 0x2c7   :  { %2030 = vmatpush1.bf16.msra.mxu0 %v7578_v35  ;;  %2083 = vmatpush1.bf16.msra.mxu1 %v7384_v26  ;;  %v10933_v35 = vld [vmem:[#allocation60_spill] sm:$0xff] }
 0x2c8   :  { %2031 = vmatprep.subr.bf16.mxu0 %v10925_v59  ;;  %2084 = vmatprep.subr.bf16.mxu1 %v10926_v5  ;;  %v10957_v26 = vld [vmem:[#allocation72_spill] sm:$0xff]  ;;  %v10984_v59 = vld [vmem:[#allocation55_spill] sm:$0xff] }
 0x2c9   :  { %v7927_v5 = vld [vmem:[#allocation7 + $0x4] ss:$16 sps:$4 sm:$0xff]  }
 0x2cb   :  { %2032 = vmatpush1.bf16.msra.mxu0 %v10927_v9  ;;  %2085 = vmatpush1.bf16.msra.mxu1 %v10928_v18  ;;  %v10985_v9 = vld [vmem:[#allocation25_spill] sm:$0xff] }
 0x2cc   :  { %2033 = vmatprep.subr.bf16.mxu0 %v10929_v21  ;;  %2086 = vmatprep.subr.bf16.mxu1 %v10930_v28 }
 0x2cd   :  { %1874 = vmatmul.mubr.bf16.gmra.mrb[44].mxu0 %v1294_v55  ;;  %1927 = vmatmul.mubr.bf16.gmra.mrb[36].mxu1 %v1294_v55  ;;  %v10983_v55 = vld [vmem:[#allocation85_spill] sm:$0xff] }
 0x2cf   :  { %2034 = vmatpush1.bf16.msra.mxu0 %v10931_v30  ;;  %2087 = vmatpush1.bf16.msra.mxu1 %v10932_v36 }
 0x2d0   :  { %2035 = vmatprep.subr.bf16.mxu0 %v10933_v35  ;;  %2088 = vmatprep.subr.bf16.mxu1 %v10934_v39 }
 0x2d3   :  { %2036 = vmatpush1.bf16.msra.mxu0 %v10935_v43  ;;  %2089 = vmatpush1.bf16.msra.mxu1 %v10936_v44  ;;  %v922_v44 = vld [vmem:[%s10540_s12] sm:$0xf] }
 0x2d4   :  { %2037 = vmatprep.subr.bf16.mxu0 %v10937_v48  ;;  %2090 = vmatprep.subr.bf16.mxu1 %v10938_v49  ;;  %v10990_v48 = vld [vmem:[#allocation23_spill] sm:$0xff] }
 0x2d5   :  { %v7943_v49 = vrot.slane %v922_v44, %v10990_v48 }
 0x2d7   :  { %2038 = vmatpush1.bf16.msra.mxu0 %v10939_v53  ;;  %2091 = vmatpush1.bf16.msra.mxu1 %v10940_v57  ;;  %10991 = vst [vmem:[#allocation58_spill] sm:$0xff] %v7943_v49  ;;  %v10992_v53 = vld [vmem:[#allocation22_spill] sm:$0xff] }
 0x2d8   :  { %2039 = vmatprep.subr.bf16.mxu0 %v10941_v58  ;;  %2092 = vmatprep.subr.bf16.mxu1 %v10942_v60  ;;  %v1306_v57 = vsub.s32 2, %v10992_v53  ;;  %v10993_v58 = vld [vmem:[#allocation24_spill] sm:$0xff] }
 0x2d9   :  { %v7947_v60 = vrot.slane %v922_v44, %v10993_v58 }
 0x2db   :  { %2040 = vmatpush1.bf16.msra.mxu0 %v10943_v61  ;;  %2093 = vmatpush1.bf16.msra.mxu1 %v10944_v62  ;;  %10994 = vst [vmem:[#allocation28_spill] sm:$0xff] %v7947_v60 }
 0x2dc   :  { %2041 = vmatprep.subr.bf16.mxu0 %v10945_v63  ;;  %2094 = vmatprep.subr.bf16.mxu1 %v10946_v1  ;;  %v7949_v63 = vrot.slane %v922_v44, %v1306_v57 }
 0x2de   :  { %10995 = vst [vmem:[#allocation59_spill] sm:$0xff] %v7949_v63 }
 0x2df   :  { %2042 = vmatpush1.bf16.msra.mxu0 %v10947_v2  ;;  %2095 = vmatpush1.bf16.msra.mxu1 %v10948_v3 }
 0x2e0   :  { %2043 = vmatprep.subr.bf16.mxu0 %v10949_v4  ;;  %2096 = vmatprep.subr.bf16.mxu1 %v10950_v6 }
 0x2e3   :  { %2044 = vmatpush1.bf16.msra.mxu0 %v10951_v7  ;;  %2097 = vmatpush1.bf16.msra.mxu1 %v10952_v8  ;;  %v1310_v8 = vsub.s32 3, %v10992_v53 }
 0x2e4   :  { %2045 = vmatprep.subr.bf16.mxu0 %v10953_v10  ;;  %2098 = vmatprep.subr.bf16.mxu1 %v10954_v11 }
 0x2e7   :  { %2046 = vmatpush1.bf16.msra.mxu0 %v10955_v19  ;;  %2099 = vmatpush1.bf16.msra.mxu1 %v10956_v20 }
 0x2e8   :  { %2047 = vmatprep.subr.bf16.mxu0 %v10957_v26  ;;  %2100 = vmatprep.subr.bf16.mxu1 %v10958_v33 }
 0x2eb   :  { %2048 = vmatpush1.bf16.msra.mxu0 %v10959_v14  ;;  %2101 = vmatpush1.bf16.msra.mxu1 %v10960_v46 }
 0x2ec   :  { %2049 = vmatprep.subr.bf16.mxu0 %v10961_v54  ;;  %2102 = vmatprep.subr.bf16.mxu1 %v10962_v41  ;;  %v7957_v41 = vrot.slane %v922_v44, %v1310_v8 }
 0x2ee   :  { %10996 = vst [vmem:[#allocation29_spill] sm:$0xff] %v7957_v41 }
 0x2ef   :  { %2050 = vmatpush1.bf16.msra.mxu0 %v10963_v0  ;;  %2103 = vmatpush1.bf16.msra.mxu1 %v10964_v22 }
 0x2f0   :  { %2051 = vmatprep.subr.bf16.mxu0 %v10965_v29  ;;  %2104 = vmatprep.subr.bf16.mxu1 %v10966_v32 }
 0x2f3   :  { %2052 = vmatpush1.bf16.msra.mxu0 %v10967_v52  ;;  %2105 = vmatpush1.bf16.msra.mxu1 %v10968_v56 }
 0x2f4   :  { %2053 = vmatprep.subr.bf16.mxu0 %v10969_v31  ;;  %2106 = vmatprep.subr.bf16.mxu1 %v10970_v50 }
 0x2f7   :  { %2054 = vmatpush1.bf16.msra.mxu0 %v10971_v17  ;;  %2107 = vmatpush1.bf16.msra.mxu1 %v10972_v16 }
 0x2f8   :  { %2055 = vmatprep.subr.bf16.mxu0 %v10973_v37  ;;  %2108 = vmatprep.subr.bf16.mxu1 %v10974_v12 }
 0x2fb   :  { %2056 = vmatpush1.bf16.msra.mxu0 %v10975_v45  ;;  %2109 = vmatpush1.bf16.msra.mxu1 %v10976_v38 }
 0x2fc   :  { %2057 = vmatprep.subr.bf16.mxu0 %v10977_v34  ;;  %2110 = vmatprep.subr.bf16.mxu1 %v10978_v15 }
 0x2ff   :  { %2058 = vmatpush1.bf16.msra.mxu0 %v10979_v51  ;;  %2111 = vmatpush1.bf16.msra.mxu1 %v10980_v27 }
 0x300   :  { %2059 = vmatprep.subr.bf16.mxu0 %v10981_v23  ;;  %2112 = vmatprep.subr.bf16.mxu1 %v10982_v47 }
 0x303   :  { %2060 = vmatpush1.bf16.msra.mxu0 %v10983_v55  ;;  %2113 = vmatpush1.bf16.msra.mxu1 %v10984_v59 }
 0x304   :  { %2224 = vmatprep.subr.bf16.mxu0 %v7927_v5  ;;  %2277 = vmatprep.subr.bf16.mxu1 %v10985_v9 }
 0x31e   :  { %v7931_v18 = vpop.f32.mrb[24].mxu0 }
 0x31f   :  { %10986 = vst [vmem:[#allocation56_spill] sm:$0xff] %v7931_v18  ;;  %v805_v21 = vpop.f32.mrb[25].mxu0  ;;  %v8273_v18 = vld [vmem:[%s10539_s11 + $0x88] ss:$16 sps:$4 sm:$0xff]  }
 0x320   :  { %11020 = vst [vmem:[#allocation41_spill] sm:$0xff] %v8273_v18 }
 0x322   :  { %v7933_v28 = vpop.f32.mrb[26].mxu0 }
 0x323   :  { %10987 = vst [vmem:[#allocation26_spill] sm:$0xff] %v7933_v28  ;;  %v810_v30 = vpop.f32.mrb[27].mxu0  ;;  %v8267_v28 = vld [vmem:[%s10539_s11 + $0x80] ss:$16 sps:$4 sm:$0xff]  }
 0x324   :  { %11019 = vst [vmem:[#allocation71_spill] sm:$0xff] %v8267_v28 }
 0x326   :  { %v7935_v36 = vpop.f32.mrb[28].mxu0 }
 0x327   :  { %10988 = vst [vmem:[#allocation57_spill] sm:$0xff] %v7935_v36  ;;  %v815_v35 = vpop.f32.mrb[29].mxu0  ;;  %v8261_v36 = vld [vmem:[%s10539_s11 + $0x8c] ss:$16 sps:$4 sm:$0xff]  }
 0x328   :  { %11018 = vst [vmem:[#allocation40_spill] sm:$0xff] %v8261_v36 }
 0x32a   :  { %v7937_v39 = vpop.f32.mrb[30].mxu0 }
 0x32b   :  { %10989 = vst [vmem:[#allocation27_spill] sm:$0xff] %v7937_v39  ;;  %v820_v43 = vpop.f32.mrb[31].mxu0  ;;  %v8255_v39 = vld [vmem:[%s10539_s11 + $0x84] ss:$16 sps:$4 sm:$0xff]  }
 0x32c   :  { %11017 = vst [vmem:[#allocation70_spill] sm:$0xff] %v8255_v39 }
 0x378   :  { %v1670_v61 = vpop.f32.mrb[32].mxu0  ;;  %v1723_v62 = vpop.f32.mrb[24].mxu1 }
 0x379   :  { %v1671_v1 = vadd.f32 %v1670_v61, %v7943_v49  ;;  %v1672_v2 = vpop.f32.mrb[33].mxu0  ;;  %v1725_v3 = vpop.f32.mrb[25].mxu1  ;;  %v1724_v14 = vadd.f32 %v1723_v62, %v7949_v63 }
 0x37a   :  { %v1673_v4 = vadd.f32 %v1672_v2, %v7947_v60  ;;  %v1674_v6 = vpop.f32.mrb[34].mxu0  ;;  %v1727_v7 = vpop.f32.mrb[26].mxu1  ;;  %v1726_v16 = vadd.f32 %v1725_v3, %v7957_v41 }
 0x37b   :  { %v1742_v10 = vmul.f32 0.5, %v1671_v1  ;;  %v1675_v11 = vadd.f32 %v1674_v6, %v7943_v49  ;;  %v1676_v19 = vpop.f32.mrb[35].mxu0  ;;  %v1729_v20 = vpop.f32.mrb[27].mxu1  ;;  %v1728_v0 = vadd.f32 %v1727_v7, %v7949_v63 }
 0x37c   :  { %v1758_v26 = vmul.f32 0.5, %v1673_v4  ;;  %v1677_v33 = vadd.f32 %v1676_v19, %v7947_v60  ;;  %v1730_v51 = vadd.f32 %v1729_v20, %v7957_v41  ;;  %v1778_v59 = vmul.f32 0.5, %v1726_v16 }
 0x37d   :  { %5587 = vtanh.f32 %v1742_v10  ;;  %v1743_v46 = vmul.f32 0.5, %v1675_v11 }
 0x37e   :  { %5589 = vtanh.f32 %v1758_v26  ;;  %v1759_v54 = vmul.f32 0.5, %v1677_v33  ;;  %v1779_v43 = vmul.f32 0.5, %v1730_v51 }
 0x37f   :  { %5591 = vtanh.f32 %v1743_v46 }
 0x380   :  { %v1680_v22 = vpop.f32.mrb[36].mxu0  ;;  %v1733_v29 = vpop.f32.mrb[28].mxu1  ;;  %5593 = vtanh.f32 %v1724_v14 }
 0x381   :  { %v1681_v32 = vadd.f32 %v1680_v22, %v7943_v49  ;;  %v1682_v52 = vpop.f32.mrb[37].mxu0  ;;  %v1735_v56 = vpop.f32.mrb[29].mxu1  ;;  %5595 = vtanh.f32 %v1759_v54  ;;  %v1734_v27 = vadd.f32 %v1733_v29, %v7949_v63 }
 0x382   :  { %v1683_v31 = vadd.f32 %v1682_v52, %v7947_v60  ;;  %v1684_v50 = vpop.f32.mrb[38].mxu0  ;;  %v1737_v17 = vpop.f32.mrb[30].mxu1  ;;  %5597 = vtanh.f32 %v1728_v0  ;;  %v1736_v53 = vadd.f32 %v1735_v56, %v7957_v41 }
 0x383   :  { %v1744_v37 = vmul.f32 0.5, %v1681_v32  ;;  %v1685_v12 = vadd.f32 %v1684_v50, %v7943_v49  ;;  %v1686_v45 = vpop.f32.mrb[39].mxu0  ;;  %v1739_v38 = vpop.f32.mrb[31].mxu1  ;;  %v1738_v30 = vadd.f32 %v1737_v17, %v7949_v63 }
 0x384   :  { %v1760_v34 = vmul.f32 0.5, %v1683_v31  ;;  %v1687_v15 = vadd.f32 %v1686_v45, %v7947_v60  ;;  %v1740_v2 = vadd.f32 %v1739_v38, %v7957_v41  ;;  %v1780_v8 = vmul.f32 0.5, %v1736_v53  ;;  %v4967_v38 = vld [vmem:[%s10913_s30 + $0x80] sm:$0xff] }
 0x385   :  { %5599 = vtanh.f32 %v1744_v37  ;;  %v1745_v23 = vmul.f32 0.5, %v1685_v12 }
 0x386   :  { %5601 = vtanh.f32 %v1760_v34  ;;  %v1761_v47 = vmul.f32 0.5, %v1687_v15  ;;  %v1781_v14 = vmul.f32 0.5, %v1740_v2 }
 0x387   :  { %v5588_v55 = vpop.eup %5587  ;;  %5603 = vtanh.f32 %v1745_v23  ;;  %v4968_v23 = vld [vmem:[%s10913_s30 + $0x88] sm:$0xff] }
 0x388   :  { %v5590_v9 = vpop.eup %5589  ;;  %v1750_v21 = vmul.f32 0.5, %v5588_v55  ;;  %5605 = vtanh.f32 %v1734_v27 }
 0x389   :  { %v1766_v35 = vmul.f32 0.5, %v5590_v9  ;;  %v5592_v44 = vpop.eup %5591  ;;  %5607 = vtanh.f32 %v1761_v47 }
 0x38a   :  { %v1754_v48 = vadd.f32 0.5, %v1750_v21  ;;  %v5594_v57 = vpop.eup %5593  ;;  %5609 = vtanh.f32 %v1778_v59  ;;  %v1751_v61 = vmul.f32 0.5, %v5592_v44  ;;  %v4971_v59 = vld [vmem:[%s10913_s30 + $0xa0] sm:$0xff] }
 0x38b   :  { %v1770_v58 = vadd.f32 0.5, %v1766_v35  ;;  %v5596_v62 = vpop.eup %5595  ;;  %5611 = vtanh.f32 %v1738_v30 }
 0x38c   :  { %v1798_v1 = vmul.f32 %v5594_v57, %v1754_v48  ;;  %v1755_v4 = vadd.f32 0.5, %v1751_v61  ;;  %v1767_v6 = vmul.f32 0.5, %v5596_v62  ;;  %5613 = vtanh.f32 %v1779_v43  ;;  %v5598_v7 = vpop.eup %5597  ;;  %v4972_v43 = vld [vmem:[%s10913_s30 + $0xa8] sm:$0xff] }
 0x38d   :  { %v1794_v3 = vmul.f32 0.0, %v1770_v58  ;;  %5615 = vtanh.f32 %v1780_v8 }
 0x38e   :  { %v1771_v19 = vadd.f32 0.5, %v1767_v6  ;;  %v1799_v20 = vmul.f32 %v5598_v7, %v1755_v4 }
 0x38f   :  { %v5600_v10 = vpop.eup %5599  ;;  %v7970_v11 = vadd.f32 %v1798_v1, %v1794_v3  ;;  %v4969_v1 = vld [vmem:[%s10913_s30 + $0x90] sm:$0xff] }
 0x390   :  { %v5602_v26 = vpop.eup %5601  ;;  %v1752_v33 = vmul.f32 0.5, %v5600_v10  ;;  %v1795_v46 = vmul.f32 0.0, %v1771_v19 }
 0x391   :  { %v1768_v54 = vmul.f32 0.5, %v5602_v26  ;;  %v5604_v0 = vpop.eup %5603  ;;  %5617 = vtanh.f32 %v7970_v11 }
 0x392   :  { %v1756_v22 = vadd.f32 0.5, %v1752_v33  ;;  %v5606_v29 = vpop.eup %5605  ;;  %v7973_v32 = vadd.f32 %v1799_v20, %v1795_v46  ;;  %v1753_v56 = vmul.f32 0.5, %v5604_v0  ;;  %5619 = vtanh.f32 %v1781_v14  ;;  %v4973_v20 = vld [vmem:[%s10913_s30 + $0xb0] sm:$0xff] }
 0x393   :  { %v1772_v52 = vadd.f32 0.5, %v1768_v54  ;;  %v5608_v31 = vpop.eup %5607  ;;  %v4975_v54 = vld [vmem:[%s10913_s30 + $0xc0] sm:$0xff] }
 0x394   :  { %v1800_v50 = vmul.f32 %v5606_v29, %v1756_v22  ;;  %v5610_v17 = vpop.eup %5609  ;;  %5621 = vtanh.f32 %v7973_v32  ;;  %v1757_v37 = vadd.f32 0.5, %v1753_v56  ;;  %v1769_v12 = vmul.f32 0.5, %v5608_v31  ;;  %v4970_v22 = vld [vmem:[%s10913_s30 + $0x98] sm:$0xff] }
 0x395   :  { %v1796_v16 = vmul.f32 0.0, %v1772_v52  ;;  %v5612_v45 = vpop.eup %5611  ;;  %v1786_v44 = vmul.f32 0.5, %v5610_v17  ;;  %v4976_v52 = vld [vmem:[%s10913_s30 + $0xc8] sm:$0xff]  ;;  %v4974_v31 = vld [vmem:[%s10913_s30 + $0xb8] sm:$0xff] }
 0x396   :  { %v5614_v34 = vpop.eup %5613  ;;  %v1773_v51 = vadd.f32 0.5, %v1769_v12  ;;  %v1801_v27 = vmul.f32 %v5612_v45, %v1757_v37 }
 0x397   :  { %v7979_v15 = vadd.f32 %v1800_v50, %v1796_v16  ;;  %v1787_v48 = vmul.f32 0.5, %v5614_v34  ;;  %v5616_v6 = vpop.eup %5615  ;;  %v1790_v33 = vadd.f32 0.5, %v1786_v44  ;;  %v4979_v16 = vld [vmem:[%s10913_s30 + $0xe0] sm:$0xff] }
 0x398   :  { %v1865_v47 = vpop.f32.mrb[40].mxu0  ;;  %v1918_v55 = vpop.f32.mrb[32].mxu1  ;;  %v1797_v9 = vmul.f32 0.0, %v1773_v51  ;;  %v1788_v45 = vmul.f32 0.5, %v5616_v6  ;;  %v4977_v51 = vld [vmem:[%s10913_s30 + $0xd0] sm:$0xff] }
 0x399   :  { %v1937_v21 = vadd.f32 %v4967_v38, %v1865_v47  ;;  %v1867_v30 = vpop.f32.mrb[41].mxu0  ;;  %v1920_v35 = vpop.f32.mrb[33].mxu1  ;;  %5623 = vtanh.f32 %v7979_v15  ;;  %v1791_v14 = vadd.f32 0.5, %v1787_v48  ;;  %v1939_v46 = vadd.f32 %v4969_v1, %v1918_v55  ;;  %v4980_v47 = vld [vmem:[%s10913_s30 + $0xe8] sm:$0xff] }
 0x39a   :  { %v1938_v53 = vadd.f32 %v4968_v23, %v1867_v30  ;;  %v1869_v57 = vpop.f32.mrb[42].mxu0  ;;  %v1922_v58 = vpop.f32.mrb[34].mxu1  ;;  %v7991_v61 = vadd.f32 %v1801_v27, %v1797_v9  ;;  %v1940_v55 = vadd.f32 %v4970_v22, %v1920_v35  ;;  %v1792_v35 = vadd.f32 0.5, %v1788_v45 }
 0x39b   :  { %v1953_v62 = vmul.f32 0.5, %v1937_v21  ;;  %v1941_v2 = vadd.f32 %v4971_v59, %v1869_v57  ;;  %v1871_v3 = vpop.f32.mrb[43].mxu0  ;;  %v1924_v4 = vpop.f32.mrb[35].mxu1  ;;  %v1943_v56 = vadd.f32 %v4973_v20, %v1922_v58 }
 0x39c   :  { %v1969_v7 = vmul.f32 0.5, %v1938_v53  ;;  %v1942_v8 = vadd.f32 %v4972_v43, %v1871_v3  ;;  %v5618_v10 = vpop.eup %5617  ;;  %5625 = vtanh.f32 %v7991_v61  ;;  %v1944_v43 = vadd.f32 %v4974_v31, %v1924_v4  ;;  %v4981_v4 = vld [vmem:[%s10913_s30 + $0xf0] sm:$0xff] }
 0x39d   :  { %v1954_v19 = vmul.f32 0.5, %v1941_v2  ;;  %v5620_v26 = vpop.eup %5619  ;;  %5627 = vtanh.f32 %v1953_v62  ;;  %v1810_v37 = vmul.f32 %v5618_v10, %v1790_v33  ;;  %v4978_v10 = vld [vmem:[%s10913_s30 + $0xd8] sm:$0xff] }
 0x39e   :  { %v5622_v0 = vpop.eup %5621  ;;  %5629 = vtanh.f32 %v1969_v7  ;;  %v1970_v29 = vmul.f32 0.5, %v1942_v8  ;;  %v1789_v38 = vmul.f32 0.5, %v5620_v26  ;;  %v1989_v7 = vmul.f32 0.5, %v1940_v55 }
 0x39f   :  { %v1811_v12 = vmul.f32 %v5622_v0, %v1791_v14  ;;  %5631 = vtanh.f32 %v1954_v19  ;;  %v1990_v26 = vmul.f32 0.5, %v1944_v43 }
 0x3a0   :  { %v1875_v50 = vpop.f32.mrb[44].mxu0  ;;  %v1928_v17 = vpop.f32.mrb[36].mxu1  ;;  %5633 = vtanh.f32 %v1939_v46  ;;  %v1793_v6 = vadd.f32 0.5, %v1789_v38 }
 0x3a1   :  { %v1945_v34 = vadd.f32 %v4975_v54, %v1875_v50  ;;  %v1877_v27 = vpop.f32.mrb[45].mxu0  ;;  %v1930_v23 = vpop.f32.mrb[37].mxu1  ;;  %v2027_v30 = vpack.c.bf16 %v1811_v12, %v1810_v37  ;;  %5635 = vtanh.f32 %v1970_v29  ;;  %v1947_v58 = vadd.f32 %v4977_v51, %v1928_v17 }
 0x3a2   :  { %v1946_v59 = vadd.f32 %v4976_v52, %v1877_v27  ;;  %v1879_v9 = vpop.f32.mrb[46].mxu0  ;;  %v1932_v21 = vpop.f32.mrb[38].mxu1  ;;  %5637 = vtanh.f32 %v1943_v56  ;;  %v1948_v29 = vadd.f32 %v4978_v10, %v1930_v23  ;;  %v4982_v52 = vld [vmem:[%s10913_s30 + $0xf8] sm:$0xff] }
 0x3a3   :  { %v1955_v44 = vmul.f32 0.5, %v1945_v34  ;;  %v1949_v48 = vadd.f32 %v4979_v16, %v1879_v9  ;;  %v1881_v53 = vpop.f32.mrb[47].mxu0  ;;  %v1934_v57 = vpop.f32.mrb[39].mxu1  ;;  %2061 = vmatprep.mubr.bf16.mxu0 %v2027_v30  ;;  %2114 = vmatprep.mubr.bf16.mxu1 %v2027_v30  ;;  %v1951_v0 = vadd.f32 %v4981_v4, %v1932_v21 }
 0x3a4   :  { %v1971_v62 = vmul.f32 0.5, %v1946_v59  ;;  %v1950_v1 = vadd.f32 %v4980_v47, %v1881_v53  ;;  %v5624_v2 = vpop.eup %5623  ;;  %v1952_v38 = vadd.f32 %v4982_v52, %v1934_v57  ;;  %v1991_v47 = vmul.f32 0.5, %v1948_v29 }
 0x3a5   :  { %5639 = vtanh.f32 %v1955_v44  ;;  %v1956_v3 = vmul.f32 0.5, %v1949_v48  ;;  %v1812_v33 = vmul.f32 %v5624_v2, %v1792_v35 }
 0x3a6   :  { %v5626_v8 = vpop.eup %5625  ;;  %5641 = vtanh.f32 %v1971_v62  ;;  %v1972_v19 = vmul.f32 0.5, %v1950_v1  ;;  %v1992_v44 = vmul.f32 0.5, %v1952_v38  ;;  %v8055_v38 = vld [vmem:[#allocation7 + $0x8] ss:$16 sps:$4 sm:$0xff]  }
 0x3a7   :  { %v5628_v20 = vpop.eup %5627  ;;  %5643 = vtanh.f32 %v1947_v58  ;;  %v1813_v14 = vmul.f32 %v5626_v8, %v1793_v6 }
 0x3a8   :  { %v5630_v46 = vpop.eup %5629  ;;  %v1961_v54 = vmul.f32 0.5, %v5628_v20  ;;  %5645 = vtanh.f32 %v1956_v3 }
 0x3a9   :  { %v1977_v22 = vmul.f32 0.5, %v5630_v46  ;;  %5647 = vtanh.f32 %v1989_v7  ;;  %v8030_v56 = vpack.c.bf16 %v1813_v14, %v1812_v33  ;;  %v5632_v31 = vpop.eup %5631 }
 0x3aa   :  { %v1965_v50 = vadd.f32 0.5, %v1961_v54  ;;  %5649 = vtanh.f32 %v1972_v19  ;;  %v5634_v17 = vpop.eup %5633  ;;  %v1962_v37 = vmul.f32 0.5, %v5632_v31 }
 0x3ab   :  { %v1981_v16 = vadd.f32 0.5, %v1977_v22  ;;  %5651 = vtanh.f32 %v1990_v26  ;;  %v5636_v12 = vpop.eup %5635 }
 0x3ac   :  { %v2009_v45 = vmul.f32 %v5634_v17, %v1965_v50  ;;  %5653 = vtanh.f32 %v1951_v0  ;;  %v5638_v34 = vpop.eup %5637  ;;  %v1966_v27 = vadd.f32 0.5, %v1962_v37  ;;  %v1978_v23 = vmul.f32 0.5, %v5636_v12 }
 0x3ad   :  { %v2005_v51 = vmul.f32 %v1981_v16, %v7815_v42  ;;  %5655 = vtanh.f32 %v1991_v47  ;;  %v8063_v47 = vld [vmem:[#allocation7 + $0x2c] ss:$16 sps:$4 sm:$0xff]  }
 0x3ae   :  { %v1982_v9 = vadd.f32 0.5, %v1978_v23  ;;  %v2010_v21 = vmul.f32 %v5638_v34, %v1966_v27  ;;  %v8060_v23 = vld [vmem:[#allocation7 + $0x24] ss:$16 sps:$4 sm:$0xff]  }
 0x3af   :  { %v5640_v55 = vpop.eup %5639  ;;  %v8033_v59 = vadd.f32 %v2009_v45, %v2005_v51  ;;  %v8052_v45 = vld [vmem:[#allocation7] ss:$16 sps:$4 sm:$0xff]  }
 0x3b0   :  { %v1963_v30 = vmul.f32 0.5, %v5640_v55  ;;  %v5642_v43 = vpop.eup %5641  ;;  %v2006_v53 = vmul.f32 %v1982_v9, %v7818_v24 }
 0x3b1   :  { %v5644_v48 = vpop.eup %5643  ;;  %v1979_v62 = vmul.f32 0.5, %v5642_v43  ;;  %5657 = vtanh.f32 %v8033_v59  ;;  %v8075_v43 = vld [vmem:[#allocation7 + $0x4c] ss:$16 sps:$4 sm:$0xff]  }
 0x3b2   :  { %v1967_v58 = vadd.f32 0.5, %v1963_v30  ;;  %v5646_v57 = vpop.eup %5645  ;;  %v8037_v1 = vadd.f32 %v2010_v21, %v2006_v53  ;;  %5659 = vtanh.f32 %v1992_v44  ;;  %v8066_v21 = vld [vmem:[#allocation7 + $0x20] ss:$16 sps:$4 sm:$0xff]   ;;  %v8069_v30 = vld [vmem:[#allocation7 + $0x28] ss:$16 sps:$4 sm:$0xff]  }
 0x3b3   :  { %v5648_v42 = vpop.eup %5647  ;;  %v1983_v2 = vadd.f32 0.5, %v1979_v62  ;;  %v1964_v35 = vmul.f32 0.5, %v5646_v57  ;;  %v8085_v53 = vld [vmem:[#allocation7 + $0x48] ss:$16 sps:$4 sm:$0xff]   ;;  %v8091_v62 = vld [vmem:[#allocation7 + $0x6c] ss:$16 sps:$4 sm:$0xff]  }
 0x3b4   :  { %v2011_v3 = vmul.f32 %v5644_v48, %v1967_v58  ;;  %v5650_v6 = vpop.eup %5649  ;;  %5661 = vtanh.f32 %v8037_v1  ;;  %v1997_v14 = vmul.f32 0.5, %v5648_v42  ;;  %v8082_v48 = vld [vmem:[#allocation7 + $0x40] ss:$16 sps:$4 sm:$0xff]   ;;  %v8088_v58 = vld [vmem:[#allocation7 + $0x64] ss:$16 sps:$4 sm:$0xff]  }
 0x3b5   :  { %v5652_v7 = vpop.eup %5651  ;;  %v2007_v4 = vmul.f32 %v1983_v2, %v7821_v25  ;;  %v1968_v24 = vadd.f32 0.5, %v1964_v35  ;;  %v1980_v8 = vmul.f32 0.5, %v5650_v6  ;;  %v8096_v57 = vld [vmem:[#allocation7 + $0x60] ss:$16 sps:$4 sm:$0xff]   ;;  %v8099_v42 = vld [vmem:[#allocation7 + $0x68] ss:$16 sps:$4 sm:$0xff]  }
 0x3b6   :  { %v5654_v10 = vpop.eup %5653  ;;  %v1998_v46 = vmul.f32 0.5, %v5652_v7  ;;  %v2001_v29 = vadd.f32 0.5, %v1997_v14  ;;  %v8102_v2 = vld [vmem:[#allocation7 + $0x84] ss:$16 sps:$4 sm:$0xff]   ;;  %v8108_v35 = vld [vmem:[#allocation7 + $0x80] ss:$16 sps:$4 sm:$0xff]  }
 0x3b7   :  { %v8041_v19 = vadd.f32 %v2011_v3, %v2007_v4  ;;  %v1984_v20 = vadd.f32 0.5, %v1980_v8  ;;  %v2012_v26 = vmul.f32 %v5654_v10, %v1968_v24  ;;  %v5656_v54 = vpop.eup %5655  ;;  %v8105_v3 = vld [vmem:[#allocation7 + $0x8c] ss:$16 sps:$4 sm:$0xff]   ;;  %v8111_v6 = vld [vmem:[#allocation7 + $0x88] ss:$16 sps:$4 sm:$0xff]  }
 0x3b8   :  { %v2002_v52 = vadd.f32 0.5, %v1998_v46  ;;  %v1999_v37 = vmul.f32 0.5, %v5656_v54  ;;  %v8114_v7 = vld [vmem:[#allocation7 + $0xa4] ss:$16 sps:$4 sm:$0xff]   ;;  %v8117_v4 = vld [vmem:[#allocation7 + $0xac] ss:$16 sps:$4 sm:$0xff]  }
 0x3b9   :  { %v2008_v33 = vmul.f32 %v1984_v20, %v7824_v40  ;;  %5663 = vtanh.f32 %v8041_v19  ;;  %v8120_v24 = vld [vmem:[#allocation7 + $0xa0] ss:$16 sps:$4 sm:$0xff]   ;;  %v8123_v8 = vld [vmem:[#allocation7 + $0xa8] ss:$16 sps:$4 sm:$0xff]   ;;  %v8126_v10 = vld [vmem:[#allocation7 + $0xc4] ss:$16 sps:$4 sm:$0xff]  }
 0x3ba   :  { %v2003_v34 = vadd.f32 0.5, %v1999_v37  ;;  %v8129_v20 = vld [vmem:[#allocation7 + $0xcc] ss:$16 sps:$4 sm:$0xff]   ;;  %v8138_v14 = vld [vmem:[#allocation7 + $0xe4] ss:$16 sps:$4 sm:$0xff]  }
 0x3bb   :  { %v8045_v0 = vadd.f32 %v2012_v26, %v2008_v33  ;;  %v5658_v22 = vpop.eup %5657  ;;  %v8132_v26 = vld [vmem:[#allocation7 + $0xc0] ss:$16 sps:$4 sm:$0xff]   ;;  %v8135_v33 = vld [vmem:[#allocation7 + $0xc8] ss:$16 sps:$4 sm:$0xff]   ;;  %10997 = vst [vmem:[#allocation60_spill] sm:$0xff] %v8138_v14 }
 0x3bc   :  { %v5660_v25 = vpop.eup %5659  ;;  %v2021_v50 = vmul.f32 %v5658_v22, %v2001_v29  ;;  %v8141_v46 = vld [vmem:[#allocation7 + $0xec] ss:$16 sps:$4 sm:$0xff]   ;;  %v8144_v54 = vld [vmem:[#allocation7 + $0xe0] ss:$16 sps:$4 sm:$0xff]   ;;  %v8147_v22 = vld [vmem:[#allocation7 + $0xe8] ss:$16 sps:$4 sm:$0xff]  }
 0x3bd   :  { %5665 = vtanh.f32 %v8045_v0  ;;  %v2000_v40 = vmul.f32 0.5, %v5660_v25  ;;  %10998 = vst [vmem:[#allocation30_spill] sm:$0xff] %v8141_v46  ;;  %10999 = vst [vmem:[#allocation61_spill] sm:$0xff] %v8144_v54  ;;  %v8153_v25 = vld [vmem:[%s10539_s11 + $0x4] ss:$16 sps:$4 sm:$0xff]  }
 0x3be   :  { %v5662_v31 = vpop.eup %5661  ;;  %11000 = vst [vmem:[#allocation31_spill] sm:$0xff] %v8147_v22  ;;  %11001 = vst [vmem:[#allocation62_spill] sm:$0xff] %v8153_v25  ;;  %v8159_v29 = vld [vmem:[%s10539_s11 + $0xc] ss:$16 sps:$4 sm:$0xff]   ;;  %v8199_v37 = vld [vmem:[%s10539_s11 + $0x28] ss:$16 sps:$4 sm:$0xff]  }
 0x3bf   :  { %v2022_v17 = vmul.f32 %v5662_v31, %v2002_v52  ;;  %v2004_v51 = vadd.f32 0.5, %v2000_v40  ;;  %11002 = vst [vmem:[#allocation32_spill] sm:$0xff] %v8159_v29  ;;  %v8169_v52 = vld [vmem:[%s10539_s11] ss:$16 sps:$4 sm:$0xff]   ;;  %v8175_v31 = vld [vmem:[%s10539_s11 + $0x8] ss:$16 sps:$4 sm:$0xff]  }
 0x3c0   :  { %11003 = vst [vmem:[#allocation63_spill] sm:$0xff] %v8169_v52  ;;  %11004 = vst [vmem:[#allocation33_spill] sm:$0xff] %v8175_v31  ;;  %v8205_v40 = vld [vmem:[%s10539_s11 + $0x44] ss:$16 sps:$4 sm:$0xff]  }
 0x3c1   :  { %v8048_v16 = vpack.c.bf16 %v2022_v17, %v2021_v50  ;;  %v8181_v50 = vld [vmem:[%s10539_s11 + $0x24] ss:$16 sps:$4 sm:$0xff]   ;;  %v8187_v17 = vld [vmem:[%s10539_s11 + $0x2c] ss:$16 sps:$4 sm:$0xff]   ;;  %11008 = vst [vmem:[#allocation35_spill] sm:$0xff] %v8199_v37  ;;  %11009 = vst [vmem:[#allocation66_spill] sm:$0xff] %v8205_v40 }
 0x3c2   :  { %11005 = vst [vmem:[#allocation64_spill] sm:$0xff] %v8181_v50  ;;  %11006 = vst [vmem:[#allocation34_spill] sm:$0xff] %v8187_v17 }
 0x3c3   :  { %2062 = vmatmul.mubr.bf16.vlgmr.msra.gmra.mrb[48].mxu0 %v8048_v16  ;;  %2115 = vmatmul.mubr.bf16.vlgmr.msra.gmra.mrb[40].mxu1 %v8048_v16  ;;  %v5664_v12 = vpop.eup %5663 }
 0x3c4   :  { %2225 = vmatpush1.bf16.msra.mxu0 %v8052_v45  ;;  %2278 = vmatpush1.bf16.msra.mxu1 %v8055_v38  ;;  %v2023_v55 = vmul.f32 %v5664_v12, %v2003_v34  ;;  %v8211_v12 = vld [vmem:[%s10539_s11 + $0x4c] ss:$16 sps:$4 sm:$0xff]   ;;  %v8219_v34 = vld [vmem:[%s10539_s11 + $0x40] ss:$16 sps:$4 sm:$0xff]  }
 0x3c5   :  { %2071 = vmatprep.mubr.bf16.mxu0 %v8030_v56  ;;  %2124 = vmatprep.mubr.bf16.mxu1 %v8030_v56  ;;  %v8072_v56 = vld [vmem:[#allocation7 + $0x44] ss:$16 sps:$4 sm:$0xff]   ;;  %11010 = vst [vmem:[#allocation36_spill] sm:$0xff] %v8211_v12  ;;  %11011 = vst [vmem:[#allocation67_spill] sm:$0xff] %v8219_v34 }
 0x3c6   :  { %2226 = vmatprep.subr.bf16.mxu0 %v8060_v23  ;;  %2279 = vmatprep.subr.bf16.mxu1 %v8063_v47 }
 0x3c7   :  { %v5666_v27 = vpop.eup %5665 }
 0x3c8   :  { %v2024_v9 = vmul.f32 %v5666_v27, %v2004_v51  ;;  %2227 = vmatpush1.bf16.msra.mxu0 %v8066_v21  ;;  %2280 = vmatpush1.bf16.msra.mxu1 %v8069_v30  ;;  %v8225_v51 = vld [vmem:[%s10539_s11 + $0x48] ss:$16 sps:$4 sm:$0xff]   ;;  %v8231_v27 = vld [vmem:[%s10539_s11 + $0x64] ss:$16 sps:$4 sm:$0xff]  }
 0x3c9   :  { %2228 = vmatprep.subr.bf16.mxu0 %v8072_v56  ;;  %2281 = vmatprep.subr.bf16.mxu1 %v8075_v43  ;;  %11012 = vst [vmem:[#allocation37_spill] sm:$0xff] %v8225_v51  ;;  %11013 = vst [vmem:[#allocation68_spill] sm:$0xff] %v8231_v27 }
 0x3ca   :  { %v8078_v44 = vpack.c.bf16 %v2024_v9, %v2023_v55  ;;  %v8237_v55 = vld [vmem:[%s10539_s11 + $0x6c] ss:$16 sps:$4 sm:$0xff]   ;;  %v8243_v9 = vld [vmem:[%s10539_s11 + $0x60] ss:$16 sps:$4 sm:$0xff]  }
 0x3cb   :  { %11014 = vst [vmem:[#allocation38_spill] sm:$0xff] %v8237_v55  ;;  %11015 = vst [vmem:[#allocation69_spill] sm:$0xff] %v8243_v9 }
 0x3cc   :  { %2072 = vmatmul.mubr.bf16.gmra.mrb[52].mxu0 %v8078_v44  ;;  %2125 = vmatmul.mubr.bf16.gmra.mrb[44].mxu1 %v8078_v44 }
 0x3cd   :  { %2229 = vmatpush1.bf16.msra.mxu0 %v8082_v48  ;;  %2282 = vmatpush1.bf16.msra.mxu1 %v8085_v53 }
 0x3ce   :  { %2230 = vmatprep.subr.bf16.mxu0 %v8088_v58  ;;  %2283 = vmatprep.subr.bf16.mxu1 %v8091_v62 }
 0x3cf   :  { %2256 = vmatprep.mubr.bf16.mxu0 %v10901_v13  ;;  %2309 = vmatprep.mubr.bf16.mxu1 %v10901_v13 }
 0x3d1   :  { %2231 = vmatpush1.bf16.msra.mxu0 %v8096_v57  ;;  %2284 = vmatpush1.bf16.msra.mxu1 %v8099_v42 }
 0x3d2   :  { %2232 = vmatprep.subr.bf16.mxu0 %v8102_v2  ;;  %2285 = vmatprep.subr.bf16.mxu1 %v8105_v3 }
 0x3d5   :  { %2233 = vmatpush1.bf16.msra.mxu0 %v8108_v35  ;;  %2286 = vmatpush1.bf16.msra.mxu1 %v8111_v6 }
 0x3d6   :  { %2234 = vmatprep.subr.bf16.mxu0 %v8114_v7  ;;  %2287 = vmatprep.subr.bf16.mxu1 %v8117_v4 }
 0x3d9   :  { %2235 = vmatpush1.bf16.msra.mxu0 %v8120_v24  ;;  %2288 = vmatpush1.bf16.msra.mxu1 %v8123_v8 }
 0x3da   :  { %2236 = vmatprep.subr.bf16.mxu0 %v8126_v10  ;;  %2289 = vmatprep.subr.bf16.mxu1 %v8129_v20 }
 0x3dd   :  { %2237 = vmatpush1.bf16.msra.mxu0 %v8132_v26  ;;  %2290 = vmatpush1.bf16.msra.mxu1 %v8135_v33 }
 0x3de   :  { %2238 = vmatprep.subr.bf16.mxu0 %v8138_v14  ;;  %2291 = vmatprep.subr.bf16.mxu1 %v8141_v46 }
 0x3e1   :  { %2239 = vmatpush1.bf16.msra.mxu0 %v8144_v54  ;;  %2292 = vmatpush1.bf16.msra.mxu1 %v8147_v22 }
 0x3e2   :  { %2422 = vmatprep.subr.bf16.mxu0 %v8153_v25  ;;  %2475 = vmatprep.subr.bf16.mxu1 %v8159_v29 }
 0x3e4   :  { %2257 = vmatmul.mubr.bf16.vlgmr.msra.gmra.mrb[56].mxu0 %v8048_v16  ;;  %2310 = vmatmul.mubr.bf16.vlgmr.msra.gmra.mrb[48].mxu1 %v8048_v16  ;;  %v8193_v16 = vld [vmem:[%s10539_s11 + $0x20] ss:$16 sps:$4 sm:$0xff]  }
 0x3e5   :  { %2266 = vmatprep.mubr.bf16.mxu0 %v10901_v13  ;;  %2319 = vmatprep.mubr.bf16.mxu1 %v10901_v13  ;;  %11007 = vst [vmem:[#allocation65_spill] sm:$0xff] %v8193_v16 }
 0x3e6   :  { %2423 = vmatpush1.bf16.msra.mxu0 %v8169_v52  ;;  %2476 = vmatpush1.bf16.msra.mxu1 %v8175_v31 }
 0x3e7   :  { %2424 = vmatprep.subr.bf16.mxu0 %v8181_v50  ;;  %2477 = vmatprep.subr.bf16.mxu1 %v8187_v17 }
 0x3ea   :  { %2425 = vmatpush1.bf16.msra.mxu0 %v8193_v16  ;;  %2478 = vmatpush1.bf16.msra.mxu1 %v8199_v37 }
 0x3eb   :  { %2426 = vmatprep.subr.bf16.mxu0 %v8205_v40  ;;  %2479 = vmatprep.subr.bf16.mxu1 %v8211_v12 }
 0x3ec   :  { %2267 = vmatmul.mubr.bf16.gmra.mrb[60].mxu0 %v8078_v44  ;;  %2320 = vmatmul.mubr.bf16.gmra.mrb[52].mxu1 %v8078_v44  ;;  %v8249_v44 = vld [vmem:[%s10539_s11 + $0x68] ss:$16 sps:$4 sm:$0xff]  }
 0x3ed   :  { %11016 = vst [vmem:[#allocation39_spill] sm:$0xff] %v8249_v44 }
 0x3ee   :  { %2427 = vmatpush1.bf16.msra.mxu0 %v8219_v34  ;;  %2480 = vmatpush1.bf16.msra.mxu1 %v8225_v51 }
 0x3ef   :  { %2428 = vmatprep.subr.bf16.mxu0 %v8231_v27  ;;  %2481 = vmatprep.subr.bf16.mxu1 %v8237_v55 }
 0x3f2   :  { %2429 = vmatpush1.bf16.msra.mxu0 %v8243_v9  ;;  %2482 = vmatpush1.bf16.msra.mxu1 %v8249_v44 }
 0x3f3   :  { %2430 = vmatprep.subr.bf16.mxu0 %v8255_v39  ;;  %2483 = vmatprep.subr.bf16.mxu1 %v8261_v36  ;;  %v8279_v39 = vld [vmem:[%s10539_s11 + $0xa4] ss:$16 sps:$4 sm:$0xff]   ;;  %v8285_v36 = vld [vmem:[%s10539_s11 + $0xac] ss:$16 sps:$4 sm:$0xff]  }
 0x3f4   :  { %11021 = vst [vmem:[#allocation72_spill] sm:$0xff] %v8279_v39  ;;  %11022 = vst [vmem:[#allocation42_spill] sm:$0xff] %v8285_v36 }
 0x3f6   :  { %2431 = vmatpush1.bf16.msra.mxu0 %v8267_v28  ;;  %2484 = vmatpush1.bf16.msra.mxu1 %v8273_v18  ;;  %v8291_v28 = vld [vmem:[%s10539_s11 + $0xa0] ss:$16 sps:$4 sm:$0xff]   ;;  %v8297_v18 = vld [vmem:[%s10539_s11 + $0xa8] ss:$16 sps:$4 sm:$0xff]  }
 0x3f7   :  { %2432 = vmatprep.subr.bf16.mxu0 %v8279_v39  ;;  %2485 = vmatprep.subr.bf16.mxu1 %v8285_v36  ;;  %11023 = vst [vmem:[#allocation73_spill] sm:$0xff] %v8291_v28  ;;  %11024 = vst [vmem:[#allocation43_spill] sm:$0xff] %v8297_v18  ;;  %v8303_v39 = vld [vmem:[%s10539_s11 + $0xc4] ss:$16 sps:$4 sm:$0xff]   ;;  %v8309_v36 = vld [vmem:[%s10539_s11 + $0xcc] ss:$16 sps:$4 sm:$0xff]  }
 0x3f8   :  { %11025 = vst [vmem:[#allocation74_spill] sm:$0xff] %v8303_v39  ;;  %11026 = vst [vmem:[#allocation44_spill] sm:$0xff] %v8309_v36 }
 0x3fa   :  { %2433 = vmatpush1.bf16.msra.mxu0 %v8291_v28  ;;  %2486 = vmatpush1.bf16.msra.mxu1 %v8297_v18  ;;  %v8315_v28 = vld [vmem:[%s10539_s11 + $0xc0] ss:$16 sps:$4 sm:$0xff]   ;;  %v8321_v18 = vld [vmem:[%s10539_s11 + $0xc8] ss:$16 sps:$4 sm:$0xff]  }
 0x3fb   :  { %2434 = vmatprep.subr.bf16.mxu0 %v8303_v39  ;;  %2487 = vmatprep.subr.bf16.mxu1 %v8309_v36  ;;  %11027 = vst [vmem:[#allocation75_spill] sm:$0xff] %v8315_v28  ;;  %11028 = vst [vmem:[#allocation45_spill] sm:$0xff] %v8321_v18  ;;  %v8327_v39 = vld [vmem:[%s10539_s11 + $0xe4] ss:$16 sps:$4 sm:$0xff]   ;;  %v8333_v36 = vld [vmem:[%s10539_s11 + $0xec] ss:$16 sps:$4 sm:$0xff]  }
 0x3fc   :  { %11029 = vst [vmem:[#allocation76_spill] sm:$0xff] %v8327_v39  ;;  %11030 = vst [vmem:[#allocation46_spill] sm:$0xff] %v8333_v36 }
 0x3fe   :  { %2435 = vmatpush1.bf16.msra.mxu0 %v8315_v28  ;;  %2488 = vmatpush1.bf16.msra.mxu1 %v8321_v18  ;;  %v8339_v28 = vld [vmem:[%s10539_s11 + $0xe0] ss:$16 sps:$4 sm:$0xff]   ;;  %v8345_v18 = vld [vmem:[%s10539_s11 + $0xe8] ss:$16 sps:$4 sm:$0xff]  }
 0x3ff   :  { %2436 = vmatprep.subr.bf16.mxu0 %v8327_v39  ;;  %2489 = vmatprep.subr.bf16.mxu1 %v8333_v36  ;;  %11031 = vst [vmem:[#allocation77_spill] sm:$0xff] %v8339_v28  ;;  %11032 = vst [vmem:[#allocation47_spill] sm:$0xff] %v8345_v18  ;;  %v8351_v39 = vld [vmem:[%s10539_s11 + $0x104] ss:$16 sps:$4 sm:$0xff]   ;;  %v8357_v36 = vld [vmem:[%s10539_s11 + $0x10c] ss:$16 sps:$4 sm:$0xff]  }
 0x400   :  { %11033 = vst [vmem:[#allocation78_spill] sm:$0xff] %v8351_v39  ;;  %11034 = vst [vmem:[#allocation48_spill] sm:$0xff] %v8357_v36 }
 0x402   :  { %2437 = vmatpush1.bf16.msra.mxu0 %v8339_v28  ;;  %2490 = vmatpush1.bf16.msra.mxu1 %v8345_v18  ;;  %v8363_v28 = vld [vmem:[%s10539_s11 + $0x100] ss:$16 sps:$4 sm:$0xff]   ;;  %v8369_v18 = vld [vmem:[%s10539_s11 + $0x108] ss:$16 sps:$4 sm:$0xff]  }
 0x403   :  { %2438 = vmatprep.subr.bf16.mxu0 %v8351_v39  ;;  %2491 = vmatprep.subr.bf16.mxu1 %v8357_v36  ;;  %11035 = vst [vmem:[#allocation79_spill] sm:$0xff] %v8363_v28  ;;  %11036 = vst [vmem:[#allocation49_spill] sm:$0xff] %v8369_v18  ;;  %v8375_v39 = vld [vmem:[%s10539_s11 + $0x124] ss:$16 sps:$4 sm:$0xff]   ;;  %v8381_v36 = vld [vmem:[%s10539_s11 + $0x12c] ss:$16 sps:$4 sm:$0xff]  }
 0x404   :  { %11037 = vst [vmem:[#allocation80_spill] sm:$0xff] %v8375_v39  ;;  %11038 = vst [vmem:[#allocation50_spill] sm:$0xff] %v8381_v36 }
 0x406   :  { %2439 = vmatpush1.bf16.msra.mxu0 %v8363_v28  ;;  %2492 = vmatpush1.bf16.msra.mxu1 %v8369_v18  ;;  %v8387_v28 = vld [vmem:[%s10539_s11 + $0x120] ss:$16 sps:$4 sm:$0xff]   ;;  %v8393_v18 = vld [vmem:[%s10539_s11 + $0x128] ss:$16 sps:$4 sm:$0xff]  }
 0x407   :  { %2440 = vmatprep.subr.bf16.mxu0 %v8375_v39  ;;  %2493 = vmatprep.subr.bf16.mxu1 %v8381_v36  ;;  %11039 = vst [vmem:[#allocation81_spill] sm:$0xff] %v8387_v28  ;;  %11040 = vst [vmem:[#allocation51_spill] sm:$0xff] %v8393_v18  ;;  %v8399_v39 = vld [vmem:[%s10539_s11 + $0x144] ss:$16 sps:$4 sm:$0xff]   ;;  %v8405_v36 = vld [vmem:[%s10539_s11 + $0x14c] ss:$16 sps:$4 sm:$0xff]  }
 0x408   :  { %11041 = vst [vmem:[#allocation82_spill] sm:$0xff] %v8399_v39  ;;  %11042 = vst [vmem:[#allocation52_spill] sm:$0xff] %v8405_v36 }
 0x40a   :  { %2441 = vmatpush1.bf16.msra.mxu0 %v8387_v28  ;;  %2494 = vmatpush1.bf16.msra.mxu1 %v8393_v18  ;;  %v8411_v28 = vld [vmem:[%s10539_s11 + $0x140] ss:$16 sps:$4 sm:$0xff]   ;;  %v8417_v18 = vld [vmem:[%s10539_s11 + $0x148] ss:$16 sps:$4 sm:$0xff]  }
 0x40b   :  { %2442 = vmatprep.subr.bf16.mxu0 %v8399_v39  ;;  %2495 = vmatprep.subr.bf16.mxu1 %v8405_v36  ;;  %11043 = vst [vmem:[#allocation83_spill] sm:$0xff] %v8411_v28  ;;  %11044 = vst [vmem:[#allocation53_spill] sm:$0xff] %v8417_v18  ;;  %v8423_v39 = vld [vmem:[%s10539_s11 + $0x164] ss:$16 sps:$4 sm:$0xff]   ;;  %v8429_v36 = vld [vmem:[%s10539_s11 + $0x16c] ss:$16 sps:$4 sm:$0xff]  }
 0x40c   :  { %11045 = vst [vmem:[#allocation84_spill] sm:$0xff] %v8423_v39  ;;  %11046 = vst [vmem:[#allocation54_spill] sm:$0xff] %v8429_v36 }
 0x40e   :  { %2443 = vmatpush1.bf16.msra.mxu0 %v8411_v28  ;;  %2496 = vmatpush1.bf16.msra.mxu1 %v8417_v18  ;;  %v8435_v28 = vld [vmem:[%s10539_s11 + $0x160] ss:$16 sps:$4 sm:$0xff]   ;;  %v8441_v18 = vld [vmem:[%s10539_s11 + $0x168] ss:$16 sps:$4 sm:$0xff]  }
 0x40f   :  { %2444 = vmatprep.subr.bf16.mxu0 %v8423_v39  ;;  %2497 = vmatprep.subr.bf16.mxu1 %v8429_v36  ;;  %11047 = vst [vmem:[#allocation85_spill] sm:$0xff] %v8435_v28  ;;  %11048 = vst [vmem:[#allocation55_spill] sm:$0xff] %v8441_v18  ;;  %v8447_v39 = vld [vmem:[%s10539_s11 + $0x184] ss:$16 sps:$4 sm:$0xff]   ;;  %v8453_v36 = vld [vmem:[%s10539_s11 + $0x18c] ss:$16 sps:$4 sm:$0xff]  }
 0x410   :  { %11049 = vst [vmem:[#allocation25_spill] sm:$0xff] %v8447_v39  ;;  %11050 = vst [vmem:[#allocation23_spill] sm:$0xff] %v8453_v36 }
 0x412   :  { %2445 = vmatpush1.bf16.msra.mxu0 %v8435_v28  ;;  %2498 = vmatpush1.bf16.msra.mxu1 %v8441_v18  ;;  %v8459_v28 = vld [vmem:[%s10539_s11 + $0x180] ss:$16 sps:$4 sm:$0xff]   ;;  %v8465_v18 = vld [vmem:[%s10539_s11 + $0x188] ss:$16 sps:$4 sm:$0xff]  }
 0x413   :  { %2446 = vmatprep.subr.bf16.mxu0 %v8447_v39  ;;  %2499 = vmatprep.subr.bf16.mxu1 %v8453_v36  ;;  %11051 = vst [vmem:[#allocation22_spill] sm:$0xff] %v8459_v28  ;;  %11052 = vst [vmem:[#allocation24_spill] sm:$0xff] %v8465_v18  ;;  %v8471_v39 = vld [vmem:[%s10539_s11 + $0x1a4] ss:$16 sps:$4 sm:$0xff]   ;;  %v8477_v36 = vld [vmem:[%s10539_s11 + $0x1ac] ss:$16 sps:$4 sm:$0xff]  }
 0x414   :  { %11053 = vst [vmem:[#allocation86_spill] sm:$0xff] %v8471_v39  ;;  %11054 = vst [vmem:[#allocation87_spill] sm:$0xff] %v8477_v36 }
 0x416   :  { %2447 = vmatpush1.bf16.msra.mxu0 %v8459_v28  ;;  %2500 = vmatpush1.bf16.msra.mxu1 %v8465_v18  ;;  %v8483_v28 = vld [vmem:[%s10539_s11 + $0x1a0] ss:$16 sps:$4 sm:$0xff]   ;;  %v8489_v18 = vld [vmem:[%s10539_s11 + $0x1a8] ss:$16 sps:$4 sm:$0xff]  }
 0x417   :  { %2448 = vmatprep.subr.bf16.mxu0 %v8471_v39  ;;  %2501 = vmatprep.subr.bf16.mxu1 %v8477_v36  ;;  %11055 = vst [vmem:[#allocation88_spill] sm:$0xff] %v8483_v28  ;;  %11056 = vst [vmem:[#allocation89_spill] sm:$0xff] %v8489_v18  ;;  %v8495_v39 = vld [vmem:[%s10539_s11 + $0x1c4] ss:$16 sps:$4 sm:$0xff]   ;;  %v8501_v36 = vld [vmem:[%s10539_s11 + $0x1cc] ss:$16 sps:$4 sm:$0xff]  }
 0x418   :  { %11057 = vst [vmem:[#allocation90_spill] sm:$0xff] %v8495_v39  ;;  %11058 = vst [vmem:[#allocation91_spill] sm:$0xff] %v8501_v36 }
 0x41a   :  { %2449 = vmatpush1.bf16.msra.mxu0 %v8483_v28  ;;  %2502 = vmatpush1.bf16.msra.mxu1 %v8489_v18  ;;  %v8507_v28 = vld [vmem:[%s10539_s11 + $0x1c0] ss:$16 sps:$4 sm:$0xff]   ;;  %v8513_v18 = vld [vmem:[%s10539_s11 + $0x1c8] ss:$16 sps:$4 sm:$0xff]  }
 0x41b   :  { %2450 = vmatprep.subr.bf16.mxu0 %v8495_v39  ;;  %2503 = vmatprep.subr.bf16.mxu1 %v8501_v36  ;;  %11059 = vst [vmem:[#allocation92_spill] sm:$0xff] %v8507_v28  ;;  %11060 = vst [vmem:[#allocation93_spill] sm:$0xff] %v8513_v18  ;;  %v8519_v39 = vld [vmem:[%s10539_s11 + $0x1e4] ss:$16 sps:$4 sm:$0xff]   ;;  %v8525_v36 = vld [vmem:[%s10539_s11 + $0x1ec] ss:$16 sps:$4 sm:$0xff]  }
 0x41c   :  { %11061 = vst [vmem:[#allocation94_spill] sm:$0xff] %v8519_v39  ;;  %11062 = vst [vmem:[#allocation95_spill] sm:$0xff] %v8525_v36 }
 0x41e   :  { %2451 = vmatpush1.bf16.msra.mxu0 %v8507_v28  ;;  %2504 = vmatpush1.bf16.msra.mxu1 %v8513_v18  ;;  %v8531_v28 = vld [vmem:[%s10539_s11 + $0x1e0] ss:$16 sps:$4 sm:$0xff]   ;;  %v8537_v18 = vld [vmem:[%s10539_s11 + $0x1e8] ss:$16 sps:$4 sm:$0xff]  }
 0x41f   :  { %2452 = vmatprep.subr.bf16.mxu0 %v8519_v39  ;;  %2505 = vmatprep.subr.bf16.mxu1 %v8525_v36  ;;  %11063 = vst [vmem:[#allocation96_spill] sm:$0xff] %v8531_v28  ;;  %11064 = vst [vmem:[#allocation97_spill] sm:$0xff] %v8537_v18  ;;  %v8541_v39 = vld [vmem:[#allocation7 + $0xc] ss:$16 sps:$4 sm:$0xff]  }
 0x420   :  { %11065 = vst [vmem:[#allocation98_spill] sm:$0xff] %v8541_v39 }
 0x422   :  { %2453 = vmatpush1.bf16.msra.mxu0 %v8531_v28  ;;  %2506 = vmatpush1.bf16.msra.mxu1 %v8537_v18 }
 0x423   :  { %2617 = vmatprep.subr.bf16.mxu0 %v7927_v5  ;;  %2670 = vmatprep.subr.bf16.mxu1 %v8541_v39 }
 0x496   :  { %v2063_v36 = vpop.f32.mrb[48].mxu0  ;;  %v2116_v44 = vpop.f32.mrb[40].mxu1 }
 0x497   :  { %v2064_v9 = vadd.f32 %v2063_v36, %v7943_v49  ;;  %v2065_v55 = vpop.f32.mrb[49].mxu0  ;;  %v2118_v27 = vpop.f32.mrb[41].mxu1  ;;  %v2117_v39 = vadd.f32 %v2116_v44, %v7949_v63 }
 0x498   :  { %v2066_v28 = vadd.f32 %v2065_v55, %v7947_v60  ;;  %v2067_v51 = vpop.f32.mrb[50].mxu0  ;;  %v2120_v34 = vpop.f32.mrb[42].mxu1  ;;  %v2119_v44 = vadd.f32 %v2118_v27, %v7957_v41 }
 0x499   :  { %v2135_v12 = vmul.f32 0.5, %v2064_v9  ;;  %v2068_v40 = vadd.f32 %v2067_v51, %v7943_v49  ;;  %v2069_v18 = vpop.f32.mrb[51].mxu0  ;;  %v2122_v37 = vpop.f32.mrb[43].mxu1  ;;  %v2121_v50 = vadd.f32 %v2120_v34, %v7949_v63 }
 0x49a   :  { %v2151_v5 = vmul.f32 0.5, %v2066_v28  ;;  %v2070_v16 = vadd.f32 %v2069_v18, %v7947_v60  ;;  %v2171_v22 = vmul.f32 0.5, %v2119_v44 }
 0x49b   :  { %5667 = vtanh.f32 %v2135_v12  ;;  %v2136_v17 = vmul.f32 0.5, %v2068_v40 }
 0x49c   :  { %5669 = vtanh.f32 %v2151_v5  ;;  %v2152_v36 = vmul.f32 0.5, %v2070_v16 }
 0x49d   :  { %5671 = vtanh.f32 %v2136_v17 }
 0x49e   :  { %5673 = vtanh.f32 %v2117_v39 }
 0x49f   :  { %v2073_v55 = vpop.f32.mrb[52].mxu0  ;;  %v2126_v31 = vpop.f32.mrb[44].mxu1  ;;  %5675 = vtanh.f32 %v2152_v36 }
 0x4a0   :  { %v2074_v9 = vadd.f32 %v2073_v55, %v7943_v49  ;;  %v2075_v51 = vpop.f32.mrb[53].mxu0  ;;  %v2128_v52 = vpop.f32.mrb[45].mxu1  ;;  %5677 = vtanh.f32 %v2121_v50  ;;  %v2123_v55 = vadd.f32 %v2122_v37, %v7957_v41  ;;  %v2127_v36 = vadd.f32 %v2126_v31, %v7949_v63 }
 0x4a1   :  { %v2076_v28 = vadd.f32 %v2075_v51, %v7947_v60  ;;  %v2077_v18 = vpop.f32.mrb[54].mxu0  ;;  %v2130_v12 = vpop.f32.mrb[46].mxu1  ;;  %v2129_v37 = vadd.f32 %v2128_v52, %v7957_v41 }
 0x4a2   :  { %v2137_v40 = vmul.f32 0.5, %v2074_v9  ;;  %v2078_v16 = vadd.f32 %v2077_v18, %v7943_v49  ;;  %v2079_v17 = vpop.f32.mrb[55].mxu0  ;;  %v2132_v5 = vpop.f32.mrb[47].mxu1  ;;  %v2131_v18 = vadd.f32 %v2130_v12, %v7949_v63  ;;  %v2172_v50 = vmul.f32 0.5, %v2123_v55 }
 0x4a3   :  { %v2153_v34 = vmul.f32 0.5, %v2076_v28  ;;  %v2080_v39 = vadd.f32 %v2079_v17, %v7947_v60 }
 0x4a4   :  { %5679 = vtanh.f32 %v2137_v40  ;;  %v2138_v29 = vmul.f32 0.5, %v2078_v16 }
 0x4a5   :  { %5681 = vtanh.f32 %v2153_v34  ;;  %v2154_v51 = vmul.f32 0.5, %v2080_v39  ;;  %v5668_v25 = vpop.eup %5667 }
 0x4a6   :  { %v5670_v27 = vpop.eup %5669  ;;  %v2143_v9 = vmul.f32 0.5, %v5668_v25  ;;  %5683 = vtanh.f32 %v2138_v29  ;;  %v2133_v25 = vadd.f32 %v2132_v5, %v7957_v41  ;;  %v4996_v41 = vld [vmem:[%s10913_s30 + $0x168] sm:$0xff] }
 0x4a7   :  { %v2159_v49 = vmul.f32 0.5, %v5670_v27  ;;  %5685 = vtanh.f32 %v2127_v36  ;;  %v5672_v28 = vpop.eup %5671  ;;  %v2173_v36 = vmul.f32 0.5, %v2129_v37 }
 0x4a8   :  { %v2147_v17 = vadd.f32 0.5, %v2143_v9  ;;  %5687 = vtanh.f32 %v2154_v51  ;;  %v5674_v40 = vpop.eup %5673  ;;  %v2144_v16 = vmul.f32 0.5, %v5672_v28  ;;  %v2174_v28 = vmul.f32 0.5, %v2133_v25 }
 0x4a9   :  { %v2163_v31 = vadd.f32 0.5, %v2159_v49  ;;  %5689 = vtanh.f32 %v2171_v22  ;;  %v5676_v34 = vpop.eup %5675 }
 0x4aa   :  { %v2191_v39 = vmul.f32 %v5674_v40, %v2147_v17  ;;  %5691 = vtanh.f32 %v2131_v18  ;;  %v2148_v12 = vadd.f32 0.5, %v2144_v16  ;;  %v2160_v44 = vmul.f32 0.5, %v5676_v34  ;;  %v5678_v55 = vpop.eup %5677 }
 0x4ab   :  { %v2187_v29 = vmul.f32 %v2163_v31, %v7970_v11  ;;  %5693 = vtanh.f32 %v2172_v50 }
 0x4ac   :  { %v2164_v52 = vadd.f32 0.5, %v2160_v44  ;;  %v2192_v51 = vmul.f32 %v5678_v55, %v2148_v12  ;;  %5695 = vtanh.f32 %v2173_v36  ;;  %v4983_v44 = vld [vmem:[%s10913_s30 + $0x100] sm:$0xff] }
 0x4ad   :  { %v8561_v9 = vadd.f32 %v2191_v39, %v2187_v29 }
 0x4ae   :  { %v5680_v27 = vpop.eup %5679  ;;  %v2188_v17 = vmul.f32 %v2164_v52, %v7973_v32 }
 0x4af   :  { %11066 = vst [vmem:[#allocation99_spill] sm:$0xff] %v8561_v9  ;;  %v5682_v49 = vpop.eup %5681  ;;  %v2145_v22 = vmul.f32 0.5, %v5680_v27  ;;  %5697 = vtanh.f32 %v8561_v9 }
 0x4b0   :  { %v2161_v18 = vmul.f32 0.5, %v5682_v49  ;;  %v5684_v40 = vpop.eup %5683  ;;  %v8565_v50 = vadd.f32 %v2192_v51, %v2188_v17  ;;  %5699 = vtanh.f32 %v2174_v28  ;;  %v4984_v51 = vld [vmem:[%s10913_s30 + $0x108] sm:$0xff] }
 0x4b1   :  { %v2149_v5 = vadd.f32 0.5, %v2145_v22  ;;  %v5686_v11 = vpop.eup %5685  ;;  %v2146_v31 = vmul.f32 0.5, %v5684_v40 }
 0x4b2   :  { %11067 = vst [vmem:[#allocation100_spill] sm:$0xff] %v8565_v50  ;;  %v2165_v37 = vadd.f32 0.5, %v2161_v18  ;;  %v5688_v16 = vpop.eup %5687  ;;  %5701 = vtanh.f32 %v8565_v50 }
 0x4b3   :  { %v2193_v34 = vmul.f32 %v5686_v11, %v2149_v5  ;;  %v5690_v39 = vpop.eup %5689  ;;  %v2150_v32 = vadd.f32 0.5, %v2146_v31  ;;  %v2162_v29 = vmul.f32 0.5, %v5688_v16  ;;  %v4988_v5 = vld [vmem:[%s10913_s30 + $0x128] sm:$0xff] }
 0x4b4   :  { %v2189_v25 = vmul.f32 %v2165_v37, %v7979_v15  ;;  %v5692_v12 = vpop.eup %5691  ;;  %v4987_v15 = vld [vmem:[%s10913_s30 + $0x120] sm:$0xff]  ;;  %v2179_v11 = vmul.f32 0.5, %v5690_v39 }
 0x4b5   :  { %v5694_v55 = vpop.eup %5693  ;;  %v2166_v27 = vadd.f32 0.5, %v2162_v29  ;;  %v2194_v52 = vmul.f32 %v5692_v12, %v2150_v32 }
 0x4b6   :  { %v8572_v36 = vadd.f32 %v2193_v34, %v2189_v25  ;;  %v2180_v37 = vmul.f32 0.5, %v5694_v55 }
 0x4b7   :  { %v2258_v49 = vpop.f32.mrb[56].mxu0  ;;  %v2311_v22 = vpop.f32.mrb[48].mxu1  ;;  %v2190_v28 = vmul.f32 %v2166_v27, %v7991_v61  ;;  %v4985_v61 = vld [vmem:[%s10913_s30 + $0x110] sm:$0xff] }
 0x4b8   :  { %11068 = vst [vmem:[#allocation101_spill] sm:$0xff] %v8572_v36  ;;  %v2330_v17 = vadd.f32 %v4983_v44, %v2258_v49  ;;  %v2260_v18 = vpop.f32.mrb[57].mxu0  ;;  %v2313_v40 = vpop.f32.mrb[49].mxu1  ;;  %5703 = vtanh.f32 %v8572_v36 }
 0x4b9   :  { %v2331_v31 = vadd.f32 %v4984_v51, %v2260_v18  ;;  %v2262_v16 = vpop.f32.mrb[58].mxu0  ;;  %v2315_v34 = vpop.f32.mrb[50].mxu1  ;;  %v8585_v25 = vadd.f32 %v2194_v52, %v2190_v28  ;;  %v4989_v52 = vld [vmem:[%s10913_s30 + $0x130] sm:$0xff]  ;;  %v2183_v28 = vadd.f32 0.5, %v2179_v11  ;;  %v2332_v18 = vadd.f32 %v4985_v61, %v2311_v22  ;;  %v4990_v22 = vld [vmem:[%s10913_s30 + $0x138] sm:$0xff] }
 0x4ba   :  { %v2346_v32 = vmul.f32 0.5, %v2330_v17  ;;  %v2334_v29 = vadd.f32 %v4987_v15, %v2262_v16  ;;  %v2264_v12 = vpop.f32.mrb[59].mxu0  ;;  %v2317_v44 = vpop.f32.mrb[51].mxu1  ;;  %v2184_v17 = vadd.f32 0.5, %v2180_v37  ;;  %v4991_v15 = vld [vmem:[%s10913_s30 + $0x140] sm:$0xff] }
 0x4bb   :  { %11069 = vst [vmem:[#allocation102_spill] sm:$0xff] %v8585_v25  ;;  %v5696_v27 = vpop.eup %5695  ;;  %v2362_v49 = vmul.f32 0.5, %v2331_v31  ;;  %v2335_v50 = vadd.f32 %v4988_v5, %v2264_v12  ;;  %5705 = vtanh.f32 %v8585_v25  ;;  %v4986_v5 = vld [vmem:[%s10913_s30 + $0x118] sm:$0xff]  ;;  %v2336_v12 = vadd.f32 %v4989_v52, %v2315_v34  ;;  %v4993_v34 = vld [vmem:[%s10913_s30 + $0x150] sm:$0xff] }
 0x4bc   :  { %v5698_v39 = vpop.eup %5697  ;;  %v2347_v55 = vmul.f32 0.5, %v2334_v29  ;;  %5707 = vtanh.f32 %v2346_v32  ;;  %v4992_v29 = vld [vmem:[%s10913_s30 + $0x148] sm:$0xff]  ;;  %v4995_v32 = vld [vmem:[%s10913_s30 + $0x160] sm:$0xff]  ;;  %v2181_v25 = vmul.f32 0.5, %v5696_v27  ;;  %v2333_v63 = vadd.f32 %v4986_v5, %v2313_v40 }
 0x4bd   :  { %v5700_v51 = vpop.eup %5699  ;;  %5709 = vtanh.f32 %v2362_v49  ;;  %v2363_v31 = vmul.f32 0.5, %v2335_v50  ;;  %v2203_v61 = vmul.f32 %v5698_v39, %v2183_v28  ;;  %v2337_v27 = vadd.f32 %v4990_v22, %v2317_v44  ;;  %v4997_v44 = vld [vmem:[%s10913_s30 + $0x170] sm:$0xff] }
 0x4be   :  { %v5702_v16 = vpop.eup %5701  ;;  %v2182_v36 = vmul.f32 0.5, %v5700_v51  ;;  %5711 = vtanh.f32 %v2347_v55  ;;  %v2185_v40 = vadd.f32 0.5, %v2181_v25 }
 0x4bf   :  { %v2268_v11 = vpop.f32.mrb[60].mxu0  ;;  %v2321_v37 = vpop.f32.mrb[52].mxu1  ;;  %v2204_v49 = vmul.f32 %v5702_v16, %v2184_v17  ;;  %5713 = vtanh.f32 %v2332_v18 }
 0x4c0   :  { %v2338_v50 = vadd.f32 %v4991_v15, %v2268_v11  ;;  %v2270_v52 = vpop.f32.mrb[61].mxu0  ;;  %v2323_v9 = vpop.f32.mrb[53].mxu1  ;;  %5715 = vtanh.f32 %v2363_v31  ;;  %v2340_v16 = vadd.f32 %v4993_v34, %v2321_v37  ;;  %v2186_v5 = vadd.f32 0.5, %v2182_v36 }
 0x4c1   :  { %v2339_v60 = vadd.f32 %v4992_v29, %v2270_v52  ;;  %v2272_v54 = vpop.f32.mrb[62].mxu0  ;;  %v2325_v39 = vpop.f32.mrb[54].mxu1  ;;  %v2420_v28 = vpack.c.bf16 %v2204_v49, %v2203_v61  ;;  %5717 = vtanh.f32 %v2336_v12  ;;  %v2382_v29 = vmul.f32 0.5, %v2333_v63  ;;  %v4998_v49 = vld [vmem:[%s10913_s30 + $0x178] sm:$0xff] }
 0x4c2   :  { %v2348_v55 = vmul.f32 0.5, %v2338_v50  ;;  %v2342_v51 = vadd.f32 %v4995_v32, %v2272_v54  ;;  %v2274_v17 = vpop.f32.mrb[63].mxu0  ;;  %v2327_v15 = vpop.f32.mrb[55].mxu1  ;;  %v4994_v54 = vld [vmem:[%s10913_s30 + $0x158] sm:$0xff]  ;;  %v2383_v12 = vmul.f32 0.5, %v2337_v27  ;;  %v2344_v63 = vadd.f32 %v4997_v44, %v2325_v39 }
 0x4c3   :  { %v2364_v11 = vmul.f32 0.5, %v2339_v60  ;;  %v2343_v46 = vadd.f32 %v4996_v41, %v2274_v17  ;;  %2454 = vmatprep.mubr.bf16.mxu0 %v2420_v28  ;;  %2507 = vmatprep.mubr.bf16.mxu1 %v2420_v28  ;;  %v5704_v14 = vpop.eup %5703  ;;  %v2341_v61 = vadd.f32 %v4994_v54, %v2323_v9  ;;  %v2345_v39 = vadd.f32 %v4998_v49, %v2327_v15 }
 0x4c4   :  { %5719 = vtanh.f32 %v2348_v55  ;;  %v2349_v18 = vmul.f32 0.5, %v2342_v51  ;;  %v2205_v22 = vmul.f32 %v5704_v14, %v2185_v40 }
 0x4c5   :  { %v5706_v31 = vpop.eup %5705  ;;  %5721 = vtanh.f32 %v2364_v11  ;;  %v2365_v60 = vmul.f32 0.5, %v2343_v46  ;;  %v2384_v11 = vmul.f32 0.5, %v2341_v61  ;;  %v2385_v54 = vmul.f32 0.5, %v2345_v39 }
 0x4c6   :  { %v5708_v41 = vpop.eup %5707  ;;  %5723 = vtanh.f32 %v2340_v16  ;;  %v2206_v37 = vmul.f32 %v5706_v31, %v2186_v5 }
 0x4c7   :  { %v5710_v32 = vpop.eup %5709  ;;  %v2354_v25 = vmul.f32 0.5, %v5708_v41  ;;  %5725 = vtanh.f32 %v2349_v18 }
 0x4c8   :  { %v2370_v36 = vmul.f32 0.5, %v5710_v32  ;;  %5727 = vtanh.f32 %v2382_v29  ;;  %v8624_v50 = vpack.c.bf16 %v2206_v37, %v2205_v22  ;;  %v5712_v34 = vpop.eup %5711 }
 0x4c9   :  { %v2358_v46 = vadd.f32 0.5, %v2354_v25  ;;  %5729 = vtanh.f32 %v2365_v60  ;;  %v5714_v52 = vpop.eup %5713  ;;  %v2355_v14 = vmul.f32 0.5, %v5712_v34 }
 0x4ca   :  { %v2374_v28 = vadd.f32 0.5, %v2370_v36  ;;  %5731 = vtanh.f32 %v2383_v12  ;;  %v5716_v27 = vpop.eup %5715 }
 0x4cb   :  { %v2402_v55 = vmul.f32 %v5714_v52, %v2358_v46  ;;  %5733 = vtanh.f32 %v2344_v63  ;;  %v5718_v51 = vpop.eup %5717  ;;  %v2359_v17 = vadd.f32 0.5, %v2355_v14  ;;  %v2371_v16 = vmul.f32 0.5, %v5716_v27 }
 0x4cc   :  { %v2398_v9 = vmul.f32 %v2374_v28, %v8033_v59  ;;  %5735 = vtanh.f32 %v2384_v11 }
 0x4cd   :  { %v2375_v5 = vadd.f32 0.5, %v2371_v16  ;;  %v2403_v29 = vmul.f32 %v5718_v51, %v2359_v17 }
 0x4ce   :  { %v5720_v18 = vpop.eup %5719  ;;  %v8627_v40 = vadd.f32 %v2402_v55, %v2398_v9 }
 0x4cf   :  { %v2356_v44 = vmul.f32 0.5, %v5720_v18  ;;  %v5722_v31 = vpop.eup %5721  ;;  %v2399_v41 = vmul.f32 %v2375_v5, %v8037_v1 }
 0x4d0   :  { %v5724_v60 = vpop.eup %5723  ;;  %v2372_v22 = vmul.f32 0.5, %v5722_v31  ;;  %5737 = vtanh.f32 %v8627_v40 }
 0x4d1   :  { %v2360_v12 = vadd.f32 0.5, %v2356_v44  ;;  %v5726_v15 = vpop.eup %5725  ;;  %v8631_v37 = vadd.f32 %v2403_v29, %v2399_v41  ;;  %5739 = vtanh.f32 %v2385_v54 }
 0x4d2   :  { %v5728_v59 = vpop.eup %5727  ;;  %v2376_v32 = vadd.f32 0.5, %v2372_v22  ;;  %v2357_v63 = vmul.f32 0.5, %v5726_v15 }
 0x4d3   :  { %v2404_v25 = vmul.f32 %v5724_v60, %v2360_v12  ;;  %v5730_v36 = vpop.eup %5729  ;;  %5741 = vtanh.f32 %v8631_v37  ;;  %v2390_v55 = vmul.f32 0.5, %v5728_v59  ;;  %v11096_v59 = vld [vmem:[#allocation73_spill] sm:$0xff] }
 0x4d4   :  { %v5732_v61 = vpop.eup %5731  ;;  %v2400_v49 = vmul.f32 %v2376_v32, %v8041_v19  ;;  %v2361_v1 = vadd.f32 0.5, %v2357_v63  ;;  %v2373_v34 = vmul.f32 0.5, %v5730_v36  ;;  %v11097_v32 = vld [vmem:[#allocation43_spill] sm:$0xff]  ;;  %v11099_v63 = vld [vmem:[#allocation44_spill] sm:$0xff] }
 0x4d5   :  { %v5734_v46 = vpop.eup %5733  ;;  %v2391_v39 = vmul.f32 0.5, %v5732_v61  ;;  %v2394_v16 = vadd.f32 0.5, %v2390_v55  ;;  %v11100_v36 = vld [vmem:[#allocation75_spill] sm:$0xff]  ;;  %v11101_v61 = vld [vmem:[#allocation45_spill] sm:$0xff] }
 0x4d6   :  { %v8635_v52 = vadd.f32 %v2404_v25, %v2400_v49  ;;  %v2377_v28 = vadd.f32 0.5, %v2373_v34  ;;  %v2405_v14 = vmul.f32 %v5734_v46, %v2361_v1  ;;  %v5736_v51 = vpop.eup %5735  ;;  %v11098_v25 = vld [vmem:[#allocation74_spill] sm:$0xff]  ;;  %v11102_v49 = vld [vmem:[#allocation76_spill] sm:$0xff]  ;;  %v11104_v34 = vld [vmem:[#allocation77_spill] sm:$0xff] }
 0x4d7   :  { %v2395_v11 = vadd.f32 0.5, %v2391_v39  ;;  %v2392_v31 = vmul.f32 0.5, %v5736_v51  ;;  %v11103_v1 = vld [vmem:[#allocation46_spill] sm:$0xff]  ;;  %v11105_v46 = vld [vmem:[#allocation47_spill] sm:$0xff]  ;;  %v11109_v55 = vld [vmem:[#allocation49_spill] sm:$0xff] }
 0x4d8   :  { %v2401_v27 = vmul.f32 %v2377_v28, %v8045_v0  ;;  %5743 = vtanh.f32 %v8635_v52  ;;  %v11106_v28 = vld [vmem:[#allocation78_spill] sm:$0xff]  ;;  %v11110_v39 = vld [vmem:[#allocation80_spill] sm:$0xff] }
 0x4d9   :  { %v2396_v60 = vadd.f32 0.5, %v2392_v31  ;;  %v11111_v51 = vld [vmem:[#allocation50_spill] sm:$0xff]  ;;  %v11120_v31 = vld [vmem:[#allocation85_spill] sm:$0xff] }
 0x4da   :  { %v8639_v9 = vadd.f32 %v2405_v14, %v2401_v27  ;;  %v5738_v17 = vpop.eup %5737  ;;  %v11107_v14 = vld [vmem:[#allocation48_spill] sm:$0xff]  ;;  %v11108_v27 = vld [vmem:[#allocation79_spill] sm:$0xff] }
 0x4db   :  { %v5740_v19 = vpop.eup %5739  ;;  %v2414_v5 = vmul.f32 %v5738_v17, %v2394_v16  ;;  %v11112_v17 = vld [vmem:[#allocation81_spill] sm:$0xff]  ;;  %v11114_v16 = vld [vmem:[#allocation82_spill] sm:$0xff] }
 0x4dc   :  { %5745 = vtanh.f32 %v8639_v9  ;;  %v2393_v54 = vmul.f32 0.5, %v5740_v19  ;;  %v11113_v19 = vld [vmem:[#allocation51_spill] sm:$0xff] }
 0x4dd   :  { %v5742_v18 = vpop.eup %5741 }
 0x4de   :  { %v2415_v29 = vmul.f32 %v5742_v18, %v2395_v11  ;;  %v2397_v41 = vadd.f32 0.5, %v2393_v54  ;;  %v11115_v11 = vld [vmem:[#allocation52_spill] sm:$0xff]  ;;  %v11116_v18 = vld [vmem:[#allocation83_spill] sm:$0xff] }
 0x4df   :  { %v11121_v54 = vld [vmem:[#allocation55_spill] sm:$0xff] }
 0x4e0   :  { %v2418_v44 = vpack.c.bf16 %v2415_v29, %v2414_v5  ;;  %v11117_v5 = vld [vmem:[#allocation53_spill] sm:$0xff]  ;;  %v11118_v29 = vld [vmem:[#allocation84_spill] sm:$0xff] }
 0x4e2   :  { %2455 = vmatmul.mubr.bf16.vlgmr.msra.gmra.mrb[64].mxu0 %v2418_v44  ;;  %2508 = vmatmul.mubr.bf16.vlgmr.msra.gmra.mrb[56].mxu1 %v2418_v44  ;;  %v5744_v0 = vpop.eup %5743 }
 0x4e3   :  { %2618 = vmatpush1.bf16.msra.mxu0 %v8052_v45  ;;  %2671 = vmatpush1.bf16.msra.mxu1 %v8055_v38  ;;  %v2416_v22 = vmul.f32 %v5744_v0, %v2396_v60  ;;  %v11070_v38 = vld [vmem:[#allocation60_spill] sm:$0xff]  ;;  %v11122_v0 = vld [vmem:[#allocation25_spill] sm:$0xff]  ;;  %v11123_v60 = vld [vmem:[#allocation23_spill] sm:$0xff] }
 0x4e4   :  { %2464 = vmatprep.mubr.bf16.mxu0 %v8624_v50  ;;  %2517 = vmatprep.mubr.bf16.mxu1 %v8624_v50  ;;  %v11095_v50 = vld [vmem:[#allocation42_spill] sm:$0xff] }
 0x4e5   :  { %2619 = vmatprep.subr.bf16.mxu0 %v8060_v23  ;;  %2672 = vmatprep.subr.bf16.mxu1 %v8063_v47  ;;  %v11071_v23 = vld [vmem:[#allocation30_spill] sm:$0xff]  ;;  %v11072_v47 = vld [vmem:[#allocation61_spill] sm:$0xff] }
 0x4e6   :  { %v5746_v12 = vpop.eup %5745 }
 0x4e7   :  { %v2417_v15 = vmul.f32 %v5746_v12, %v2397_v41  ;;  %2620 = vmatpush1.bf16.msra.mxu0 %v8066_v21  ;;  %2673 = vmatpush1.bf16.msra.mxu1 %v8069_v30  ;;  %v11073_v21 = vld [vmem:[#allocation31_spill] sm:$0xff]  ;;  %v11074_v30 = vld [vmem:[#allocation62_spill] sm:$0xff]  ;;  %v11125_v12 = vld [vmem:[#allocation24_spill] sm:$0xff] }
 0x4e8   :  { %2621 = vmatprep.subr.bf16.mxu0 %v8072_v56  ;;  %2674 = vmatprep.subr.bf16.mxu1 %v8075_v43  ;;  %v11075_v56 = vld [vmem:[#allocation32_spill] sm:$0xff]  ;;  %v11076_v43 = vld [vmem:[#allocation63_spill] sm:$0xff]  ;;  %v11124_v41 = vld [vmem:[#allocation22_spill] sm:$0xff] }
 0x4e9   :  { %v2419_v45 = vpack.c.bf16 %v2417_v15, %v2416_v22  ;;  %v11126_v22 = vld [vmem:[#allocation86_spill] sm:$0xff]  ;;  %v11127_v15 = vld [vmem:[#allocation87_spill] sm:$0xff] }
 0x4eb   :  { %2465 = vmatmul.mubr.bf16.gmra.mrb[68].mxu0 %v2419_v45  ;;  %2518 = vmatmul.mubr.bf16.gmra.mrb[60].mxu1 %v2419_v45 }
 0x4ec   :  { %2622 = vmatpush1.bf16.msra.mxu0 %v8082_v48  ;;  %2675 = vmatpush1.bf16.msra.mxu1 %v8085_v53  ;;  %v11077_v48 = vld [vmem:[#allocation33_spill] sm:$0xff]  ;;  %v11078_v53 = vld [vmem:[#allocation64_spill] sm:$0xff] }
 0x4ed   :  { %2623 = vmatprep.subr.bf16.mxu0 %v8088_v58  ;;  %2676 = vmatprep.subr.bf16.mxu1 %v8091_v62  ;;  %v11079_v58 = vld [vmem:[#allocation34_spill] sm:$0xff]  ;;  %v11080_v62 = vld [vmem:[#allocation65_spill] sm:$0xff] }
 0x4ee   :  { %2649 = vmatprep.mubr.bf16.mxu0 %v10901_v13  ;;  %2702 = vmatprep.mubr.bf16.mxu1 %v10901_v13 }
 0x4f0   :  { %2624 = vmatpush1.bf16.msra.mxu0 %v8096_v57  ;;  %2677 = vmatpush1.bf16.msra.mxu1 %v8099_v42  ;;  %v11081_v57 = vld [vmem:[#allocation35_spill] sm:$0xff]  ;;  %v11082_v42 = vld [vmem:[#allocation66_spill] sm:$0xff] }
 0x4f1   :  { %2625 = vmatprep.subr.bf16.mxu0 %v8102_v2  ;;  %2678 = vmatprep.subr.bf16.mxu1 %v8105_v3  ;;  %v11083_v2 = vld [vmem:[#allocation36_spill] sm:$0xff]  ;;  %v11084_v3 = vld [vmem:[#allocation67_spill] sm:$0xff] }
 0x4f4   :  { %2626 = vmatpush1.bf16.msra.mxu0 %v8108_v35  ;;  %2679 = vmatpush1.bf16.msra.mxu1 %v8111_v6  ;;  %v11085_v35 = vld [vmem:[#allocation37_spill] sm:$0xff]  ;;  %v11086_v6 = vld [vmem:[#allocation68_spill] sm:$0xff] }
 0x4f5   :  { %2627 = vmatprep.subr.bf16.mxu0 %v8114_v7  ;;  %2680 = vmatprep.subr.bf16.mxu1 %v8117_v4  ;;  %v11087_v7 = vld [vmem:[#allocation38_spill] sm:$0xff]  ;;  %v11088_v4 = vld [vmem:[#allocation69_spill] sm:$0xff] }
 0x4f8   :  { %2628 = vmatpush1.bf16.msra.mxu0 %v8120_v24  ;;  %2681 = vmatpush1.bf16.msra.mxu1 %v8123_v8  ;;  %v11089_v24 = vld [vmem:[#allocation39_spill] sm:$0xff]  ;;  %v11090_v8 = vld [vmem:[#allocation70_spill] sm:$0xff] }
 0x4f9   :  { %2629 = vmatprep.subr.bf16.mxu0 %v8126_v10  ;;  %2682 = vmatprep.subr.bf16.mxu1 %v8129_v20  ;;  %v11091_v10 = vld [vmem:[#allocation40_spill] sm:$0xff]  ;;  %v11092_v20 = vld [vmem:[#allocation71_spill] sm:$0xff] }
 0x4fc   :  { %2630 = vmatpush1.bf16.msra.mxu0 %v8132_v26  ;;  %2683 = vmatpush1.bf16.msra.mxu1 %v8135_v33  ;;  %v11093_v26 = vld [vmem:[#allocation41_spill] sm:$0xff]  ;;  %v11094_v33 = vld [vmem:[#allocation72_spill] sm:$0xff] }
 0x4fd   :  { %2631 = vmatprep.subr.bf16.mxu0 %v11070_v38  ;;  %2684 = vmatprep.subr.bf16.mxu1 %v11071_v23  ;;  %v11129_v38 = vld [vmem:[#allocation89_spill] sm:$0xff]  ;;  %v11130_v23 = vld [vmem:[#allocation90_spill] sm:$0xff] }
 0x500   :  { %2632 = vmatpush1.bf16.msra.mxu0 %v11072_v47  ;;  %2685 = vmatpush1.bf16.msra.mxu1 %v11073_v21  ;;  %v11131_v47 = vld [vmem:[#allocation91_spill] sm:$0xff]  ;;  %v11132_v21 = vld [vmem:[#allocation92_spill] sm:$0xff] }
 0x501   :  { %2815 = vmatprep.subr.bf16.mxu0 %v11074_v30  ;;  %2868 = vmatprep.subr.bf16.mxu1 %v11075_v56  ;;  %v11133_v30 = vld [vmem:[#allocation93_spill] sm:$0xff]  ;;  %v11134_v56 = vld [vmem:[#allocation94_spill] sm:$0xff] }
 0x503   :  { %2650 = vmatmul.mubr.bf16.vlgmr.msra.gmra.mrb[72].mxu0 %v2418_v44  ;;  %2703 = vmatmul.mubr.bf16.vlgmr.msra.gmra.mrb[64].mxu1 %v2418_v44  ;;  %v11119_v44 = vld [vmem:[#allocation54_spill] sm:$0xff] }
 0x504   :  { %2659 = vmatprep.mubr.bf16.mxu0 %v10901_v13  ;;  %2712 = vmatprep.mubr.bf16.mxu1 %v10901_v13 }
 0x505   :  { %2816 = vmatpush1.bf16.msra.mxu0 %v11076_v43  ;;  %2869 = vmatpush1.bf16.msra.mxu1 %v11077_v48  ;;  %v11135_v43 = vld [vmem:[#allocation95_spill] sm:$0xff]  ;;  %v11136_v48 = vld [vmem:[#allocation96_spill] sm:$0xff] }
 0x506   :  { %2817 = vmatprep.subr.bf16.mxu0 %v11078_v53  ;;  %2870 = vmatprep.subr.bf16.mxu1 %v11079_v58  ;;  %v11137_v53 = vld [vmem:[#allocation97_spill] sm:$0xff]  ;;  %v8742_v58 = vld [vmem:[#allocation7 + $0x4] ss:$16 sps:$4 sm:$0xff]  }
 0x509   :  { %2818 = vmatpush1.bf16.msra.mxu0 %v11080_v62  ;;  %2871 = vmatpush1.bf16.msra.mxu1 %v11081_v57  ;;  %v11138_v62 = vld [vmem:[#allocation98_spill] sm:$0xff] }
 0x50a   :  { %2819 = vmatprep.subr.bf16.mxu0 %v11082_v42  ;;  %2872 = vmatprep.subr.bf16.mxu1 %v11083_v2  ;;  %v11139_v2 = vld [vmem:[#allocation58_spill] sm:$0xff] }
 0x50b   :  { %2660 = vmatmul.mubr.bf16.gmra.mrb[76].mxu0 %v2419_v45  ;;  %2713 = vmatmul.mubr.bf16.gmra.mrb[68].mxu1 %v2419_v45  ;;  %v11128_v45 = vld [vmem:[#allocation88_spill] sm:$0xff] }
 0x50d   :  { %2820 = vmatpush1.bf16.msra.mxu0 %v11084_v3  ;;  %2873 = vmatpush1.bf16.msra.mxu1 %v11085_v35 }
 0x50e   :  { %2821 = vmatprep.subr.bf16.mxu0 %v11086_v6  ;;  %2874 = vmatprep.subr.bf16.mxu1 %v11087_v7  ;;  %v11140_v7 = vld [vmem:[#allocation28_spill] sm:$0xff] }
 0x511   :  { %2822 = vmatpush1.bf16.msra.mxu0 %v11088_v4  ;;  %2875 = vmatpush1.bf16.msra.mxu1 %v11089_v24 }
 0x512   :  { %2823 = vmatprep.subr.bf16.mxu0 %v11090_v8  ;;  %2876 = vmatprep.subr.bf16.mxu1 %v11091_v10 }
 0x515   :  { %2824 = vmatpush1.bf16.msra.mxu0 %v11092_v20  ;;  %2877 = vmatpush1.bf16.msra.mxu1 %v11093_v26 }
 0x516   :  { %2825 = vmatprep.subr.bf16.mxu0 %v11094_v33  ;;  %2878 = vmatprep.subr.bf16.mxu1 %v11095_v50 }
 0x519   :  { %2826 = vmatpush1.bf16.msra.mxu0 %v11096_v59  ;;  %2879 = vmatpush1.bf16.msra.mxu1 %v11097_v32  ;;  %v11141_v32 = vld [vmem:[#allocation59_spill] sm:$0xff] }
 0x51a   :  { %2827 = vmatprep.subr.bf16.mxu0 %v11098_v25  ;;  %2880 = vmatprep.subr.bf16.mxu1 %v11099_v63 }
 0x51d   :  { %2828 = vmatpush1.bf16.msra.mxu0 %v11100_v36  ;;  %2881 = vmatpush1.bf16.msra.mxu1 %v11101_v61 }
 0x51e   :  { %2829 = vmatprep.subr.bf16.mxu0 %v11102_v49  ;;  %2882 = vmatprep.subr.bf16.mxu1 %v11103_v1 }
 0x521   :  { %2830 = vmatpush1.bf16.msra.mxu0 %v11104_v34  ;;  %2883 = vmatpush1.bf16.msra.mxu1 %v11105_v46 }
 0x522   :  { %2831 = vmatprep.subr.bf16.mxu0 %v11106_v28  ;;  %2884 = vmatprep.subr.bf16.mxu1 %v11107_v14 }
 0x525   :  { %2832 = vmatpush1.bf16.msra.mxu0 %v11108_v27  ;;  %2885 = vmatpush1.bf16.msra.mxu1 %v11109_v55 }
 0x526   :  { %2833 = vmatprep.subr.bf16.mxu0 %v11110_v39  ;;  %2886 = vmatprep.subr.bf16.mxu1 %v11111_v51  ;;  %v11142_v39 = vld [vmem:[#allocation29_spill] sm:$0xff] }
 0x529   :  { %2834 = vmatpush1.bf16.msra.mxu0 %v11112_v17  ;;  %2887 = vmatpush1.bf16.msra.mxu1 %v11113_v19 }
 0x52a   :  { %2835 = vmatprep.subr.bf16.mxu0 %v11114_v16  ;;  %2888 = vmatprep.subr.bf16.mxu1 %v11115_v11 }
 0x52d   :  { %2836 = vmatpush1.bf16.msra.mxu0 %v11116_v18  ;;  %2889 = vmatpush1.bf16.msra.mxu1 %v11117_v5 }
 0x52e   :  { %2837 = vmatprep.subr.bf16.mxu0 %v11118_v29  ;;  %2890 = vmatprep.subr.bf16.mxu1 %v11119_v44 }
 0x531   :  { %2838 = vmatpush1.bf16.msra.mxu0 %v11120_v31  ;;  %2891 = vmatpush1.bf16.msra.mxu1 %v11121_v54 }
 0x532   :  { %2839 = vmatprep.subr.bf16.mxu0 %v11122_v0  ;;  %2892 = vmatprep.subr.bf16.mxu1 %v11123_v60 }
 0x535   :  { %2840 = vmatpush1.bf16.msra.mxu0 %v11124_v41  ;;  %2893 = vmatpush1.bf16.msra.mxu1 %v11125_v12 }
 0x536   :  { %2841 = vmatprep.subr.bf16.mxu0 %v11126_v22  ;;  %2894 = vmatprep.subr.bf16.mxu1 %v11127_v15 }
 0x539   :  { %2842 = vmatpush1.bf16.msra.mxu0 %v11128_v45  ;;  %2895 = vmatpush1.bf16.msra.mxu1 %v11129_v38 }
 0x53a   :  { %2843 = vmatprep.subr.bf16.mxu0 %v11130_v23  ;;  %2896 = vmatprep.subr.bf16.mxu1 %v11131_v47 }
 0x53d   :  { %2844 = vmatpush1.bf16.msra.mxu0 %v11132_v21  ;;  %2897 = vmatpush1.bf16.msra.mxu1 %v11133_v30 }
 0x53e   :  { %2845 = vmatprep.subr.bf16.mxu0 %v11134_v56  ;;  %2898 = vmatprep.subr.bf16.mxu1 %v11135_v43 }
 0x541   :  { %2846 = vmatpush1.bf16.msra.mxu0 %v11136_v48  ;;  %2899 = vmatpush1.bf16.msra.mxu1 %v11137_v53 }
 0x542   :  { %3010 = vmatprep.subr.bf16.mxu0 %v8742_v58  ;;  %3063 = vmatprep.subr.bf16.mxu1 %v11138_v62  ;;  %v11143_v62 = vld [vmem:[#allocation99_spill] sm:$0xff] }
 0x5b5   :  { %v2456_v57 = vpop.f32.mrb[64].mxu0  ;;  %v2509_v42 = vpop.f32.mrb[56].mxu1 }
 0x5b6   :  { %v2457_v3 = vadd.f32 %v2456_v57, %v11139_v2  ;;  %v2458_v35 = vpop.f32.mrb[65].mxu0  ;;  %v2511_v6 = vpop.f32.mrb[57].mxu1  ;;  %v2510_v25 = vadd.f32 %v2509_v42, %v11141_v32 }
 0x5b7   :  { %v2459_v4 = vadd.f32 %v2458_v35, %v11140_v7  ;;  %v2460_v24 = vpop.f32.mrb[66].mxu0  ;;  %v2513_v8 = vpop.f32.mrb[58].mxu1  ;;  %v2512_v51 = vadd.f32 %v2511_v6, %v11142_v39 }
 0x5b8   :  { %v2528_v10 = vmul.f32 0.5, %v2457_v3  ;;  %v2461_v20 = vadd.f32 %v2460_v24, %v11139_v2  ;;  %v2462_v26 = vpop.f32.mrb[67].mxu0  ;;  %v2515_v33 = vpop.f32.mrb[59].mxu1  ;;  %v2514_v61 = vadd.f32 %v2513_v8, %v11141_v32 }
 0x5b9   :  { %v2544_v50 = vmul.f32 0.5, %v2459_v4  ;;  %v2463_v59 = vadd.f32 %v2462_v26, %v11140_v7  ;;  %v2516_v29 = vadd.f32 %v2515_v33, %v11142_v39  ;;  %v2564_v60 = vmul.f32 0.5, %v2512_v51 }
 0x5ba   :  { %5747 = vtanh.f32 %v2528_v10  ;;  %v2529_v63 = vmul.f32 0.5, %v2461_v20 }
 0x5bb   :  { %5749 = vtanh.f32 %v2544_v50  ;;  %v2545_v36 = vmul.f32 0.5, %v2463_v59  ;;  %v2565_v45 = vmul.f32 0.5, %v2516_v29  ;;  %v11144_v50 = vld [vmem:[#allocation100_spill] sm:$0xff] }
 0x5bc   :  { %5751 = vtanh.f32 %v2529_v63 }
 0x5bd   :  { %5753 = vtanh.f32 %v2510_v25 }
 0x5be   :  { %v2466_v49 = vpop.f32.mrb[68].mxu0  ;;  %v2519_v1 = vpop.f32.mrb[60].mxu1  ;;  %5755 = vtanh.f32 %v2545_v36 }
 0x5bf   :  { %v2467_v34 = vadd.f32 %v2466_v49, %v11139_v2  ;;  %v2468_v46 = vpop.f32.mrb[69].mxu0  ;;  %v2521_v28 = vpop.f32.mrb[61].mxu1  ;;  %5757 = vtanh.f32 %v2514_v61  ;;  %v2520_v44 = vadd.f32 %v2519_v1, %v11141_v32 }
 0x5c0   :  { %v2469_v14 = vadd.f32 %v2468_v46, %v11140_v7  ;;  %v2470_v27 = vpop.f32.mrb[70].mxu0  ;;  %v2523_v55 = vpop.f32.mrb[62].mxu1  ;;  %v2522_v47 = vadd.f32 %v2521_v28, %v11142_v39 }
 0x5c1   :  { %v2530_v17 = vmul.f32 0.5, %v2467_v34  ;;  %v2471_v19 = vadd.f32 %v2470_v27, %v11139_v2  ;;  %v2472_v16 = vpop.f32.mrb[71].mxu0  ;;  %v2525_v11 = vpop.f32.mrb[63].mxu1  ;;  %v2524_v22 = vadd.f32 %v2523_v55, %v11141_v32  ;;  %v11145_v27 = vld [vmem:[#allocation101_spill] sm:$0xff] }
 0x5c2   :  { %v2546_v18 = vmul.f32 0.5, %v2469_v14  ;;  %v2473_v5 = vadd.f32 %v2472_v16, %v11140_v7  ;;  %v2526_v53 = vadd.f32 %v2525_v11, %v11142_v39  ;;  %v2566_v6 = vmul.f32 0.5, %v2522_v47  ;;  %v4999_v16 = vld [vmem:[%s10913_s30 + $0x180] sm:$0xff] }
 0x5c3   :  { %5759 = vtanh.f32 %v2530_v17  ;;  %v2531_v31 = vmul.f32 0.5, %v2471_v19 }
 0x5c4   :  { %5761 = vtanh.f32 %v2546_v18  ;;  %v2547_v54 = vmul.f32 0.5, %v2473_v5  ;;  %v5748_v0 = vpop.eup %5747  ;;  %v2567_v33 = vmul.f32 0.5, %v2526_v53 }
 0x5c5   :  { %v5750_v41 = vpop.eup %5749  ;;  %v2536_v12 = vmul.f32 0.5, %v5748_v0  ;;  %5763 = vtanh.f32 %v2531_v31  ;;  %v5003_v0 = vld [vmem:[%s10913_s30 + $0x1a0] sm:$0xff] }
 0x5c6   :  { %v2552_v15 = vmul.f32 0.5, %v5750_v41  ;;  %5765 = vtanh.f32 %v2520_v44  ;;  %v5752_v38 = vpop.eup %5751  ;;  %v5000_v44 = vld [vmem:[%s10913_s30 + $0x188] sm:$0xff] }
 0x5c7   :  { %v2540_v23 = vadd.f32 0.5, %v2536_v12  ;;  %5767 = vtanh.f32 %v2547_v54  ;;  %v5754_v21 = vpop.eup %5753  ;;  %v2537_v56 = vmul.f32 0.5, %v5752_v38 }
 0x5c8   :  { %v2556_v30 = vadd.f32 0.5, %v2552_v15  ;;  %5769 = vtanh.f32 %v2564_v60  ;;  %v5756_v43 = vpop.eup %5755  ;;  %v11146_v60 = vld [vmem:[#allocation102_spill] sm:$0xff] }
 0x5c9   :  { %v2584_v48 = vmul.f32 %v5754_v21, %v2540_v23  ;;  %5771 = vtanh.f32 %v2524_v22  ;;  %v2541_v42 = vadd.f32 0.5, %v2537_v56  ;;  %v2553_v3 = vmul.f32 0.5, %v5756_v43  ;;  %v5758_v35 = vpop.eup %5757 }
 0x5ca   :  { %v2580_v57 = vmul.f32 %v2556_v30, %v11143_v62  ;;  %5773 = vtanh.f32 %v2565_v45  ;;  %v5004_v45 = vld [vmem:[%s10913_s30 + $0x1a8] sm:$0xff] }
 0x5cb   :  { %v2557_v8 = vadd.f32 0.5, %v2553_v3  ;;  %v2585_v10 = vmul.f32 %v5758_v35, %v2541_v42  ;;  %5775 = vtanh.f32 %v2566_v6 }
 0x5cc   :  { %v8763_v24 = vadd.f32 %v2584_v48, %v2580_v57  ;;  %v5001_v48 = vld [vmem:[%s10913_s30 + $0x190] sm:$0xff] }
 0x5cd   :  { %v5760_v4 = vpop.eup %5759  ;;  %v2581_v59 = vmul.f32 %v2557_v8, %v11144_v50  ;;  %v5005_v8 = vld [vmem:[%s10913_s30 + $0x1b0] sm:$0xff]  ;;  %v5007_v50 = vld [vmem:[%s10913_s30 + $0x1c0] sm:$0xff] }
 0x5ce   :  { %v5762_v20 = vpop.eup %5761  ;;  %v2538_v26 = vmul.f32 0.5, %v5760_v4  ;;  %5777 = vtanh.f32 %v8763_v24 }
 0x5cf   :  { %v2554_v25 = vmul.f32 0.5, %v5762_v20  ;;  %v5764_v63 = vpop.eup %5763  ;;  %v8767_v49 = vadd.f32 %v2585_v10, %v2581_v59  ;;  %5779 = vtanh.f32 %v2567_v33 }
 0x5d0   :  { %v2542_v36 = vadd.f32 0.5, %v2538_v26  ;;  %v5766_v61 = vpop.eup %5765  ;;  %v2539_v34 = vmul.f32 0.5, %v5764_v63 }
 0x5d1   :  { %v2558_v1 = vadd.f32 0.5, %v2554_v25  ;;  %v5768_v46 = vpop.eup %5767  ;;  %5781 = vtanh.f32 %v8767_v49  ;;  %v5002_v25 = vld [vmem:[%s10913_s30 + $0x198] sm:$0xff] }
 0x5d2   :  { %v2586_v28 = vmul.f32 %v5766_v61, %v2542_v36  ;;  %v5770_v14 = vpop.eup %5769  ;;  %v2543_v51 = vadd.f32 0.5, %v2539_v34  ;;  %v2555_v17 = vmul.f32 0.5, %v5768_v46  ;;  %v5008_v36 = vld [vmem:[%s10913_s30 + $0x1c8] sm:$0xff] }
 0x5d3   :  { %v2582_v55 = vmul.f32 %v2558_v1, %v11145_v27  ;;  %v5772_v19 = vpop.eup %5771  ;;  %v2572_v38 = vmul.f32 0.5, %v5770_v14  ;;  %v5006_v1 = vld [vmem:[%s10913_s30 + $0x1b8] sm:$0xff] }
 0x5d4   :  { %v5774_v11 = vpop.eup %5773  ;;  %v2559_v5 = vadd.f32 0.5, %v2555_v17  ;;  %v2587_v29 = vmul.f32 %v5772_v19, %v2543_v51  ;;  %v5009_v19 = vld [vmem:[%s10913_s30 + $0x1d0] sm:$0xff] }
 0x5d5   :  { %v8774_v18 = vadd.f32 %v2586_v28, %v2582_v55  ;;  %v2573_v23 = vmul.f32 0.5, %v5774_v11  ;;  %v5776_v42 = vpop.eup %5775  ;;  %v2576_v20 = vadd.f32 0.5, %v2572_v38  ;;  %v5011_v28 = vld [vmem:[%s10913_s30 + $0x1e0] sm:$0xff] }
 0x5d6   :  { %v2651_v31 = vpop.f32.mrb[72].mxu0  ;;  %v2704_v54 = vpop.f32.mrb[64].mxu1  ;;  %v2583_v41 = vmul.f32 %v2559_v5, %v11146_v60  ;;  %v2574_v55 = vmul.f32 0.5, %v5776_v42  ;;  %v5012_v5 = vld [vmem:[%s10913_s30 + $0x1e8] sm:$0xff] }
 0x5d7   :  { %v2723_v12 = vadd.f32 %v4999_v16, %v2651_v31  ;;  %v2653_v22 = vpop.f32.mrb[73].mxu0  ;;  %v2706_v15 = vpop.f32.mrb[65].mxu1  ;;  %5783 = vtanh.f32 %v8774_v18  ;;  %v2577_v26 = vadd.f32 0.5, %v2573_v23  ;;  %v2725_v33 = vadd.f32 %v5001_v48, %v2704_v54 }
 0x5d8   :  { %v2724_v47 = vadd.f32 %v5000_v44, %v2653_v22  ;;  %v2655_v21 = vpop.f32.mrb[74].mxu0  ;;  %v2708_v30 = vpop.f32.mrb[66].mxu1  ;;  %v8787_v56 = vadd.f32 %v2587_v29, %v2583_v41  ;;  %v2726_v29 = vadd.f32 %v5002_v25, %v2706_v15  ;;  %v2578_v15 = vadd.f32 0.5, %v2574_v55 }
 0x5d9   :  { %v2739_v43 = vmul.f32 0.5, %v2723_v12  ;;  %v2727_v53 = vadd.f32 %v5003_v0, %v2655_v21  ;;  %v2657_v62 = vpop.f32.mrb[75].mxu0  ;;  %v2710_v57 = vpop.f32.mrb[67].mxu1  ;;  %v2729_v61 = vadd.f32 %v5005_v8, %v2708_v30 }
 0x5da   :  { %v2755_v3 = vmul.f32 0.5, %v2724_v47  ;;  %v2728_v35 = vadd.f32 %v5004_v45, %v2657_v62  ;;  %v5778_v6 = vpop.eup %5777  ;;  %5785 = vtanh.f32 %v8787_v56  ;;  %v2730_v60 = vadd.f32 %v5006_v1, %v2710_v57  ;;  %v5010_v57 = vld [vmem:[%s10913_s30 + $0x1d8] sm:$0xff] }
 0x5db   :  { %v2740_v4 = vmul.f32 0.5, %v2727_v53  ;;  %v5780_v10 = vpop.eup %5779  ;;  %5787 = vtanh.f32 %v2739_v43  ;;  %v2596_v14 = vmul.f32 %v5778_v6, %v2576_v20  ;;  %v2775_v48 = vmul.f32 0.5, %v2726_v29  ;;  %v5013_v53 = vld [vmem:[%s10913_s30 + $0x1f0] sm:$0xff] }
 0x5dc   :  { %v5782_v59 = vpop.eup %5781  ;;  %5789 = vtanh.f32 %v2755_v3  ;;  %v2756_v63 = vmul.f32 0.5, %v2728_v35  ;;  %v2575_v51 = vmul.f32 0.5, %v5780_v10  ;;  %v2776_v35 = vmul.f32 0.5, %v2730_v60 }
 0x5dd   :  { %v2597_v27 = vmul.f32 %v5782_v59, %v2577_v26  ;;  %5791 = vtanh.f32 %v2740_v4 }
 0x5de   :  { %v2661_v34 = vpop.f32.mrb[76].mxu0  ;;  %v2714_v46 = vpop.f32.mrb[68].mxu1  ;;  %5793 = vtanh.f32 %v2725_v33  ;;  %v2579_v43 = vadd.f32 0.5, %v2575_v51 }
 0x5df   :  { %v2731_v17 = vadd.f32 %v5007_v50, %v2661_v34  ;;  %v2663_v16 = vpop.f32.mrb[77].mxu0  ;;  %v2716_v11 = vpop.f32.mrb[69].mxu1  ;;  %v2813_v0 = vpack.c.bf16 %v2597_v27, %v2596_v14  ;;  %5795 = vtanh.f32 %v2756_v63  ;;  %v2733_v38 = vadd.f32 %v5009_v19, %v2714_v46  ;;  %v5014_v50 = vld [vmem:[%s10913_s30 + $0x1f8] sm:$0xff] }
 0x5e0   :  { %v2732_v44 = vadd.f32 %v5008_v36, %v2663_v16  ;;  %v2665_v31 = vpop.f32.mrb[78].mxu0  ;;  %v2718_v54 = vpop.f32.mrb[70].mxu1  ;;  %5797 = vtanh.f32 %v2729_v61  ;;  %v2734_v33 = vadd.f32 %v5010_v57, %v2716_v11 }
 0x5e1   :  { %v2741_v41 = vmul.f32 0.5, %v2731_v17  ;;  %v2735_v12 = vadd.f32 %v5011_v28, %v2665_v31  ;;  %v2667_v22 = vpop.f32.mrb[79].mxu0  ;;  %v2720_v45 = vpop.f32.mrb[71].mxu1  ;;  %2847 = vmatprep.mubr.bf16.mxu0 %v2813_v0  ;;  %2900 = vmatprep.mubr.bf16.mxu1 %v2813_v0  ;;  %v2737_v20 = vadd.f32 %v5013_v53, %v2718_v54 }
 0x5e2   :  { %v2757_v23 = vmul.f32 0.5, %v2732_v44  ;;  %v2736_v47 = vadd.f32 %v5012_v5, %v2667_v22  ;;  %v5784_v21 = vpop.eup %5783  ;;  %v2738_v28 = vadd.f32 %v5014_v50, %v2720_v45  ;;  %v2777_v17 = vmul.f32 0.5, %v2734_v33 }
 0x5e3   :  { %5799 = vtanh.f32 %v2741_v41  ;;  %v2742_v30 = vmul.f32 0.5, %v2735_v12  ;;  %v2598_v6 = vmul.f32 %v5784_v21, %v2578_v15 }
 0x5e4   :  { %v5786_v62 = vpop.eup %5785  ;;  %5801 = vtanh.f32 %v2757_v23  ;;  %v2758_v42 = vmul.f32 0.5, %v2736_v47  ;;  %v2778_v31 = vmul.f32 0.5, %v2738_v28  ;;  %v8856_v28 = vld [vmem:[#allocation7 + $0x24] ss:$16 sps:$4 sm:$0xff]  }
 0x5e5   :  { %v5788_v3 = vpop.eup %5787  ;;  %5803 = vtanh.f32 %v2733_v38  ;;  %v2599_v4 = vmul.f32 %v5786_v62, %v2579_v43 }
 0x5e6   :  { %v5790_v8 = vpop.eup %5789  ;;  %v2747_v10 = vmul.f32 0.5, %v5788_v3  ;;  %5805 = vtanh.f32 %v2742_v30 }
 0x5e7   :  { %v2763_v26 = vmul.f32 0.5, %v5790_v8  ;;  %5807 = vtanh.f32 %v2775_v48  ;;  %v8826_v59 = vpack.c.bf16 %v2599_v4, %v2598_v6  ;;  %v5792_v25 = vpop.eup %5791 }
 0x5e8   :  { %v2751_v63 = vadd.f32 0.5, %v2747_v10  ;;  %5809 = vtanh.f32 %v2758_v42  ;;  %v5794_v36 = vpop.eup %5793  ;;  %v2748_v1 = vmul.f32 0.5, %v5792_v25 }
 0x5e9   :  { %v2767_v61 = vadd.f32 0.5, %v2763_v26  ;;  %5811 = vtanh.f32 %v2776_v35  ;;  %v5796_v34 = vpop.eup %5795 }
 0x5ea   :  { %v2795_v46 = vmul.f32 %v5794_v36, %v2751_v63  ;;  %5813 = vtanh.f32 %v2737_v20  ;;  %v5798_v14 = vpop.eup %5797  ;;  %v2752_v55 = vadd.f32 0.5, %v2748_v1  ;;  %v2764_v51 = vmul.f32 0.5, %v5796_v34  ;;  %v8848_v36 = vld [vmem:[#allocation7] ss:$16 sps:$4 sm:$0xff]  }
 0x5eb   :  { %v2791_v27 = vmul.f32 %v2767_v61, %v8627_v40  ;;  %5815 = vtanh.f32 %v2777_v17  ;;  %v8851_v61 = vld [vmem:[#allocation7 + $0x8] ss:$16 sps:$4 sm:$0xff]  }
 0x5ec   :  { %v2768_v11 = vadd.f32 0.5, %v2764_v51  ;;  %v2796_v5 = vmul.f32 %v5798_v14, %v2752_v55  ;;  %v8859_v14 = vld [vmem:[#allocation7 + $0x2c] ss:$16 sps:$4 sm:$0xff]   ;;  %v8862_v51 = vld [vmem:[#allocation7 + $0x20] ss:$16 sps:$4 sm:$0xff]  }
 0x5ed   :  { %v5800_v19 = vpop.eup %5799  ;;  %v8829_v16 = vadd.f32 %v2795_v46, %v2791_v27  ;;  %v8865_v17 = vld [vmem:[#allocation7 + $0x28] ss:$16 sps:$4 sm:$0xff]  }
 0x5ee   :  { %v2749_v29 = vmul.f32 0.5, %v5800_v19  ;;  %v5802_v44 = vpop.eup %5801  ;;  %v2792_v0 = vmul.f32 %v2768_v11, %v8631_v37  ;;  %v8871_v19 = vld [vmem:[#allocation7 + $0x4c] ss:$16 sps:$4 sm:$0xff]  }
 0x5ef   :  { %v5804_v54 = vpop.eup %5803  ;;  %v2765_v41 = vmul.f32 0.5, %v5802_v44  ;;  %5817 = vtanh.f32 %v8829_v16  ;;  %v8884_v44 = vld [vmem:[#allocation7 + $0x64] ss:$16 sps:$4 sm:$0xff]  }
 0x5f0   :  { %v2753_v60 = vadd.f32 0.5, %v2749_v29  ;;  %v5806_v12 = vpop.eup %5805  ;;  %v8833_v22 = vadd.f32 %v2796_v5, %v2792_v0  ;;  %5819 = vtanh.f32 %v2778_v31  ;;  %v8878_v5 = vld [vmem:[#allocation7 + $0x40] ss:$16 sps:$4 sm:$0xff]   ;;  %v8881_v29 = vld [vmem:[#allocation7 + $0x48] ss:$16 sps:$4 sm:$0xff]  }
 0x5f1   :  { %v5808_v40 = vpop.eup %5807  ;;  %v2769_v45 = vadd.f32 0.5, %v2765_v41  ;;  %v2750_v23 = vmul.f32 0.5, %v5806_v12  ;;  %v8887_v31 = vld [vmem:[#allocation7 + $0x6c] ss:$16 sps:$4 sm:$0xff]   ;;  %v8895_v0 = vld [vmem:[#allocation7 + $0x68] ss:$16 sps:$4 sm:$0xff]  }
 0x5f2   :  { %v2797_v38 = vmul.f32 %v5804_v54, %v2753_v60  ;;  %v5810_v47 = vpop.eup %5809  ;;  %5821 = vtanh.f32 %v8833_v22  ;;  %v2783_v42 = vmul.f32 0.5, %v5808_v40  ;;  %v8892_v54 = vld [vmem:[#allocation7 + $0x60] ss:$16 sps:$4 sm:$0xff]   ;;  %v8898_v60 = vld [vmem:[#allocation7 + $0x84] ss:$16 sps:$4 sm:$0xff]  }
 0x5f3   :  { %v5812_v21 = vpop.eup %5811  ;;  %v2793_v30 = vmul.f32 %v2769_v45, %v8635_v52  ;;  %v2754_v37 = vadd.f32 0.5, %v2750_v23  ;;  %v2766_v15 = vmul.f32 0.5, %v5810_v47  ;;  %v8901_v41 = vld [vmem:[#allocation7 + $0x8c] ss:$16 sps:$4 sm:$0xff]   ;;  %v8904_v12 = vld [vmem:[#allocation7 + $0x80] ss:$16 sps:$4 sm:$0xff]  }
 0x5f4   :  { %v5814_v43 = vpop.eup %5813  ;;  %v2784_v3 = vmul.f32 0.5, %v5812_v21  ;;  %v2787_v8 = vadd.f32 0.5, %v2783_v42  ;;  %v8907_v40 = vld [vmem:[#allocation7 + $0x88] ss:$16 sps:$4 sm:$0xff]   ;;  %v8910_v45 = vld [vmem:[#allocation7 + $0xa4] ss:$16 sps:$4 sm:$0xff]  }
 0x5f5   :  { %v8837_v48 = vadd.f32 %v2797_v38, %v2793_v30  ;;  %v2770_v53 = vadd.f32 0.5, %v2766_v15  ;;  %v2798_v62 = vmul.f32 %v5814_v43, %v2754_v37  ;;  %v5816_v35 = vpop.eup %5815  ;;  %v8913_v38 = vld [vmem:[#allocation7 + $0xac] ss:$16 sps:$4 sm:$0xff]   ;;  %v8916_v23 = vld [vmem:[#allocation7 + $0xa0] ss:$16 sps:$4 sm:$0xff]  }
 0x5f6   :  { %v2788_v10 = vadd.f32 0.5, %v2784_v3  ;;  %v2785_v25 = vmul.f32 0.5, %v5816_v35  ;;  %v8919_v47 = vld [vmem:[#allocation7 + $0xa8] ss:$16 sps:$4 sm:$0xff]   ;;  %v8922_v21 = vld [vmem:[#allocation7 + $0xc4] ss:$16 sps:$4 sm:$0xff]  }
 0x5f7   :  { %v2794_v57 = vmul.f32 %v2770_v53, %v8639_v9  ;;  %5823 = vtanh.f32 %v8837_v48  ;;  %v8925_v30 = vld [vmem:[#allocation7 + $0xcc] ss:$16 sps:$4 sm:$0xff]   ;;  %v8928_v37 = vld [vmem:[#allocation7 + $0xc0] ss:$16 sps:$4 sm:$0xff]   ;;  %v8931_v15 = vld [vmem:[#allocation7 + $0xc8] ss:$16 sps:$4 sm:$0xff]  }
 0x5f8   :  { %v2789_v1 = vadd.f32 0.5, %v2785_v25  ;;  %v8934_v43 = vld [vmem:[#allocation7 + $0xe4] ss:$16 sps:$4 sm:$0xff]   ;;  %v8937_v53 = vld [vmem:[#allocation7 + $0xec] ss:$16 sps:$4 sm:$0xff]  }
 0x5f9   :  { %v8841_v6 = vadd.f32 %v2798_v62, %v2794_v57  ;;  %v5818_v4 = vpop.eup %5817  ;;  %11147 = vst [vmem:[#allocation60_spill] sm:$0xff] %v8934_v43  ;;  %11148 = vst [vmem:[#allocation30_spill] sm:$0xff] %v8937_v53  ;;  %v8940_v62 = vld [vmem:[#allocation7 + $0xe0] ss:$16 sps:$4 sm:$0xff]   ;;  %v8943_v57 = vld [vmem:[#allocation7 + $0xe8] ss:$16 sps:$4 sm:$0xff]  }
 0x5fa   :  { %v5820_v52 = vpop.eup %5819  ;;  %v2807_v26 = vmul.f32 %v5818_v4, %v2787_v8  ;;  %11149 = vst [vmem:[#allocation61_spill] sm:$0xff] %v8940_v62  ;;  %11150 = vst [vmem:[#allocation31_spill] sm:$0xff] %v8943_v57  ;;  %v8949_v42 = vld [vmem:[%s10539_s11 + $0x4] ss:$16 sps:$4 sm:$0xff]   ;;  %v8955_v3 = vld [vmem:[%s10539_s11 + $0xc] ss:$16 sps:$4 sm:$0xff]  }
 0x5fb   :  { %5825 = vtanh.f32 %v8841_v6  ;;  %v2786_v9 = vmul.f32 0.5, %v5820_v52  ;;  %11151 = vst [vmem:[#allocation62_spill] sm:$0xff] %v8949_v42  ;;  %11152 = vst [vmem:[#allocation32_spill] sm:$0xff] %v8955_v3  ;;  %v8965_v35 = vld [vmem:[%s10539_s11] ss:$16 sps:$4 sm:$0xff]  }
 0x5fc   :  { %v5822_v20 = vpop.eup %5821  ;;  %11153 = vst [vmem:[#allocation63_spill] sm:$0xff] %v8965_v35  ;;  %v8971_v4 = vld [vmem:[%s10539_s11 + $0x8] ss:$16 sps:$4 sm:$0xff]   ;;  %v8977_v52 = vld [vmem:[%s10539_s11 + $0x24] ss:$16 sps:$4 sm:$0xff]  }
 0x5fd   :  { %v2808_v33 = vmul.f32 %v5822_v20, %v2788_v10  ;;  %v2790_v34 = vadd.f32 0.5, %v2786_v9  ;;  %11154 = vst [vmem:[#allocation33_spill] sm:$0xff] %v8971_v4  ;;  %11155 = vst [vmem:[#allocation64_spill] sm:$0xff] %v8977_v52  ;;  %v8983_v8 = vld [vmem:[%s10539_s11 + $0x2c] ss:$16 sps:$4 sm:$0xff]  }
 0x5fe   :  { %11156 = vst [vmem:[#allocation34_spill] sm:$0xff] %v8983_v8  ;;  %v8989_v10 = vld [vmem:[%s10539_s11 + $0x20] ss:$16 sps:$4 sm:$0xff]   ;;  %v8995_v20 = vld [vmem:[%s10539_s11 + $0x28] ss:$16 sps:$4 sm:$0xff]  }
 0x5ff   :  { %v8844_v50 = vpack.c.bf16 %v2808_v33, %v2807_v26  ;;  %11157 = vst [vmem:[#allocation65_spill] sm:$0xff] %v8989_v10  ;;  %11158 = vst [vmem:[#allocation35_spill] sm:$0xff] %v8995_v20  ;;  %v9001_v26 = vld [vmem:[%s10539_s11 + $0x44] ss:$16 sps:$4 sm:$0xff]   ;;  %v9007_v33 = vld [vmem:[%s10539_s11 + $0x4c] ss:$16 sps:$4 sm:$0xff]  }
 0x600   :  { %11159 = vst [vmem:[#allocation66_spill] sm:$0xff] %v9001_v26  ;;  %11160 = vst [vmem:[#allocation36_spill] sm:$0xff] %v9007_v33  ;;  %v9021_v25 = vld [vmem:[%s10539_s11 + $0x48] ss:$16 sps:$4 sm:$0xff]   ;;  %v9027_v9 = vld [vmem:[%s10539_s11 + $0x64] ss:$16 sps:$4 sm:$0xff]  }
 0x601   :  { %2848 = vmatmul.mubr.bf16.vlgmr.msra.gmra.mrb[80].mxu0 %v8844_v50  ;;  %2901 = vmatmul.mubr.bf16.vlgmr.msra.gmra.mrb[72].mxu1 %v8844_v50  ;;  %v5824_v63 = vpop.eup %5823  ;;  %11162 = vst [vmem:[#allocation37_spill] sm:$0xff] %v9021_v25  ;;  %11163 = vst [vmem:[#allocation68_spill] sm:$0xff] %v9027_v9 }
 0x602   :  { %3011 = vmatpush1.bf16.msra.mxu0 %v8848_v36  ;;  %3064 = vmatpush1.bf16.msra.mxu1 %v8851_v61  ;;  %v2809_v27 = vmul.f32 %v5824_v63, %v2789_v1  ;;  %v9033_v63 = vld [vmem:[%s10539_s11 + $0x6c] ss:$16 sps:$4 sm:$0xff]   ;;  %v9039_v1 = vld [vmem:[%s10539_s11 + $0x60] ss:$16 sps:$4 sm:$0xff]  }
 0x603   :  { %2857 = vmatprep.mubr.bf16.mxu0 %v8826_v59  ;;  %2910 = vmatprep.mubr.bf16.mxu1 %v8826_v59  ;;  %v8868_v59 = vld [vmem:[#allocation7 + $0x44] ss:$16 sps:$4 sm:$0xff]   ;;  %11164 = vst [vmem:[#allocation38_spill] sm:$0xff] %v9033_v63  ;;  %11165 = vst [vmem:[#allocation69_spill] sm:$0xff] %v9039_v1 }
 0x604   :  { %3012 = vmatprep.subr.bf16.mxu0 %v8856_v28  ;;  %3065 = vmatprep.subr.bf16.mxu1 %v8859_v14 }
 0x605   :  { %v5826_v46 = vpop.eup %5825 }
 0x606   :  { %v2810_v55 = vmul.f32 %v5826_v46, %v2790_v34  ;;  %3013 = vmatpush1.bf16.msra.mxu0 %v8862_v51  ;;  %3066 = vmatpush1.bf16.msra.mxu1 %v8865_v17  ;;  %v9045_v34 = vld [vmem:[%s10539_s11 + $0x68] ss:$16 sps:$4 sm:$0xff]   ;;  %v9051_v46 = vld [vmem:[%s10539_s11 + $0x84] ss:$16 sps:$4 sm:$0xff]  }
 0x607   :  { %3014 = vmatprep.subr.bf16.mxu0 %v8868_v59  ;;  %3067 = vmatprep.subr.bf16.mxu1 %v8871_v19  ;;  %11166 = vst [vmem:[#allocation39_spill] sm:$0xff] %v9045_v34  ;;  %11167 = vst [vmem:[#allocation70_spill] sm:$0xff] %v9051_v46 }
 0x608   :  { %v8874_v11 = vpack.c.bf16 %v2810_v55, %v2809_v27  ;;  %v9057_v27 = vld [vmem:[%s10539_s11 + $0x8c] ss:$16 sps:$4 sm:$0xff]   ;;  %v9063_v55 = vld [vmem:[%s10539_s11 + $0x80] ss:$16 sps:$4 sm:$0xff]  }
 0x609   :  { %11168 = vst [vmem:[#allocation40_spill] sm:$0xff] %v9057_v27  ;;  %11169 = vst [vmem:[#allocation71_spill] sm:$0xff] %v9063_v55 }
 0x60a   :  { %2858 = vmatmul.mubr.bf16.gmra.mrb[84].mxu0 %v8874_v11  ;;  %2911 = vmatmul.mubr.bf16.gmra.mrb[76].mxu1 %v8874_v11 }
 0x60b   :  { %3015 = vmatpush1.bf16.msra.mxu0 %v8878_v5  ;;  %3068 = vmatpush1.bf16.msra.mxu1 %v8881_v29 }
 0x60c   :  { %3016 = vmatprep.subr.bf16.mxu0 %v8884_v44  ;;  %3069 = vmatprep.subr.bf16.mxu1 %v8887_v31 }
 0x60d   :  { %3042 = vmatprep.mubr.bf16.mxu0 %v10901_v13  ;;  %3095 = vmatprep.mubr.bf16.mxu1 %v10901_v13 }
 0x60f   :  { %3017 = vmatpush1.bf16.msra.mxu0 %v8892_v54  ;;  %3070 = vmatpush1.bf16.msra.mxu1 %v8895_v0 }
 0x610   :  { %3018 = vmatprep.subr.bf16.mxu0 %v8898_v60  ;;  %3071 = vmatprep.subr.bf16.mxu1 %v8901_v41 }
 0x613   :  { %3019 = vmatpush1.bf16.msra.mxu0 %v8904_v12  ;;  %3072 = vmatpush1.bf16.msra.mxu1 %v8907_v40 }
 0x614   :  { %3020 = vmatprep.subr.bf16.mxu0 %v8910_v45  ;;  %3073 = vmatprep.subr.bf16.mxu1 %v8913_v38 }
 0x617   :  { %3021 = vmatpush1.bf16.msra.mxu0 %v8916_v23  ;;  %3074 = vmatpush1.bf16.msra.mxu1 %v8919_v47 }
 0x618   :  { %3022 = vmatprep.subr.bf16.mxu0 %v8922_v21  ;;  %3075 = vmatprep.subr.bf16.mxu1 %v8925_v30 }
 0x61b   :  { %3023 = vmatpush1.bf16.msra.mxu0 %v8928_v37  ;;  %3076 = vmatpush1.bf16.msra.mxu1 %v8931_v15 }
 0x61c   :  { %3024 = vmatprep.subr.bf16.mxu0 %v8934_v43  ;;  %3077 = vmatprep.subr.bf16.mxu1 %v8937_v53 }
 0x61f   :  { %3025 = vmatpush1.bf16.msra.mxu0 %v8940_v62  ;;  %3078 = vmatpush1.bf16.msra.mxu1 %v8943_v57 }
 0x620   :  { %3208 = vmatprep.subr.bf16.mxu0 %v8949_v42  ;;  %3261 = vmatprep.subr.bf16.mxu1 %v8955_v3 }
 0x622   :  { %3043 = vmatmul.mubr.bf16.vlgmr.msra.gmra.mrb[88].mxu0 %v8844_v50  ;;  %3096 = vmatmul.mubr.bf16.vlgmr.msra.gmra.mrb[80].mxu1 %v8844_v50  ;;  %v9015_v50 = vld [vmem:[%s10539_s11 + $0x40] ss:$16 sps:$4 sm:$0xff]  }
 0x623   :  { %3052 = vmatprep.mubr.bf16.mxu0 %v10901_v13  ;;  %3105 = vmatprep.mubr.bf16.mxu1 %v10901_v13  ;;  %11161 = vst [vmem:[#allocation67_spill] sm:$0xff] %v9015_v50 }
 0x624   :  { %3209 = vmatpush1.bf16.msra.mxu0 %v8965_v35  ;;  %3262 = vmatpush1.bf16.msra.mxu1 %v8971_v4 }
 0x625   :  { %3210 = vmatprep.subr.bf16.mxu0 %v8977_v52  ;;  %3263 = vmatprep.subr.bf16.mxu1 %v8983_v8 }
 0x628   :  { %3211 = vmatpush1.bf16.msra.mxu0 %v8989_v10  ;;  %3264 = vmatpush1.bf16.msra.mxu1 %v8995_v20 }
 0x629   :  { %3212 = vmatprep.subr.bf16.mxu0 %v9001_v26  ;;  %3265 = vmatprep.subr.bf16.mxu1 %v9007_v33 }
 0x62a   :  { %3053 = vmatmul.mubr.bf16.gmra.mrb[92].mxu0 %v8874_v11  ;;  %3106 = vmatmul.mubr.bf16.gmra.mrb[84].mxu1 %v8874_v11  ;;  %v9069_v11 = vld [vmem:[%s10539_s11 + $0x88] ss:$16 sps:$4 sm:$0xff]  }
 0x62b   :  { %11170 = vst [vmem:[#allocation41_spill] sm:$0xff] %v9069_v11 }
 0x62c   :  { %3213 = vmatpush1.bf16.msra.mxu0 %v9015_v50  ;;  %3266 = vmatpush1.bf16.msra.mxu1 %v9021_v25 }
 0x62d   :  { %3214 = vmatprep.subr.bf16.mxu0 %v9027_v9  ;;  %3267 = vmatprep.subr.bf16.mxu1 %v9033_v63 }
 0x630   :  { %3215 = vmatpush1.bf16.msra.mxu0 %v9039_v1  ;;  %3268 = vmatpush1.bf16.msra.mxu1 %v9045_v34 }
 0x631   :  { %3216 = vmatprep.subr.bf16.mxu0 %v9051_v46  ;;  %3269 = vmatprep.subr.bf16.mxu1 %v9057_v27  ;;  %v9075_v46 = vld [vmem:[%s10539_s11 + $0xa4] ss:$16 sps:$4 sm:$0xff]   ;;  %v9081_v27 = vld [vmem:[%s10539_s11 + $0xac] ss:$16 sps:$4 sm:$0xff]  }
 0x632   :  { %11171 = vst [vmem:[#allocation72_spill] sm:$0xff] %v9075_v46  ;;  %11172 = vst [vmem:[#allocation42_spill] sm:$0xff] %v9081_v27 }
 0x634   :  { %3217 = vmatpush1.bf16.msra.mxu0 %v9063_v55  ;;  %3270 = vmatpush1.bf16.msra.mxu1 %v9069_v11  ;;  %v9087_v55 = vld [vmem:[%s10539_s11 + $0xa0] ss:$16 sps:$4 sm:$0xff]   ;;  %v9093_v11 = vld [vmem:[%s10539_s11 + $0xa8] ss:$16 sps:$4 sm:$0xff]  }
 0x635   :  { %3218 = vmatprep.subr.bf16.mxu0 %v9075_v46  ;;  %3271 = vmatprep.subr.bf16.mxu1 %v9081_v27  ;;  %11173 = vst [vmem:[#allocation73_spill] sm:$0xff] %v9087_v55  ;;  %11174 = vst [vmem:[#allocation43_spill] sm:$0xff] %v9093_v11  ;;  %v9099_v46 = vld [vmem:[%s10539_s11 + $0xc4] ss:$16 sps:$4 sm:$0xff]   ;;  %v9105_v27 = vld [vmem:[%s10539_s11 + $0xcc] ss:$16 sps:$4 sm:$0xff]  }
 0x636   :  { %11175 = vst [vmem:[#allocation74_spill] sm:$0xff] %v9099_v46  ;;  %11176 = vst [vmem:[#allocation44_spill] sm:$0xff] %v9105_v27 }
 0x638   :  { %3219 = vmatpush1.bf16.msra.mxu0 %v9087_v55  ;;  %3272 = vmatpush1.bf16.msra.mxu1 %v9093_v11  ;;  %v9111_v55 = vld [vmem:[%s10539_s11 + $0xc0] ss:$16 sps:$4 sm:$0xff]   ;;  %v9117_v11 = vld [vmem:[%s10539_s11 + $0xc8] ss:$16 sps:$4 sm:$0xff]  }
 0x639   :  { %3220 = vmatprep.subr.bf16.mxu0 %v9099_v46  ;;  %3273 = vmatprep.subr.bf16.mxu1 %v9105_v27  ;;  %11177 = vst [vmem:[#allocation75_spill] sm:$0xff] %v9111_v55  ;;  %11178 = vst [vmem:[#allocation45_spill] sm:$0xff] %v9117_v11  ;;  %v9123_v46 = vld [vmem:[%s10539_s11 + $0xe4] ss:$16 sps:$4 sm:$0xff]   ;;  %v9129_v27 = vld [vmem:[%s10539_s11 + $0xec] ss:$16 sps:$4 sm:$0xff]  }
 0x63a   :  { %11179 = vst [vmem:[#allocation76_spill] sm:$0xff] %v9123_v46  ;;  %11180 = vst [vmem:[#allocation46_spill] sm:$0xff] %v9129_v27 }
 0x63c   :  { %3221 = vmatpush1.bf16.msra.mxu0 %v9111_v55  ;;  %3274 = vmatpush1.bf16.msra.mxu1 %v9117_v11  ;;  %v9135_v55 = vld [vmem:[%s10539_s11 + $0xe0] ss:$16 sps:$4 sm:$0xff]   ;;  %v9141_v11 = vld [vmem:[%s10539_s11 + $0xe8] ss:$16 sps:$4 sm:$0xff]  }
 0x63d   :  { %3222 = vmatprep.subr.bf16.mxu0 %v9123_v46  ;;  %3275 = vmatprep.subr.bf16.mxu1 %v9129_v27  ;;  %11181 = vst [vmem:[#allocation77_spill] sm:$0xff] %v9135_v55  ;;  %11182 = vst [vmem:[#allocation47_spill] sm:$0xff] %v9141_v11  ;;  %v9147_v46 = vld [vmem:[%s10539_s11 + $0x104] ss:$16 sps:$4 sm:$0xff]   ;;  %v9153_v27 = vld [vmem:[%s10539_s11 + $0x10c] ss:$16 sps:$4 sm:$0xff]  }
 0x63e   :  { %11183 = vst [vmem:[#allocation78_spill] sm:$0xff] %v9147_v46  ;;  %11184 = vst [vmem:[#allocation48_spill] sm:$0xff] %v9153_v27 }
 0x640   :  { %3223 = vmatpush1.bf16.msra.mxu0 %v9135_v55  ;;  %3276 = vmatpush1.bf16.msra.mxu1 %v9141_v11  ;;  %v9159_v55 = vld [vmem:[%s10539_s11 + $0x100] ss:$16 sps:$4 sm:$0xff]   ;;  %v9165_v11 = vld [vmem:[%s10539_s11 + $0x108] ss:$16 sps:$4 sm:$0xff]  }
 0x641   :  { %3224 = vmatprep.subr.bf16.mxu0 %v9147_v46  ;;  %3277 = vmatprep.subr.bf16.mxu1 %v9153_v27  ;;  %11185 = vst [vmem:[#allocation79_spill] sm:$0xff] %v9159_v55  ;;  %11186 = vst [vmem:[#allocation49_spill] sm:$0xff] %v9165_v11  ;;  %v9171_v46 = vld [vmem:[%s10539_s11 + $0x124] ss:$16 sps:$4 sm:$0xff]   ;;  %v9177_v27 = vld [vmem:[%s10539_s11 + $0x12c] ss:$16 sps:$4 sm:$0xff]  }
 0x642   :  { %11187 = vst [vmem:[#allocation80_spill] sm:$0xff] %v9171_v46  ;;  %11188 = vst [vmem:[#allocation50_spill] sm:$0xff] %v9177_v27 }
 0x644   :  { %3225 = vmatpush1.bf16.msra.mxu0 %v9159_v55  ;;  %3278 = vmatpush1.bf16.msra.mxu1 %v9165_v11  ;;  %v9183_v55 = vld [vmem:[%s10539_s11 + $0x120] ss:$16 sps:$4 sm:$0xff]   ;;  %v9189_v11 = vld [vmem:[%s10539_s11 + $0x128] ss:$16 sps:$4 sm:$0xff]  }
 0x645   :  { %3226 = vmatprep.subr.bf16.mxu0 %v9171_v46  ;;  %3279 = vmatprep.subr.bf16.mxu1 %v9177_v27  ;;  %11189 = vst [vmem:[#allocation81_spill] sm:$0xff] %v9183_v55  ;;  %11190 = vst [vmem:[#allocation51_spill] sm:$0xff] %v9189_v11  ;;  %v9195_v46 = vld [vmem:[%s10539_s11 + $0x144] ss:$16 sps:$4 sm:$0xff]   ;;  %v9201_v27 = vld [vmem:[%s10539_s11 + $0x14c] ss:$16 sps:$4 sm:$0xff]  }
 0x646   :  { %11191 = vst [vmem:[#allocation82_spill] sm:$0xff] %v9195_v46  ;;  %11192 = vst [vmem:[#allocation52_spill] sm:$0xff] %v9201_v27 }
 0x648   :  { %3227 = vmatpush1.bf16.msra.mxu0 %v9183_v55  ;;  %3280 = vmatpush1.bf16.msra.mxu1 %v9189_v11  ;;  %v9207_v55 = vld [vmem:[%s10539_s11 + $0x140] ss:$16 sps:$4 sm:$0xff]   ;;  %v9213_v11 = vld [vmem:[%s10539_s11 + $0x148] ss:$16 sps:$4 sm:$0xff]  }
 0x649   :  { %3228 = vmatprep.subr.bf16.mxu0 %v9195_v46  ;;  %3281 = vmatprep.subr.bf16.mxu1 %v9201_v27  ;;  %11193 = vst [vmem:[#allocation83_spill] sm:$0xff] %v9207_v55  ;;  %11194 = vst [vmem:[#allocation53_spill] sm:$0xff] %v9213_v11  ;;  %v9219_v46 = vld [vmem:[%s10539_s11 + $0x164] ss:$16 sps:$4 sm:$0xff]   ;;  %v9225_v27 = vld [vmem:[%s10539_s11 + $0x16c] ss:$16 sps:$4 sm:$0xff]  }
 0x64a   :  { %11195 = vst [vmem:[#allocation84_spill] sm:$0xff] %v9219_v46  ;;  %11196 = vst [vmem:[#allocation54_spill] sm:$0xff] %v9225_v27 }
 0x64c   :  { %3229 = vmatpush1.bf16.msra.mxu0 %v9207_v55  ;;  %3282 = vmatpush1.bf16.msra.mxu1 %v9213_v11  ;;  %v9231_v55 = vld [vmem:[%s10539_s11 + $0x160] ss:$16 sps:$4 sm:$0xff]   ;;  %v9237_v11 = vld [vmem:[%s10539_s11 + $0x168] ss:$16 sps:$4 sm:$0xff]  }
 0x64d   :  { %3230 = vmatprep.subr.bf16.mxu0 %v9219_v46  ;;  %3283 = vmatprep.subr.bf16.mxu1 %v9225_v27  ;;  %11197 = vst [vmem:[#allocation85_spill] sm:$0xff] %v9231_v55  ;;  %11198 = vst [vmem:[#allocation55_spill] sm:$0xff] %v9237_v11  ;;  %v9243_v46 = vld [vmem:[%s10539_s11 + $0x184] ss:$16 sps:$4 sm:$0xff]   ;;  %v9249_v27 = vld [vmem:[%s10539_s11 + $0x18c] ss:$16 sps:$4 sm:$0xff]  }
 0x64e   :  { %11199 = vst [vmem:[#allocation25_spill] sm:$0xff] %v9243_v46  ;;  %11200 = vst [vmem:[#allocation23_spill] sm:$0xff] %v9249_v27 }
 0x650   :  { %3231 = vmatpush1.bf16.msra.mxu0 %v9231_v55  ;;  %3284 = vmatpush1.bf16.msra.mxu1 %v9237_v11  ;;  %v9255_v55 = vld [vmem:[%s10539_s11 + $0x180] ss:$16 sps:$4 sm:$0xff]   ;;  %v9261_v11 = vld [vmem:[%s10539_s11 + $0x188] ss:$16 sps:$4 sm:$0xff]  }
 0x651   :  { %3232 = vmatprep.subr.bf16.mxu0 %v9243_v46  ;;  %3285 = vmatprep.subr.bf16.mxu1 %v9249_v27  ;;  %11201 = vst [vmem:[#allocation22_spill] sm:$0xff] %v9255_v55  ;;  %11202 = vst [vmem:[#allocation24_spill] sm:$0xff] %v9261_v11  ;;  %v9267_v46 = vld [vmem:[%s10539_s11 + $0x1a4] ss:$16 sps:$4 sm:$0xff]   ;;  %v9273_v27 = vld [vmem:[%s10539_s11 + $0x1ac] ss:$16 sps:$4 sm:$0xff]  }
 0x652   :  { %11203 = vst [vmem:[#allocation86_spill] sm:$0xff] %v9267_v46  ;;  %11204 = vst [vmem:[#allocation87_spill] sm:$0xff] %v9273_v27 }
 0x654   :  { %3233 = vmatpush1.bf16.msra.mxu0 %v9255_v55  ;;  %3286 = vmatpush1.bf16.msra.mxu1 %v9261_v11  ;;  %v9279_v55 = vld [vmem:[%s10539_s11 + $0x1a0] ss:$16 sps:$4 sm:$0xff]   ;;  %v9285_v11 = vld [vmem:[%s10539_s11 + $0x1a8] ss:$16 sps:$4 sm:$0xff]  }
 0x655   :  { %3234 = vmatprep.subr.bf16.mxu0 %v9267_v46  ;;  %3287 = vmatprep.subr.bf16.mxu1 %v9273_v27  ;;  %11205 = vst [vmem:[#allocation88_spill] sm:$0xff] %v9279_v55  ;;  %11206 = vst [vmem:[#allocation89_spill] sm:$0xff] %v9285_v11  ;;  %v9291_v46 = vld [vmem:[%s10539_s11 + $0x1c4] ss:$16 sps:$4 sm:$0xff]   ;;  %v9297_v27 = vld [vmem:[%s10539_s11 + $0x1cc] ss:$16 sps:$4 sm:$0xff]  }
 0x656   :  { %11207 = vst [vmem:[#allocation90_spill] sm:$0xff] %v9291_v46  ;;  %11208 = vst [vmem:[#allocation91_spill] sm:$0xff] %v9297_v27 }
 0x658   :  { %3235 = vmatpush1.bf16.msra.mxu0 %v9279_v55  ;;  %3288 = vmatpush1.bf16.msra.mxu1 %v9285_v11  ;;  %v9303_v55 = vld [vmem:[%s10539_s11 + $0x1c0] ss:$16 sps:$4 sm:$0xff]   ;;  %v9309_v11 = vld [vmem:[%s10539_s11 + $0x1c8] ss:$16 sps:$4 sm:$0xff]  }
 0x659   :  { %3236 = vmatprep.subr.bf16.mxu0 %v9291_v46  ;;  %3289 = vmatprep.subr.bf16.mxu1 %v9297_v27  ;;  %11209 = vst [vmem:[#allocation92_spill] sm:$0xff] %v9303_v55  ;;  %11210 = vst [vmem:[#allocation93_spill] sm:$0xff] %v9309_v11  ;;  %v9315_v46 = vld [vmem:[%s10539_s11 + $0x1e4] ss:$16 sps:$4 sm:$0xff]   ;;  %v9321_v27 = vld [vmem:[%s10539_s11 + $0x1ec] ss:$16 sps:$4 sm:$0xff]  }
 0x65a   :  { %11211 = vst [vmem:[#allocation94_spill] sm:$0xff] %v9315_v46  ;;  %11212 = vst [vmem:[#allocation95_spill] sm:$0xff] %v9321_v27 }
 0x65c   :  { %3237 = vmatpush1.bf16.msra.mxu0 %v9303_v55  ;;  %3290 = vmatpush1.bf16.msra.mxu1 %v9309_v11  ;;  %v9327_v55 = vld [vmem:[%s10539_s11 + $0x1e0] ss:$16 sps:$4 sm:$0xff]   ;;  %v9333_v11 = vld [vmem:[%s10539_s11 + $0x1e8] ss:$16 sps:$4 sm:$0xff]  }
 0x65d   :  { %3238 = vmatprep.subr.bf16.mxu0 %v9315_v46  ;;  %3291 = vmatprep.subr.bf16.mxu1 %v9321_v27  ;;  %11213 = vst [vmem:[#allocation96_spill] sm:$0xff] %v9327_v55  ;;  %11214 = vst [vmem:[#allocation97_spill] sm:$0xff] %v9333_v11  ;;  %v9337_v46 = vld [vmem:[#allocation7 + $0xc] ss:$16 sps:$4 sm:$0xff]  }
 0x65e   :  { %11215 = vst [vmem:[#allocation98_spill] sm:$0xff] %v9337_v46 }
 0x660   :  { %3239 = vmatpush1.bf16.msra.mxu0 %v9327_v55  ;;  %3292 = vmatpush1.bf16.msra.mxu1 %v9333_v11 }
 0x661   :  { %3403 = vmatprep.subr.bf16.mxu0 %v8742_v58  ;;  %3456 = vmatprep.subr.bf16.mxu1 %v9337_v46 }
 0x6d4   :  { %v2849_v27 = vpop.f32.mrb[80].mxu0  ;;  %v2902_v34 = vpop.f32.mrb[72].mxu1 }
 0x6d5   :  { %v2850_v1 = vadd.f32 %v2849_v27, %v11139_v2  ;;  %v2851_v63 = vpop.f32.mrb[81].mxu0  ;;  %v2904_v9 = vpop.f32.mrb[73].mxu1  ;;  %v2903_v46 = vadd.f32 %v2902_v34, %v11141_v32 }
 0x6d6   :  { %v2852_v55 = vadd.f32 %v2851_v63, %v11140_v7  ;;  %v2853_v25 = vpop.f32.mrb[82].mxu0  ;;  %v2906_v50 = vpop.f32.mrb[74].mxu1  ;;  %v2905_v34 = vadd.f32 %v2904_v9, %v11142_v39 }
 0x6d7   :  { %v2921_v33 = vmul.f32 0.5, %v2850_v1  ;;  %v2854_v26 = vadd.f32 %v2853_v25, %v11139_v2  ;;  %v2855_v11 = vpop.f32.mrb[83].mxu0  ;;  %v2908_v20 = vpop.f32.mrb[75].mxu1  ;;  %v2907_v52 = vadd.f32 %v2906_v50, %v11141_v32 }
 0x6d8   :  { %v2937_v58 = vmul.f32 0.5, %v2852_v55  ;;  %v2856_v10 = vadd.f32 %v2855_v11, %v11140_v7  ;;  %v2957_v57 = vmul.f32 0.5, %v2905_v34 }
 0x6d9   :  { %5827 = vtanh.f32 %v2921_v33  ;;  %v2922_v8 = vmul.f32 0.5, %v2854_v26 }
 0x6da   :  { %5829 = vtanh.f32 %v2937_v58  ;;  %v2938_v27 = vmul.f32 0.5, %v2856_v10 }
 0x6db   :  { %5831 = vtanh.f32 %v2922_v8 }
 0x6dc   :  { %5833 = vtanh.f32 %v2903_v46 }
 0x6dd   :  { %v2859_v63 = vpop.f32.mrb[84].mxu0  ;;  %v2912_v4 = vpop.f32.mrb[76].mxu1  ;;  %5835 = vtanh.f32 %v2938_v27 }
 0x6de   :  { %v2860_v1 = vadd.f32 %v2859_v63, %v11139_v2  ;;  %v2861_v25 = vpop.f32.mrb[85].mxu0  ;;  %v2914_v35 = vpop.f32.mrb[77].mxu1  ;;  %5837 = vtanh.f32 %v2907_v52  ;;  %v2909_v63 = vadd.f32 %v2908_v20, %v11142_v39  ;;  %v2913_v27 = vadd.f32 %v2912_v4, %v11141_v32 }
 0x6df   :  { %v2862_v55 = vadd.f32 %v2861_v25, %v11140_v7  ;;  %v2863_v11 = vpop.f32.mrb[86].mxu0  ;;  %v2916_v33 = vpop.f32.mrb[78].mxu1  ;;  %v2915_v20 = vadd.f32 %v2914_v35, %v11142_v39 }
 0x6e0   :  { %v2923_v26 = vmul.f32 0.5, %v2860_v1  ;;  %v2864_v10 = vadd.f32 %v2863_v11, %v11139_v2  ;;  %v2865_v8 = vpop.f32.mrb[87].mxu0  ;;  %v2918_v58 = vpop.f32.mrb[79].mxu1  ;;  %v2917_v11 = vadd.f32 %v2916_v33, %v11141_v32  ;;  %v2958_v52 = vmul.f32 0.5, %v2909_v63 }
 0x6e1   :  { %v2939_v50 = vmul.f32 0.5, %v2862_v55  ;;  %v2866_v46 = vadd.f32 %v2865_v8, %v11140_v7 }
 0x6e2   :  { %5839 = vtanh.f32 %v2923_v26  ;;  %v2924_v3 = vmul.f32 0.5, %v2864_v10 }
 0x6e3   :  { %5841 = vtanh.f32 %v2939_v50  ;;  %v2940_v25 = vmul.f32 0.5, %v2866_v46  ;;  %v5828_v42 = vpop.eup %5827 }
 0x6e4   :  { %v5830_v9 = vpop.eup %5829  ;;  %v2929_v1 = vmul.f32 0.5, %v5828_v42  ;;  %5843 = vtanh.f32 %v2924_v3  ;;  %v2919_v42 = vadd.f32 %v2918_v58, %v11142_v39  ;;  %v5028_v39 = vld [vmem:[%s10913_s30 + $0x268] sm:$0xff] }
 0x6e5   :  { %v2945_v2 = vmul.f32 0.5, %v5830_v9  ;;  %5845 = vtanh.f32 %v2913_v27  ;;  %v5832_v55 = vpop.eup %5831  ;;  %v2959_v27 = vmul.f32 0.5, %v2915_v20 }
 0x6e6   :  { %v2933_v8 = vadd.f32 0.5, %v2929_v1  ;;  %5847 = vtanh.f32 %v2940_v25  ;;  %v5834_v26 = vpop.eup %5833  ;;  %v2930_v10 = vmul.f32 0.5, %v5832_v55  ;;  %v2960_v55 = vmul.f32 0.5, %v2919_v42 }
 0x6e7   :  { %v2949_v4 = vadd.f32 0.5, %v2945_v2  ;;  %5849 = vtanh.f32 %v2957_v57  ;;  %v5836_v50 = vpop.eup %5835 }
 0x6e8   :  { %v2977_v46 = vmul.f32 %v5834_v26, %v2933_v8  ;;  %5851 = vtanh.f32 %v2917_v11  ;;  %v2934_v33 = vadd.f32 0.5, %v2930_v10  ;;  %v2946_v34 = vmul.f32 0.5, %v5836_v50  ;;  %v5838_v63 = vpop.eup %5837 }
 0x6e9   :  { %v2973_v3 = vmul.f32 %v2949_v4, %v8763_v24  ;;  %5853 = vtanh.f32 %v2958_v52 }
 0x6ea   :  { %v2950_v35 = vadd.f32 0.5, %v2946_v34  ;;  %v2978_v25 = vmul.f32 %v5838_v63, %v2934_v33  ;;  %5855 = vtanh.f32 %v2959_v27  ;;  %v5015_v34 = vld [vmem:[%s10913_s30 + $0x200] sm:$0xff] }
 0x6eb   :  { %v9357_v1 = vadd.f32 %v2977_v46, %v2973_v3 }
 0x6ec   :  { %v5840_v9 = vpop.eup %5839  ;;  %v2974_v8 = vmul.f32 %v2950_v35, %v8767_v49 }
 0x6ed   :  { %11216 = vst [vmem:[#allocation99_spill] sm:$0xff] %v9357_v1  ;;  %v5842_v2 = vpop.eup %5841  ;;  %v2931_v57 = vmul.f32 0.5, %v5840_v9  ;;  %5857 = vtanh.f32 %v9357_v1 }
 0x6ee   :  { %v2947_v11 = vmul.f32 0.5, %v5842_v2  ;;  %v5844_v26 = vpop.eup %5843  ;;  %v9361_v52 = vadd.f32 %v2978_v25, %v2974_v8  ;;  %5859 = vtanh.f32 %v2960_v55  ;;  %v5016_v25 = vld [vmem:[%s10913_s30 + $0x208] sm:$0xff] }
 0x6ef   :  { %v2935_v58 = vadd.f32 0.5, %v2931_v57  ;;  %v5846_v24 = vpop.eup %5845  ;;  %v2932_v4 = vmul.f32 0.5, %v5844_v26 }
 0x6f0   :  { %11217 = vst [vmem:[#allocation100_spill] sm:$0xff] %v9361_v52  ;;  %v2951_v20 = vadd.f32 0.5, %v2947_v11  ;;  %v5848_v10 = vpop.eup %5847  ;;  %5861 = vtanh.f32 %v9361_v52 }
 0x6f1   :  { %v2979_v50 = vmul.f32 %v5846_v24, %v2935_v58  ;;  %v5850_v46 = vpop.eup %5849  ;;  %v2936_v49 = vadd.f32 0.5, %v2932_v4  ;;  %v2948_v3 = vmul.f32 0.5, %v5848_v10  ;;  %v5020_v58 = vld [vmem:[%s10913_s30 + $0x228] sm:$0xff] }
 0x6f2   :  { %v2975_v42 = vmul.f32 %v2951_v20, %v8774_v18  ;;  %v5852_v33 = vpop.eup %5851  ;;  %v5019_v18 = vld [vmem:[%s10913_s30 + $0x220] sm:$0xff]  ;;  %v2965_v24 = vmul.f32 0.5, %v5850_v46 }
 0x6f3   :  { %v5854_v63 = vpop.eup %5853  ;;  %v2952_v9 = vadd.f32 0.5, %v2948_v3  ;;  %v2980_v35 = vmul.f32 %v5852_v33, %v2936_v49 }
 0x6f4   :  { %v9368_v27 = vadd.f32 %v2979_v50, %v2975_v42  ;;  %v2966_v20 = vmul.f32 0.5, %v5854_v63 }
 0x6f5   :  { %v3044_v2 = vpop.f32.mrb[88].mxu0  ;;  %v3097_v57 = vpop.f32.mrb[80].mxu1  ;;  %v2976_v55 = vmul.f32 %v2952_v9, %v8787_v56  ;;  %v5017_v56 = vld [vmem:[%s10913_s30 + $0x210] sm:$0xff] }
 0x6f6   :  { %11218 = vst [vmem:[#allocation101_spill] sm:$0xff] %v9368_v27  ;;  %v3116_v8 = vadd.f32 %v5015_v34, %v3044_v2  ;;  %v3046_v11 = vpop.f32.mrb[89].mxu0  ;;  %v3099_v26 = vpop.f32.mrb[81].mxu1  ;;  %5863 = vtanh.f32 %v9368_v27 }
 0x6f7   :  { %v3117_v4 = vadd.f32 %v5016_v25, %v3046_v11  ;;  %v3048_v10 = vpop.f32.mrb[90].mxu0  ;;  %v3101_v50 = vpop.f32.mrb[82].mxu1  ;;  %v9381_v42 = vadd.f32 %v2980_v35, %v2976_v55  ;;  %v5021_v35 = vld [vmem:[%s10913_s30 + $0x230] sm:$0xff]  ;;  %v2969_v55 = vadd.f32 0.5, %v2965_v24  ;;  %v3118_v11 = vadd.f32 %v5017_v56, %v3097_v57  ;;  %v5022_v57 = vld [vmem:[%s10913_s30 + $0x238] sm:$0xff] }
 0x6f8   :  { %v3132_v49 = vmul.f32 0.5, %v3116_v8  ;;  %v3120_v3 = vadd.f32 %v5019_v18, %v3048_v10  ;;  %v3050_v33 = vpop.f32.mrb[91].mxu0  ;;  %v3103_v34 = vpop.f32.mrb[83].mxu1  ;;  %v2970_v8 = vadd.f32 0.5, %v2966_v20  ;;  %v5023_v18 = vld [vmem:[%s10913_s30 + $0x240] sm:$0xff] }
 0x6f9   :  { %11219 = vst [vmem:[#allocation102_spill] sm:$0xff] %v9381_v42  ;;  %v5856_v9 = vpop.eup %5855  ;;  %v3148_v2 = vmul.f32 0.5, %v3117_v4  ;;  %v3121_v52 = vadd.f32 %v5020_v58, %v3050_v33  ;;  %5865 = vtanh.f32 %v9381_v42  ;;  %v5018_v58 = vld [vmem:[%s10913_s30 + $0x218] sm:$0xff]  ;;  %v3122_v33 = vadd.f32 %v5021_v35, %v3101_v50  ;;  %v5025_v50 = vld [vmem:[%s10913_s30 + $0x250] sm:$0xff] }
 0x6fa   :  { %v5858_v46 = vpop.eup %5857  ;;  %v3133_v63 = vmul.f32 0.5, %v3120_v3  ;;  %5867 = vtanh.f32 %v3132_v49  ;;  %v5024_v3 = vld [vmem:[%s10913_s30 + $0x248] sm:$0xff]  ;;  %v5027_v49 = vld [vmem:[%s10913_s30 + $0x260] sm:$0xff]  ;;  %v2967_v42 = vmul.f32 0.5, %v5856_v9  ;;  %v3119_v32 = vadd.f32 %v5018_v58, %v3099_v26 }
 0x6fb   :  { %v5860_v25 = vpop.eup %5859  ;;  %5869 = vtanh.f32 %v3148_v2  ;;  %v3149_v4 = vmul.f32 0.5, %v3121_v52  ;;  %v2989_v56 = vmul.f32 %v5858_v46, %v2969_v55  ;;  %v3123_v9 = vadd.f32 %v5022_v57, %v3103_v34  ;;  %v5029_v34 = vld [vmem:[%s10913_s30 + $0x270] sm:$0xff] }
 0x6fc   :  { %v5862_v10 = vpop.eup %5861  ;;  %v2968_v27 = vmul.f32 0.5, %v5860_v25  ;;  %5871 = vtanh.f32 %v3133_v63  ;;  %v2971_v26 = vadd.f32 0.5, %v2967_v42 }
 0x6fd   :  { %v3054_v24 = vpop.f32.mrb[92].mxu0  ;;  %v3107_v20 = vpop.f32.mrb[84].mxu1  ;;  %v2990_v2 = vmul.f32 %v5862_v10, %v2970_v8  ;;  %5873 = vtanh.f32 %v3118_v11 }
 0x6fe   :  { %v3124_v52 = vadd.f32 %v5023_v18, %v3054_v24  ;;  %v3056_v35 = vpop.f32.mrb[93].mxu0  ;;  %v3109_v1 = vpop.f32.mrb[85].mxu1  ;;  %5875 = vtanh.f32 %v3149_v4  ;;  %v3126_v10 = vadd.f32 %v5025_v50, %v3107_v20  ;;  %v2972_v58 = vadd.f32 0.5, %v2968_v27 }
 0x6ff   :  { %v3125_v7 = vadd.f32 %v5024_v3, %v3056_v35  ;;  %v3058_v62 = vpop.f32.mrb[94].mxu0  ;;  %v3111_v46 = vpop.f32.mrb[86].mxu1  ;;  %v3206_v55 = vpack.c.bf16 %v2990_v2, %v2989_v56  ;;  %5877 = vtanh.f32 %v3122_v33  ;;  %v3168_v3 = vmul.f32 0.5, %v3119_v32  ;;  %v5030_v2 = vld [vmem:[%s10913_s30 + $0x278] sm:$0xff] }
 0x700   :  { %v3134_v63 = vmul.f32 0.5, %v3124_v52  ;;  %v3128_v25 = vadd.f32 %v5027_v49, %v3058_v62  ;;  %v3060_v8 = vpop.f32.mrb[95].mxu0  ;;  %v3113_v18 = vpop.f32.mrb[87].mxu1  ;;  %v5026_v62 = vld [vmem:[%s10913_s30 + $0x258] sm:$0xff]  ;;  %v3169_v33 = vmul.f32 0.5, %v3123_v9  ;;  %v3130_v32 = vadd.f32 %v5029_v34, %v3111_v46 }
 0x701   :  { %v3150_v24 = vmul.f32 0.5, %v3125_v7  ;;  %v3129_v53 = vadd.f32 %v5028_v39, %v3060_v8  ;;  %3240 = vmatprep.mubr.bf16.mxu0 %v3206_v55  ;;  %3293 = vmatprep.mubr.bf16.mxu1 %v3206_v55  ;;  %v5864_v43 = vpop.eup %5863  ;;  %v3127_v56 = vadd.f32 %v5026_v62, %v3109_v1  ;;  %v3131_v46 = vadd.f32 %v5030_v2, %v3113_v18 }
 0x702   :  { %5879 = vtanh.f32 %v3134_v63  ;;  %v3135_v11 = vmul.f32 0.5, %v3128_v25  ;;  %v2991_v57 = vmul.f32 %v5864_v43, %v2971_v26 }
 0x703   :  { %v5866_v4 = vpop.eup %5865  ;;  %5881 = vtanh.f32 %v3150_v24  ;;  %v3151_v7 = vmul.f32 0.5, %v3129_v53  ;;  %v3170_v24 = vmul.f32 0.5, %v3127_v56  ;;  %v3171_v62 = vmul.f32 0.5, %v3131_v46 }
 0x704   :  { %v5868_v39 = vpop.eup %5867  ;;  %5883 = vtanh.f32 %v3126_v10  ;;  %v2992_v20 = vmul.f32 %v5866_v4, %v2972_v58 }
 0x705   :  { %v5870_v49 = vpop.eup %5869  ;;  %v3140_v42 = vmul.f32 0.5, %v5868_v39  ;;  %5885 = vtanh.f32 %v3135_v11 }
 0x706   :  { %v3156_v27 = vmul.f32 0.5, %v5870_v49  ;;  %5887 = vtanh.f32 %v3168_v3  ;;  %v9420_v52 = vpack.c.bf16 %v2992_v20, %v2991_v57  ;;  %v5872_v50 = vpop.eup %5871 }
 0x707   :  { %v3144_v53 = vadd.f32 0.5, %v3140_v42  ;;  %5889 = vtanh.f32 %v3151_v7  ;;  %v5874_v35 = vpop.eup %5873  ;;  %v3141_v43 = vmul.f32 0.5, %v5872_v50 }
 0x708   :  { %v3160_v55 = vadd.f32 0.5, %v3156_v27  ;;  %5891 = vtanh.f32 %v3169_v33  ;;  %v5876_v9 = vpop.eup %5875 }
 0x709   :  { %v3188_v63 = vmul.f32 %v5874_v35, %v3144_v53  ;;  %5893 = vtanh.f32 %v3130_v32  ;;  %v5878_v25 = vpop.eup %5877  ;;  %v3145_v8 = vadd.f32 0.5, %v3141_v43  ;;  %v3157_v10 = vmul.f32 0.5, %v5876_v9 }
 0x70a   :  { %v3184_v1 = vmul.f32 %v3160_v55, %v8829_v16  ;;  %5895 = vtanh.f32 %v3170_v24 }
 0x70b   :  { %v3161_v58 = vadd.f32 0.5, %v3157_v10  ;;  %v3189_v3 = vmul.f32 %v5878_v25, %v3145_v8 }
 0x70c   :  { %v5880_v11 = vpop.eup %5879  ;;  %v9423_v26 = vadd.f32 %v3188_v63, %v3184_v1 }
 0x70d   :  { %v3142_v34 = vmul.f32 0.5, %v5880_v11  ;;  %v5882_v4 = vpop.eup %5881  ;;  %v3185_v39 = vmul.f32 %v3161_v58, %v8833_v22 }
 0x70e   :  { %v5884_v7 = vpop.eup %5883  ;;  %v3158_v57 = vmul.f32 0.5, %v5882_v4  ;;  %5897 = vtanh.f32 %v9423_v26 }
 0x70f   :  { %v3146_v33 = vadd.f32 0.5, %v3142_v34  ;;  %v5886_v18 = vpop.eup %5885  ;;  %v9427_v20 = vadd.f32 %v3189_v3, %v3185_v39  ;;  %5899 = vtanh.f32 %v3171_v62 }
 0x710   :  { %v5888_v16 = vpop.eup %5887  ;;  %v3162_v49 = vadd.f32 0.5, %v3158_v57  ;;  %v3143_v32 = vmul.f32 0.5, %v5886_v18 }
 0x711   :  { %v3190_v42 = vmul.f32 %v5884_v7, %v3146_v33  ;;  %v5890_v27 = vpop.eup %5889  ;;  %5901 = vtanh.f32 %v9427_v20  ;;  %v3176_v63 = vmul.f32 0.5, %v5888_v16  ;;  %v11246_v16 = vld [vmem:[#allocation73_spill] sm:$0xff] }
 0x712   :  { %v5892_v56 = vpop.eup %5891  ;;  %v3186_v2 = vmul.f32 %v3162_v49, %v8837_v48  ;;  %v3147_v22 = vadd.f32 0.5, %v3143_v32  ;;  %v3159_v50 = vmul.f32 0.5, %v5890_v27  ;;  %v11247_v49 = vld [vmem:[#allocation43_spill] sm:$0xff]  ;;  %v11249_v32 = vld [vmem:[#allocation44_spill] sm:$0xff] }
 0x713   :  { %v5894_v53 = vpop.eup %5893  ;;  %v3177_v46 = vmul.f32 0.5, %v5892_v56  ;;  %v3180_v10 = vadd.f32 0.5, %v3176_v63  ;;  %v11250_v27 = vld [vmem:[#allocation75_spill] sm:$0xff]  ;;  %v11251_v56 = vld [vmem:[#allocation45_spill] sm:$0xff] }
 0x714   :  { %v9431_v35 = vadd.f32 %v3190_v42, %v3186_v2  ;;  %v3163_v55 = vadd.f32 0.5, %v3159_v50  ;;  %v3191_v43 = vmul.f32 %v5894_v53, %v3147_v22  ;;  %v5896_v25 = vpop.eup %5895  ;;  %v11248_v42 = vld [vmem:[#allocation74_spill] sm:$0xff]  ;;  %v11252_v2 = vld [vmem:[#allocation76_spill] sm:$0xff]  ;;  %v11254_v50 = vld [vmem:[#allocation77_spill] sm:$0xff] }
 0x715   :  { %v3181_v24 = vadd.f32 0.5, %v3177_v46  ;;  %v3178_v4 = vmul.f32 0.5, %v5896_v25  ;;  %v11253_v22 = vld [vmem:[#allocation46_spill] sm:$0xff]  ;;  %v11255_v53 = vld [vmem:[#allocation47_spill] sm:$0xff]  ;;  %v11259_v63 = vld [vmem:[#allocation49_spill] sm:$0xff] }
 0x716   :  { %v3187_v9 = vmul.f32 %v3163_v55, %v8841_v6  ;;  %5903 = vtanh.f32 %v9431_v35  ;;  %v11256_v55 = vld [vmem:[#allocation78_spill] sm:$0xff]  ;;  %v11260_v46 = vld [vmem:[#allocation80_spill] sm:$0xff] }
 0x717   :  { %v3182_v7 = vadd.f32 0.5, %v3178_v4  ;;  %v11261_v25 = vld [vmem:[#allocation50_spill] sm:$0xff]  ;;  %v11270_v4 = vld [vmem:[#allocation85_spill] sm:$0xff] }
 0x718   :  { %v9435_v1 = vadd.f32 %v3191_v43, %v3187_v9  ;;  %v5898_v8 = vpop.eup %5897  ;;  %v11257_v43 = vld [vmem:[#allocation48_spill] sm:$0xff]  ;;  %v11258_v9 = vld [vmem:[#allocation79_spill] sm:$0xff] }
 0x719   :  { %v5900_v48 = vpop.eup %5899  ;;  %v3200_v58 = vmul.f32 %v5898_v8, %v3180_v10  ;;  %v11262_v8 = vld [vmem:[#allocation81_spill] sm:$0xff]  ;;  %v11264_v10 = vld [vmem:[#allocation82_spill] sm:$0xff] }
 0x71a   :  { %5905 = vtanh.f32 %v9435_v1  ;;  %v3179_v62 = vmul.f32 0.5, %v5900_v48  ;;  %v11263_v48 = vld [vmem:[#allocation51_spill] sm:$0xff] }
 0x71b   :  { %v5902_v11 = vpop.eup %5901 }
 0x71c   :  { %v3201_v3 = vmul.f32 %v5902_v11, %v3181_v24  ;;  %v3183_v39 = vadd.f32 0.5, %v3179_v62  ;;  %v11265_v24 = vld [vmem:[#allocation52_spill] sm:$0xff]  ;;  %v11266_v11 = vld [vmem:[#allocation83_spill] sm:$0xff] }
 0x71d   :  { %v11271_v62 = vld [vmem:[#allocation55_spill] sm:$0xff] }
 0x71e   :  { %v3204_v34 = vpack.c.bf16 %v3201_v3, %v3200_v58  ;;  %v11267_v58 = vld [vmem:[#allocation53_spill] sm:$0xff]  ;;  %v11268_v3 = vld [vmem:[#allocation84_spill] sm:$0xff] }
 0x720   :  { %3241 = vmatmul.mubr.bf16.vlgmr.msra.gmra.mrb[96].mxu0 %v3204_v34  ;;  %3294 = vmatmul.mubr.bf16.vlgmr.msra.gmra.mrb[88].mxu1 %v3204_v34  ;;  %v5904_v6 = vpop.eup %5903 }
 0x721   :  { %3404 = vmatpush1.bf16.msra.mxu0 %v8848_v36  ;;  %3457 = vmatpush1.bf16.msra.mxu1 %v8851_v61  ;;  %v3202_v57 = vmul.f32 %v5904_v6, %v3182_v7  ;;  %v11220_v61 = vld [vmem:[#allocation60_spill] sm:$0xff]  ;;  %v11272_v6 = vld [vmem:[#allocation25_spill] sm:$0xff]  ;;  %v11273_v7 = vld [vmem:[#allocation23_spill] sm:$0xff] }
 0x722   :  { %3250 = vmatprep.mubr.bf16.mxu0 %v9420_v52  ;;  %3303 = vmatprep.mubr.bf16.mxu1 %v9420_v52  ;;  %v11245_v52 = vld [vmem:[#allocation42_spill] sm:$0xff] }
 0x723   :  { %3405 = vmatprep.subr.bf16.mxu0 %v8856_v28  ;;  %3458 = vmatprep.subr.bf16.mxu1 %v8859_v14  ;;  %v11221_v28 = vld [vmem:[#allocation30_spill] sm:$0xff]  ;;  %v11222_v14 = vld [vmem:[#allocation61_spill] sm:$0xff] }
 0x724   :  { %v5906_v33 = vpop.eup %5905 }
 0x725   :  { %v3203_v18 = vmul.f32 %v5906_v33, %v3183_v39  ;;  %3406 = vmatpush1.bf16.msra.mxu0 %v8862_v51  ;;  %3459 = vmatpush1.bf16.msra.mxu1 %v8865_v17  ;;  %v11223_v51 = vld [vmem:[#allocation31_spill] sm:$0xff]  ;;  %v11224_v17 = vld [vmem:[#allocation62_spill] sm:$0xff]  ;;  %v11275_v33 = vld [vmem:[#allocation24_spill] sm:$0xff] }
 0x726   :  { %3407 = vmatprep.subr.bf16.mxu0 %v8868_v59  ;;  %3460 = vmatprep.subr.bf16.mxu1 %v8871_v19  ;;  %v11225_v59 = vld [vmem:[#allocation32_spill] sm:$0xff]  ;;  %v11226_v19 = vld [vmem:[#allocation63_spill] sm:$0xff]  ;;  %v11274_v39 = vld [vmem:[#allocation22_spill] sm:$0xff] }
 0x727   :  { %v3205_v36 = vpack.c.bf16 %v3203_v18, %v3202_v57  ;;  %v11276_v57 = vld [vmem:[#allocation86_spill] sm:$0xff]  ;;  %v11277_v18 = vld [vmem:[#allocation87_spill] sm:$0xff] }
 0x729   :  { %3251 = vmatmul.mubr.bf16.gmra.mrb[100].mxu0 %v3205_v36  ;;  %3304 = vmatmul.mubr.bf16.gmra.mrb[92].mxu1 %v3205_v36 }
 0x72a   :  { %3408 = vmatpush1.bf16.msra.mxu0 %v8878_v5  ;;  %3461 = vmatpush1.bf16.msra.mxu1 %v8881_v29  ;;  %v11227_v5 = vld [vmem:[#allocation33_spill] sm:$0xff]  ;;  %v11228_v29 = vld [vmem:[#allocation64_spill] sm:$0xff] }
 0x72b   :  { %3409 = vmatprep.subr.bf16.mxu0 %v8884_v44  ;;  %3462 = vmatprep.subr.bf16.mxu1 %v8887_v31  ;;  %v11229_v44 = vld [vmem:[#allocation34_spill] sm:$0xff]  ;;  %v11230_v31 = vld [vmem:[#allocation65_spill] sm:$0xff] }
 0x72c   :  { %3435 = vmatprep.mubr.bf16.mxu0 %v10901_v13  ;;  %3488 = vmatprep.mubr.bf16.mxu1 %v10901_v13 }
 0x72e   :  { %3410 = vmatpush1.bf16.msra.mxu0 %v8892_v54  ;;  %3463 = vmatpush1.bf16.msra.mxu1 %v8895_v0  ;;  %v11231_v54 = vld [vmem:[#allocation35_spill] sm:$0xff]  ;;  %v11232_v0 = vld [vmem:[#allocation66_spill] sm:$0xff] }
 0x72f   :  { %3411 = vmatprep.subr.bf16.mxu0 %v8898_v60  ;;  %3464 = vmatprep.subr.bf16.mxu1 %v8901_v41  ;;  %v11233_v60 = vld [vmem:[#allocation36_spill] sm:$0xff]  ;;  %v11234_v41 = vld [vmem:[#allocation67_spill] sm:$0xff] }
 0x732   :  { %3412 = vmatpush1.bf16.msra.mxu0 %v8904_v12  ;;  %3465 = vmatpush1.bf16.msra.mxu1 %v8907_v40  ;;  %v11235_v12 = vld [vmem:[#allocation37_spill] sm:$0xff]  ;;  %v11236_v40 = vld [vmem:[#allocation68_spill] sm:$0xff] }
 0x733   :  { %3413 = vmatprep.subr.bf16.mxu0 %v8910_v45  ;;  %3466 = vmatprep.subr.bf16.mxu1 %v8913_v38  ;;  %v11237_v45 = vld [vmem:[#allocation38_spill] sm:$0xff]  ;;  %v11238_v38 = vld [vmem:[#allocation69_spill] sm:$0xff] }
 0x736   :  { %3414 = vmatpush1.bf16.msra.mxu0 %v8916_v23  ;;  %3467 = vmatpush1.bf16.msra.mxu1 %v8919_v47  ;;  %v11239_v23 = vld [vmem:[#allocation39_spill] sm:$0xff]  ;;  %v11240_v47 = vld [vmem:[#allocation70_spill] sm:$0xff] }
 0x737   :  { %3415 = vmatprep.subr.bf16.mxu0 %v8922_v21  ;;  %3468 = vmatprep.subr.bf16.mxu1 %v8925_v30  ;;  %v11241_v21 = vld [vmem:[#allocation40_spill] sm:$0xff]  ;;  %v11242_v30 = vld [vmem:[#allocation71_spill] sm:$0xff] }
 0x73a   :  { %3416 = vmatpush1.bf16.msra.mxu0 %v8928_v37  ;;  %3469 = vmatpush1.bf16.msra.mxu1 %v8931_v15  ;;  %v11243_v37 = vld [vmem:[#allocation41_spill] sm:$0xff]  ;;  %v11244_v15 = vld [vmem:[#allocation72_spill] sm:$0xff] }
 0x73b   :  { %3417 = vmatprep.subr.bf16.mxu0 %v11220_v61  ;;  %3470 = vmatprep.subr.bf16.mxu1 %v11221_v28  ;;  %v11279_v61 = vld [vmem:[#allocation89_spill] sm:$0xff]  ;;  %v11280_v28 = vld [vmem:[#allocation90_spill] sm:$0xff] }
 0x73e   :  { %3418 = vmatpush1.bf16.msra.mxu0 %v11222_v14  ;;  %3471 = vmatpush1.bf16.msra.mxu1 %v11223_v51  ;;  %v11281_v14 = vld [vmem:[#allocation91_spill] sm:$0xff]  ;;  %v11282_v51 = vld [vmem:[#allocation92_spill] sm:$0xff] }
 0x73f   :  { %3601 = vmatprep.subr.bf16.mxu0 %v11224_v17  ;;  %3654 = vmatprep.subr.bf16.mxu1 %v11225_v59  ;;  %v11283_v17 = vld [vmem:[#allocation93_spill] sm:$0xff]  ;;  %v11284_v59 = vld [vmem:[#allocation94_spill] sm:$0xff] }
 0x741   :  { %3436 = vmatmul.mubr.bf16.vlgmr.msra.gmra.mrb[104].mxu0 %v3204_v34  ;;  %3489 = vmatmul.mubr.bf16.vlgmr.msra.gmra.mrb[96].mxu1 %v3204_v34  ;;  %v11269_v34 = vld [vmem:[#allocation54_spill] sm:$0xff] }
 0x742   :  { %3445 = vmatprep.mubr.bf16.mxu0 %v10901_v13  ;;  %3498 = vmatprep.mubr.bf16.mxu1 %v10901_v13 }
 0x743   :  { %3602 = vmatpush1.bf16.msra.mxu0 %v11226_v19  ;;  %3655 = vmatpush1.bf16.msra.mxu1 %v11227_v5  ;;  %v11285_v19 = vld [vmem:[#allocation95_spill] sm:$0xff]  ;;  %v11286_v5 = vld [vmem:[#allocation96_spill] sm:$0xff] }
 0x744   :  { %3603 = vmatprep.subr.bf16.mxu0 %v11228_v29  ;;  %3656 = vmatprep.subr.bf16.mxu1 %v11229_v44  ;;  %v11287_v29 = vld [vmem:[#allocation97_spill] sm:$0xff]  ;;  %v9538_v44 = vld [vmem:[#allocation7 + $0x4] ss:$16 sps:$4 sm:$0xff]  }
 0x747   :  { %3604 = vmatpush1.bf16.msra.mxu0 %v11230_v31  ;;  %3657 = vmatpush1.bf16.msra.mxu1 %v11231_v54  ;;  %v11288_v31 = vld [vmem:[#allocation98_spill] sm:$0xff] }
 0x748   :  { %3605 = vmatprep.subr.bf16.mxu0 %v11232_v0  ;;  %3658 = vmatprep.subr.bf16.mxu1 %v11233_v60  ;;  %v11289_v60 = vld [vmem:[#allocation58_spill] sm:$0xff] }
 0x749   :  { %3446 = vmatmul.mubr.bf16.gmra.mrb[108].mxu0 %v3205_v36  ;;  %3499 = vmatmul.mubr.bf16.gmra.mrb[100].mxu1 %v3205_v36  ;;  %v11278_v36 = vld [vmem:[#allocation88_spill] sm:$0xff] }
 0x74b   :  { %3606 = vmatpush1.bf16.msra.mxu0 %v11234_v41  ;;  %3659 = vmatpush1.bf16.msra.mxu1 %v11235_v12 }
 0x74c   :  { %3607 = vmatprep.subr.bf16.mxu0 %v11236_v40  ;;  %3660 = vmatprep.subr.bf16.mxu1 %v11237_v45  ;;  %v11290_v45 = vld [vmem:[#allocation28_spill] sm:$0xff] }
 0x74f   :  { %3608 = vmatpush1.bf16.msra.mxu0 %v11238_v38  ;;  %3661 = vmatpush1.bf16.msra.mxu1 %v11239_v23 }
 0x750   :  { %3609 = vmatprep.subr.bf16.mxu0 %v11240_v47  ;;  %3662 = vmatprep.subr.bf16.mxu1 %v11241_v21 }
 0x753   :  { %3610 = vmatpush1.bf16.msra.mxu0 %v11242_v30  ;;  %3663 = vmatpush1.bf16.msra.mxu1 %v11243_v37 }
 0x754   :  { %3611 = vmatprep.subr.bf16.mxu0 %v11244_v15  ;;  %3664 = vmatprep.subr.bf16.mxu1 %v11245_v52 }
 0x757   :  { %3612 = vmatpush1.bf16.msra.mxu0 %v11246_v16  ;;  %3665 = vmatpush1.bf16.msra.mxu1 %v11247_v49  ;;  %v11291_v49 = vld [vmem:[#allocation59_spill] sm:$0xff] }
 0x758   :  { %3613 = vmatprep.subr.bf16.mxu0 %v11248_v42  ;;  %3666 = vmatprep.subr.bf16.mxu1 %v11249_v32 }
 0x75b   :  { %3614 = vmatpush1.bf16.msra.mxu0 %v11250_v27  ;;  %3667 = vmatpush1.bf16.msra.mxu1 %v11251_v56 }
 0x75c   :  { %3615 = vmatprep.subr.bf16.mxu0 %v11252_v2  ;;  %3668 = vmatprep.subr.bf16.mxu1 %v11253_v22 }
 0x75f   :  { %3616 = vmatpush1.bf16.msra.mxu0 %v11254_v50  ;;  %3669 = vmatpush1.bf16.msra.mxu1 %v11255_v53 }
 0x760   :  { %3617 = vmatprep.subr.bf16.mxu0 %v11256_v55  ;;  %3670 = vmatprep.subr.bf16.mxu1 %v11257_v43 }
 0x763   :  { %3618 = vmatpush1.bf16.msra.mxu0 %v11258_v9  ;;  %3671 = vmatpush1.bf16.msra.mxu1 %v11259_v63 }
 0x764   :  { %3619 = vmatprep.subr.bf16.mxu0 %v11260_v46  ;;  %3672 = vmatprep.subr.bf16.mxu1 %v11261_v25  ;;  %v11292_v46 = vld [vmem:[#allocation29_spill] sm:$0xff] }
 0x767   :  { %3620 = vmatpush1.bf16.msra.mxu0 %v11262_v8  ;;  %3673 = vmatpush1.bf16.msra.mxu1 %v11263_v48 }
 0x768   :  { %3621 = vmatprep.subr.bf16.mxu0 %v11264_v10  ;;  %3674 = vmatprep.subr.bf16.mxu1 %v11265_v24 }
 0x76b   :  { %3622 = vmatpush1.bf16.msra.mxu0 %v11266_v11  ;;  %3675 = vmatpush1.bf16.msra.mxu1 %v11267_v58 }
 0x76c   :  { %3623 = vmatprep.subr.bf16.mxu0 %v11268_v3  ;;  %3676 = vmatprep.subr.bf16.mxu1 %v11269_v34 }
 0x76f   :  { %3624 = vmatpush1.bf16.msra.mxu0 %v11270_v4  ;;  %3677 = vmatpush1.bf16.msra.mxu1 %v11271_v62 }
 0x770   :  { %3625 = vmatprep.subr.bf16.mxu0 %v11272_v6  ;;  %3678 = vmatprep.subr.bf16.mxu1 %v11273_v7 }
 0x773   :  { %3626 = vmatpush1.bf16.msra.mxu0 %v11274_v39  ;;  %3679 = vmatpush1.bf16.msra.mxu1 %v11275_v33 }
 0x774   :  { %3627 = vmatprep.subr.bf16.mxu0 %v11276_v57  ;;  %3680 = vmatprep.subr.bf16.mxu1 %v11277_v18 }
 0x777   :  { %3628 = vmatpush1.bf16.msra.mxu0 %v11278_v36  ;;  %3681 = vmatpush1.bf16.msra.mxu1 %v11279_v61 }
 0x778   :  { %3629 = vmatprep.subr.bf16.mxu0 %v11280_v28  ;;  %3682 = vmatprep.subr.bf16.mxu1 %v11281_v14 }
 0x77b   :  { %3630 = vmatpush1.bf16.msra.mxu0 %v11282_v51  ;;  %3683 = vmatpush1.bf16.msra.mxu1 %v11283_v17 }
 0x77c   :  { %3631 = vmatprep.subr.bf16.mxu0 %v11284_v59  ;;  %3684 = vmatprep.subr.bf16.mxu1 %v11285_v19 }
 0x77f   :  { %3632 = vmatpush1.bf16.msra.mxu0 %v11286_v5  ;;  %3685 = vmatpush1.bf16.msra.mxu1 %v11287_v29 }
 0x780   :  { %3796 = vmatprep.subr.bf16.mxu0 %v9538_v44  ;;  %3849 = vmatprep.subr.bf16.mxu1 %v11288_v31  ;;  %v11293_v31 = vld [vmem:[#allocation99_spill] sm:$0xff] }
 0x7f3   :  { %v3242_v54 = vpop.f32.mrb[96].mxu0  ;;  %v3295_v0 = vpop.f32.mrb[88].mxu1 }
 0x7f4   :  { %v3243_v41 = vadd.f32 %v3242_v54, %v11289_v60  ;;  %v3244_v12 = vpop.f32.mrb[97].mxu0  ;;  %v3297_v40 = vpop.f32.mrb[89].mxu1  ;;  %v3296_v42 = vadd.f32 %v3295_v0, %v11291_v49 }
 0x7f5   :  { %v3245_v38 = vadd.f32 %v3244_v12, %v11290_v45  ;;  %v3246_v23 = vpop.f32.mrb[98].mxu0  ;;  %v3299_v47 = vpop.f32.mrb[90].mxu1  ;;  %v3298_v25 = vadd.f32 %v3297_v40, %v11292_v46 }
 0x7f6   :  { %v3314_v21 = vmul.f32 0.5, %v3243_v41  ;;  %v3247_v30 = vadd.f32 %v3246_v23, %v11289_v60  ;;  %v3248_v37 = vpop.f32.mrb[99].mxu0  ;;  %v3301_v15 = vpop.f32.mrb[91].mxu1  ;;  %v3300_v56 = vadd.f32 %v3299_v47, %v11291_v49 }
 0x7f7   :  { %v3330_v52 = vmul.f32 0.5, %v3245_v38  ;;  %v3249_v16 = vadd.f32 %v3248_v37, %v11290_v45  ;;  %v3302_v3 = vadd.f32 %v3301_v15, %v11292_v46  ;;  %v3350_v7 = vmul.f32 0.5, %v3298_v25 }
 0x7f8   :  { %5907 = vtanh.f32 %v3314_v21  ;;  %v3315_v32 = vmul.f32 0.5, %v3247_v30 }
 0x7f9   :  { %5909 = vtanh.f32 %v3330_v52  ;;  %v3331_v27 = vmul.f32 0.5, %v3249_v16  ;;  %v3351_v36 = vmul.f32 0.5, %v3302_v3  ;;  %v11294_v52 = vld [vmem:[#allocation100_spill] sm:$0xff] }
 0x7fa   :  { %5911 = vtanh.f32 %v3315_v32 }
 0x7fb   :  { %5913 = vtanh.f32 %v3296_v42 }
 0x7fc   :  { %v3252_v2 = vpop.f32.mrb[100].mxu0  ;;  %v3305_v22 = vpop.f32.mrb[92].mxu1  ;;  %5915 = vtanh.f32 %v3331_v27 }
 0x7fd   :  { %v3253_v50 = vadd.f32 %v3252_v2, %v11289_v60  ;;  %v3254_v53 = vpop.f32.mrb[101].mxu0  ;;  %v3307_v55 = vpop.f32.mrb[93].mxu1  ;;  %5917 = vtanh.f32 %v3300_v56  ;;  %v3306_v34 = vadd.f32 %v3305_v22, %v11291_v49 }
 0x7fe   :  { %v3255_v43 = vadd.f32 %v3254_v53, %v11290_v45  ;;  %v3256_v9 = vpop.f32.mrb[102].mxu0  ;;  %v3309_v63 = vpop.f32.mrb[94].mxu1  ;;  %v3308_v14 = vadd.f32 %v3307_v55, %v11292_v46 }
 0x7ff   :  { %v3316_v8 = vmul.f32 0.5, %v3253_v50  ;;  %v3257_v48 = vadd.f32 %v3256_v9, %v11289_v60  ;;  %v3258_v10 = vpop.f32.mrb[103].mxu0  ;;  %v3311_v24 = vpop.f32.mrb[95].mxu1  ;;  %v3310_v57 = vadd.f32 %v3309_v63, %v11291_v49  ;;  %v11295_v9 = vld [vmem:[#allocation101_spill] sm:$0xff] }
 0x800   :  { %v3332_v11 = vmul.f32 0.5, %v3255_v43  ;;  %v3259_v58 = vadd.f32 %v3258_v10, %v11290_v45  ;;  %v3312_v29 = vadd.f32 %v3311_v24, %v11292_v46  ;;  %v3352_v40 = vmul.f32 0.5, %v3308_v14  ;;  %v5031_v10 = vld [vmem:[%s10913_s30 + $0x280] sm:$0xff] }
 0x801   :  { %5919 = vtanh.f32 %v3316_v8  ;;  %v3317_v4 = vmul.f32 0.5, %v3257_v48 }
 0x802   :  { %5921 = vtanh.f32 %v3332_v11  ;;  %v3333_v62 = vmul.f32 0.5, %v3259_v58  ;;  %v5908_v6 = vpop.eup %5907  ;;  %v3353_v15 = vmul.f32 0.5, %v3312_v29 }
 0x803   :  { %v5910_v39 = vpop.eup %5909  ;;  %v3322_v33 = vmul.f32 0.5, %v5908_v6  ;;  %5923 = vtanh.f32 %v3317_v4  ;;  %v5035_v6 = vld [vmem:[%s10913_s30 + $0x2a0] sm:$0xff] }
 0x804   :  { %v3338_v18 = vmul.f32 0.5, %v5910_v39  ;;  %5925 = vtanh.f32 %v3306_v34  ;;  %v5912_v61 = vpop.eup %5911  ;;  %v5032_v34 = vld [vmem:[%s10913_s30 + $0x288] sm:$0xff] }
 0x805   :  { %v3326_v28 = vadd.f32 0.5, %v3322_v33  ;;  %5927 = vtanh.f32 %v3333_v62  ;;  %v5914_v51 = vpop.eup %5913  ;;  %v3323_v59 = vmul.f32 0.5, %v5912_v61 }
 0x806   :  { %v3342_v17 = vadd.f32 0.5, %v3338_v18  ;;  %5929 = vtanh.f32 %v3350_v7  ;;  %v5916_v19 = vpop.eup %5915  ;;  %v11296_v7 = vld [vmem:[#allocation102_spill] sm:$0xff] }
 0x807   :  { %v3370_v5 = vmul.f32 %v5914_v51, %v3326_v28  ;;  %5931 = vtanh.f32 %v3310_v57  ;;  %v3327_v0 = vadd.f32 0.5, %v3323_v59  ;;  %v3339_v41 = vmul.f32 0.5, %v5916_v19  ;;  %v5918_v12 = vpop.eup %5917 }
 0x808   :  { %v3366_v54 = vmul.f32 %v3342_v17, %v11293_v31  ;;  %5933 = vtanh.f32 %v3351_v36  ;;  %v5036_v36 = vld [vmem:[%s10913_s30 + $0x2a8] sm:$0xff] }
 0x809   :  { %v3343_v47 = vadd.f32 0.5, %v3339_v41  ;;  %v3371_v21 = vmul.f32 %v5918_v12, %v3327_v0  ;;  %5935 = vtanh.f32 %v3352_v40 }
 0x80a   :  { %v9559_v23 = vadd.f32 %v3370_v5, %v3366_v54  ;;  %v5033_v5 = vld [vmem:[%s10913_s30 + $0x290] sm:$0xff] }
 0x80b   :  { %v5920_v38 = vpop.eup %5919  ;;  %v3367_v16 = vmul.f32 %v3343_v47, %v11294_v52  ;;  %v5037_v47 = vld [vmem:[%s10913_s30 + $0x2b0] sm:$0xff]  ;;  %v5039_v52 = vld [vmem:[%s10913_s30 + $0x2c0] sm:$0xff] }
 0x80c   :  { %v5922_v30 = vpop.eup %5921  ;;  %v3324_v37 = vmul.f32 0.5, %v5920_v38  ;;  %5937 = vtanh.f32 %v9559_v23 }
 0x80d   :  { %v3340_v42 = vmul.f32 0.5, %v5922_v30  ;;  %v5924_v32 = vpop.eup %5923  ;;  %v9563_v2 = vadd.f32 %v3371_v21, %v3367_v16  ;;  %5939 = vtanh.f32 %v3353_v15 }
 0x80e   :  { %v3328_v27 = vadd.f32 0.5, %v3324_v37  ;;  %v5926_v56 = vpop.eup %5925  ;;  %v3325_v50 = vmul.f32 0.5, %v5924_v32 }
 0x80f   :  { %v3344_v22 = vadd.f32 0.5, %v3340_v42  ;;  %v5928_v53 = vpop.eup %5927  ;;  %5941 = vtanh.f32 %v9563_v2  ;;  %v5034_v42 = vld [vmem:[%s10913_s30 + $0x298] sm:$0xff] }
 0x810   :  { %v3372_v55 = vmul.f32 %v5926_v56, %v3328_v27  ;;  %v5930_v43 = vpop.eup %5929  ;;  %v3329_v25 = vadd.f32 0.5, %v3325_v50  ;;  %v3341_v8 = vmul.f32 0.5, %v5928_v53  ;;  %v5040_v27 = vld [vmem:[%s10913_s30 + $0x2c8] sm:$0xff] }
 0x811   :  { %v3368_v63 = vmul.f32 %v3344_v22, %v11295_v9  ;;  %v5932_v48 = vpop.eup %5931  ;;  %v3358_v61 = vmul.f32 0.5, %v5930_v43  ;;  %v5038_v22 = vld [vmem:[%s10913_s30 + $0x2b8] sm:$0xff] }
 0x812   :  { %v5934_v24 = vpop.eup %5933  ;;  %v3345_v58 = vadd.f32 0.5, %v3341_v8  ;;  %v3373_v3 = vmul.f32 %v5932_v48, %v3329_v25  ;;  %v5041_v48 = vld [vmem:[%s10913_s30 + $0x2d0] sm:$0xff] }
 0x813   :  { %v9570_v11 = vadd.f32 %v3372_v55, %v3368_v63  ;;  %v3359_v28 = vmul.f32 0.5, %v5934_v24  ;;  %v5936_v0 = vpop.eup %5935  ;;  %v3362_v30 = vadd.f32 0.5, %v3358_v61  ;;  %v5043_v55 = vld [vmem:[%s10913_s30 + $0x2e0] sm:$0xff] }
 0x814   :  { %v3437_v4 = vpop.f32.mrb[104].mxu0  ;;  %v3490_v62 = vpop.f32.mrb[96].mxu1  ;;  %v3369_v39 = vmul.f32 %v3345_v58, %v11296_v7  ;;  %v3360_v63 = vmul.f32 0.5, %v5936_v0  ;;  %v5044_v58 = vld [vmem:[%s10913_s30 + $0x2e8] sm:$0xff] }
 0x815   :  { %v3509_v33 = vadd.f32 %v5031_v10, %v3437_v4  ;;  %v3439_v57 = vpop.f32.mrb[105].mxu0  ;;  %v3492_v18 = vpop.f32.mrb[97].mxu1  ;;  %5943 = vtanh.f32 %v9570_v11  ;;  %v3363_v37 = vadd.f32 0.5, %v3359_v28  ;;  %v3511_v15 = vadd.f32 %v5033_v5, %v3490_v62 }
 0x816   :  { %v3510_v14 = vadd.f32 %v5032_v34, %v3439_v57  ;;  %v3441_v51 = vpop.f32.mrb[106].mxu0  ;;  %v3494_v17 = vpop.f32.mrb[98].mxu1  ;;  %v9583_v59 = vadd.f32 %v3373_v3, %v3369_v39  ;;  %v3512_v3 = vadd.f32 %v5034_v42, %v3492_v18  ;;  %v3364_v18 = vadd.f32 0.5, %v3360_v63 }
 0x817   :  { %v3525_v19 = vmul.f32 0.5, %v3509_v33  ;;  %v3513_v29 = vadd.f32 %v5035_v6, %v3441_v51  ;;  %v3443_v31 = vpop.f32.mrb[107].mxu0  ;;  %v3496_v54 = vpop.f32.mrb[99].mxu1  ;;  %v3515_v56 = vadd.f32 %v5037_v47, %v3494_v17 }
 0x818   :  { %v3541_v41 = vmul.f32 0.5, %v3510_v14  ;;  %v3514_v12 = vadd.f32 %v5036_v36, %v3443_v31  ;;  %v5938_v40 = vpop.eup %5937  ;;  %5945 = vtanh.f32 %v9583_v59  ;;  %v3516_v7 = vadd.f32 %v5038_v22, %v3496_v54  ;;  %v5042_v54 = vld [vmem:[%s10913_s30 + $0x2d8] sm:$0xff] }
 0x819   :  { %v3526_v38 = vmul.f32 0.5, %v3513_v29  ;;  %v5940_v21 = vpop.eup %5939  ;;  %5947 = vtanh.f32 %v3525_v19  ;;  %v3382_v43 = vmul.f32 %v5938_v40, %v3362_v30  ;;  %v3561_v5 = vmul.f32 0.5, %v3512_v3  ;;  %v5045_v29 = vld [vmem:[%s10913_s30 + $0x2f0] sm:$0xff] }
 0x81a   :  { %v5942_v16 = vpop.eup %5941  ;;  %5949 = vtanh.f32 %v3541_v41  ;;  %v3542_v32 = vmul.f32 0.5, %v3514_v12  ;;  %v3361_v25 = vmul.f32 0.5, %v5940_v21  ;;  %v3562_v12 = vmul.f32 0.5, %v3516_v7 }
 0x81b   :  { %v3383_v9 = vmul.f32 %v5942_v16, %v3363_v37  ;;  %5951 = vtanh.f32 %v3526_v38 }
 0x81c   :  { %v3447_v50 = vpop.f32.mrb[108].mxu0  ;;  %v3500_v53 = vpop.f32.mrb[100].mxu1  ;;  %5953 = vtanh.f32 %v3511_v15  ;;  %v3365_v19 = vadd.f32 0.5, %v3361_v25 }
 0x81d   :  { %v3517_v8 = vadd.f32 %v5039_v52, %v3447_v50  ;;  %v3449_v10 = vpop.f32.mrb[109].mxu0  ;;  %v3502_v24 = vpop.f32.mrb[101].mxu1  ;;  %v3599_v6 = vpack.c.bf16 %v3383_v9, %v3382_v43  ;;  %5955 = vtanh.f32 %v3542_v32  ;;  %v3519_v61 = vadd.f32 %v5041_v48, %v3500_v53  ;;  %v5046_v52 = vld [vmem:[%s10913_s30 + $0x2f8] sm:$0xff] }
 0x81e   :  { %v3518_v34 = vadd.f32 %v5040_v27, %v3449_v10  ;;  %v3451_v4 = vpop.f32.mrb[110].mxu0  ;;  %v3504_v62 = vpop.f32.mrb[102].mxu1  ;;  %5957 = vtanh.f32 %v3515_v56  ;;  %v3520_v15 = vadd.f32 %v5042_v54, %v3502_v24 }
 0x81f   :  { %v3527_v39 = vmul.f32 0.5, %v3517_v8  ;;  %v3521_v33 = vadd.f32 %v5043_v55, %v3451_v4  ;;  %v3453_v57 = vpop.f32.mrb[111].mxu0  ;;  %v3506_v36 = vpop.f32.mrb[103].mxu1  ;;  %3633 = vmatprep.mubr.bf16.mxu0 %v3599_v6  ;;  %3686 = vmatprep.mubr.bf16.mxu1 %v3599_v6  ;;  %v3523_v30 = vadd.f32 %v5045_v29, %v3504_v62 }
 0x820   :  { %v3543_v28 = vmul.f32 0.5, %v3518_v34  ;;  %v3522_v14 = vadd.f32 %v5044_v58, %v3453_v57  ;;  %v5944_v51 = vpop.eup %5943  ;;  %v3524_v55 = vadd.f32 %v5046_v52, %v3506_v36  ;;  %v3563_v8 = vmul.f32 0.5, %v3520_v15 }
 0x821   :  { %5959 = vtanh.f32 %v3527_v39  ;;  %v3528_v17 = vmul.f32 0.5, %v3521_v33  ;;  %v3384_v40 = vmul.f32 %v5944_v51, %v3364_v18 }
 0x822   :  { %v5946_v31 = vpop.eup %5945  ;;  %5961 = vtanh.f32 %v3543_v28  ;;  %v3544_v0 = vmul.f32 0.5, %v3522_v14  ;;  %v3564_v4 = vmul.f32 0.5, %v3524_v55  ;;  %v9652_v55 = vld [vmem:[#allocation7 + $0x24] ss:$16 sps:$4 sm:$0xff]  }
 0x823   :  { %v5948_v41 = vpop.eup %5947  ;;  %5963 = vtanh.f32 %v3519_v61  ;;  %v3385_v38 = vmul.f32 %v5946_v31, %v3365_v19 }
 0x824   :  { %v5950_v47 = vpop.eup %5949  ;;  %v3533_v21 = vmul.f32 0.5, %v5948_v41  ;;  %5965 = vtanh.f32 %v3528_v17 }
 0x825   :  { %v3549_v37 = vmul.f32 0.5, %v5950_v47  ;;  %5967 = vtanh.f32 %v3561_v5  ;;  %v9622_v16 = vpack.c.bf16 %v3385_v38, %v3384_v40  ;;  %v5952_v42 = vpop.eup %5951 }
 0x826   :  { %v3537_v32 = vadd.f32 0.5, %v3533_v21  ;;  %5969 = vtanh.f32 %v3544_v0  ;;  %v5954_v27 = vpop.eup %5953  ;;  %v3534_v22 = vmul.f32 0.5, %v5952_v42 }
 0x827   :  { %v3553_v56 = vadd.f32 0.5, %v3549_v37  ;;  %5971 = vtanh.f32 %v3562_v12  ;;  %v5956_v50 = vpop.eup %5955 }
 0x828   :  { %v3581_v53 = vmul.f32 %v5954_v27, %v3537_v32  ;;  %5973 = vtanh.f32 %v3523_v30  ;;  %v5958_v43 = vpop.eup %5957  ;;  %v3538_v63 = vadd.f32 0.5, %v3534_v22  ;;  %v3550_v25 = vmul.f32 0.5, %v5956_v50  ;;  %v9644_v27 = vld [vmem:[#allocation7] ss:$16 sps:$4 sm:$0xff]  }
 0x829   :  { %v3577_v9 = vmul.f32 %v3553_v56, %v9423_v26  ;;  %5975 = vtanh.f32 %v3563_v8  ;;  %v9647_v56 = vld [vmem:[#allocation7 + $0x8] ss:$16 sps:$4 sm:$0xff]  }
 0x82a   :  { %v3554_v24 = vadd.f32 0.5, %v3550_v25  ;;  %v3582_v58 = vmul.f32 %v5958_v43, %v3538_v63  ;;  %v9655_v43 = vld [vmem:[#allocation7 + $0x2c] ss:$16 sps:$4 sm:$0xff]   ;;  %v9658_v25 = vld [vmem:[#allocation7 + $0x20] ss:$16 sps:$4 sm:$0xff]  }
 0x82b   :  { %v5960_v48 = vpop.eup %5959  ;;  %v9625_v10 = vadd.f32 %v3581_v53, %v3577_v9  ;;  %v9661_v8 = vld [vmem:[#allocation7 + $0x28] ss:$16 sps:$4 sm:$0xff]  }
 0x82c   :  { %v3535_v3 = vmul.f32 0.5, %v5960_v48  ;;  %v5962_v34 = vpop.eup %5961  ;;  %v3578_v6 = vmul.f32 %v3554_v24, %v9427_v20  ;;  %v9667_v48 = vld [vmem:[#allocation7 + $0x4c] ss:$16 sps:$4 sm:$0xff]  }
 0x82d   :  { %v5964_v62 = vpop.eup %5963  ;;  %v3551_v39 = vmul.f32 0.5, %v5962_v34  ;;  %5977 = vtanh.f32 %v9625_v10  ;;  %v9680_v34 = vld [vmem:[#allocation7 + $0x64] ss:$16 sps:$4 sm:$0xff]  }
 0x82e   :  { %v3539_v7 = vadd.f32 0.5, %v3535_v3  ;;  %v5966_v33 = vpop.eup %5965  ;;  %v9629_v57 = vadd.f32 %v3582_v58, %v3578_v6  ;;  %5979 = vtanh.f32 %v3564_v4  ;;  %v9674_v58 = vld [vmem:[#allocation7 + $0x40] ss:$16 sps:$4 sm:$0xff]   ;;  %v9677_v3 = vld [vmem:[#allocation7 + $0x48] ss:$16 sps:$4 sm:$0xff]  }
 0x82f   :  { %v5968_v26 = vpop.eup %5967  ;;  %v3555_v36 = vadd.f32 0.5, %v3551_v39  ;;  %v3536_v28 = vmul.f32 0.5, %v5966_v33  ;;  %v9683_v4 = vld [vmem:[#allocation7 + $0x6c] ss:$16 sps:$4 sm:$0xff]   ;;  %v9691_v6 = vld [vmem:[#allocation7 + $0x68] ss:$16 sps:$4 sm:$0xff]  }
 0x830   :  { %v3583_v61 = vmul.f32 %v5964_v62, %v3539_v7  ;;  %v5970_v14 = vpop.eup %5969  ;;  %5981 = vtanh.f32 %v9629_v57  ;;  %v3569_v0 = vmul.f32 0.5, %v5968_v26  ;;  %v9688_v62 = vld [vmem:[#allocation7 + $0x60] ss:$16 sps:$4 sm:$0xff]   ;;  %v9694_v7 = vld [vmem:[#allocation7 + $0x84] ss:$16 sps:$4 sm:$0xff]  }
 0x831   :  { %v5972_v51 = vpop.eup %5971  ;;  %v3579_v17 = vmul.f32 %v3555_v36, %v9431_v35  ;;  %v3540_v20 = vadd.f32 0.5, %v3536_v28  ;;  %v3552_v18 = vmul.f32 0.5, %v5970_v14  ;;  %v9697_v39 = vld [vmem:[#allocation7 + $0x8c] ss:$16 sps:$4 sm:$0xff]   ;;  %v9700_v33 = vld [vmem:[#allocation7 + $0x80] ss:$16 sps:$4 sm:$0xff]  }
 0x832   :  { %v5974_v19 = vpop.eup %5973  ;;  %v3570_v41 = vmul.f32 0.5, %v5972_v51  ;;  %v3573_v47 = vadd.f32 0.5, %v3569_v0  ;;  %v9703_v26 = vld [vmem:[#allocation7 + $0x88] ss:$16 sps:$4 sm:$0xff]   ;;  %v9706_v36 = vld [vmem:[#allocation7 + $0xa4] ss:$16 sps:$4 sm:$0xff]  }
 0x833   :  { %v9633_v5 = vadd.f32 %v3583_v61, %v3579_v17  ;;  %v3556_v29 = vadd.f32 0.5, %v3552_v18  ;;  %v3584_v31 = vmul.f32 %v5974_v19, %v3540_v20  ;;  %v5976_v12 = vpop.eup %5975  ;;  %v9709_v61 = vld [vmem:[#allocation7 + $0xac] ss:$16 sps:$4 sm:$0xff]   ;;  %v9712_v28 = vld [vmem:[#allocation7 + $0xa0] ss:$16 sps:$4 sm:$0xff]  }
 0x834   :  { %v3574_v21 = vadd.f32 0.5, %v3570_v41  ;;  %v3571_v42 = vmul.f32 0.5, %v5976_v12  ;;  %v9715_v14 = vld [vmem:[#allocation7 + $0xa8] ss:$16 sps:$4 sm:$0xff]   ;;  %v9718_v51 = vld [vmem:[#allocation7 + $0xc4] ss:$16 sps:$4 sm:$0xff]  }
 0x835   :  { %v3580_v54 = vmul.f32 %v3556_v29, %v9435_v1  ;;  %5983 = vtanh.f32 %v9633_v5  ;;  %v9721_v17 = vld [vmem:[#allocation7 + $0xcc] ss:$16 sps:$4 sm:$0xff]   ;;  %v9724_v20 = vld [vmem:[#allocation7 + $0xc0] ss:$16 sps:$4 sm:$0xff]   ;;  %v9727_v18 = vld [vmem:[#allocation7 + $0xc8] ss:$16 sps:$4 sm:$0xff]  }
 0x836   :  { %v3575_v22 = vadd.f32 0.5, %v3571_v42  ;;  %v9730_v19 = vld [vmem:[#allocation7 + $0xe4] ss:$16 sps:$4 sm:$0xff]   ;;  %v9733_v29 = vld [vmem:[#allocation7 + $0xec] ss:$16 sps:$4 sm:$0xff]  }
 0x837   :  { %v9637_v40 = vadd.f32 %v3584_v31, %v3580_v54  ;;  %v5978_v38 = vpop.eup %5977  ;;  %11297 = vst [vmem:[#allocation60_spill] sm:$0xff] %v9730_v19  ;;  %11298 = vst [vmem:[#allocation30_spill] sm:$0xff] %v9733_v29  ;;  %v9736_v31 = vld [vmem:[#allocation7 + $0xe0] ss:$16 sps:$4 sm:$0xff]   ;;  %v9739_v54 = vld [vmem:[#allocation7 + $0xe8] ss:$16 sps:$4 sm:$0xff]  }
 0x838   :  { %v5980_v35 = vpop.eup %5979  ;;  %v3593_v37 = vmul.f32 %v5978_v38, %v3573_v47  ;;  %11299 = vst [vmem:[#allocation61_spill] sm:$0xff] %v9736_v31  ;;  %11300 = vst [vmem:[#allocation31_spill] sm:$0xff] %v9739_v54  ;;  %v9745_v0 = vld [vmem:[%s10539_s11 + $0x4] ss:$16 sps:$4 sm:$0xff]   ;;  %v9751_v41 = vld [vmem:[%s10539_s11 + $0xc] ss:$16 sps:$4 sm:$0xff]  }
 0x839   :  { %5985 = vtanh.f32 %v9637_v40  ;;  %v3572_v1 = vmul.f32 0.5, %v5980_v35  ;;  %11301 = vst [vmem:[#allocation62_spill] sm:$0xff] %v9745_v0  ;;  %11302 = vst [vmem:[#allocation32_spill] sm:$0xff] %v9751_v41  ;;  %v9761_v12 = vld [vmem:[%s10539_s11] ss:$16 sps:$4 sm:$0xff]  }
 0x83a   :  { %v5982_v30 = vpop.eup %5981  ;;  %11303 = vst [vmem:[#allocation63_spill] sm:$0xff] %v9761_v12  ;;  %v9767_v38 = vld [vmem:[%s10539_s11 + $0x8] ss:$16 sps:$4 sm:$0xff]   ;;  %v9773_v35 = vld [vmem:[%s10539_s11 + $0x24] ss:$16 sps:$4 sm:$0xff]  }
 0x83b   :  { %v3594_v15 = vmul.f32 %v5982_v30, %v3574_v21  ;;  %v3576_v50 = vadd.f32 0.5, %v3572_v1  ;;  %11304 = vst [vmem:[#allocation33_spill] sm:$0xff] %v9767_v38  ;;  %11305 = vst [vmem:[#allocation64_spill] sm:$0xff] %v9773_v35  ;;  %v9779_v47 = vld [vmem:[%s10539_s11 + $0x2c] ss:$16 sps:$4 sm:$0xff]  }
 0x83c   :  { %11306 = vst [vmem:[#allocation34_spill] sm:$0xff] %v9779_v47  ;;  %v9785_v21 = vld [vmem:[%s10539_s11 + $0x20] ss:$16 sps:$4 sm:$0xff]   ;;  %v9791_v30 = vld [vmem:[%s10539_s11 + $0x28] ss:$16 sps:$4 sm:$0xff]  }
 0x83d   :  { %v9640_v52 = vpack.c.bf16 %v3594_v15, %v3593_v37  ;;  %11307 = vst [vmem:[#allocation65_spill] sm:$0xff] %v9785_v21  ;;  %11308 = vst [vmem:[#allocation35_spill] sm:$0xff] %v9791_v30  ;;  %v9797_v37 = vld [vmem:[%s10539_s11 + $0x44] ss:$16 sps:$4 sm:$0xff]   ;;  %v9803_v15 = vld [vmem:[%s10539_s11 + $0x4c] ss:$16 sps:$4 sm:$0xff]  }
 0x83e   :  { %11309 = vst [vmem:[#allocation66_spill] sm:$0xff] %v9797_v37  ;;  %11310 = vst [vmem:[#allocation36_spill] sm:$0xff] %v9803_v15  ;;  %v9817_v42 = vld [vmem:[%s10539_s11 + $0x48] ss:$16 sps:$4 sm:$0xff]   ;;  %v9823_v1 = vld [vmem:[%s10539_s11 + $0x64] ss:$16 sps:$4 sm:$0xff]  }
 0x83f   :  { %3634 = vmatmul.mubr.bf16.vlgmr.msra.gmra.mrb[112].mxu0 %v9640_v52  ;;  %3687 = vmatmul.mubr.bf16.vlgmr.msra.gmra.mrb[104].mxu1 %v9640_v52  ;;  %v5984_v32 = vpop.eup %5983  ;;  %11312 = vst [vmem:[#allocation37_spill] sm:$0xff] %v9817_v42  ;;  %11313 = vst [vmem:[#allocation68_spill] sm:$0xff] %v9823_v1 }
 0x840   :  { %3797 = vmatpush1.bf16.msra.mxu0 %v9644_v27  ;;  %3850 = vmatpush1.bf16.msra.mxu1 %v9647_v56  ;;  %v3595_v9 = vmul.f32 %v5984_v32, %v3575_v22  ;;  %v9829_v32 = vld [vmem:[%s10539_s11 + $0x6c] ss:$16 sps:$4 sm:$0xff]   ;;  %v9835_v22 = vld [vmem:[%s10539_s11 + $0x60] ss:$16 sps:$4 sm:$0xff]  }
 0x841   :  { %3643 = vmatprep.mubr.bf16.mxu0 %v9622_v16  ;;  %3696 = vmatprep.mubr.bf16.mxu1 %v9622_v16  ;;  %v9664_v16 = vld [vmem:[#allocation7 + $0x44] ss:$16 sps:$4 sm:$0xff]   ;;  %11314 = vst [vmem:[#allocation38_spill] sm:$0xff] %v9829_v32  ;;  %11315 = vst [vmem:[#allocation69_spill] sm:$0xff] %v9835_v22 }
 0x842   :  { %3798 = vmatprep.subr.bf16.mxu0 %v9652_v55  ;;  %3851 = vmatprep.subr.bf16.mxu1 %v9655_v43 }
 0x843   :  { %v5986_v53 = vpop.eup %5985 }
 0x844   :  { %v3596_v63 = vmul.f32 %v5986_v53, %v3576_v50  ;;  %3799 = vmatpush1.bf16.msra.mxu0 %v9658_v25  ;;  %3852 = vmatpush1.bf16.msra.mxu1 %v9661_v8  ;;  %v9841_v50 = vld [vmem:[%s10539_s11 + $0x68] ss:$16 sps:$4 sm:$0xff]   ;;  %v9847_v53 = vld [vmem:[%s10539_s11 + $0x84] ss:$16 sps:$4 sm:$0xff]  }
 0x845   :  { %3800 = vmatprep.subr.bf16.mxu0 %v9664_v16  ;;  %3853 = vmatprep.subr.bf16.mxu1 %v9667_v48  ;;  %11316 = vst [vmem:[#allocation39_spill] sm:$0xff] %v9841_v50  ;;  %11317 = vst [vmem:[#allocation70_spill] sm:$0xff] %v9847_v53 }
 0x846   :  { %v9670_v24 = vpack.c.bf16 %v3596_v63, %v3595_v9  ;;  %v9853_v9 = vld [vmem:[%s10539_s11 + $0x8c] ss:$16 sps:$4 sm:$0xff]   ;;  %v9859_v63 = vld [vmem:[%s10539_s11 + $0x80] ss:$16 sps:$4 sm:$0xff]  }
 0x847   :  { %11318 = vst [vmem:[#allocation40_spill] sm:$0xff] %v9853_v9  ;;  %11319 = vst [vmem:[#allocation71_spill] sm:$0xff] %v9859_v63 }
 0x848   :  { %3644 = vmatmul.mubr.bf16.gmra.mrb[116].mxu0 %v9670_v24  ;;  %3697 = vmatmul.mubr.bf16.gmra.mrb[108].mxu1 %v9670_v24 }
 0x849   :  { %3801 = vmatpush1.bf16.msra.mxu0 %v9674_v58  ;;  %3854 = vmatpush1.bf16.msra.mxu1 %v9677_v3 }
 0x84a   :  { %3802 = vmatprep.subr.bf16.mxu0 %v9680_v34  ;;  %3855 = vmatprep.subr.bf16.mxu1 %v9683_v4 }
 0x84b   :  { %3828 = vmatprep.mubr.bf16.mxu0 %v10901_v13  ;;  %3881 = vmatprep.mubr.bf16.mxu1 %v10901_v13 }
 0x84d   :  { %3803 = vmatpush1.bf16.msra.mxu0 %v9688_v62  ;;  %3856 = vmatpush1.bf16.msra.mxu1 %v9691_v6 }
 0x84e   :  { %3804 = vmatprep.subr.bf16.mxu0 %v9694_v7  ;;  %3857 = vmatprep.subr.bf16.mxu1 %v9697_v39 }
 0x851   :  { %3805 = vmatpush1.bf16.msra.mxu0 %v9700_v33  ;;  %3858 = vmatpush1.bf16.msra.mxu1 %v9703_v26 }
 0x852   :  { %3806 = vmatprep.subr.bf16.mxu0 %v9706_v36  ;;  %3859 = vmatprep.subr.bf16.mxu1 %v9709_v61 }
 0x855   :  { %3807 = vmatpush1.bf16.msra.mxu0 %v9712_v28  ;;  %3860 = vmatpush1.bf16.msra.mxu1 %v9715_v14 }
 0x856   :  { %3808 = vmatprep.subr.bf16.mxu0 %v9718_v51  ;;  %3861 = vmatprep.subr.bf16.mxu1 %v9721_v17 }
 0x859   :  { %3809 = vmatpush1.bf16.msra.mxu0 %v9724_v20  ;;  %3862 = vmatpush1.bf16.msra.mxu1 %v9727_v18 }
 0x85a   :  { %3810 = vmatprep.subr.bf16.mxu0 %v9730_v19  ;;  %3863 = vmatprep.subr.bf16.mxu1 %v9733_v29 }
 0x85d   :  { %3811 = vmatpush1.bf16.msra.mxu0 %v9736_v31  ;;  %3864 = vmatpush1.bf16.msra.mxu1 %v9739_v54 }
 0x85e   :  { %3994 = vmatprep.subr.bf16.mxu0 %v9745_v0  ;;  %4047 = vmatprep.subr.bf16.mxu1 %v9751_v41 }
 0x860   :  { %3829 = vmatmul.mubr.bf16.vlgmr.msra.gmra.mrb[120].mxu0 %v9640_v52  ;;  %3882 = vmatmul.mubr.bf16.vlgmr.msra.gmra.mrb[112].mxu1 %v9640_v52  ;;  %v9811_v52 = vld [vmem:[%s10539_s11 + $0x40] ss:$16 sps:$4 sm:$0xff]  }
 0x861   :  { %3838 = vmatprep.mubr.bf16.mxu0 %v10901_v13  ;;  %3891 = vmatprep.mubr.bf16.mxu1 %v10901_v13  ;;  %11311 = vst [vmem:[#allocation67_spill] sm:$0xff] %v9811_v52 }
 0x862   :  { %3995 = vmatpush1.bf16.msra.mxu0 %v9761_v12  ;;  %4048 = vmatpush1.bf16.msra.mxu1 %v9767_v38 }
 0x863   :  { %3996 = vmatprep.subr.bf16.mxu0 %v9773_v35  ;;  %4049 = vmatprep.subr.bf16.mxu1 %v9779_v47 }
 0x866   :  { %3997 = vmatpush1.bf16.msra.mxu0 %v9785_v21  ;;  %4050 = vmatpush1.bf16.msra.mxu1 %v9791_v30 }
 0x867   :  { %3998 = vmatprep.subr.bf16.mxu0 %v9797_v37  ;;  %4051 = vmatprep.subr.bf16.mxu1 %v9803_v15 }
 0x868   :  { %3839 = vmatmul.mubr.bf16.gmra.mrb[124].mxu0 %v9670_v24  ;;  %3892 = vmatmul.mubr.bf16.gmra.mrb[116].mxu1 %v9670_v24  ;;  %v9865_v24 = vld [vmem:[%s10539_s11 + $0x88] ss:$16 sps:$4 sm:$0xff]  }
 0x869   :  { %11320 = vst [vmem:[#allocation41_spill] sm:$0xff] %v9865_v24 }
 0x86a   :  { %3999 = vmatpush1.bf16.msra.mxu0 %v9811_v52  ;;  %4052 = vmatpush1.bf16.msra.mxu1 %v9817_v42 }
 0x86b   :  { %4000 = vmatprep.subr.bf16.mxu0 %v9823_v1  ;;  %4053 = vmatprep.subr.bf16.mxu1 %v9829_v32 }
 0x86e   :  { %4001 = vmatpush1.bf16.msra.mxu0 %v9835_v22  ;;  %4054 = vmatpush1.bf16.msra.mxu1 %v9841_v50 }
 0x86f   :  { %4002 = vmatprep.subr.bf16.mxu0 %v9847_v53  ;;  %4055 = vmatprep.subr.bf16.mxu1 %v9853_v9  ;;  %v9871_v53 = vld [vmem:[%s10539_s11 + $0xa4] ss:$16 sps:$4 sm:$0xff]   ;;  %v9877_v9 = vld [vmem:[%s10539_s11 + $0xac] ss:$16 sps:$4 sm:$0xff]  }
 0x870   :  { %11321 = vst [vmem:[#allocation72_spill] sm:$0xff] %v9871_v53  ;;  %11322 = vst [vmem:[#allocation42_spill] sm:$0xff] %v9877_v9 }
 0x872   :  { %4003 = vmatpush1.bf16.msra.mxu0 %v9859_v63  ;;  %4056 = vmatpush1.bf16.msra.mxu1 %v9865_v24  ;;  %v9883_v63 = vld [vmem:[%s10539_s11 + $0xa0] ss:$16 sps:$4 sm:$0xff]   ;;  %v9889_v24 = vld [vmem:[%s10539_s11 + $0xa8] ss:$16 sps:$4 sm:$0xff]  }
 0x873   :  { %4004 = vmatprep.subr.bf16.mxu0 %v9871_v53  ;;  %4057 = vmatprep.subr.bf16.mxu1 %v9877_v9  ;;  %11323 = vst [vmem:[#allocation73_spill] sm:$0xff] %v9883_v63  ;;  %11324 = vst [vmem:[#allocation43_spill] sm:$0xff] %v9889_v24  ;;  %v9895_v53 = vld [vmem:[%s10539_s11 + $0xc4] ss:$16 sps:$4 sm:$0xff]   ;;  %v9901_v9 = vld [vmem:[%s10539_s11 + $0xcc] ss:$16 sps:$4 sm:$0xff]  }
 0x874   :  { %11325 = vst [vmem:[#allocation74_spill] sm:$0xff] %v9895_v53  ;;  %11326 = vst [vmem:[#allocation44_spill] sm:$0xff] %v9901_v9 }
 0x876   :  { %4005 = vmatpush1.bf16.msra.mxu0 %v9883_v63  ;;  %4058 = vmatpush1.bf16.msra.mxu1 %v9889_v24  ;;  %v9907_v63 = vld [vmem:[%s10539_s11 + $0xc0] ss:$16 sps:$4 sm:$0xff]   ;;  %v9913_v24 = vld [vmem:[%s10539_s11 + $0xc8] ss:$16 sps:$4 sm:$0xff]  }
 0x877   :  { %4006 = vmatprep.subr.bf16.mxu0 %v9895_v53  ;;  %4059 = vmatprep.subr.bf16.mxu1 %v9901_v9  ;;  %11327 = vst [vmem:[#allocation75_spill] sm:$0xff] %v9907_v63  ;;  %11328 = vst [vmem:[#allocation45_spill] sm:$0xff] %v9913_v24  ;;  %v9919_v53 = vld [vmem:[%s10539_s11 + $0xe4] ss:$16 sps:$4 sm:$0xff]   ;;  %v9925_v9 = vld [vmem:[%s10539_s11 + $0xec] ss:$16 sps:$4 sm:$0xff]  }
 0x878   :  { %11329 = vst [vmem:[#allocation76_spill] sm:$0xff] %v9919_v53  ;;  %11330 = vst [vmem:[#allocation46_spill] sm:$0xff] %v9925_v9 }
 0x87a   :  { %4007 = vmatpush1.bf16.msra.mxu0 %v9907_v63  ;;  %4060 = vmatpush1.bf16.msra.mxu1 %v9913_v24  ;;  %v9931_v63 = vld [vmem:[%s10539_s11 + $0xe0] ss:$16 sps:$4 sm:$0xff]   ;;  %v9937_v24 = vld [vmem:[%s10539_s11 + $0xe8] ss:$16 sps:$4 sm:$0xff]  }
 0x87b   :  { %4008 = vmatprep.subr.bf16.mxu0 %v9919_v53  ;;  %4061 = vmatprep.subr.bf16.mxu1 %v9925_v9  ;;  %11331 = vst [vmem:[#allocation77_spill] sm:$0xff] %v9931_v63  ;;  %11332 = vst [vmem:[#allocation47_spill] sm:$0xff] %v9937_v24  ;;  %v9943_v53 = vld [vmem:[%s10539_s11 + $0x104] ss:$16 sps:$4 sm:$0xff]   ;;  %v9949_v9 = vld [vmem:[%s10539_s11 + $0x10c] ss:$16 sps:$4 sm:$0xff]  }
 0x87c   :  { %11333 = vst [vmem:[#allocation78_spill] sm:$0xff] %v9943_v53  ;;  %11334 = vst [vmem:[#allocation48_spill] sm:$0xff] %v9949_v9 }
 0x87e   :  { %4009 = vmatpush1.bf16.msra.mxu0 %v9931_v63  ;;  %4062 = vmatpush1.bf16.msra.mxu1 %v9937_v24  ;;  %v9955_v63 = vld [vmem:[%s10539_s11 + $0x100] ss:$16 sps:$4 sm:$0xff]   ;;  %v9961_v24 = vld [vmem:[%s10539_s11 + $0x108] ss:$16 sps:$4 sm:$0xff]  }
 0x87f   :  { %4010 = vmatprep.subr.bf16.mxu0 %v9943_v53  ;;  %4063 = vmatprep.subr.bf16.mxu1 %v9949_v9  ;;  %11335 = vst [vmem:[#allocation79_spill] sm:$0xff] %v9955_v63  ;;  %11336 = vst [vmem:[#allocation49_spill] sm:$0xff] %v9961_v24  ;;  %v9967_v53 = vld [vmem:[%s10539_s11 + $0x124] ss:$16 sps:$4 sm:$0xff]   ;;  %v9973_v9 = vld [vmem:[%s10539_s11 + $0x12c] ss:$16 sps:$4 sm:$0xff]  }
 0x880   :  { %11337 = vst [vmem:[#allocation80_spill] sm:$0xff] %v9967_v53  ;;  %11338 = vst [vmem:[#allocation50_spill] sm:$0xff] %v9973_v9 }
 0x882   :  { %4011 = vmatpush1.bf16.msra.mxu0 %v9955_v63  ;;  %4064 = vmatpush1.bf16.msra.mxu1 %v9961_v24  ;;  %v9979_v63 = vld [vmem:[%s10539_s11 + $0x120] ss:$16 sps:$4 sm:$0xff]   ;;  %v9985_v24 = vld [vmem:[%s10539_s11 + $0x128] ss:$16 sps:$4 sm:$0xff]  }
 0x883   :  { %4012 = vmatprep.subr.bf16.mxu0 %v9967_v53  ;;  %4065 = vmatprep.subr.bf16.mxu1 %v9973_v9  ;;  %11339 = vst [vmem:[#allocation81_spill] sm:$0xff] %v9979_v63  ;;  %11340 = vst [vmem:[#allocation51_spill] sm:$0xff] %v9985_v24  ;;  %v9991_v53 = vld [vmem:[%s10539_s11 + $0x144] ss:$16 sps:$4 sm:$0xff]   ;;  %v9997_v9 = vld [vmem:[%s10539_s11 + $0x14c] ss:$16 sps:$4 sm:$0xff]  }
 0x884   :  { %11341 = vst [vmem:[#allocation82_spill] sm:$0xff] %v9991_v53  ;;  %11342 = vst [vmem:[#allocation52_spill] sm:$0xff] %v9997_v9 }
 0x886   :  { %4013 = vmatpush1.bf16.msra.mxu0 %v9979_v63  ;;  %4066 = vmatpush1.bf16.msra.mxu1 %v9985_v24  ;;  %v10003_v63 = vld [vmem:[%s10539_s11 + $0x140] ss:$16 sps:$4 sm:$0xff]   ;;  %v10009_v24 = vld [vmem:[%s10539_s11 + $0x148] ss:$16 sps:$4 sm:$0xff]  }
 0x887   :  { %4014 = vmatprep.subr.bf16.mxu0 %v9991_v53  ;;  %4067 = vmatprep.subr.bf16.mxu1 %v9997_v9  ;;  %11343 = vst [vmem:[#allocation83_spill] sm:$0xff] %v10003_v63  ;;  %11344 = vst [vmem:[#allocation53_spill] sm:$0xff] %v10009_v24  ;;  %v10015_v53 = vld [vmem:[%s10539_s11 + $0x164] ss:$16 sps:$4 sm:$0xff]   ;;  %v10021_v9 = vld [vmem:[%s10539_s11 + $0x16c] ss:$16 sps:$4 sm:$0xff]  }
 0x888   :  { %11345 = vst [vmem:[#allocation84_spill] sm:$0xff] %v10015_v53  ;;  %11346 = vst [vmem:[#allocation54_spill] sm:$0xff] %v10021_v9 }
 0x88a   :  { %4015 = vmatpush1.bf16.msra.mxu0 %v10003_v63  ;;  %4068 = vmatpush1.bf16.msra.mxu1 %v10009_v24  ;;  %v10027_v63 = vld [vmem:[%s10539_s11 + $0x160] ss:$16 sps:$4 sm:$0xff]   ;;  %v10033_v24 = vld [vmem:[%s10539_s11 + $0x168] ss:$16 sps:$4 sm:$0xff]  }
 0x88b   :  { %4016 = vmatprep.subr.bf16.mxu0 %v10015_v53  ;;  %4069 = vmatprep.subr.bf16.mxu1 %v10021_v9  ;;  %11347 = vst [vmem:[#allocation85_spill] sm:$0xff] %v10027_v63  ;;  %11348 = vst [vmem:[#allocation55_spill] sm:$0xff] %v10033_v24  ;;  %v10039_v53 = vld [vmem:[%s10539_s11 + $0x184] ss:$16 sps:$4 sm:$0xff]   ;;  %v10045_v9 = vld [vmem:[%s10539_s11 + $0x18c] ss:$16 sps:$4 sm:$0xff]  }
 0x88c   :  { %11349 = vst [vmem:[#allocation25_spill] sm:$0xff] %v10039_v53  ;;  %11350 = vst [vmem:[#allocation23_spill] sm:$0xff] %v10045_v9 }
 0x88e   :  { %4017 = vmatpush1.bf16.msra.mxu0 %v10027_v63  ;;  %4070 = vmatpush1.bf16.msra.mxu1 %v10033_v24  ;;  %v10051_v63 = vld [vmem:[%s10539_s11 + $0x180] ss:$16 sps:$4 sm:$0xff]   ;;  %v10057_v24 = vld [vmem:[%s10539_s11 + $0x188] ss:$16 sps:$4 sm:$0xff]  }
 0x88f   :  { %4018 = vmatprep.subr.bf16.mxu0 %v10039_v53  ;;  %4071 = vmatprep.subr.bf16.mxu1 %v10045_v9  ;;  %11351 = vst [vmem:[#allocation22_spill] sm:$0xff] %v10051_v63  ;;  %11352 = vst [vmem:[#allocation24_spill] sm:$0xff] %v10057_v24  ;;  %v10063_v53 = vld [vmem:[%s10539_s11 + $0x1a4] ss:$16 sps:$4 sm:$0xff]   ;;  %v10069_v9 = vld [vmem:[%s10539_s11 + $0x1ac] ss:$16 sps:$4 sm:$0xff]  }
 0x890   :  { %11353 = vst [vmem:[#allocation86_spill] sm:$0xff] %v10063_v53  ;;  %11354 = vst [vmem:[#allocation87_spill] sm:$0xff] %v10069_v9 }
 0x892   :  { %4019 = vmatpush1.bf16.msra.mxu0 %v10051_v63  ;;  %4072 = vmatpush1.bf16.msra.mxu1 %v10057_v24  ;;  %v10075_v63 = vld [vmem:[%s10539_s11 + $0x1a0] ss:$16 sps:$4 sm:$0xff]   ;;  %v10081_v24 = vld [vmem:[%s10539_s11 + $0x1a8] ss:$16 sps:$4 sm:$0xff]  }
 0x893   :  { %4020 = vmatprep.subr.bf16.mxu0 %v10063_v53  ;;  %4073 = vmatprep.subr.bf16.mxu1 %v10069_v9  ;;  %11355 = vst [vmem:[#allocation88_spill] sm:$0xff] %v10075_v63  ;;  %11356 = vst [vmem:[#allocation89_spill] sm:$0xff] %v10081_v24  ;;  %v10087_v53 = vld [vmem:[%s10539_s11 + $0x1c4] ss:$16 sps:$4 sm:$0xff]   ;;  %v10093_v9 = vld [vmem:[%s10539_s11 + $0x1cc] ss:$16 sps:$4 sm:$0xff]  }
 0x894   :  { %11357 = vst [vmem:[#allocation90_spill] sm:$0xff] %v10087_v53  ;;  %11358 = vst [vmem:[#allocation91_spill] sm:$0xff] %v10093_v9 }
 0x896   :  { %4021 = vmatpush1.bf16.msra.mxu0 %v10075_v63  ;;  %4074 = vmatpush1.bf16.msra.mxu1 %v10081_v24  ;;  %v10099_v63 = vld [vmem:[%s10539_s11 + $0x1c0] ss:$16 sps:$4 sm:$0xff]   ;;  %v10105_v24 = vld [vmem:[%s10539_s11 + $0x1c8] ss:$16 sps:$4 sm:$0xff]  }
 0x897   :  { %4022 = vmatprep.subr.bf16.mxu0 %v10087_v53  ;;  %4075 = vmatprep.subr.bf16.mxu1 %v10093_v9  ;;  %11359 = vst [vmem:[#allocation92_spill] sm:$0xff] %v10099_v63  ;;  %11360 = vst [vmem:[#allocation93_spill] sm:$0xff] %v10105_v24  ;;  %v10111_v53 = vld [vmem:[%s10539_s11 + $0x1e4] ss:$16 sps:$4 sm:$0xff]   ;;  %v10117_v9 = vld [vmem:[%s10539_s11 + $0x1ec] ss:$16 sps:$4 sm:$0xff]  }
 0x898   :  { %11361 = vst [vmem:[#allocation94_spill] sm:$0xff] %v10111_v53  ;;  %11362 = vst [vmem:[#allocation95_spill] sm:$0xff] %v10117_v9 }
 0x89a   :  { %4023 = vmatpush1.bf16.msra.mxu0 %v10099_v63  ;;  %4076 = vmatpush1.bf16.msra.mxu1 %v10105_v24  ;;  %v10123_v63 = vld [vmem:[%s10539_s11 + $0x1e0] ss:$16 sps:$4 sm:$0xff]   ;;  %v10129_v24 = vld [vmem:[%s10539_s11 + $0x1e8] ss:$16 sps:$4 sm:$0xff]  }
 0x89b   :  { %4024 = vmatprep.subr.bf16.mxu0 %v10111_v53  ;;  %4077 = vmatprep.subr.bf16.mxu1 %v10117_v9  ;;  %11363 = vst [vmem:[#allocation96_spill] sm:$0xff] %v10123_v63  ;;  %11364 = vst [vmem:[#allocation97_spill] sm:$0xff] %v10129_v24  ;;  %v6474_v53 = vld [vmem:[#allocation7 + $0xc] ss:$16 sps:$4 sm:$0xff]  }
 0x89e   :  { %4025 = vmatpush1.bf16.msra.mxu0 %v10123_v63  ;;  %4078 = vmatpush1.bf16.msra.mxu1 %v10129_v24 }
 0x89f   :  { %4189 = vmatprep.subr.bf16.mxu0 %v9538_v44  ;;  %4242 = vmatprep.subr.bf16.mxu1 %v6474_v53 }
 0x912   :  { %v3635_v50 = vpop.f32.mrb[112].mxu0  ;;  %v3688_v9 = vpop.f32.mrb[104].mxu1 }
 0x913   :  { %v3636_v22 = vadd.f32 %v3635_v50, %v11289_v60  ;;  %v3637_v32 = vpop.f32.mrb[113].mxu0  ;;  %v3690_v1 = vpop.f32.mrb[105].mxu1  ;;  %v3689_v53 = vadd.f32 %v3688_v9, %v11291_v49 }
 0x914   :  { %v3638_v42 = vadd.f32 %v3637_v32, %v11290_v45  ;;  %v3639_v63 = vpop.f32.mrb[114].mxu0  ;;  %v3692_v52 = vpop.f32.mrb[106].mxu1  ;;  %v3691_v9 = vadd.f32 %v3690_v1, %v11292_v46 }
 0x915   :  { %v3707_v15 = vmul.f32 0.5, %v3636_v22  ;;  %v3640_v37 = vadd.f32 %v3639_v63, %v11289_v60  ;;  %v3641_v30 = vpop.f32.mrb[115].mxu0  ;;  %v3694_v21 = vpop.f32.mrb[107].mxu1  ;;  %v3693_v35 = vadd.f32 %v3692_v52, %v11291_v49 }
 0x916   :  { %v3723_v24 = vmul.f32 0.5, %v3638_v42  ;;  %v3642_v44 = vadd.f32 %v3641_v30, %v11290_v45  ;;  %v3743_v54 = vmul.f32 0.5, %v3691_v9 }
 0x917   :  { %5987 = vtanh.f32 %v3707_v15  ;;  %v3708_v47 = vmul.f32 0.5, %v3640_v37 }
 0x918   :  { %5989 = vtanh.f32 %v3723_v24  ;;  %v3724_v50 = vmul.f32 0.5, %v3642_v44 }
 0x919   :  { %5991 = vtanh.f32 %v3708_v47 }
 0x91a   :  { %5993 = vtanh.f32 %v3689_v53 }
 0x91b   :  { %v3645_v32 = vpop.f32.mrb[116].mxu0  ;;  %v3698_v38 = vpop.f32.mrb[108].mxu1  ;;  %5995 = vtanh.f32 %v3724_v50 }
 0x91c   :  { %v3646_v22 = vadd.f32 %v3645_v32, %v11289_v60  ;;  %v3647_v63 = vpop.f32.mrb[117].mxu0  ;;  %v3700_v12 = vpop.f32.mrb[109].mxu1  ;;  %5997 = vtanh.f32 %v3693_v35  ;;  %v3695_v32 = vadd.f32 %v3694_v21, %v11292_v46  ;;  %v3699_v50 = vadd.f32 %v3698_v38, %v11291_v49 }
 0x91d   :  { %v3648_v42 = vadd.f32 %v3647_v63, %v11290_v45  ;;  %v3649_v30 = vpop.f32.mrb[118].mxu0  ;;  %v3702_v15 = vpop.f32.mrb[110].mxu1  ;;  %v3701_v21 = vadd.f32 %v3700_v12, %v11292_v46 }
 0x91e   :  { %v3709_v37 = vmul.f32 0.5, %v3646_v22  ;;  %v3650_v24 = vadd.f32 %v3649_v30, %v11289_v60  ;;  %v3651_v47 = vpop.f32.mrb[119].mxu0  ;;  %v3704_v44 = vpop.f32.mrb[111].mxu1  ;;  %v3703_v30 = vadd.f32 %v3702_v15, %v11291_v49  ;;  %v3744_v35 = vmul.f32 0.5, %v3695_v32 }
 0x91f   :  { %v3725_v52 = vmul.f32 0.5, %v3648_v42  ;;  %v3652_v53 = vadd.f32 %v3651_v47, %v11290_v45 }
 0x920   :  { %5999 = vtanh.f32 %v3709_v37  ;;  %v3710_v41 = vmul.f32 0.5, %v3650_v24 }
 0x921   :  { %6001 = vtanh.f32 %v3725_v52  ;;  %v3726_v63 = vmul.f32 0.5, %v3652_v53  ;;  %v5988_v0 = vpop.eup %5987 }
 0x922   :  { %v5990_v1 = vpop.eup %5989  ;;  %v3715_v22 = vmul.f32 0.5, %v5988_v0  ;;  %6003 = vtanh.f32 %v3710_v41  ;;  %v3705_v0 = vadd.f32 %v3704_v44, %v11292_v46  ;;  %v5060_v46 = vld [vmem:[%s10913_s30 + $0x368] sm:$0xff] }
 0x923   :  { %v3731_v60 = vmul.f32 0.5, %v5990_v1  ;;  %6005 = vtanh.f32 %v3699_v50  ;;  %v5992_v42 = vpop.eup %5991  ;;  %v3745_v50 = vmul.f32 0.5, %v3701_v21 }
 0x924   :  { %v3719_v47 = vadd.f32 0.5, %v3715_v22  ;;  %6007 = vtanh.f32 %v3726_v63  ;;  %v5994_v37 = vpop.eup %5993  ;;  %v3716_v24 = vmul.f32 0.5, %v5992_v42  ;;  %v3746_v42 = vmul.f32 0.5, %v3705_v0 }
 0x925   :  { %v3735_v38 = vadd.f32 0.5, %v3731_v60  ;;  %6009 = vtanh.f32 %v3743_v54  ;;  %v5996_v52 = vpop.eup %5995 }
 0x926   :  { %v3763_v53 = vmul.f32 %v5994_v37, %v3719_v47  ;;  %6011 = vtanh.f32 %v3703_v30  ;;  %v3720_v15 = vadd.f32 0.5, %v3716_v24  ;;  %v3732_v9 = vmul.f32 0.5, %v5996_v52  ;;  %v5998_v32 = vpop.eup %5997 }
 0x927   :  { %v3759_v41 = vmul.f32 %v3735_v38, %v9559_v23  ;;  %6013 = vtanh.f32 %v3744_v35 }
 0x928   :  { %v3736_v12 = vadd.f32 0.5, %v3732_v9  ;;  %v3764_v63 = vmul.f32 %v5998_v32, %v3720_v15  ;;  %6015 = vtanh.f32 %v3745_v50  ;;  %v5047_v9 = vld [vmem:[%s10913_s30 + $0x300] sm:$0xff] }
 0x929   :  { %v10150_v22 = vadd.f32 %v3763_v53, %v3759_v41 }
 0x92a   :  { %v6000_v1 = vpop.eup %5999  ;;  %v3760_v47 = vmul.f32 %v3736_v12, %v9563_v2 }
 0x92b   :  { %11365 = vst [vmem:[#allocation98_spill] sm:$0xff] %v10150_v22  ;;  %v6002_v60 = vpop.eup %6001  ;;  %v3717_v54 = vmul.f32 0.5, %v6000_v1  ;;  %6017 = vtanh.f32 %v10150_v22 }
 0x92c   :  { %v3733_v30 = vmul.f32 0.5, %v6002_v60  ;;  %v6004_v37 = vpop.eup %6003  ;;  %v10154_v35 = vadd.f32 %v3764_v63, %v3760_v47  ;;  %6019 = vtanh.f32 %v3746_v42  ;;  %v5048_v63 = vld [vmem:[%s10913_s30 + $0x308] sm:$0xff] }
 0x92d   :  { %v3721_v44 = vadd.f32 0.5, %v3717_v54  ;;  %v6006_v23 = vpop.eup %6005  ;;  %v3718_v38 = vmul.f32 0.5, %v6004_v37 }
 0x92e   :  { %11366 = vst [vmem:[#allocation99_spill] sm:$0xff] %v10154_v35  ;;  %v3737_v21 = vadd.f32 0.5, %v3733_v30  ;;  %v6008_v24 = vpop.eup %6007  ;;  %6021 = vtanh.f32 %v10154_v35 }
 0x92f   :  { %v3765_v52 = vmul.f32 %v6006_v23, %v3721_v44  ;;  %v6010_v53 = vpop.eup %6009  ;;  %v3722_v2 = vadd.f32 0.5, %v3718_v38  ;;  %v3734_v41 = vmul.f32 0.5, %v6008_v24  ;;  %v5052_v44 = vld [vmem:[%s10913_s30 + $0x328] sm:$0xff] }
 0x930   :  { %v3761_v0 = vmul.f32 %v3737_v21, %v9570_v11  ;;  %v6012_v15 = vpop.eup %6011  ;;  %v5051_v11 = vld [vmem:[%s10913_s30 + $0x320] sm:$0xff]  ;;  %v3751_v23 = vmul.f32 0.5, %v6010_v53 }
 0x931   :  { %v6014_v32 = vpop.eup %6013  ;;  %v3738_v1 = vadd.f32 0.5, %v3734_v41  ;;  %v3766_v12 = vmul.f32 %v6012_v15, %v3722_v2 }
 0x932   :  { %v10161_v50 = vadd.f32 %v3765_v52, %v3761_v0  ;;  %v3752_v21 = vmul.f32 0.5, %v6014_v32 }
 0x933   :  { %v3830_v60 = vpop.f32.mrb[120].mxu0  ;;  %v3883_v54 = vpop.f32.mrb[112].mxu1  ;;  %v3762_v42 = vmul.f32 %v3738_v1, %v9583_v59  ;;  %v5049_v59 = vld [vmem:[%s10913_s30 + $0x310] sm:$0xff] }
 0x934   :  { %11367 = vst [vmem:[#allocation100_spill] sm:$0xff] %v10161_v50  ;;  %v3902_v47 = vadd.f32 %v5047_v9, %v3830_v60  ;;  %v3832_v30 = vpop.f32.mrb[121].mxu0  ;;  %v3885_v37 = vpop.f32.mrb[113].mxu1  ;;  %6023 = vtanh.f32 %v10161_v50 }
 0x935   :  { %v3903_v38 = vadd.f32 %v5048_v63, %v3832_v30  ;;  %v3834_v24 = vpop.f32.mrb[122].mxu0  ;;  %v3887_v52 = vpop.f32.mrb[114].mxu1  ;;  %v10174_v0 = vadd.f32 %v3766_v12, %v3762_v42  ;;  %v5053_v12 = vld [vmem:[%s10913_s30 + $0x330] sm:$0xff]  ;;  %v3755_v42 = vadd.f32 0.5, %v3751_v23  ;;  %v3904_v30 = vadd.f32 %v5049_v59, %v3883_v54  ;;  %v5054_v54 = vld [vmem:[%s10913_s30 + $0x338] sm:$0xff] }
 0x936   :  { %v3918_v2 = vmul.f32 0.5, %v3902_v47  ;;  %v3906_v41 = vadd.f32 %v5051_v11, %v3834_v24  ;;  %v3836_v15 = vpop.f32.mrb[123].mxu0  ;;  %v3889_v9 = vpop.f32.mrb[115].mxu1  ;;  %v3756_v47 = vadd.f32 0.5, %v3752_v21  ;;  %v5055_v11 = vld [vmem:[%s10913_s30 + $0x340] sm:$0xff] }
 0x937   :  { %11368 = vst [vmem:[#allocation101_spill] sm:$0xff] %v10174_v0  ;;  %v6016_v1 = vpop.eup %6015  ;;  %v3934_v60 = vmul.f32 0.5, %v3903_v38  ;;  %v3907_v35 = vadd.f32 %v5052_v44, %v3836_v15  ;;  %6025 = vtanh.f32 %v10174_v0  ;;  %v5050_v44 = vld [vmem:[%s10913_s30 + $0x318] sm:$0xff]  ;;  %v3908_v15 = vadd.f32 %v5053_v12, %v3887_v52  ;;  %v5057_v52 = vld [vmem:[%s10913_s30 + $0x350] sm:$0xff] }
 0x938   :  { %v6018_v53 = vpop.eup %6017  ;;  %v3919_v32 = vmul.f32 0.5, %v3906_v41  ;;  %6027 = vtanh.f32 %v3918_v2  ;;  %v5056_v41 = vld [vmem:[%s10913_s30 + $0x348] sm:$0xff]  ;;  %v5059_v2 = vld [vmem:[%s10913_s30 + $0x360] sm:$0xff]  ;;  %v3753_v0 = vmul.f32 0.5, %v6016_v1  ;;  %v3905_v49 = vadd.f32 %v5050_v44, %v3885_v37 }
 0x939   :  { %v6020_v63 = vpop.eup %6019  ;;  %6029 = vtanh.f32 %v3934_v60  ;;  %v3935_v38 = vmul.f32 0.5, %v3907_v35  ;;  %v3775_v59 = vmul.f32 %v6018_v53, %v3755_v42  ;;  %v3909_v1 = vadd.f32 %v5054_v54, %v3889_v9  ;;  %v5061_v9 = vld [vmem:[%s10913_s30 + $0x370] sm:$0xff] }
 0x93a   :  { %v6022_v24 = vpop.eup %6021  ;;  %v3754_v50 = vmul.f32 0.5, %v6020_v63  ;;  %6031 = vtanh.f32 %v3919_v32  ;;  %v3757_v37 = vadd.f32 0.5, %v3753_v0 }
 0x93b   :  { %v3840_v23 = vpop.f32.mrb[124].mxu0  ;;  %v3893_v21 = vpop.f32.mrb[116].mxu1  ;;  %v3776_v60 = vmul.f32 %v6022_v24, %v3756_v47  ;;  %6033 = vtanh.f32 %v3904_v30 }
 0x93c   :  { %v3910_v35 = vadd.f32 %v5055_v11, %v3840_v23  ;;  %v3842_v12 = vpop.f32.mrb[125].mxu0  ;;  %v3895_v22 = vpop.f32.mrb[117].mxu1  ;;  %6035 = vtanh.f32 %v3935_v38  ;;  %v3912_v24 = vadd.f32 %v5057_v52, %v3893_v21  ;;  %v3758_v44 = vadd.f32 0.5, %v3754_v50 }
 0x93d   :  { %v3911_v45 = vadd.f32 %v5056_v41, %v3842_v12  ;;  %v3844_v31 = vpop.f32.mrb[126].mxu0  ;;  %v3897_v53 = vpop.f32.mrb[118].mxu1  ;;  %v3992_v42 = vpack.c.bf16 %v3776_v60, %v3775_v59  ;;  %6037 = vtanh.f32 %v3908_v15  ;;  %v3954_v41 = vmul.f32 0.5, %v3905_v49  ;;  %v5062_v60 = vld [vmem:[%s10913_s30 + $0x378] sm:$0xff] }
 0x93e   :  { %v3920_v32 = vmul.f32 0.5, %v3910_v35  ;;  %v3914_v63 = vadd.f32 %v5059_v2, %v3844_v31  ;;  %v3846_v47 = vpop.f32.mrb[127].mxu0  ;;  %v3899_v11 = vpop.f32.mrb[119].mxu1  ;;  %v5058_v31 = vld [vmem:[%s10913_s30 + $0x358] sm:$0xff]  ;;  %v3955_v15 = vmul.f32 0.5, %v3909_v1  ;;  %v3916_v49 = vadd.f32 %v5061_v9, %v3897_v53 }
 0x93f   :  { %v3936_v23 = vmul.f32 0.5, %v3911_v45  ;;  %v3915_v29 = vadd.f32 %v5060_v46, %v3846_v47  ;;  %4026 = vmatprep.mubr.bf16.mxu0 %v3992_v42  ;;  %4079 = vmatprep.mubr.bf16.mxu1 %v3992_v42  ;;  %v6024_v19 = vpop.eup %6023  ;;  %v3913_v59 = vadd.f32 %v5058_v31, %v3895_v22  ;;  %v3917_v53 = vadd.f32 %v5062_v60, %v3899_v11 }
 0x940   :  { %6039 = vtanh.f32 %v3920_v32  ;;  %v3921_v30 = vmul.f32 0.5, %v3914_v63  ;;  %v3777_v54 = vmul.f32 %v6024_v19, %v3757_v37 }
 0x941   :  { %v6026_v38 = vpop.eup %6025  ;;  %6041 = vtanh.f32 %v3936_v23  ;;  %v3937_v45 = vmul.f32 0.5, %v3915_v29  ;;  %v3956_v23 = vmul.f32 0.5, %v3913_v59  ;;  %v3957_v31 = vmul.f32 0.5, %v3917_v53 }
 0x942   :  { %v6028_v46 = vpop.eup %6027  ;;  %6043 = vtanh.f32 %v3912_v24  ;;  %v3778_v21 = vmul.f32 %v6026_v38, %v3758_v44 }
 0x943   :  { %v6030_v2 = vpop.eup %6029  ;;  %v3926_v0 = vmul.f32 0.5, %v6028_v46  ;;  %6045 = vtanh.f32 %v3921_v30 }
 0x944   :  { %v3942_v50 = vmul.f32 0.5, %v6030_v2  ;;  %6047 = vtanh.f32 %v3954_v41  ;;  %v10213_v35 = vpack.c.bf16 %v3778_v21, %v3777_v54  ;;  %v6032_v52 = vpop.eup %6031 }
 0x945   :  { %v3930_v29 = vadd.f32 0.5, %v3926_v0  ;;  %6049 = vtanh.f32 %v3937_v45  ;;  %v6034_v12 = vpop.eup %6033  ;;  %v3927_v19 = vmul.f32 0.5, %v6032_v52 }
 0x946   :  { %v3946_v42 = vadd.f32 0.5, %v3942_v50  ;;  %6051 = vtanh.f32 %v3955_v15  ;;  %v6036_v1 = vpop.eup %6035 }
 0x947   :  { %v3974_v32 = vmul.f32 %v6034_v12, %v3930_v29  ;;  %6053 = vtanh.f32 %v3916_v49  ;;  %v6038_v63 = vpop.eup %6037  ;;  %v3931_v47 = vadd.f32 0.5, %v3927_v19  ;;  %v3943_v24 = vmul.f32 0.5, %v6036_v1 }
 0x948   :  { %v3970_v22 = vmul.f32 %v3946_v42, %v9625_v10  ;;  %6055 = vtanh.f32 %v3956_v23 }
 0x949   :  { %v3947_v44 = vadd.f32 0.5, %v3943_v24  ;;  %v3975_v41 = vmul.f32 %v6038_v63, %v3931_v47 }
 0x94a   :  { %v6040_v30 = vpop.eup %6039  ;;  %v10216_v37 = vadd.f32 %v3974_v32, %v3970_v22 }
 0x94b   :  { %v3928_v9 = vmul.f32 0.5, %v6040_v30  ;;  %v6042_v38 = vpop.eup %6041  ;;  %v3971_v46 = vmul.f32 %v3947_v44, %v9629_v57 }
 0x94c   :  { %v6044_v45 = vpop.eup %6043  ;;  %v3944_v54 = vmul.f32 0.5, %v6042_v38  ;;  %6057 = vtanh.f32 %v10216_v37 }
 0x94d   :  { %v3932_v15 = vadd.f32 0.5, %v3928_v9  ;;  %v6046_v11 = vpop.eup %6045  ;;  %v10220_v21 = vadd.f32 %v3975_v41, %v3971_v46  ;;  %6059 = vtanh.f32 %v3957_v31 }
 0x94e   :  { %v6048_v10 = vpop.eup %6047  ;;  %v3948_v2 = vadd.f32 0.5, %v3944_v54  ;;  %v3929_v49 = vmul.f32 0.5, %v6046_v11 }
 0x94f   :  { %v3976_v0 = vmul.f32 %v6044_v45, %v3932_v15  ;;  %v6050_v50 = vpop.eup %6049  ;;  %6061 = vtanh.f32 %v10220_v21  ;;  %v3962_v32 = vmul.f32 0.5, %v6048_v10  ;;  %v11396_v10 = vld [vmem:[#allocation43_spill] sm:$0xff] }
 0x950   :  { %v6052_v59 = vpop.eup %6051  ;;  %v3972_v60 = vmul.f32 %v3948_v2, %v9633_v5  ;;  %v3933_v57 = vadd.f32 0.5, %v3929_v49  ;;  %v3945_v52 = vmul.f32 0.5, %v6050_v50  ;;  %v11397_v2 = vld [vmem:[#allocation74_spill] sm:$0xff]  ;;  %v11399_v49 = vld [vmem:[#allocation75_spill] sm:$0xff]  ;;  %v11400_v50 = vld [vmem:[#allocation45_spill] sm:$0xff] }
 0x951   :  { %v6054_v29 = vpop.eup %6053  ;;  %v3963_v53 = vmul.f32 0.5, %v6052_v59  ;;  %v3966_v24 = vadd.f32 0.5, %v3962_v32  ;;  %v11401_v59 = vld [vmem:[#allocation76_spill] sm:$0xff] }
 0x952   :  { %v10224_v12 = vadd.f32 %v3976_v0, %v3972_v60  ;;  %v3949_v42 = vadd.f32 0.5, %v3945_v52  ;;  %v3977_v19 = vmul.f32 %v6054_v29, %v3933_v57  ;;  %v6056_v63 = vpop.eup %6055  ;;  %v11398_v0 = vld [vmem:[#allocation44_spill] sm:$0xff]  ;;  %v11402_v60 = vld [vmem:[#allocation46_spill] sm:$0xff]  ;;  %v11403_v57 = vld [vmem:[#allocation77_spill] sm:$0xff] }
 0x953   :  { %v3967_v23 = vadd.f32 0.5, %v3963_v53  ;;  %v3964_v38 = vmul.f32 0.5, %v6056_v63  ;;  %v11404_v52 = vld [vmem:[#allocation47_spill] sm:$0xff]  ;;  %v11405_v29 = vld [vmem:[#allocation78_spill] sm:$0xff]  ;;  %v11409_v32 = vld [vmem:[#allocation80_spill] sm:$0xff] }
 0x954   :  { %v3973_v1 = vmul.f32 %v3949_v42, %v9637_v40  ;;  %6063 = vtanh.f32 %v10224_v12  ;;  %v11406_v42 = vld [vmem:[#allocation48_spill] sm:$0xff]  ;;  %v11410_v53 = vld [vmem:[#allocation50_spill] sm:$0xff]  ;;  %v11411_v63 = vld [vmem:[#allocation81_spill] sm:$0xff] }
 0x955   :  { %v3968_v45 = vadd.f32 0.5, %v3964_v38  ;;  %v11420_v38 = vld [vmem:[#allocation55_spill] sm:$0xff] }
 0x956   :  { %v10228_v22 = vadd.f32 %v3977_v19, %v3973_v1  ;;  %v6058_v47 = vpop.eup %6057  ;;  %v11407_v19 = vld [vmem:[#allocation79_spill] sm:$0xff]  ;;  %v11408_v1 = vld [vmem:[#allocation49_spill] sm:$0xff] }
 0x957   :  { %v6060_v5 = vpop.eup %6059  ;;  %v3986_v44 = vmul.f32 %v6058_v47, %v3966_v24  ;;  %v11412_v47 = vld [vmem:[#allocation51_spill] sm:$0xff]  ;;  %v11414_v24 = vld [vmem:[#allocation52_spill] sm:$0xff] }
 0x958   :  { %6065 = vtanh.f32 %v10228_v22  ;;  %v3965_v31 = vmul.f32 0.5, %v6060_v5  ;;  %v11413_v5 = vld [vmem:[#allocation82_spill] sm:$0xff] }
 0x959   :  { %v6062_v30 = vpop.eup %6061 }
 0x95a   :  { %v3987_v41 = vmul.f32 %v6062_v30, %v3967_v23  ;;  %v3969_v46 = vadd.f32 0.5, %v3965_v31  ;;  %v11415_v23 = vld [vmem:[#allocation83_spill] sm:$0xff]  ;;  %v11416_v30 = vld [vmem:[#allocation53_spill] sm:$0xff] }
 0x95b   :  { %v11421_v31 = vld [vmem:[#allocation25_spill] sm:$0xff] }
 0x95c   :  { %v3990_v9 = vpack.c.bf16 %v3987_v41, %v3986_v44  ;;  %v11417_v44 = vld [vmem:[#allocation84_spill] sm:$0xff]  ;;  %v11418_v41 = vld [vmem:[#allocation54_spill] sm:$0xff] }
 0x95e   :  { %4027 = vmatmul.mubr.bf16.vlgmr.msra.gmra.mrb[128].mxu0 %v3990_v9  ;;  %4080 = vmatmul.mubr.bf16.vlgmr.msra.gmra.mrb[120].mxu1 %v3990_v9  ;;  %v6064_v40 = vpop.eup %6063 }
 0x95f   :  { %4190 = vmatpush1.bf16.msra.mxu0 %v9644_v27  ;;  %4243 = vmatpush1.bf16.msra.mxu1 %v9647_v56  ;;  %v3988_v54 = vmul.f32 %v6064_v40, %v3968_v45  ;;  %v11369_v56 = vld [vmem:[#allocation60_spill] sm:$0xff]  ;;  %v11422_v40 = vld [vmem:[#allocation23_spill] sm:$0xff]  ;;  %v11423_v45 = vld [vmem:[#allocation22_spill] sm:$0xff] }
 0x960   :  { %4036 = vmatprep.mubr.bf16.mxu0 %v10213_v35  ;;  %4089 = vmatprep.mubr.bf16.mxu1 %v10213_v35  ;;  %v11395_v35 = vld [vmem:[#allocation73_spill] sm:$0xff] }
 0x961   :  { %4191 = vmatprep.subr.bf16.mxu0 %v9652_v55  ;;  %4244 = vmatprep.subr.bf16.mxu1 %v9655_v43  ;;  %v11370_v55 = vld [vmem:[#allocation30_spill] sm:$0xff]  ;;  %v11371_v43 = vld [vmem:[#allocation61_spill] sm:$0xff] }
 0x962   :  { %v6066_v15 = vpop.eup %6065 }
 0x963   :  { %v3989_v11 = vmul.f32 %v6066_v15, %v3969_v46  ;;  %4192 = vmatpush1.bf16.msra.mxu0 %v9658_v25  ;;  %4245 = vmatpush1.bf16.msra.mxu1 %v9661_v8  ;;  %v11372_v25 = vld [vmem:[#allocation31_spill] sm:$0xff]  ;;  %v11373_v8 = vld [vmem:[#allocation62_spill] sm:$0xff]  ;;  %v11424_v46 = vld [vmem:[#allocation24_spill] sm:$0xff] }
 0x964   :  { %4193 = vmatprep.subr.bf16.mxu0 %v9664_v16  ;;  %4246 = vmatprep.subr.bf16.mxu1 %v9667_v48  ;;  %v11374_v16 = vld [vmem:[#allocation32_spill] sm:$0xff]  ;;  %v11375_v48 = vld [vmem:[#allocation63_spill] sm:$0xff]  ;;  %v11425_v15 = vld [vmem:[#allocation86_spill] sm:$0xff] }
 0x965   :  { %v3991_v27 = vpack.c.bf16 %v3989_v11, %v3988_v54  ;;  %v11426_v54 = vld [vmem:[#allocation87_spill] sm:$0xff]  ;;  %v11427_v11 = vld [vmem:[#allocation88_spill] sm:$0xff] }
 0x967   :  { %4037 = vmatmul.mubr.bf16.gmra.mrb[132].mxu0 %v3991_v27  ;;  %4090 = vmatmul.mubr.bf16.gmra.mrb[124].mxu1 %v3991_v27 }
 0x968   :  { %4194 = vmatpush1.bf16.msra.mxu0 %v9674_v58  ;;  %4247 = vmatpush1.bf16.msra.mxu1 %v9677_v3  ;;  %v11376_v58 = vld [vmem:[#allocation33_spill] sm:$0xff]  ;;  %v11377_v3 = vld [vmem:[#allocation64_spill] sm:$0xff] }
 0x969   :  { %4195 = vmatprep.subr.bf16.mxu0 %v9680_v34  ;;  %4248 = vmatprep.subr.bf16.mxu1 %v9683_v4  ;;  %v11378_v34 = vld [vmem:[#allocation34_spill] sm:$0xff]  ;;  %v11379_v4 = vld [vmem:[#allocation65_spill] sm:$0xff] }
 0x96a   :  { %4221 = vmatprep.mubr.bf16.mxu0 %v10901_v13  ;;  %4274 = vmatprep.mubr.bf16.mxu1 %v10901_v13 }
 0x96c   :  { %4196 = vmatpush1.bf16.msra.mxu0 %v9688_v62  ;;  %4249 = vmatpush1.bf16.msra.mxu1 %v9691_v6  ;;  %v11380_v62 = vld [vmem:[#allocation35_spill] sm:$0xff]  ;;  %v11381_v6 = vld [vmem:[#allocation66_spill] sm:$0xff] }
 0x96d   :  { %4197 = vmatprep.subr.bf16.mxu0 %v9694_v7  ;;  %4250 = vmatprep.subr.bf16.mxu1 %v9697_v39  ;;  %v11382_v7 = vld [vmem:[#allocation36_spill] sm:$0xff]  ;;  %v11383_v39 = vld [vmem:[#allocation67_spill] sm:$0xff] }
 0x970   :  { %4198 = vmatpush1.bf16.msra.mxu0 %v9700_v33  ;;  %4251 = vmatpush1.bf16.msra.mxu1 %v9703_v26  ;;  %v11385_v33 = vld [vmem:[#allocation68_spill] sm:$0xff]  ;;  %v11386_v26 = vld [vmem:[#allocation38_spill] sm:$0xff] }
 0x971   :  { %4199 = vmatprep.subr.bf16.mxu0 %v9706_v36  ;;  %4252 = vmatprep.subr.bf16.mxu1 %v9709_v61  ;;  %v11387_v36 = vld [vmem:[#allocation69_spill] sm:$0xff]  ;;  %v11388_v61 = vld [vmem:[#allocation39_spill] sm:$0xff] }
 0x974   :  { %4200 = vmatpush1.bf16.msra.mxu0 %v9712_v28  ;;  %4253 = vmatpush1.bf16.msra.mxu1 %v9715_v14  ;;  %v11389_v28 = vld [vmem:[#allocation70_spill] sm:$0xff]  ;;  %v11390_v14 = vld [vmem:[#allocation40_spill] sm:$0xff] }
 0x975   :  { %4201 = vmatprep.subr.bf16.mxu0 %v9718_v51  ;;  %4254 = vmatprep.subr.bf16.mxu1 %v9721_v17  ;;  %v11391_v51 = vld [vmem:[#allocation71_spill] sm:$0xff]  ;;  %v11392_v17 = vld [vmem:[#allocation41_spill] sm:$0xff] }
 0x978   :  { %4202 = vmatpush1.bf16.msra.mxu0 %v9724_v20  ;;  %4255 = vmatpush1.bf16.msra.mxu1 %v9727_v18  ;;  %v11393_v20 = vld [vmem:[#allocation72_spill] sm:$0xff]  ;;  %v11394_v18 = vld [vmem:[#allocation42_spill] sm:$0xff] }
 0x979   :  { %4203 = vmatprep.subr.bf16.mxu0 %v11369_v56  ;;  %4256 = vmatprep.subr.bf16.mxu1 %v11370_v55  ;;  %v11429_v56 = vld [vmem:[#allocation90_spill] sm:$0xff]  ;;  %v11430_v55 = vld [vmem:[#allocation91_spill] sm:$0xff] }
 0x97c   :  { %4204 = vmatpush1.bf16.msra.mxu0 %v11371_v43  ;;  %4257 = vmatpush1.bf16.msra.mxu1 %v11372_v25  ;;  %v11431_v43 = vld [vmem:[#allocation92_spill] sm:$0xff]  ;;  %v11432_v25 = vld [vmem:[#allocation93_spill] sm:$0xff] }
 0x97d   :  { %4387 = vmatprep.subr.bf16.mxu0 %v11373_v8  ;;  %4440 = vmatprep.subr.bf16.mxu1 %v11374_v16  ;;  %v11433_v8 = vld [vmem:[#allocation94_spill] sm:$0xff]  ;;  %v11434_v16 = vld [vmem:[#allocation95_spill] sm:$0xff] }
 0x97f   :  { %4222 = vmatmul.mubr.bf16.vlgmr.msra.gmra.mrb[136].mxu0 %v3990_v9  ;;  %4275 = vmatmul.mubr.bf16.vlgmr.msra.gmra.mrb[128].mxu1 %v3990_v9  ;;  %v11419_v9 = vld [vmem:[#allocation85_spill] sm:$0xff] }
 0x980   :  { %4231 = vmatprep.mubr.bf16.mxu0 %v10901_v13  ;;  %4284 = vmatprep.mubr.bf16.mxu1 %v10901_v13  ;;  %v11384_v13 = vld [vmem:[#allocation37_spill] sm:$0xff] }
 0x981   :  { %4388 = vmatpush1.bf16.msra.mxu0 %v11375_v48  ;;  %4441 = vmatpush1.bf16.msra.mxu1 %v11376_v58  ;;  %v11435_v48 = vld [vmem:[#allocation96_spill] sm:$0xff]  ;;  %v11436_v58 = vld [vmem:[#allocation97_spill] sm:$0xff] }
 0x982   :  { %4389 = vmatprep.subr.bf16.mxu0 %v11377_v3  ;;  %4442 = vmatprep.subr.bf16.mxu1 %v11378_v34 }
 0x985   :  { %4390 = vmatpush1.bf16.msra.mxu0 %v11379_v4  ;;  %4443 = vmatpush1.bf16.msra.mxu1 %v11380_v62  ;;  %v11437_v4 = vld [vmem:[#allocation58_spill] sm:$0xff] }
 0x986   :  { %4391 = vmatprep.subr.bf16.mxu0 %v11381_v6  ;;  %4444 = vmatprep.subr.bf16.mxu1 %v11382_v7 }
 0x987   :  { %4232 = vmatmul.mubr.bf16.gmra.mrb[140].mxu0 %v3991_v27  ;;  %4285 = vmatmul.mubr.bf16.gmra.mrb[132].mxu1 %v3991_v27  ;;  %v11428_v27 = vld [vmem:[#allocation89_spill] sm:$0xff] }
 0x989   :  { %4392 = vmatpush1.bf16.msra.mxu0 %v11383_v39  ;;  %4445 = vmatpush1.bf16.msra.mxu1 %v11384_v13  ;;  %v11438_v39 = vld [vmem:[#allocation28_spill] sm:$0xff] }
 0x98a   :  { %4393 = vmatprep.subr.bf16.mxu0 %v11385_v33  ;;  %4446 = vmatprep.subr.bf16.mxu1 %v11386_v26 }
 0x98d   :  { %4394 = vmatpush1.bf16.msra.mxu0 %v11387_v36  ;;  %4447 = vmatpush1.bf16.msra.mxu1 %v11388_v61 }
 0x98e   :  { %4395 = vmatprep.subr.bf16.mxu0 %v11389_v28  ;;  %4448 = vmatprep.subr.bf16.mxu1 %v11390_v14 }
 0x991   :  { %4396 = vmatpush1.bf16.msra.mxu0 %v11391_v51  ;;  %4449 = vmatpush1.bf16.msra.mxu1 %v11392_v17 }
 0x992   :  { %4397 = vmatprep.subr.bf16.mxu0 %v11393_v20  ;;  %4450 = vmatprep.subr.bf16.mxu1 %v11394_v18  ;;  %v11439_v20 = vld [vmem:[#allocation59_spill] sm:$0xff] }
 0x995   :  { %4398 = vmatpush1.bf16.msra.mxu0 %v11395_v35  ;;  %4451 = vmatpush1.bf16.msra.mxu1 %v11396_v10 }
 0x996   :  { %4399 = vmatprep.subr.bf16.mxu0 %v11397_v2  ;;  %4452 = vmatprep.subr.bf16.mxu1 %v11398_v0 }
 0x999   :  { %4400 = vmatpush1.bf16.msra.mxu0 %v11399_v49  ;;  %4453 = vmatpush1.bf16.msra.mxu1 %v11400_v50 }
 0x99a   :  { %4401 = vmatprep.subr.bf16.mxu0 %v11401_v59  ;;  %4454 = vmatprep.subr.bf16.mxu1 %v11402_v60 }
 0x99d   :  { %4402 = vmatpush1.bf16.msra.mxu0 %v11403_v57  ;;  %4455 = vmatpush1.bf16.msra.mxu1 %v11404_v52 }
 0x99e   :  { %4403 = vmatprep.subr.bf16.mxu0 %v11405_v29  ;;  %4456 = vmatprep.subr.bf16.mxu1 %v11406_v42  ;;  %v11440_v42 = vld [vmem:[#allocation29_spill] sm:$0xff] }
 0x9a1   :  { %4404 = vmatpush1.bf16.msra.mxu0 %v11407_v19  ;;  %4457 = vmatpush1.bf16.msra.mxu1 %v11408_v1 }
 0x9a2   :  { %4405 = vmatprep.subr.bf16.mxu0 %v11409_v32  ;;  %4458 = vmatprep.subr.bf16.mxu1 %v11410_v53 }
 0x9a5   :  { %4406 = vmatpush1.bf16.msra.mxu0 %v11411_v63  ;;  %4459 = vmatpush1.bf16.msra.mxu1 %v11412_v47 }
 0x9a6   :  { %4407 = vmatprep.subr.bf16.mxu0 %v11413_v5  ;;  %4460 = vmatprep.subr.bf16.mxu1 %v11414_v24 }
 0x9a9   :  { %4408 = vmatpush1.bf16.msra.mxu0 %v11415_v23  ;;  %4461 = vmatpush1.bf16.msra.mxu1 %v11416_v30 }
 0x9aa   :  { %4409 = vmatprep.subr.bf16.mxu0 %v11417_v44  ;;  %4462 = vmatprep.subr.bf16.mxu1 %v11418_v41 }
 0x9ad   :  { %4410 = vmatpush1.bf16.msra.mxu0 %v11419_v9  ;;  %4463 = vmatpush1.bf16.msra.mxu1 %v11420_v38 }
 0x9ae   :  { %4411 = vmatprep.subr.bf16.mxu0 %v11421_v31  ;;  %4464 = vmatprep.subr.bf16.mxu1 %v11422_v40 }
 0x9b1   :  { %4412 = vmatpush1.bf16.msra.mxu0 %v11423_v45  ;;  %4465 = vmatpush1.bf16.msra.mxu1 %v11424_v46 }
 0x9b2   :  { %4413 = vmatprep.subr.bf16.mxu0 %v11425_v15  ;;  %4466 = vmatprep.subr.bf16.mxu1 %v11426_v54 }
 0x9b5   :  { %4414 = vmatpush1.bf16.msra.mxu0 %v11427_v11  ;;  %4467 = vmatpush1.bf16.msra.mxu1 %v11428_v27 }
 0x9b6   :  { %4415 = vmatprep.subr.bf16.mxu0 %v11429_v56  ;;  %4468 = vmatprep.subr.bf16.mxu1 %v11430_v55 }
 0x9b9   :  { %4416 = vmatpush1.bf16.msra.mxu0 %v11431_v43  ;;  %4469 = vmatpush1.bf16.msra.mxu1 %v11432_v25 }
 0x9ba   :  { %4417 = vmatprep.subr.bf16.mxu0 %v11433_v8  ;;  %4470 = vmatprep.subr.bf16.mxu1 %v11434_v16  ;;  %v11441_v16 = vld [vmem:[#allocation98_spill] sm:$0xff] }
 0x9bd   :  { %4418 = vmatpush1.bf16.msra.mxu0 %v11435_v48  ;;  %4471 = vmatpush1.bf16.msra.mxu1 %v11436_v58 }
 0xa31   :  { %v4028_v3 = vpop.f32.mrb[128].mxu0  ;;  %v4081_v34 = vpop.f32.mrb[120].mxu1 }
 0xa32   :  { %v4029_v62 = vadd.f32 %v4028_v3, %v11437_v4  ;;  %v4030_v6 = vpop.f32.mrb[129].mxu0  ;;  %v4083_v7 = vpop.f32.mrb[121].mxu1  ;;  %v4082_v18 = vadd.f32 %v4081_v34, %v11439_v20 }
 0xa33   :  { %v4031_v13 = vadd.f32 %v4030_v6, %v11438_v39  ;;  %v4032_v33 = vpop.f32.mrb[130].mxu0  ;;  %v4085_v26 = vpop.f32.mrb[122].mxu1  ;;  %v4084_v19 = vadd.f32 %v4083_v7, %v11440_v42 }
 0xa34   :  { %v4100_v36 = vmul.f32 0.5, %v4029_v62  ;;  %v4033_v61 = vadd.f32 %v4032_v33, %v11437_v4  ;;  %v4034_v28 = vpop.f32.mrb[131].mxu0  ;;  %v4087_v14 = vpop.f32.mrb[123].mxu1  ;;  %v4086_v2 = vadd.f32 %v4085_v26, %v11439_v20 }
 0xa35   :  { %v4116_v51 = vmul.f32 0.5, %v4031_v13  ;;  %v4035_v17 = vadd.f32 %v4034_v28, %v11438_v39  ;;  %v4088_v24 = vadd.f32 %v4087_v14, %v11440_v42  ;;  %v4136_v9 = vmul.f32 0.5, %v4084_v19  ;;  %v11442_v28 = vld [vmem:[#allocation99_spill] sm:$0xff] }
 0xa36   :  { %6067 = vtanh.f32 %v4100_v36  ;;  %v4101_v35 = vmul.f32 0.5, %v4033_v61 }
 0xa37   :  { %6069 = vtanh.f32 %v4116_v51  ;;  %v4117_v10 = vmul.f32 0.5, %v4035_v17  ;;  %v4137_v46 = vmul.f32 0.5, %v4088_v24 }
 0xa38   :  { %6071 = vtanh.f32 %v4101_v35 }
 0xa39   :  { %6073 = vtanh.f32 %v4082_v18 }
 0xa3a   :  { %v4038_v0 = vpop.f32.mrb[132].mxu0  ;;  %v4091_v49 = vpop.f32.mrb[124].mxu1  ;;  %6075 = vtanh.f32 %v4117_v10 }
 0xa3b   :  { %v4039_v50 = vadd.f32 %v4038_v0, %v11437_v4  ;;  %v4040_v59 = vpop.f32.mrb[133].mxu0  ;;  %v4093_v60 = vpop.f32.mrb[125].mxu1  ;;  %6077 = vtanh.f32 %v4086_v2  ;;  %v4092_v23 = vadd.f32 %v4091_v49, %v11439_v20 }
 0xa3c   :  { %v4041_v57 = vadd.f32 %v4040_v59, %v11438_v39  ;;  %v4042_v52 = vpop.f32.mrb[134].mxu0  ;;  %v4095_v29 = vpop.f32.mrb[126].mxu1  ;;  %v4094_v11 = vadd.f32 %v4093_v60, %v11440_v42  ;;  %v11443_v60 = vld [vmem:[#allocation100_spill] sm:$0xff] }
 0xa3d   :  { %v4102_v1 = vmul.f32 0.5, %v4039_v50  ;;  %v4043_v32 = vadd.f32 %v4042_v52, %v11437_v4  ;;  %v4044_v53 = vpop.f32.mrb[135].mxu0  ;;  %v4097_v63 = vpop.f32.mrb[127].mxu1  ;;  %v4096_v40 = vadd.f32 %v4095_v29, %v11439_v20 }
 0xa3e   :  { %v4118_v47 = vmul.f32 0.5, %v4041_v57  ;;  %v4045_v5 = vadd.f32 %v4044_v53, %v11438_v39  ;;  %v4098_v8 = vadd.f32 %v4097_v63, %v11440_v42  ;;  %v4138_v62 = vmul.f32 0.5, %v4094_v11 }
 0xa3f   :  { %6079 = vtanh.f32 %v4102_v1  ;;  %v4103_v30 = vmul.f32 0.5, %v4043_v32  ;;  %v5063_v1 = vld [vmem:[%s10913_s30 + $0x380] sm:$0xff] }
 0xa40   :  { %6081 = vtanh.f32 %v4118_v47  ;;  %v4119_v44 = vmul.f32 0.5, %v4045_v5  ;;  %v6068_v41 = vpop.eup %6067  ;;  %v4139_v61 = vmul.f32 0.5, %v4098_v8  ;;  %v5064_v5 = vld [vmem:[%s10913_s30 + $0x388] sm:$0xff] }
 0xa41   :  { %v6070_v38 = vpop.eup %6069  ;;  %v4108_v31 = vmul.f32 0.5, %v6068_v41  ;;  %6083 = vtanh.f32 %v4103_v30  ;;  %v5067_v30 = vld [vmem:[%s10913_s30 + $0x3a0] sm:$0xff] }
 0xa42   :  { %v4124_v45 = vmul.f32 0.5, %v6070_v38  ;;  %6085 = vtanh.f32 %v4092_v23  ;;  %v6072_v15 = vpop.eup %6071 }
 0xa43   :  { %v4112_v54 = vadd.f32 0.5, %v4108_v31  ;;  %6087 = vtanh.f32 %v4119_v44  ;;  %v6074_v27 = vpop.eup %6073  ;;  %v4109_v55 = vmul.f32 0.5, %v6072_v15  ;;  %v11444_v44 = vld [vmem:[#allocation101_spill] sm:$0xff] }
 0xa44   :  { %v4128_v56 = vadd.f32 0.5, %v4124_v45  ;;  %6089 = vtanh.f32 %v4136_v9  ;;  %v6076_v43 = vpop.eup %6075 }
 0xa45   :  { %v4156_v25 = vmul.f32 %v6074_v27, %v4112_v54  ;;  %6091 = vtanh.f32 %v4096_v40  ;;  %v4113_v58 = vadd.f32 0.5, %v4109_v55  ;;  %v4125_v3 = vmul.f32 0.5, %v6076_v43  ;;  %v6078_v34 = vpop.eup %6077  ;;  %v5068_v40 = vld [vmem:[%s10913_s30 + $0x3a8] sm:$0xff]  ;;  %v5065_v55 = vld [vmem:[%s10913_s30 + $0x390] sm:$0xff] }
 0xa46   :  { %v4152_v48 = vmul.f32 %v4128_v56, %v11441_v16  ;;  %6093 = vtanh.f32 %v4137_v46 }
 0xa47   :  { %v4129_v13 = vadd.f32 0.5, %v4125_v3  ;;  %v4157_v33 = vmul.f32 %v6078_v34, %v4113_v58  ;;  %6095 = vtanh.f32 %v4138_v62  ;;  %v5069_v62 = vld [vmem:[%s10913_s30 + $0x3b0] sm:$0xff] }
 0xa48   :  { %v10348_v7 = vadd.f32 %v4156_v25, %v4152_v48 }
 0xa49   :  { %v6080_v6 = vpop.eup %6079  ;;  %v4153_v14 = vmul.f32 %v4129_v13, %v11442_v28  ;;  %v5066_v28 = vld [vmem:[%s10913_s30 + $0x398] sm:$0xff] }
 0xa4a   :  { %v6082_v26 = vpop.eup %6081  ;;  %v4110_v36 = vmul.f32 0.5, %v6080_v6  ;;  %6097 = vtanh.f32 %v10348_v7 }
 0xa4b   :  { %v4126_v51 = vmul.f32 0.5, %v6082_v26  ;;  %v6084_v17 = vpop.eup %6083  ;;  %v10352_v10 = vadd.f32 %v4157_v33, %v4153_v14  ;;  %6099 = vtanh.f32 %v4139_v61 }
 0xa4c   :  { %v4114_v18 = vadd.f32 0.5, %v4110_v36  ;;  %v6086_v35 = vpop.eup %6085  ;;  %v4111_v0 = vmul.f32 0.5, %v6084_v17  ;;  %v5071_v36 = vld [vmem:[%s10913_s30 + $0x3c0] sm:$0xff] }
 0xa4d   :  { %v4130_v2 = vadd.f32 0.5, %v4126_v51  ;;  %v6088_v49 = vpop.eup %6087  ;;  %6101 = vtanh.f32 %v10352_v10  ;;  %v5072_v51 = vld [vmem:[%s10913_s30 + $0x3c8] sm:$0xff] }
 0xa4e   :  { %v4158_v50 = vmul.f32 %v6086_v35, %v4114_v18  ;;  %v6090_v59 = vpop.eup %6089  ;;  %v4115_v52 = vadd.f32 0.5, %v4111_v0  ;;  %v4127_v29 = vmul.f32 0.5, %v6088_v49 }
 0xa4f   :  { %v4154_v57 = vmul.f32 %v4130_v2, %v11443_v60  ;;  %v6092_v19 = vpop.eup %6091  ;;  %v4144_v45 = vmul.f32 0.5, %v6090_v59  ;;  %v5075_v2 = vld [vmem:[%s10913_s30 + $0x3e0] sm:$0xff] }
 0xa50   :  { %v6094_v32 = vpop.eup %6093  ;;  %v4131_v63 = vadd.f32 0.5, %v4127_v29  ;;  %v4159_v47 = vmul.f32 %v6092_v19, %v4115_v52  ;;  %v5076_v19 = vld [vmem:[%s10913_s30 + $0x3e8] sm:$0xff] }
 0xa51   :  { %v10359_v53 = vadd.f32 %v4158_v50, %v4154_v57  ;;  %v4145_v46 = vmul.f32 0.5, %v6094_v32  ;;  %v6096_v16 = vpop.eup %6095  ;;  %v4148_v13 = vadd.f32 0.5, %v4144_v45  ;;  %v5073_v57 = vld [vmem:[%s10913_s30 + $0x3d0] sm:$0xff] }
 0xa52   :  { %v4223_v24 = vpop.f32.mrb[136].mxu0  ;;  %v4276_v23 = vpop.f32.mrb[128].mxu1  ;;  %v4155_v41 = vmul.f32 %v4131_v63, %v11444_v44  ;;  %v4146_v50 = vmul.f32 0.5, %v6096_v16 }
 0xa53   :  { %v4295_v9 = vadd.f32 %v5063_v1, %v4223_v24  ;;  %v4225_v38 = vpop.f32.mrb[137].mxu0  ;;  %v4278_v31 = vpop.f32.mrb[129].mxu1  ;;  %6103 = vtanh.f32 %v10359_v53  ;;  %v4149_v33 = vadd.f32 0.5, %v4145_v46  ;;  %v4297_v26 = vadd.f32 %v5065_v55, %v4276_v23  ;;  %v5070_v24 = vld [vmem:[%s10913_s30 + $0x3b8] sm:$0xff]  ;;  %v5077_v55 = vld [vmem:[%s10913_s30 + $0x3f0] sm:$0xff] }
 0xa54   :  { %v4296_v15 = vadd.f32 %v5064_v5, %v4225_v38  ;;  %v4227_v54 = vpop.f32.mrb[138].mxu0  ;;  %v4280_v11 = vpop.f32.mrb[130].mxu1  ;;  %v10372_v27 = vadd.f32 %v4159_v47, %v4155_v41  ;;  %v4298_v1 = vadd.f32 %v5066_v28, %v4278_v31  ;;  %v4150_v46 = vadd.f32 0.5, %v4146_v50 }
 0xa55   :  { %v4311_v56 = vmul.f32 0.5, %v4295_v9  ;;  %v4299_v43 = vadd.f32 %v5067_v30, %v4227_v54  ;;  %v4229_v25 = vpop.f32.mrb[139].mxu0  ;;  %v4282_v8 = vpop.f32.mrb[131].mxu1  ;;  %v4301_v17 = vadd.f32 %v5069_v62, %v4280_v11 }
 0xa56   :  { %v4327_v48 = vmul.f32 0.5, %v4296_v15  ;;  %v4300_v58 = vadd.f32 %v5068_v40, %v4229_v25  ;;  %v6098_v3 = vpop.eup %6097  ;;  %6105 = vtanh.f32 %v10372_v27  ;;  %v4347_v54 = vmul.f32 0.5, %v4298_v1 }
 0xa57   :  { %v4312_v34 = vmul.f32 0.5, %v4299_v43  ;;  %v6100_v6 = vpop.eup %6099  ;;  %6107 = vtanh.f32 %v4311_v56  ;;  %v4168_v0 = vmul.f32 %v6098_v3, %v4148_v13  ;;  %v4302_v11 = vadd.f32 %v5070_v24, %v4282_v8  ;;  %v5074_v56 = vld [vmem:[%s10913_s30 + $0x3d8] sm:$0xff] }
 0xa58   :  { %v6102_v61 = vpop.eup %6101  ;;  %6109 = vtanh.f32 %v4327_v48  ;;  %v4328_v14 = vmul.f32 0.5, %v4300_v58  ;;  %v4147_v59 = vmul.f32 0.5, %v6100_v6 }
 0xa59   :  { %v4169_v49 = vmul.f32 %v6102_v61, %v4149_v33  ;;  %6111 = vtanh.f32 %v4312_v34  ;;  %v4348_v13 = vmul.f32 0.5, %v4302_v11  ;;  %v5078_v33 = vld [vmem:[%s10913_s30 + $0x3f8] sm:$0xff] }
 0xa5a   :  { %v4233_v18 = vpop.f32.mrb[140].mxu0  ;;  %v4286_v35 = vpop.f32.mrb[132].mxu1  ;;  %6113 = vtanh.f32 %v4297_v26  ;;  %v4151_v15 = vadd.f32 0.5, %v4147_v59 }
 0xa5b   :  { %v4303_v60 = vadd.f32 %v5071_v36, %v4233_v18  ;;  %v4235_v52 = vpop.f32.mrb[141].mxu0  ;;  %v4288_v29 = vpop.f32.mrb[133].mxu1  ;;  %v4385_v5 = vpack.c.bf16 %v4169_v49, %v4168_v0  ;;  %6115 = vtanh.f32 %v4328_v14  ;;  %v4305_v9 = vadd.f32 %v5073_v57, %v4286_v35 }
 0xa5c   :  { %v4304_v32 = vadd.f32 %v5072_v51, %v4235_v52  ;;  %v4237_v63 = vpop.f32.mrb[142].mxu0  ;;  %v4290_v47 = vpop.f32.mrb[134].mxu1  ;;  %6117 = vtanh.f32 %v4301_v17  ;;  %v4306_v62 = vadd.f32 %v5074_v56, %v4288_v29 }
 0xa5d   :  { %v4313_v23 = vmul.f32 0.5, %v4303_v60  ;;  %v4307_v30 = vadd.f32 %v5075_v2, %v4237_v63  ;;  %v4239_v44 = vpop.f32.mrb[143].mxu0  ;;  %v4292_v41 = vpop.f32.mrb[135].mxu1  ;;  %4419 = vmatprep.mubr.bf16.mxu0 %v4385_v5  ;;  %4472 = vmatprep.mubr.bf16.mxu1 %v4385_v5  ;;  %v4309_v8 = vadd.f32 %v5077_v55, %v4290_v47 }
 0xa5e   :  { %v4329_v38 = vmul.f32 0.5, %v4304_v32  ;;  %v4308_v40 = vadd.f32 %v5076_v19, %v4239_v44  ;;  %v6104_v31 = vpop.eup %6103  ;;  %v4349_v35 = vmul.f32 0.5, %v4306_v62  ;;  %v4310_v2 = vadd.f32 %v5078_v33, %v4292_v41 }
 0xa5f   :  { %6119 = vtanh.f32 %v4313_v23  ;;  %v4314_v45 = vmul.f32 0.5, %v4307_v30  ;;  %v4170_v48 = vmul.f32 %v6104_v31, %v4150_v46 }
 0xa60   :  { %v6106_v43 = vpop.eup %6105  ;;  %6121 = vtanh.f32 %v4329_v38  ;;  %v4330_v25 = vmul.f32 0.5, %v4308_v40  ;;  %v4350_v32 = vmul.f32 0.5, %v4310_v2 }
 0xa61   :  { %v6108_v16 = vpop.eup %6107  ;;  %6123 = vtanh.f32 %v4305_v9  ;;  %v4171_v58 = vmul.f32 %v6106_v43, %v4151_v15 }
 0xa62   :  { %v6110_v3 = vpop.eup %6109  ;;  %v4319_v34 = vmul.f32 0.5, %v6108_v16  ;;  %6125 = vtanh.f32 %v4314_v45 }
 0xa63   :  { %v4335_v6 = vmul.f32 0.5, %v6110_v3  ;;  %6127 = vtanh.f32 %v4347_v54  ;;  %v10411_v26 = vpack.c.bf16 %v4171_v58, %v4170_v48  ;;  %v6112_v36 = vpop.eup %6111 }
 0xa64   :  { %v4323_v61 = vadd.f32 0.5, %v4319_v34  ;;  %6129 = vtanh.f32 %v4330_v25  ;;  %v6114_v28 = vpop.eup %6113  ;;  %v4320_v51 = vmul.f32 0.5, %v6112_v36 }
 0xa65   :  { %v4339_v14 = vadd.f32 0.5, %v4335_v6  ;;  %v6116_v17 = vpop.eup %6115  ;;  %6131 = vtanh.f32 %v4309_v8 }
 0xa66   :  { %v4367_v18 = vmul.f32 %v6114_v28, %v4323_v61  ;;  %v6118_v0 = vpop.eup %6117  ;;  %v4324_v50 = vadd.f32 0.5, %v4320_v51  ;;  %v4336_v59 = vmul.f32 0.5, %v6116_v17  ;;  %6133 = vtanh.f32 %v4348_v13 }
 0xa67   :  { %v4363_v49 = vmul.f32 %v4339_v14, %v10216_v37  ;;  %6135 = vtanh.f32 %v4349_v35  ;;  %v4566_v35 = vld [vmem:[%s10541_s13 + $0x8] sm:$0xff] }
 0xa68   :  { %v4340_v52 = vadd.f32 0.5, %v4336_v59  ;;  %v4368_v29 = vmul.f32 %v6118_v0, %v4324_v50  ;;  %v4568_v0 = vld [vmem:[%s10541_s13 + $0x18] sm:$0xff]  ;;  %v4569_v50 = vld [vmem:[%s10541_s13 + $0x20] sm:$0xff]  ;;  %v4570_v59 = vld [vmem:[%s10541_s13 + $0x28] sm:$0xff] }
 0xa69   :  { %v6120_v60 = vpop.eup %6119  ;;  %v4371_v57 = vadd.f32 %v4367_v18, %v4363_v49  ;;  %v4565_v18 = vld [vmem:[%s10541_s13] sm:$0xff] }
 0xa6a   :  { %v4321_v19 = vmul.f32 0.5, %v6120_v60  ;;  %v6122_v1 = vpop.eup %6121  ;;  %v4364_v47 = vmul.f32 %v4340_v52, %v10220_v21  ;;  %v5323_v2 = vpack.c.bf16 %v4566_v35, %v4565_v18  ;;  %v5331_v60 = vpack.c.bf16 %v4570_v59, %v4569_v50  ;;  %v4572_v52 = vld [vmem:[%s10541_s13 + $0x38] sm:$0xff] }
 0xa6b   :  { %v6124_v63 = vpop.eup %6123  ;;  %6137 = vtanh.f32 %v4371_v57  ;;  %v4337_v24 = vmul.f32 0.5, %v6122_v1  ;;  %v4571_v57 = vld [vmem:[%s10541_s13 + $0x30] sm:$0xff]  ;;  %v4574_v1 = vld [vmem:[%s10541_s13 + $0x48] sm:$0xff] }
 0xa6c   :  { %v4325_v5 = vadd.f32 0.5, %v4321_v19  ;;  %v6126_v23 = vpop.eup %6125  ;;  %v4372_v37 = vadd.f32 %v4368_v29, %v4364_v47  ;;  %6139 = vtanh.f32 %v4350_v32  ;;  %5324 = vmatprep.subr.bf16.mxu0 %v5323_v2  ;;  %v5335_v29 = vpack.c.bf16 %v4572_v52, %v4571_v57  ;;  %v4573_v19 = vld [vmem:[%s10541_s13 + $0x40] sm:$0xff]  ;;  %v4576_v47 = vld [vmem:[%s10541_s13 + $0x58] sm:$0xff] }
 0xa6d   :  { %v6128_v30 = vpop.eup %6127  ;;  %v4341_v44 = vadd.f32 0.5, %v4337_v24  ;;  %v4322_v9 = vmul.f32 0.5, %v6126_v23  ;;  %v5339_v32 = vpack.c.bf16 %v4574_v1, %v4573_v19  ;;  %v4577_v24 = vld [vmem:[%s10541_s13 + $0x60] sm:$0xff]  ;;  %v4578_v23 = vld [vmem:[%s10541_s13 + $0x68] sm:$0xff] }
 0xa6e   :  { %v4369_v41 = vmul.f32 %v6124_v63, %v4325_v5  ;;  %v6130_v38 = vpop.eup %6129  ;;  %6141 = vtanh.f32 %v4372_v37  ;;  %v4355_v15 = vmul.f32 0.5, %v6128_v30  ;;  %v4575_v63 = vld [vmem:[%s10541_s13 + $0x50] sm:$0xff]  ;;  %v5347_v30 = vpack.c.bf16 %v4578_v23, %v4577_v24 }
 0xa6f   :  { %v4365_v40 = vmul.f32 %v4341_v44, %v10224_v12  ;;  %v4326_v31 = vadd.f32 0.5, %v4322_v9  ;;  %v4338_v45 = vmul.f32 0.5, %v6130_v38  ;;  %v6132_v46 = vpop.eup %6131  ;;  %v5343_v5 = vpack.c.bf16 %v4576_v47, %v4575_v63  ;;  %v4579_v37 = vld [vmem:[%s10541_s13 + $0x70] sm:$0xff]  ;;  %v4580_v44 = vld [vmem:[%s10541_s13 + $0x78] sm:$0xff] }
 0xa70   :  { %v6134_v54 = vpop.eup %6133  ;;  %v4359_v25 = vadd.f32 0.5, %v4355_v15 }
 0xa71   :  { %v4373_v11 = vadd.f32 %v4369_v41, %v4365_v40  ;;  %v4342_v21 = vadd.f32 0.5, %v4338_v45  ;;  %v4370_v56 = vmul.f32 %v6132_v46, %v4326_v31  ;;  %v6136_v43 = vpop.eup %6135  ;;  %v4356_v16 = vmul.f32 0.5, %v6134_v54 }
 0xa72   :  { %v4357_v62 = vmul.f32 0.5, %v6136_v43  ;;  %v5351_v41 = vpack.c.bf16 %v4580_v44, %v4579_v37 }
 0xa73   :  { %6143 = vtanh.f32 %v4373_v11  ;;  %v4366_v55 = vmul.f32 %v4342_v21, %v10228_v22  ;;  %v4360_v12 = vadd.f32 0.5, %v4356_v16 }
 0xa74   :  { %v4361_v33 = vadd.f32 0.5, %v4357_v62 }
 0xa75   :  { %v6138_v48 = vpop.eup %6137  ;;  %v4374_v58 = vadd.f32 %v4370_v56, %v4366_v55 }
 0xa76   :  { %v4379_v3 = vmul.f32 %v6138_v48, %v4359_v25  ;;  %v6140_v34 = vpop.eup %6139 }
 0xa77   :  { %6145 = vtanh.f32 %v4374_v58  ;;  %v4358_v36 = vmul.f32 0.5, %v6140_v34 }
 0xa78   :  { %v6142_v8 = vpop.eup %6141 }
 0xa79   :  { %v4380_v6 = vmul.f32 %v6142_v8, %v4360_v12  ;;  %v4362_v22 = vadd.f32 0.5, %v4358_v36 }
 0xa7b   :  { %v4383_v13 = vpack.c.bf16 %v4380_v6, %v4379_v3 }
 0xa7d   :  { %v6144_v61 = vpop.eup %6143  ;;  %4420 = vmatmul.mubr.bf16.vlgmr.msra.gmra.mrb[144].mxu0 %v4383_v13  ;;  %4473 = vmatmul.mubr.bf16.vlgmr.msra.gmra.mrb[136].mxu1 %v4383_v13 }
 0xa7e   :  { %v4381_v28 = vmul.f32 %v6144_v61, %v4361_v33  ;;  %4429 = vmatprep.mubr.bf16.mxu0 %v10411_v26  ;;  %4482 = vmatprep.mubr.bf16.mxu1 %v10411_v26  ;;  %v4567_v26 = vld [vmem:[%s10541_s13 + $0x10] sm:$0xff]  ;;  %s6676_s13 = smov 64  }
 0xa7f   :  { %5326 = vmatpush3.bf16.msra.mxu0 %v5323_v2  ;;  %v5327_v49 = vpack.c.bf16 %v4568_v0, %v4567_v26 }
 0xa81   :  { %v6146_v14 = vpop.eup %6145  ;;  %5328 = vmatprep.subr.bf16.mxu0 %v5327_v49 }
 0xa82   :  { %v4382_v51 = vmul.f32 %v6146_v14, %v4362_v22 }
 0xa83   :  { %5330 = vmatpush3.bf16.msra.mxu0 %v5327_v49 }
 0xa84   :  { %v4384_v17 = vpack.c.bf16 %v4382_v51, %v4381_v28  ;;  %5332 = vmatprep.subr.bf16.mxu0 %v5331_v60 }
 0xa86   :  { %4430 = vmatmul.mubr.bf16.gmra.mrb[148].mxu0 %v4384_v17  ;;  %4483 = vmatmul.mubr.bf16.gmra.mrb[140].mxu1 %v4384_v17 }
 0xa87   :  { %5334 = vmatpush3.bf16.msra.mxu0 %v5331_v60 }
 0xa88   :  { %5336 = vmatprep.subr.bf16.mxu0 %v5335_v29 }
 0xa8b   :  { %5338 = vmatpush3.bf16.msra.mxu0 %v5335_v29 }
 0xa8c   :  { %5340 = vmatprep.subr.bf16.mxu0 %v5339_v32 }
 0xa8f   :  { %5342 = vmatpush3.bf16.msra.mxu0 %v5339_v32 }
 0xa90   :  { %5344 = vmatprep.subr.bf16.mxu0 %v5343_v5 }
 0xa93   :  { %5346 = vmatpush3.bf16.msra.mxu0 %v5343_v5 }
 0xa94   :  { %5348 = vmatprep.subr.bf16.mxu0 %v5347_v30 }
 0xa97   :  { %5350 = vmatpush3.bf16.msra.mxu0 %v5347_v30 }
 0xa98   :  { %5352 = vmatprep.subr.bf16.mxu0 %v5351_v41 }
 0xa9b   :  { %5354 = vmatpush3.bf16.msra.mxu0 %v5351_v41 }
 0xb50   :  { %v4421_v9 = vpop.f32.mrb[144].mxu0  ;;  %v4474_v38 = vpop.f32.mrb[136].mxu1 }
 0xb51   :  { %v4422_v40 = vadd.f32 %v4421_v9, %v11437_v4  ;;  %v4423_v31 = vpop.f32.mrb[145].mxu0  ;;  %v4476_v45 = vpop.f32.mrb[137].mxu1  ;;  %v4475_v16 = vadd.f32 %v4474_v38, %v11439_v20 }
 0xb52   :  { %v4424_v46 = vadd.f32 %v4423_v31, %v11438_v39  ;;  %v4425_v15 = vpop.f32.mrb[146].mxu0  ;;  %v4478_v54 = vpop.f32.mrb[138].mxu1  ;;  %v4477_v3 = vadd.f32 %v4476_v45, %v11440_v42 }
 0xb53   :  { %v4493_v11 = vmul.f32 0.5, %v4422_v40  ;;  %v4426_v21 = vadd.f32 %v4425_v15, %v11437_v4  ;;  %v4427_v56 = vpop.f32.mrb[147].mxu0  ;;  %v4480_v55 = vpop.f32.mrb[139].mxu1  ;;  %v4479_v34 = vadd.f32 %v4478_v54, %v11439_v20 }
 0xb54   :  { %v4509_v43 = vmul.f32 0.5, %v4424_v46  ;;  %v4428_v25 = vadd.f32 %v4427_v56, %v11438_v39  ;;  %v4529_v28 = vmul.f32 0.5, %v4477_v3  ;;  %v4481_v2 = vadd.f32 %v4480_v55, %v11440_v42 }
 0xb55   :  { %6147 = vtanh.f32 %v4493_v11  ;;  %v4494_v48 = vmul.f32 0.5, %v4426_v21 }
 0xb56   :  { %6149 = vtanh.f32 %v4509_v43  ;;  %v4510_v58 = vmul.f32 0.5, %v4428_v25  ;;  %v4530_v29 = vmul.f32 0.5, %v4481_v2 }
 0xb57   :  { %6151 = vtanh.f32 %v4494_v48 }
 0xb58   :  { %6153 = vtanh.f32 %v4475_v16 }
 0xb59   :  { %v4431_v12 = vpop.f32.mrb[148].mxu0  ;;  %v4484_v62 = vpop.f32.mrb[140].mxu1  ;;  %6155 = vtanh.f32 %v4510_v58 }
 0xb5a   :  { %v4432_v8 = vadd.f32 %v4431_v12, %v11437_v4  ;;  %v4433_v6 = vpop.f32.mrb[149].mxu0  ;;  %v4486_v13 = vpop.f32.mrb[141].mxu1  ;;  %6157 = vtanh.f32 %v4479_v34  ;;  %v4485_v26 = vadd.f32 %v4484_v62, %v11439_v20 }
 0xb5b   :  { %v4434_v33 = vadd.f32 %v4433_v6, %v11438_v39  ;;  %v4435_v36 = vpop.f32.mrb[150].mxu0  ;;  %v4488_v61 = vpop.f32.mrb[142].mxu1 }
 0xb5c   :  { %v4495_v22 = vmul.f32 0.5, %v4432_v8  ;;  %v4436_v14 = vadd.f32 %v4435_v36, %v11437_v4  ;;  %v4437_v51 = vpop.f32.mrb[151].mxu0  ;;  %v4490_v17 = vpop.f32.mrb[143].mxu1  ;;  %v4487_v4 = vadd.f32 %v4486_v13, %v11440_v42  ;;  %v4489_v57 = vadd.f32 %v4488_v61, %v11439_v20 }
 0xb5d   :  { %v4511_v18 = vmul.f32 0.5, %v4434_v33  ;;  %v4438_v35 = vadd.f32 %v4437_v51, %v11438_v39  ;;  %v4491_v23 = vadd.f32 %v4490_v17, %v11440_v42 }
 0xb5e   :  { %6159 = vtanh.f32 %v4495_v22  ;;  %v4496_v0 = vmul.f32 0.5, %v4436_v14  ;;  %v4531_v24 = vmul.f32 0.5, %v4487_v4  ;;  %v4703_v4 = vld [vmem:[#allocation10 + $0x8] sm:$0xff] }
 0xb5f   :  { %6161 = vtanh.f32 %v4511_v18  ;;  %v4512_v49 = vmul.f32 0.5, %v4438_v35  ;;  %v6148_v50 = vpop.eup %6147  ;;  %v4532_v46 = vmul.f32 0.5, %v4491_v23  ;;  %v4711_v23 = vld [vmem:[#allocation10 + $0x48] sm:$0xff] }
 0xb60   :  { %6163 = vtanh.f32 %v4529_v28  ;;  %v6150_v59 = vpop.eup %6149  ;;  %v4501_v60 = vmul.f32 0.5, %v6148_v50 }
 0xb61   :  { %6165 = vtanh.f32 %v4496_v0  ;;  %v4517_v52 = vmul.f32 0.5, %v6150_v59  ;;  %v6152_v39 = vpop.eup %6151 }
 0xb62   :  { %6167 = vtanh.f32 %v4485_v26  ;;  %v4505_v19 = vadd.f32 0.5, %v4501_v60  ;;  %v6154_v1 = vpop.eup %6153  ;;  %v4502_v63 = vmul.f32 0.5, %v6152_v39  ;;  %v4702_v60 = vld [vmem:[#allocation10] sm:$0xff] }
 0xb63   :  { %6169 = vtanh.f32 %v4512_v49  ;;  %v4521_v32 = vadd.f32 0.5, %v4517_v52  ;;  %v6156_v47 = vpop.eup %6155  ;;  %v5355_v52 = vpack.c.bf16 %v4703_v4, %v4702_v60 }
 0xb64   :  { %v4549_v5 = vmul.f32 %v6154_v1, %v4505_v19  ;;  %6171 = vtanh.f32 %v4489_v57  ;;  %v4506_v37 = vadd.f32 0.5, %v4502_v63  ;;  %v4518_v44 = vmul.f32 0.5, %v6156_v47  ;;  %v6158_v20 = vpop.eup %6157  ;;  %v4704_v57 = vld [vmem:[#allocation10 + $0x10] sm:$0xff]  ;;  %v4706_v19 = vld [vmem:[#allocation10 + $0x20] sm:$0xff]  ;;  %v4707_v1 = vld [vmem:[#allocation10 + $0x28] sm:$0xff] }
 0xb65   :  { %v4545_v30 = vmul.f32 %v4521_v32, %v10348_v7  ;;  %6173 = vtanh.f32 %v4530_v29  ;;  %v4705_v29 = vld [vmem:[#allocation10 + $0x18] sm:$0xff]  ;;  %5356 = vmatprep.subr.bf16.mxu1 %v5355_v52  ;;  %v5363_v32 = vpack.c.bf16 %v4707_v1, %v4706_v19  ;;  %v4708_v63 = vld [vmem:[#allocation10 + $0x30] sm:$0xff] }
 0xb66   :  { %v4522_v38 = vadd.f32 0.5, %v4518_v44  ;;  %v4550_v40 = vmul.f32 %v6158_v20, %v4506_v37  ;;  %6175 = vtanh.f32 %v4531_v24  ;;  %v5359_v39 = vpack.c.bf16 %v4705_v29, %v4704_v57  ;;  %5358 = vmatpush3.bf16.msra.mxu1 %v5355_v52  ;;  %v4709_v47 = vld [vmem:[#allocation10 + $0x38] sm:$0xff]  ;;  %v4710_v24 = vld [vmem:[#allocation10 + $0x40] sm:$0xff]  ;;  %v4712_v37 = vld [vmem:[#allocation10 + $0x50] sm:$0xff] }
 0xb67   :  { %v4553_v9 = vadd.f32 %v4549_v5, %v4545_v30  ;;  %v5367_v5 = vpack.c.bf16 %v4709_v47, %v4708_v63  ;;  %v5371_v30 = vpack.c.bf16 %v4711_v23, %v4710_v24  ;;  %v4713_v44 = vld [vmem:[#allocation10 + $0x58] sm:$0xff] }
 0xb68   :  { %v6160_v41 = vpop.eup %6159  ;;  %v4546_v54 = vmul.f32 %v4522_v38, %v10352_v10  ;;  %5360 = vmatprep.subr.bf16.mxu1 %v5359_v39  ;;  %v5375_v20 = vpack.c.bf16 %v4713_v44, %v4712_v37 }
 0xb69   :  { %v6162_v31 = vpop.eup %6161  ;;  %v4503_v45 = vmul.f32 0.5, %v6160_v41  ;;  %6177 = vtanh.f32 %v4553_v9  ;;  %v4714_v41 = vld [vmem:[#allocation10 + $0x60] sm:$0xff]  ;;  %v4715_v9 = vld [vmem:[#allocation10 + $0x68] sm:$0xff] }
 0xb6a   :  { %v6164_v15 = vpop.eup %6163  ;;  %v4519_v11 = vmul.f32 0.5, %v6162_v31  ;;  %v4554_v56 = vadd.f32 %v4550_v40, %v4546_v54  ;;  %6179 = vtanh.f32 %v4532_v46  ;;  %5362 = vmatpush3.bf16.msra.mxu1 %v5359_v39  ;;  %v5379_v38 = vpack.c.bf16 %v4715_v9, %v4714_v41  ;;  %v4716_v40 = vld [vmem:[#allocation10 + $0x70] sm:$0xff]  ;;  %v4717_v31 = vld [vmem:[#allocation10 + $0x78] sm:$0xff] }
 0xb6b   :  { %v6166_v42 = vpop.eup %6165  ;;  %v4507_v21 = vadd.f32 0.5, %v4503_v45  ;;  %v4537_v12 = vmul.f32 0.5, %v6164_v15  ;;  %5364 = vmatprep.subr.bf16.mxu1 %v5363_v32  ;;  %v5383_v45 = vpack.c.bf16 %v4717_v31, %v4716_v40  ;;  %v5079_v46 = vld [vmem:[#allocation8] ss:$0 sm:$0xff] }
 0xb6c   :  { %v6168_v7 = vpop.eup %6167  ;;  %v4523_v55 = vadd.f32 0.5, %v4519_v11  ;;  %v4504_v43 = vmul.f32 0.5, %v6166_v42  ;;  %6181 = vtanh.f32 %v4554_v56 }
 0xb6d   :  { %v6170_v25 = vpop.eup %6169  ;;  %v4551_v16 = vmul.f32 %v6168_v7, %v4507_v21  ;;  %v4541_v36 = vadd.f32 0.5, %v4537_v12 }
 0xb6e   :  { %v4547_v48 = vmul.f32 %v4523_v55, %v10359_v53  ;;  %v4508_v58 = vadd.f32 0.5, %v4504_v43  ;;  %v4520_v3 = vmul.f32 0.5, %v6170_v25  ;;  %v6172_v34 = vpop.eup %6171  ;;  %5366 = vmatpush3.bf16.msra.mxu1 %v5363_v32 }
 0xb6f   :  { %v6174_v62 = vpop.eup %6173  ;;  %5368 = vmatprep.subr.bf16.mxu1 %v5367_v5 }
 0xb70   :  { %v4555_v8 = vadd.f32 %v4551_v16, %v4547_v48  ;;  %v4524_v10 = vadd.f32 0.5, %v4520_v3  ;;  %v4552_v6 = vmul.f32 %v6172_v34, %v4508_v58  ;;  %v6176_v33 = vpop.eup %6175  ;;  %v4538_v61 = vmul.f32 0.5, %v6174_v62  ;;  %v4866_v58 = vld [vmem:[%s10537_s9] ss:$0 sm:$0xff]  ;;  %v11445_v3 = vld [vmem:[#allocation56_spill] sm:$0xff]  ;;  %v11446_v62 = vld [vmem:[#allocation26_spill] sm:$0xff] }
 0xb71   :  { %v4539_v17 = vmul.f32 0.5, %v6176_v33  ;;  %v804_v34 = vadd.f32 %v4866_v58, %v11445_v3  ;;  %v11447_v33 = vld [vmem:[#allocation57_spill] sm:$0xff]  ;;  %s6677_s9 = smov [#allocation14]  }
 0xb72   :  { %6183 = vtanh.f32 %v4555_v8  ;;  %v4548_v13 = vmul.f32 %v4524_v10, %v10372_v27  ;;  %v4542_v53 = vadd.f32 0.5, %v4538_v61  ;;  %5370 = vmatpush3.bf16.msra.mxu1 %v5367_v5  ;;  %v809_v8 = vadd.f32 %v4866_v58, %v11446_v62  ;;  %s4831_s11 = sshll.u32 %s6677_s9, 4  ;;  %s4832_s11 = int_to_ptr.vmem [resolvable:$true] %s4831_s11 }
 0xb73   :  { %v6178_v28 = vpop.eup %6177  ;;  %v4543_v2 = vadd.f32 0.5, %v4539_v17  ;;  %5372 = vmatprep.subr.bf16.mxu1 %v5371_v30  ;;  %v822_v12 = vmax.f32 %v804_v34, 0.0  ;;  %s6607_s6 = scalar_lea.vmem %s4832_s11, 512  ;;  %p6612_p7 = scmp.lt.s32.totalorder %s4832_s11, %s4832_s11 }
 0xb74   :  { %v4556_v22 = vadd.f32 %v4552_v6, %v4548_v13  ;;  %v4561_v14 = vmul.f32 %v6178_v28, %v4541_v36  ;;  %v6180_v51 = vpop.eup %6179  ;;  %v823_v13 = vmax.f32 %v809_v8, 0.0  ;;  %v814_v36 = vadd.f32 %v4866_v58, %v11447_v33  ;;  %p6608_p6 = scmp.ne.s32.totalorder %s4832_s11, %s6607_s6  ;;  %p6613_p8 = scmp.lt.s32.totalorder %s6607_s6, %s6607_s6 }
 0xb75   :  { %v4540_v26 = vmul.f32 0.5, %v6180_v51 }
 0xb76   :  { %6185 = vtanh.f32 %v4556_v22  ;;  %5153 = vmatprep.mubr.f32.mxu0 %v4561_v14  ;;  %v6182_v18 = vpop.eup %6181  ;;  %5374 = vmatpush3.bf16.msra.mxu1 %v5371_v30  ;;  %v824_v22 = vmax.f32 %v814_v36, 0.0  ;;  %v11448_v14 = vld [vmem:[#allocation27_spill] sm:$0xff]  ;;  %p6614_p9 = por %p6613_p8, %p6612_p7 }
 0xb77   :  { %v4562_v35 = vmul.f32 %v6182_v18, %v4542_v53  ;;  %v4544_v50 = vadd.f32 0.5, %v4540_v26  ;;  %5376 = vmatprep.subr.bf16.mxu1 %v5375_v20  ;;  %v819_v51 = vadd.f32 %v4866_v58, %v11448_v14 }
 0xb78   :  { %p6615_p10 = pnand %p6614_p9, %p6608_p6 }
 0xb79   :  { %5154 = vmatmul.mubr.f32.vlgmr.msra.gmra.mrb[152].mxu0 %v4562_v35  ;;  %v825_v18 = vmax.f32 %v819_v51, 0.0 }
 0xb7a   :  { %5378 = vmatpush3.bf16.msra.mxu1 %v5375_v20 }
 0xb7b   :  { %5380 = vmatprep.subr.bf16.mxu1 %v5379_v38 }
 0xb7c   :  { %v6184_v0 = vpop.eup %6183 }
 0xb7d   :  { %v4563_v49 = vmul.f32 %v6184_v0, %v4543_v2 }
 0xb7e   :  { %5382 = vmatpush3.bf16.msra.mxu1 %v5379_v38 }
 0xb7f   :  { %5156 = vmatprep.mubr.f32.mxu0 %v4563_v49  ;;  %5384 = vmatprep.subr.bf16.mxu1 %v5383_v45 }
 0xb80   :  { %v6186_v27 = vpop.eup %6185 }
 0xb81   :  { %v4564_v59 = vmul.f32 %v6186_v27, %v4544_v50 }
 0xb82   :  { %5386 = vmatpush3.bf16.msra.mxu1 %v5383_v45 }
 0xb83   :  { %5157 = vmatmul.mubr.f32.gmra.mrb[154].mxu0 %v4564_v59 }
 0xc4c   :  { %v5155_v15 = vpop.f32.mrb[152].mxu0 }
 0xc4d   :  { %v4654_v54 = vpop.f32.mrb[153].mxu0  ;;  %v4660_v42 = vadd.f32 %v5155_v15, %v5079_v46 }
 0xc4e   :  { %v4655_v11 = vadd.f32 %v5079_v46, %v4654_v54 }
 0xc4f   :  { %v4674_v7 = vmax.f32 %v4660_v42, 0.0 }
 0xc50   :  { %v4673_v21 = vmax.f32 %v4655_v11, 0.0 }
 0xc52   :  { %4681 = vrot.lane.b32.xlu0 %v4673_v21, %s6676_s13 }
 0xc56   :  { %v5158_v56 = vpop.f32.mrb[154].mxu0  ;;  %4683 = vrot.lane.b32.xlu0 %v4674_v7, %s6676_s13 }
 0xc57   :  { %v4664_v55 = vpop.f32.mrb[155].mxu0  ;;  %v4670_v25 = vadd.f32 %v5158_v56, %v5079_v46 }
 0xc58   :  { %v4665_v43 = vadd.f32 %v5079_v46, %v4664_v55 }
 0xc59   :  { %v4676_v48 = vmax.f32 %v4670_v25, 0.0 }
 0xc5a   :  { %v4675_v16 = vmax.f32 %v4665_v43, 0.0 }
 0xc5c   :  { %4685 = vrot.lane.b32.xlu1 %v4675_v16, %s6676_s13 }
 0xc60   :  { %4687 = vrot.lane.b32.xlu1 %v4676_v48, %s6676_s13 }
 0xcc4   :  { %v4682_v10 = vpop.permute.xlu0 %4681 }
 0xcc5   :  { %v4694_v6 = vsel %vm4693_vm3, %v822_v12, %v4682_v10 }
 0xcc6   :  { %4698 = vst [vmem:[#allocation14] sm:$0xff] %v4694_v6  ;;  %5191 = vmatprep.mubr.f32.mxu1 %v4694_v6 }
 0xcc8   :  { %v4684_v61 = vpop.permute.xlu0 %4683 }
 0xcc9   :  { %v4695_v28 = vsel %vm4693_vm3, %v823_v13, %v4684_v61 }
 0xcca   :  { %4699 = vst [vmem:[#allocation14 + $0x8] sm:$0xff] %v4695_v28  ;;  %5192 = vmatmul.mubr.f32.vlgmr.msra.gmra.mrb[144].mxu1 %v4695_v28 }
 0xcce   :  { %v4686_v53 = vpop.permute.xlu1 %4685 }
 0xccf   :  { %v4696_v17 = vsel %vm4693_vm3, %v824_v22, %v4686_v53 }
 0xcd0   :  { %4700 = vst [vmem:[#allocation14 + $0x10] sm:$0xff] %v4696_v17  ;;  %5194 = vmatprep.mubr.f32.mxu1 %v4696_v17 }
 0xcd2   :  { %v4688_v35 = vpop.permute.xlu1 %4687 }
 0xcd3   :  { %v4697_v2 = vsel %vm4693_vm3, %v825_v18, %v4688_v35 }
 0xcd4   :  { %4701 = vst [vmem:[#allocation14 + $0x18] sm:$0xff] %v4697_v2  ;;  %5195 = vmatmul.mubr.f32.gmra.mrb[146].mxu1 %v4697_v2 }
 0xcd5   :  { %6618 = shalt.err (!%p6615_p10)
}
 0xcd6   :  { %s6619_s20 = scalar_lea.hbm %s10546_s18, 512 }
 0xcd7   :  { %p6620_p11 = scmp.ne.s32.totalorder %s10546_s18, %s6619_s20  ;;  %p6623_p12 = scmp.lt.u32.totalorder %s6619_s20, %s10546_s18 }
 0xcd9   :  { %p6625_p13 = pnand %p6623_p12, %p6620_p11 }
 0xcdb   :  { %6628 = shalt.err (!%p6625_p13)
}
 0xcdc   :  { %4837 = dma.vmem_to_hbm [thread:$0]  %s4832_s11, 512, %s10546_s18, [#allocation15], %s6670_s10, %s6670_s10, %s6671_s25   ;;  %v5080_v26 = vld [vmem:[#allocation11] ss:$0 sm:$0xff] }
 0xcdd   :  { %s6678_s26 = smov [#allocation13]  }
 0xcde   :  { %s4819_s29 = sshll.u32 %s6678_s26, 4  ;;  %s4820_s29 = int_to_ptr.vmem [resolvable:$true] %s4819_s29 }
 0xcdf   :  { %s6629_s24 = scalar_lea.vmem %s4820_s29, 512  ;;  %p6634_p1 = scmp.lt.s32.totalorder %s4820_s29, %s4820_s29 }
 0xce0   :  { %p6630_p0 = scmp.ne.s32.totalorder %s4820_s29, %s6629_s24  ;;  %p6635_p2 = scmp.lt.s32.totalorder %s6629_s24, %s6629_s24 }
 0xce2   :  { %p6636_p3 = por %p6635_p2, %p6634_p1 }
 0xce4   :  { %p6637_p4 = pnand %p6636_p3, %p6630_p0 }
 0xd9d   :  { %v5193_v0 = vpop.f32.mrb[144].mxu1 }
 0xd9e   :  { %v4797_v49 = vadd.f32 %v5193_v0, %v5080_v26  ;;  %v4791_v50 = vpop.f32.mrb[145].mxu1 }
 0xd9f   :  { %v4792_v27 = vadd.f32 %v5080_v26, %v4791_v50 }
 0xda0   :  { %4811 = vst [vmem:[#allocation13 + $0x8] sm:$0xff] %v4797_v49 }
 0xda1   :  { %4810 = vst [vmem:[#allocation13] sm:$0xff] %v4792_v27 }
 0xda7   :  { %v5196_v59 = vpop.f32.mrb[146].mxu1 }
 0xda8   :  { %v4807_v60 = vadd.f32 %v5196_v59, %v5080_v26  ;;  %v4801_v4 = vpop.f32.mrb[147].mxu1 }
 0xda9   :  { %v4802_v57 = vadd.f32 %v5080_v26, %v4801_v4 }
 0xdaa   :  { %4813 = vst [vmem:[#allocation13 + $0x18] sm:$0xff] %v4807_v60 }
 0xdab   :  { %4812 = vst [vmem:[#allocation13 + $0x10] sm:$0xff] %v4802_v57 }
 0xdac   :  { %6640 = shalt.err (!%p6637_p4)
}
 0xdad   :  { %s6641_s15 = scalar_lea.hbm %s10545_s17, 512 }
 0xdae   :  { %p6642_p5 = scmp.ne.s32.totalorder %s10545_s17, %s6641_s15  ;;  %p6645_p6 = scmp.lt.u32.totalorder %s6641_s15, %s10545_s17 }
 0xdb0   :  { %p6647_p7 = pnand %p6645_p6, %p6642_p5 }
 0xdb2   :  { %6650 = shalt.err (!%p6647_p7)
}
 0xdb3   :  { %4825 = dma.vmem_to_hbm [thread:$0]  %s4820_s29, 512, %s10545_s17, [#allocation4], %s6670_s10, %s6670_s10, %s6671_s25  }
 0xdb4   :  { %6659 = dma.done.wait [#allocation4], 512  }
 0xdb5   :  { %6660 = vsyncadd [#allocation4], 4294966784 }
 0xdb6   :  { %6661 = dma.done.wait [#allocation15], 512  }
 0xdb7   :  { %6662 = vsyncadd [#allocation15], 4294966784 }
 0xdb8   :  { %4844 = vsyncpa [#allocation3], 1 }
 0xdb9   :  { %4845 = vsyncpa [#allocation6], 1 }
 0xdba   :  { %4846 = vsyncpa [#allocation9], 1 }
 0xdbb   :  { %4847 = vsyncpa [#allocation12], 1 }
 0xdbc   :  { %4848 = vsyncpa [#allocation4], 1 }
 0xdbd   :  { %4849 = vsyncpa [#allocation15], 1 }

</bundles_post_ra>
